<compile_context>
chip_gen: v6e
topology: v6e:2x2x1
jax: 0.10.0
libtpu: 0.0.40
codegen_flags: <defaults>
</compile_context>

<pallas_src>
import math
from functools import partial

import jax
import jax.numpy as jnp
from jax.experimental import pallas as pl
from jax.experimental.pallas import tpu as pltpu


def _round_up(x, m):
    return ((x + m - 1) // m) * m


# ---------------------------------------------------------------------------
# Pallas kernels
# ---------------------------------------------------------------------------

def _gemm_bias_relu_kernel(x_ref, w_ref, b_ref, o_ref):
    acc = jnp.dot(x_ref[...], w_ref[...], preferred_element_type=jnp.float32)
    o_ref[...] = jnp.maximum(acc + b_ref[...], 0.0).astype(o_ref.dtype)


def _pick_tm(M, tm_max=512):
    """Row-tile size: <=tm_max, multiple of 8, minimal padding waste."""
    if M <= tm_max:
        return _round_up(M, 8)
    nblk = -(-M // tm_max)                 # ceil(M / tm_max)
    return _round_up(-(-M // nblk), 8)     # ceil(M / nblk), rounded to sublanes


def gemm_bias_relu(x, w, b, *, tm_max=512):
    """Fused (x @ w + b) -> ReLU as a Pallas TPU kernel.

    x: (M, K) f32 im2col patches, w: (K, N) f32, b: (N,) f32 -> (M, N) f32
    """
    M, K = x.shape
    N = w.shape[1]
    tm = _pick_tm(M, tm_max)
    Mp = _round_up(M, tm)
    xp = jnp.pad(x, ((0, Mp - M), (0, 0))) if Mp != M else x
    out = pl.pallas_call(
        _gemm_bias_relu_kernel,
        out_shape=jax.ShapeDtypeStruct((Mp, N), jnp.float32),
        grid=(Mp // tm,),
        in_specs=[
            pl.BlockSpec((tm, K), lambda i: (i, 0)),   # im2col row tile
            pl.BlockSpec((K, N), lambda i: (0, 0)),    # weights resident in VMEM
            pl.BlockSpec((1, N), lambda i: (0, 0)),    # bias resident in VMEM
        ],
        out_specs=pl.BlockSpec((tm, N), lambda i: (i, 0)),
        compiler_params=pltpu.CompilerParams(dimension_semantics=("parallel",)),
    )(xp, w, b.reshape(1, N))
    return out[:M] if Mp != M else out


def _tail_kernel(cols_ref, pool_ref, w5_ref, b5_ref, w1_ref, b1_ref,
                 w2t_ref, b2_ref, o_ref):
    # Conv block 5 as GEMM + bias + ReLU on the im2col rows (N*121, K5)
    h5 = jnp.dot(cols_ref[...], w5_ref[...], preferred_element_type=jnp.float32)
    h5 = jnp.maximum(h5 + b5_ref[...], 0.0)
    # AvgPool2d(11, 11): mean over each batch-row's 121 positions, expressed as
    # a tiny matmul with a precomputed block-diagonal (1/121) pooling matrix.
    pooled = jnp.dot(pool_ref[...], h5, preferred_element_type=jnp.float32)
    # Dropout (identity in eval) -> Linear(8F, 8F) -> ReLU
    h1 = jnp.dot(pooled, w1_ref[...], preferred_element_type=jnp.float32) + b1_ref[...]
    h1 = jnp.maximum(h1, 0.0)
    # Dropout (identity in eval) -> Linear(8F, 1), done as a lane reduction
    o = jnp.sum(h1 * w2t_ref[...], axis=-1, keepdims=True) + b2_ref[...]
    o_ref[...] = o.astype(o_ref.dtype)


def tail_fused(cols, nb, w5, b5, w1, b1, w2, b2):
    """Fused conv5(3x3,s2)+ReLU + AvgPool2d(11,11) + Linear + ReLU + Linear head.

    cols: (nb*121, K5) f32 im2col patches of the conv5 input (11x11 output map),
    w5: (K5, C), b5: (C,), w1: (C, C), b1: (C,), w2: (C, 1), b2: (1,) -> (nb, 1)
    """
    P = 121
    K5 = cols.shape[1]
    C = w5.shape[1]
    nbp = max(_round_up(nb, 8), 8)
    M5 = nbp * P
    if cols.shape[0] != M5:
        cols = jnp.pad(cols, ((0, M5 - cols.shape[0]), (0, 0)))
    # Pooling matrix: pool[i, j] = 1/121 iff row j belongs to batch element i.
    row = jnp.arange(nbp, dtype=jnp.int32)[:, None]
    col = jnp.arange(M5, dtype=jnp.int32)[None, :]
    pool = jnp.where(col // P == row, 1.0 / P, 0.0).astype(jnp.float32)
    out = pl.pallas_call(
        _tail_kernel,
        out_shape=jax.ShapeDtypeStruct((nbp, 1), jnp.float32),
        grid=(1,),
        in_specs=[
            pl.BlockSpec((M5, K5), lambda i: (0, 0)),
            pl.BlockSpec((nbp, M5), lambda i: (0, 0)),
            pl.BlockSpec((K5, C), lambda i: (0, 0)),
            pl.BlockSpec((1, C), lambda i: (0, 0)),
            pl.BlockSpec((C, C), lambda i: (0, 0)),
            pl.BlockSpec((1, C), lambda i: (0, 0)),
            pl.BlockSpec((1, C), lambda i: (0, 0)),
            pl.BlockSpec((1, 1), lambda i: (0, 0)),
        ],
        out_specs=pl.BlockSpec((nbp, 1), lambda i: (0, 0)),
    )(cols, pool, w5, b5.reshape(1, C), w1, b1.reshape(1, C),
      w2.reshape(1, C), b2.reshape(1, 1))
    return out[:nb]


# ---------------------------------------------------------------------------
# Layer wrappers (JAX glue around the Pallas kernels)
# ---------------------------------------------------------------------------

def im2col_nhwc(x, *, kernel, stride):
    """x: (N, H, W, Cin) -> ((N*Ho*Wo, k*k*Cin), Ho, Wo); K order = (ki, kj, cin)."""
    nb, h, wd, cin = x.shape
    ho = (h - kernel) // stride + 1
    wo = (wd - kernel) // stride + 1
    taps = [
        x[:, ki:ki + stride * (ho - 1) + 1:stride,
             kj:kj + stride * (wo - 1) + 1:stride, :]
        for ki in range(kernel) for kj in range(kernel)
    ]
    cols = jnp.stack(taps, axis=3).reshape(nb * ho * wo, kernel * kernel * cin)
    return cols, ho, wo


def conv2d_relu_nhwc(x, w, b, *, kernel, stride):
    """Conv2d(kernel, stride, padding=0) + ReLU on NHWC activations.

    x: (N, H, W, Cin) f32, w: (Cout, Cin, k, k) (PyTorch layout), b: (Cout,)
    """
    nb = x.shape[0]
    cout = w.shape[0]
    cols, ho, wo = im2col_nhwc(x, kernel=kernel, stride=stride)
    wm = jnp.transpose(w, (2, 3, 1, 0)).reshape(kernel * kernel * w.shape[1], cout)
    out = gemm_bias_relu(cols, wm, b)      # fused GEMM + bias + ReLU (Pallas)
    return out.reshape(nb, ho, wo, cout)


def make_conv_cfg(init_features):
    f = init_features
    # (cin, cout, kernel, stride) for each _block_Conv2D (padding=0)
    return [
        (3, f, 7, 4),
        (f, 2 * f, 5, 1),
        (2 * f, 4 * f, 3, 2),
        (4 * f, 8 * f, 3, 1),
        (8 * f, 8 * f, 3, 2),
    ]


def init_params(key, init_features):
    conv_cfg = make_conv_cfg(init_features)
    f8 = 8 * init_features
    fc_dims = [(f8, f8), (f8, 1)]
    keys = jax.random.split(key, len(conv_cfg) + len(fc_dims))
    params = {"conv": [], "fc": []}
    for i, (ci, co, k, _s) in enumerate(conv_cfg):
        kw, kb = jax.random.split(keys[i])
        bound = 1.0 / math.sqrt(ci * k * k)
        params["conv"].append((
            jax.random.uniform(kw, (co, ci, k, k), jnp.float32, -bound, bound),
            jax.random.uniform(kb, (co,), jnp.float32, -bound, bound)))
    for i, (din, dout) in enumerate(fc_dims):
        kw, kb = jax.random.split(keys[len(conv_cfg) + i])
        bound = 1.0 / math.sqrt(din)
        params["fc"].append((
            jax.random.uniform(kw, (din, dout), jnp.float32, -bound, bound),
            jax.random.uniform(kb, (dout,), jnp.float32, -bound, bound)))
    return params


def japaness_discriminator_forward(params, x, *, conv_cfg):
    # Single layout change: NCHW -> NHWC; everything downstream stays NHWC.
    h = jnp.transpose(x, (0, 2, 3, 1))
    # disc_1 conv blocks 1..4: fused im2col GEMM + bias + ReLU Pallas kernels.
    for (w, b), (_ci, _co, k, s) in zip(params["conv"][:-1], conv_cfg[:-1]):
        h = conv2d_relu_nhwc(h, w, b, kernel=k, stride=s)
    # Tail: conv block 5 + AvgPool2d(11,11) + flatten + disc_2 head, one kernel.
    nb = h.shape[0]
    w5, b5 = params["conv"][-1]
    _ci5, cout5, k5, s5 = conv_cfg[-1]
    cols5, ho, wo = im2col_nhwc(h, kernel=k5, stride=s5)
    assert ho == 11 and wo == 11, (ho, wo)   # AvgPool2d(11,11) -> 1x1 as in the spec
    w5m = jnp.transpose(w5, (2, 3, 1, 0)).reshape(k5 * k5 * w5.shape[1], cout5)
    (w1, b1), (w2, b2) = params["fc"]
    # TODO(synk): nn.Dropout(0.5) is identity in eval/inference mode; training-mode
    # stochastic masking is not implemented.
    return tail_fused(cols5, nb, w5m, b5, w1, b1, w2, b2)


if __name__ == "__main__":
    init_features = 8     # smaller than the PyTorch default (32) but structure-preserving
    batch = 2
    spatial = 224         # minimum legal input is 223; 224 is the canonical size

    key = jax.random.PRNGKey(0)
    kx, kp = jax.random.split(key)
    x = jax.random.normal(kx, (batch, 3, spatial, spatial), jnp.float32)
    params = init_params(kp, init_features)
    conv_cfg = make_conv_cfg(init_features)

    fwd = jax.jit(partial(japaness_discriminator_forward, conv_cfg=conv_cfg))
    out = jax.block_until_ready(fwd(params, x))

    # spatial: 224 -> 55 -> 51 -> 25 -> 23 -> 11 -> avgpool -> 1; final Linear(64, 1)
    assert out.shape == (batch, 1), out.shape
    assert bool(jnp.all(jnp.isfinite(out)))
    print("KERNEL_OK")
</pallas_src>

<mosaic_0001>
module attributes {stable_mosaic.version = 11 : i64} {
  func.func @_gemm_bias_relu_kernel(%arg0: i32, %arg1: memref<512x147xf32, #tpu.memory_space<vmem>>, %arg2: memref<147x8xf32, #tpu.memory_space<vmem>>, %arg3: memref<1x8xf32, #tpu.memory_space<vmem>>, %arg4: memref<512x8xf32, #tpu.memory_space<vmem>>) attributes {dimension_semantics = [#tpu.dimension_semantics<parallel>], iteration_bounds = array<i64: 12>, scalar_prefetch = 0 : i64, scratch_operands = 0 : i64, tpu.core_type = #tpu.core_type<tc>, window_params = [{transform_indices = @transform_0, window_bounds = array<i64: 512, 147>}, {pipeline_mode = #tpu.pipeline_mode<synchronous>, transform_indices = @transform_1, window_bounds = array<i64: 147, 8>}, {pipeline_mode = #tpu.pipeline_mode<synchronous>, transform_indices = @transform_2, window_bounds = array<i64: 1, 8>}, {transform_indices = @transform_3, window_bounds = array<i64: 512, 8>}]} {
    %c0 = arith.constant 0 : index
    %c0_0 = arith.constant 0 : index
    %0 = vector.load %arg1[%c0, %c0_0] : memref<512x147xf32, #tpu.memory_space<vmem>>, vector<512x147xf32>
    %c0_1 = arith.constant 0 : index
    %c0_2 = arith.constant 0 : index
    %1 = vector.load %arg2[%c0_1, %c0_2] : memref<147x8xf32, #tpu.memory_space<vmem>>, vector<147x8xf32>
    %cst = arith.constant dense<0.000000e+00> : vector<512x8xf32>
    %2 = tpu.matmul %0, %1, %cst {dimension_numbers = #tpu.dot_dimension_numbers<[1], [0], [0], [1], [0, 0, 1, 1], [], []>} : vector<512x147xf32>, vector<147x8xf32>, vector<512x8xf32> -> vector<512x8xf32>
    %c0_3 = arith.constant 0 : index
    %c0_4 = arith.constant 0 : index
    %3 = vector.load %arg3[%c0_3, %c0_4] : memref<1x8xf32, #tpu.memory_space<vmem>>, vector<1x8xf32>
    %4 = vector.broadcast %3 : vector<1x8xf32> to vector<512x8xf32>
    %5 = arith.addf %2, %4 : vector<512x8xf32>
    %cst_5 = arith.constant 0.000000e+00 : f32
    %6 = vector.broadcast %cst_5 : f32 to vector<512x8xf32>
    %7 = arith.maximumf %5, %6 : vector<512x8xf32>
    %c0_6 = arith.constant 0 : index
    %c0_7 = arith.constant 0 : index
    %8 = vector.load %arg4[%c0_6, %c0_7] : memref<512x8xf32, #tpu.memory_space<vmem>>, vector<512x8xf32>
    tpu.vector_store %arg4[%c0_6, %c0_7], %7 {strides = array<i32>} : memref<512x8xf32, #tpu.memory_space<vmem>>, vector<512x8xf32>,
    return
  }
  func.func @transform_0(%arg0: i32) -> (i32, i32) {
    %c0_i32 = arith.constant 0 : i32
    %c0_i32_0 = arith.constant 0 : i32
    return %arg0, %c0_i32 : i32, i32
  }
  func.func @transform_1(%arg0: i32) -> (i32, i32) {
    %c0_i32 = arith.constant 0 : i32
    %c0_i32_0 = arith.constant 0 : i32
    %c0_i32_1 = arith.constant 0 : i32
    return %c0_i32, %c0_i32_0 : i32, i32
  }
  func.func @transform_2(%arg0: i32) -> (i32, i32) {
    %c0_i32 = arith.constant 0 : i32
    %c0_i32_0 = arith.constant 0 : i32
    %c0_i32_1 = arith.constant 0 : i32
    return %c0_i32, %c0_i32_0 : i32, i32
  }
  func.func @transform_3(%arg0: i32) -> (i32, i32) {
    %c0_i32 = arith.constant 0 : i32
    %c0_i32_0 = arith.constant 0 : i32
    return %arg0, %c0_i32 : i32, i32
  }
}

module attributes {stable_mosaic.version = 11 : i64} {
  func.func @_gemm_bias_relu_kernel(%arg0: i32, %arg1: memref<480x200xf32, #tpu.memory_space<vmem>>, %arg2: memref<200x16xf32, #tpu.memory_space<vmem>>, %arg3: memref<1x16xf32, #tpu.memory_space<vmem>>, %arg4: memref<480x16xf32, #tpu.memory_space<vmem>>) attributes {dimension_semantics = [#tpu.dimension_semantics<parallel>], iteration_bounds = array<i64: 11>, scalar_prefetch = 0 : i64, scratch_operands = 0 : i64, tpu.core_type = #tpu.core_type<tc>, window_params = [{transform_indices = @transform_0, window_bounds = array<i64: 480, 200>}, {pipeline_mode = #tpu.pipeline_mode<synchronous>, transform_indices = @transform_1, window_bounds = array<i64: 200, 16>}, {pipeline_mode = #tpu.pipeline_mode<synchronous>, transform_indices = @transform_2, window_bounds = array<i64: 1, 16>}, {transform_indices = @transform_3, window_bounds = array<i64: 480, 16>}]} {
    %c0 = arith.constant 0 : index
    %c0_0 = arith.constant 0 : index
    %0 = vector.load %arg1[%c0, %c0_0] : memref<480x200xf32, #tpu.memory_space<vmem>>, vector<480x200xf32>
    %c0_1 = arith.constant 0 : index
    %c0_2 = arith.constant 0 : index
    %1 = vector.load %arg2[%c0_1, %c0_2] : memref<200x16xf32, #tpu.memory_space<vmem>>, vector<200x16xf32>
    %cst = arith.constant dense<0.000000e+00> : vector<480x16xf32>
    %2 = tpu.matmul %0, %1, %cst {dimension_numbers = #tpu.dot_dimension_numbers<[1], [0], [0], [1], [0, 0, 1, 1], [], []>} : vector<480x200xf32>, vector<200x16xf32>, vector<480x16xf32> -> vector<480x16xf32>
    %c0_3 = arith.constant 0 : index
    %c0_4 = arith.constant 0 : index
    %3 = vector.load %arg3[%c0_3, %c0_4] : memref<1x16xf32, #tpu.memory_space<vmem>>, vector<1x16xf32>
    %4 = vector.broadcast %3 : vector<1x16xf32> to vector<480x16xf32>
    %5 = arith.addf %2, %4 : vector<480x16xf32>
    %cst_5 = arith.constant 0.000000e+00 : f32
    %6 = vector.broadcast %cst_5 : f32 to vector<480x16xf32>
    %7 = arith.maximumf %5, %6 : vector<480x16xf32>
    %c0_6 = arith.constant 0 : index
    %c0_7 = arith.constant 0 : index
    %8 = vector.load %arg4[%c0_6, %c0_7] : memref<480x16xf32, #tpu.memory_space<vmem>>, vector<480x16xf32>
    tpu.vector_store %arg4[%c0_6, %c0_7], %7 {strides = array<i32>} : memref<480x16xf32, #tpu.memory_space<vmem>>, vector<480x16xf32>,
    return
  }
  func.func @transform_0(%arg0: i32) -> (i32, i32) {
    %c0_i32 = arith.constant 0 : i32
    %c0_i32_0 = arith.constant 0 : i32
    return %arg0, %c0_i32 : i32, i32
  }
  func.func @transform_1(%arg0: i32) -> (i32, i32) {
    %c0_i32 = arith.constant 0 : i32
    %c0_i32_0 = arith.constant 0 : i32
    %c0_i32_1 = arith.constant 0 : i32
    return %c0_i32, %c0_i32_0 : i32, i32
  }
  func.func @transform_2(%arg0: i32) -> (i32, i32) {
    %c0_i32 = arith.constant 0 : i32
    %c0_i32_0 = arith.constant 0 : i32
    %c0_i32_1 = arith.constant 0 : i32
    return %c0_i32, %c0_i32_0 : i32, i32
  }
  func.func @transform_3(%arg0: i32) -> (i32, i32) {
    %c0_i32 = arith.constant 0 : i32
    %c0_i32_0 = arith.constant 0 : i32
    return %arg0, %c0_i32 : i32, i32
  }
}

module attributes {stable_mosaic.version = 11 : i64} {
  func.func @_gemm_bias_relu_kernel(%arg0: i32, %arg1: memref<424x144xf32, #tpu.memory_space<vmem>>, %arg2: memref<144x32xf32, #tpu.memory_space<vmem>>, %arg3: memref<1x32xf32, #tpu.memory_space<vmem>>, %arg4: memref<424x32xf32, #tpu.memory_space<vmem>>) attributes {dimension_semantics = [#tpu.dimension_semantics<parallel>], iteration_bounds = array<i64: 3>, scalar_prefetch = 0 : i64, scratch_operands = 0 : i64, tpu.core_type = #tpu.core_type<tc>, window_params = [{transform_indices = @transform_0, window_bounds = array<i64: 424, 144>}, {pipeline_mode = #tpu.pipeline_mode<synchronous>, transform_indices = @transform_1, window_bounds = array<i64: 144, 32>}, {pipeline_mode = #tpu.pipeline_mode<synchronous>, transform_indices = @transform_2, window_bounds = array<i64: 1, 32>}, {transform_indices = @transform_3, window_bounds = array<i64: 424, 32>}]} {
    %c0 = arith.constant 0 : index
    %c0_0 = arith.constant 0 : index
    %0 = vector.load %arg1[%c0, %c0_0] : memref<424x144xf32, #tpu.memory_space<vmem>>, vector<424x144xf32>
    %c0_1 = arith.constant 0 : index
    %c0_2 = arith.constant 0 : index
    %1 = vector.load %arg2[%c0_1, %c0_2] : memref<144x32xf32, #tpu.memory_space<vmem>>, vector<144x32xf32>
    %cst = arith.constant dense<0.000000e+00> : vector<424x32xf32>
    %2 = tpu.matmul %0, %1, %cst {dimension_numbers = #tpu.dot_dimension_numbers<[1], [0], [0], [1], [0, 0, 1, 1], [], []>} : vector<424x144xf32>, vector<144x32xf32>, vector<424x32xf32> -> vector<424x32xf32>
    %c0_3 = arith.constant 0 : index
    %c0_4 = arith.constant 0 : index
    %3 = vector.load %arg3[%c0_3, %c0_4] : memref<1x32xf32, #tpu.memory_space<vmem>>, vector<1x32xf32>
    %4 = vector.broadcast %3 : vector<1x32xf32> to vector<424x32xf32>
    %5 = arith.addf %2, %4 : vector<424x32xf32>
    %cst_5 = arith.constant 0.000000e+00 : f32
    %6 = vector.broadcast %cst_5 : f32 to vector<424x32xf32>
    %7 = arith.maximumf %5, %6 : vector<424x32xf32>
    %c0_6 = arith.constant 0 : index
    %c0_7 = arith.constant 0 : index
    %8 = vector.load %arg4[%c0_6, %c0_7] : memref<424x32xf32, #tpu.memory_space<vmem>>, vector<424x32xf32>
    tpu.vector_store %arg4[%c0_6, %c0_7], %7 {strides = array<i32>} : memref<424x32xf32, #tpu.memory_space<vmem>>, vector<424x32xf32>,
    return
  }
  func.func @transform_0(%arg0: i32) -> (i32, i32) {
    %c0_i32 = arith.constant 0 : i32
    %c0_i32_0 = arith.constant 0 : i32
    return %arg0, %c0_i32 : i32, i32
  }
  func.func @transform_1(%arg0: i32) -> (i32, i32) {
    %c0_i32 = arith.constant 0 : i32
    %c0_i32_0 = arith.constant 0 : i32
    %c0_i32_1 = arith.constant 0 : i32
    return %c0_i32, %c0_i32_0 : i32, i32
  }
  func.func @transform_2(%arg0: i32) -> (i32, i32) {
    %c0_i32 = arith.constant 0 : i32
    %c0_i32_0 = arith.constant 0 : i32
    %c0_i32_1 = arith.constant 0 : i32
    return %c0_i32, %c0_i32_0 : i32, i32
  }
  func.func @transform_3(%arg0: i32) -> (i32, i32) {
    %c0_i32 = arith.constant 0 : i32
    %c0_i32_0 = arith.constant 0 : i32
    return %arg0, %c0_i32 : i32, i32
  }
}

module attributes {stable_mosaic.version = 11 : i64} {
  func.func @_gemm_bias_relu_kernel(%arg0: i32, %arg1: memref<360x288xf32, #tpu.memory_space<vmem>>, %arg2: memref<288x64xf32, #tpu.memory_space<vmem>>, %arg3: memref<1x64xf32, #tpu.memory_space<vmem>>, %arg4: memref<360x64xf32, #tpu.memory_space<vmem>>) attributes {dimension_semantics = [#tpu.dimension_semantics<parallel>], iteration_bounds = array<i64: 3>, scalar_prefetch = 0 : i64, scratch_operands = 0 : i64, tpu.core_type = #tpu.core_type<tc>, window_params = [{transform_indices = @transform_0, window_bounds = array<i64: 360, 288>}, {pipeline_mode = #tpu.pipeline_mode<synchronous>, transform_indices = @transform_1, window_bounds = array<i64: 288, 64>}, {pipeline_mode = #tpu.pipeline_mode<synchronous>, transform_indices = @transform_2, window_bounds = array<i64: 1, 64>}, {transform_indices = @transform_3, window_bounds = array<i64: 360, 64>}]} {
    %c0 = arith.constant 0 : index
    %c0_0 = arith.constant 0 : index
    %0 = vector.load %arg1[%c0, %c0_0] : memref<360x288xf32, #tpu.memory_space<vmem>>, vector<360x288xf32>
    %c0_1 = arith.constant 0 : index
    %c0_2 = arith.constant 0 : index
    %1 = vector.load %arg2[%c0_1, %c0_2] : memref<288x64xf32, #tpu.memory_space<vmem>>, vector<288x64xf32>
    %cst = arith.constant dense<0.000000e+00> : vector<360x64xf32>
    %2 = tpu.matmul %0, %1, %cst {dimension_numbers = #tpu.dot_dimension_numbers<[1], [0], [0], [1], [0, 0, 1, 1], [], []>} : vector<360x288xf32>, vector<288x64xf32>, vector<360x64xf32> -> vector<360x64xf32>
    %c0_3 = arith.constant 0 : index
    %c0_4 = arith.constant 0 : index
    %3 = vector.load %arg3[%c0_3, %c0_4] : memref<1x64xf32, #tpu.memory_space<vmem>>, vector<1x64xf32>
    %4 = vector.broadcast %3 : vector<1x64xf32> to vector<360x64xf32>
    %5 = arith.addf %2, %4 : vector<360x64xf32>
    %cst_5 = arith.constant 0.000000e+00 : f32
    %6 = vector.broadcast %cst_5 : f32 to vector<360x64xf32>
    %7 = arith.maximumf %5, %6 : vector<360x64xf32>
    %c0_6 = arith.constant 0 : index
    %c0_7 = arith.constant 0 : index
    %8 = vector.load %arg4[%c0_6, %c0_7] : memref<360x64xf32, #tpu.memory_space<vmem>>, vector<360x64xf32>
    tpu.vector_store %arg4[%c0_6, %c0_7], %7 {strides = array<i32>} : memref<360x64xf32, #tpu.memory_space<vmem>>, vector<360x64xf32>,
    return
  }
  func.func @transform_0(%arg0: i32) -> (i32, i32) {
    %c0_i32 = arith.constant 0 : i32
    %c0_i32_0 = arith.constant 0 : i32
    return %arg0, %c0_i32 : i32, i32
  }
  func.func @transform_1(%arg0: i32) -> (i32, i32) {
    %c0_i32 = arith.constant 0 : i32
    %c0_i32_0 = arith.constant 0 : i32
    %c0_i32_1 = arith.constant 0 : i32
    return %c0_i32, %c0_i32_0 : i32, i32
  }
  func.func @transform_2(%arg0: i32) -> (i32, i32) {
    %c0_i32 = arith.constant 0 : i32
    %c0_i32_0 = arith.constant 0 : i32
    %c0_i32_1 = arith.constant 0 : i32
    return %c0_i32, %c0_i32_0 : i32, i32
  }
  func.func @transform_3(%arg0: i32) -> (i32, i32) {
    %c0_i32 = arith.constant 0 : i32
    %c0_i32_0 = arith.constant 0 : i32
    return %arg0, %c0_i32 : i32, i32
  }
}

module attributes {stable_mosaic.version = 11 : i64} {
  func.func @_tail_kernel(%arg0: i32, %arg1: memref<968x576xf32, #tpu.memory_space<vmem>>, %arg2: memref<8x968xf32, #tpu.memory_space<vmem>>, %arg3: memref<576x64xf32, #tpu.memory_space<vmem>>, %arg4: memref<1x64xf32, #tpu.memory_space<vmem>>, %arg5: memref<64x64xf32, #tpu.memory_space<vmem>>, %arg6: memref<1x64xf32, #tpu.memory_space<vmem>>, %arg7: memref<1x64xf32, #tpu.memory_space<vmem>>, %arg8: memref<1x1xf32, #tpu.memory_space<vmem>>, %arg9: memref<8x1xf32, #tpu.memory_space<vmem>>) attributes {dimension_semantics = [#tpu.dimension_semantics<arbitrary>], iteration_bounds = array<i64: 1>, scalar_prefetch = 0 : i64, scratch_operands = 0 : i64, tpu.core_type = #tpu.core_type<tc>, window_params = [{pipeline_mode = #tpu.pipeline_mode<synchronous>, transform_indices = @transform_0, window_bounds = array<i64: 968, 576>}, {pipeline_mode = #tpu.pipeline_mode<synchronous>, transform_indices = @transform_1, window_bounds = array<i64: 8, 968>}, {pipeline_mode = #tpu.pipeline_mode<synchronous>, transform_indices = @transform_2, window_bounds = array<i64: 576, 64>}, {pipeline_mode = #tpu.pipeline_mode<synchronous>, transform_indices = @transform_3, window_bounds = array<i64: 1, 64>}, {pipeline_mode = #tpu.pipeline_mode<synchronous>, transform_indices = @transform_4, window_bounds = array<i64: 64, 64>}, {pipeline_mode = #tpu.pipeline_mode<synchronous>, transform_indices = @transform_5, window_bounds = array<i64: 1, 64>}, {pipeline_mode = #tpu.pipeline_mode<synchronous>, transform_indices = @transform_6, window_bounds = array<i64: 1, 64>}, {pipeline_mode = #tpu.pipeline_mode<synchronous>, transform_indices = @transform_7, window_bounds = array<i64: 1, 1>}, {pipeline_mode = #tpu.pipeline_mode<synchronous>, transform_indices = @transform_8, window_bounds = array<i64: 8, 1>}]} {
    %c0 = arith.constant 0 : index
    %c0_0 = arith.constant 0 : index
    %0 = vector.load %arg1[%c0, %c0_0] : memref<968x576xf32, #tpu.memory_space<vmem>>, vector<968x576xf32>
    %c0_1 = arith.constant 0 : index
    %c0_2 = arith.constant 0 : index
    %1 = vector.load %arg3[%c0_1, %c0_2] : memref<576x64xf32, #tpu.memory_space<vmem>>, vector<576x64xf32>
    %cst = arith.constant dense<0.000000e+00> : vector<968x64xf32>
    %2 = tpu.matmul %0, %1, %cst {dimension_numbers = #tpu.dot_dimension_numbers<[1], [0], [0], [1], [0, 0, 1, 1], [], []>} : vector<968x576xf32>, vector<576x64xf32>, vector<968x64xf32> -> vector<968x64xf32>
    %c0_3 = arith.constant 0 : index
    %c0_4 = arith.constant 0 : index
    %3 = vector.load %arg4[%c0_3, %c0_4] : memref<1x64xf32, #tpu.memory_space<vmem>>, vector<1x64xf32>
    %4 = vector.broadcast %3 : vector<1x64xf32> to vector<968x64xf32>
    %5 = arith.addf %2, %4 : vector<968x64xf32>
    %cst_5 = arith.constant 0.000000e+00 : f32
    %6 = vector.broadcast %cst_5 : f32 to vector<968x64xf32>
    %7 = arith.maximumf %5, %6 : vector<968x64xf32>
    %c0_6 = arith.constant 0 : index
    %c0_7 = arith.constant 0 : index
    %8 = vector.load %arg2[%c0_6, %c0_7] : memref<8x968xf32, #tpu.memory_space<vmem>>, vector<8x968xf32>
    %cst_8 = arith.constant dense<0.000000e+00> : vector<8x64xf32>
    %9 = tpu.matmul %8, %7, %cst_8 {dimension_numbers = #tpu.dot_dimension_numbers<[1], [0], [0], [1], [0, 0, 1, 1], [], []>} : vector<8x968xf32>, vector<968x64xf32>, vector<8x64xf32> -> vector<8x64xf32>
    %c0_9 = arith.constant 0 : index
    %c0_10 = arith.constant 0 : index
    %10 = vector.load %arg5[%c0_9, %c0_10] : memref<64x64xf32, #tpu.memory_space<vmem>>, vector<64x64xf32>
    %cst_11 = arith.constant dense<0.000000e+00> : vector<8x64xf32>
    %11 = tpu.matmul %9, %10, %cst_11 {dimension_numbers = #tpu.dot_dimension_numbers<[1], [0], [0], [1], [0, 0, 1, 1], [], []>} : vector<8x64xf32>, vector<64x64xf32>, vector<8x64xf32> -> vector<8x64xf32>
    %c0_12 = arith.constant 0 : index
    %c0_13 = arith.constant 0 : index
    %12 = vector.load %arg6[%c0_12, %c0_13] : memref<1x64xf32, #tpu.memory_space<vmem>>, vector<1x64xf32>
    %13 = vector.broadcast %12 : vector<1x64xf32> to vector<8x64xf32>
    %14 = arith.addf %11, %13 : vector<8x64xf32>
    %cst_14 = arith.constant 0.000000e+00 : f32
    %15 = vector.broadcast %cst_14 : f32 to vector<8x64xf32>
    %16 = arith.maximumf %14, %15 : vector<8x64xf32>
    %c0_15 = arith.constant 0 : index
    %c0_16 = arith.constant 0 : index
    %17 = vector.load %arg7[%c0_15, %c0_16] : memref<1x64xf32, #tpu.memory_space<vmem>>, vector<1x64xf32>
    %18 = vector.broadcast %17 : vector<1x64xf32> to vector<8x64xf32>
    %19 = arith.mulf %16, %18 : vector<8x64xf32>
    %cst_17 = arith.constant dense<0.000000e+00> : vector<8xf32>
    %20 = vector.multi_reduction <add>, %19, %cst_17 [1] : vector<8x64xf32> to vector<8xf32>
    %21 = vector.shape_cast %20 : vector<8xf32> to vector<8x1xf32>
    %c0_18 = arith.constant 0 : index
    %c0_19 = arith.constant 0 : index
    %22 = vector.load %arg8[%c0_18, %c0_19] : memref<1x1xf32, #tpu.memory_space<vmem>>, vector<1x1xf32>
    %23 = vector.broadcast %22 : vector<1x1xf32> to vector<8x1xf32>
    %24 = arith.addf %21, %23 : vector<8x1xf32>
    %c0_20 = arith.constant 0 : index
    %c0_21 = arith.constant 0 : index
    %25 = vector.load %arg9[%c0_20, %c0_21] : memref<8x1xf32, #tpu.memory_space<vmem>>, vector<8x1xf32>
    tpu.vector_store %arg9[%c0_20, %c0_21], %24 {strides = array<i32>} : memref<8x1xf32, #tpu.memory_space<vmem>>, vector<8x1xf32>,
    return
  }
  func.func @transform_0(%arg0: i32) -> (i32, i32) {
    %c0_i32 = arith.constant 0 : i32
    %c0_i32_0 = arith.constant 0 : i32
    %c0_i32_1 = arith.constant 0 : i32
    return %c0_i32, %c0_i32_0 : i32, i32
  }
  func.func @transform_1(%arg0: i32) -> (i32, i32) {
    %c0_i32 = arith.constant 0 : i32
    %c0_i32_0 = arith.constant 0 : i32
    %c0_i32_1 = arith.constant 0 : i32
    return %c0_i32, %c0_i32_0 : i32, i32
  }
  func.func @transform_2(%arg0: i32) -> (i32, i32) {
    %c0_i32 = arith.constant 0 : i32
    %c0_i32_0 = arith.constant 0 : i32
    %c0_i32_1 = arith.constant 0 : i32
    return %c0_i32, %c0_i32_0 : i32, i32
  }
  func.func @transform_3(%arg0: i32) -> (i32, i32) {
    %c0_i32 = arith.constant 0 : i32
    %c0_i32_0 = arith.constant 0 : i32
    %c0_i32_1 = arith.constant 0 : i32
    return %c0_i32, %c0_i32_0 : i32, i32
  }
  func.func @transform_4(%arg0: i32) -> (i32, i32) {
    %c0_i32 = arith.constant 0 : i32
    %c0_i32_0 = arith.constant 0 : i32
    %c0_i32_1 = arith.constant 0 : i32
    return %c0_i32, %c0_i32_0 : i32, i32
  }
  func.func @transform_5(%arg0: i32) -> (i32, i32) {
    %c0_i32 = arith.constant 0 : i32
    %c0_i32_0 = arith.constant 0 : i32
    %c0_i32_1 = arith.constant 0 : i32
    return %c0_i32, %c0_i32_0 : i32, i32
  }
  func.func @transform_6(%arg0: i32) -> (i32, i32) {
    %c0_i32 = arith.constant 0 : i32
    %c0_i32_0 = arith.constant 0 : i32
    %c0_i32_1 = arith.constant 0 : i32
    return %c0_i32, %c0_i32_0 : i32, i32
  }
  func.func @transform_7(%arg0: i32) -> (i32, i32) {
    %c0_i32 = arith.constant 0 : i32
    %c0_i32_0 = arith.constant 0 : i32
    %c0_i32_1 = arith.constant 0 : i32
    return %c0_i32, %c0_i32_0 : i32, i32
  }
  func.func @transform_8(%arg0: i32) -> (i32, i32) {
    %c0_i32 = arith.constant 0 : i32
    %c0_i32_0 = arith.constant 0 : i32
    %c0_i32_1 = arith.constant 0 : i32
    return %c0_i32, %c0_i32_0 : i32, i32
  }
}

</mosaic_0001>

<bundles_post_ra>
// kernel: japaness_discriminator_forward.5
= control target key start
LH: loop header
LB: loop body
LE: loop exit
PB: predicated region body
PF: predicated region fallthrough
CT: control target
= control target key end

     0   :  { %s1253_s12 = smov 0   ;;  %s1764_s0 = inlined_call_operand.vmem [shape: f32[6144,147], index: 0, kind: input, shape index: {}]   ;;  %s1765_s1 = inlined_call_operand.vmem [shape: f32[147,8], index: 1, kind: input, shape index: {}]   ;;  %s1766_s2 = inlined_call_operand.vmem [shape: f32[1,8], index: 2, kind: input, shape index: {}]   ;;  %s1767_s3 = inlined_call_operand.vmem [shape: f32[6144,8], index: 3, kind: output, shape index: {}]  }
   0x1 LB: > { %s1098_s13 = sadd.s32 4294967295, %s1230_s12   ;;  %p1102_p0 = scmp.ge.s32.totalorder %s1230_s12, 1  ;;  %s1230_s12 = sphi %s1253_s12, %s13_s12  }
   0x2   : > { %p139_p1 = scmp.lt.s32.totalorder %s1230_s12, 13 }
   0x4   : > { %p140_p2 = pnand %p1102_p0, %p139_p1 }
   0x5   : > { %s1103_s9 = sshll.u32 (!%p140_p2), %s1098_s13, 6 }
   0x6   : > { %143 = sbr.rel (%p140_p2) target bundleno = 373 (0x175), region = 32  ;;  %p165_p3 = scmp.lt.s32.totalorder (!%p140_p2), %s1103_s9, 767 }
   0xb   : > { %v320_v0 = vld [vmem:[%s1765_s1 + $0x78] sm:$0xff]  ;;  %v1232_v1 = vmov 0.0   ;;  %v319_v2 = vld [vmem:[%s1765_s1 + $0x70] sm:$0xff]  ;;  %v318_v3 = vld [vmem:[%s1765_s1 + $0x68] sm:$0xff]  ;;  %s1769_s9 = smov (!%p165_p3, %s1103_s9), 767  ;;  %vm524_vm0 = vcmask 1042432  }
   0xc   : > { %528 = vmatprep.subr.mxu0 %v1232_v1  ;;  %1177 = vmatprep.subr.mxu1 %v1232_v1  ;;  %v317_v4 = vld [vmem:[%s1765_s1 + $0x60] sm:$0xff]  ;;  %v316_v5 = vld [vmem:[%s1765_s1 + $0x58] sm:$0xff]  ;;  %v315_v6 = vld [vmem:[%s1765_s1 + $0x50] sm:$0xff]  ;;  %s1176_s21 = sshll.u32 %s1769_s9, 4  ;;  %vm331_vm1 = vcmask 154624   ;;  %s1107_s6 = sshll.u32 %s1769_s9, 3 }
   0xd   : > { %529 = vmatpush1.msra.mxu0 %v320_v0  ;;  %1196 = vmatpush1.msra.mxu1 %v320_v0  ;;  %v314_v7 = vld [vmem:[%s1765_s1 + $0x48] sm:$0xff]  ;;  %v313_v8 = vld [vmem:[%s1765_s1 + $0x40] sm:$0xff]  ;;  %v312_v9 = vld [vmem:[%s1765_s1 + $0x38] sm:$0xff]  ;;  %s1357_s28 = scalar_lea.vmem %s1764_s0, %s1176_s21  ;;  %s1569_s10 = scalar_lea.vmem %s1767_s3, %s1107_s6  ;;  %vm977_vm2 = vcmask 64512  }
   0xe   : > { %530 = vmatprep.subr.mxu0 %v1232_v1  ;;  %1178 = vmatprep.subr.mxu1 %v1232_v1  ;;  %v311_v10 = vld [vmem:[%s1765_s1 + $0x30] sm:$0xff]  ;;  %v310_v11 = vld [vmem:[%s1765_s1 + $0x28] sm:$0xff]  ;;  %v309_v12 = vld [vmem:[%s1765_s1 + $0x20] sm:$0xff] }
   0xf   : > { %531 = vmatpush1.msra.mxu0 %v319_v2  ;;  %1197 = vmatpush1.msra.mxu1 %v319_v2  ;;  %v308_v13 = vld [vmem:[%s1765_s1 + $0x18] sm:$0xff]  ;;  %v307_v14 = vld [vmem:[%s1765_s1 + $0x10] sm:$0xff]  ;;  %v306_v15 = vld [vmem:[%s1765_s1 + $0x8] sm:$0xff] }
  0x10   : > { %532 = vmatprep.subr.mxu0 %v1232_v1  ;;  %1179 = vmatprep.subr.mxu1 %v1232_v1  ;;  %v305_v16 = vld [vmem:[%s1765_s1] sm:$0xff]  ;;  %v323_v17 = vld [vmem:[%s1765_s1 + $0x90] sm:$0x7]  ;;  %v322_v18 = vld [vmem:[%s1765_s1 + $0x88] sm:$0xff] }
  0x11   : > { %533 = vmatpush1.msra.mxu0 %v318_v3  ;;  %1198 = vmatpush1.msra.mxu1 %v318_v3  ;;  %v321_v19 = vld [vmem:[%s1765_s1 + $0x80] sm:$0xff]  ;;  %v178_v20 = vld [vmem:[%s1357_s28 + $0x8] sm:$0xff]  ;;  %v180_v24 = vld [vmem:[%s1357_s28 + $0x18] sm:$0xff] }
  0x12   : > { %534 = vmatprep.subr.mxu0 %v1232_v1  ;;  %1180 = vmatprep.subr.mxu1 %v1232_v1  ;;  %v242_v21 = vld [vmem:[%s1357_s28 + $0x208] sm:$0xff]  ;;  %v177_v22 = vld [vmem:[%s1357_s28] sm:$0xff]  ;;  %v244_v25 = vld [vmem:[%s1357_s28 + $0x218] sm:$0xff] }
  0x13   : > { %535 = vmatpush1.msra.mxu0 %v317_v4  ;;  %1199 = vmatpush1.msra.mxu1 %v317_v4  ;;  %v241_v23 = vld [vmem:[%s1357_s28 + $0x200] sm:$0xff]  ;;  %v179_v26 = vld [vmem:[%s1357_s28 + $0x10] sm:$0xff]  ;;  %v182_v28 = vld [vmem:[%s1357_s28 + $0x28] sm:$0xff] }
  0x14   : > { %536 = vmatprep.subr.mxu0 %v1232_v1  ;;  %1181 = vmatprep.subr.mxu1 %v1232_v1  ;;  %v243_v27 = vld [vmem:[%s1357_s28 + $0x210] sm:$0xff]  ;;  %v246_v29 = vld [vmem:[%s1357_s28 + $0x228] sm:$0xff]  ;;  %v181_v30 = vld [vmem:[%s1357_s28 + $0x20] sm:$0xff] }
  0x15   : > { %537 = vmatpush1.msra.mxu0 %v316_v5  ;;  %1200 = vmatpush1.msra.mxu1 %v316_v5  ;;  %v245_v31 = vld [vmem:[%s1357_s28 + $0x220] sm:$0xff]  ;;  %v184_v32 = vld [vmem:[%s1357_s28 + $0x38] sm:$0xff]  ;;  %v183_v34 = vld [vmem:[%s1357_s28 + $0x30] sm:$0xff] }
  0x16   : > { %538 = vmatprep.subr.mxu0 %v1232_v1  ;;  %1182 = vmatprep.subr.mxu1 %v1232_v1  ;;  %v248_v33 = vld [vmem:[%s1357_s28 + $0x238] sm:$0xff]  ;;  %v247_v35 = vld [vmem:[%s1357_s28 + $0x230] sm:$0xff]  ;;  %v186_v36 = vld [vmem:[%s1357_s28 + $0x48] sm:$0xff] }
  0x17   : > { %539 = vmatpush1.msra.mxu0 %v315_v6  ;;  %1201 = vmatpush1.msra.mxu1 %v315_v6  ;;  %v250_v37 = vld [vmem:[%s1357_s28 + $0x248] sm:$0xff]  ;;  %v185_v38 = vld [vmem:[%s1357_s28 + $0x40] sm:$0xff]  ;;  %v188_v40 = vld [vmem:[%s1357_s28 + $0x58] sm:$0xff] }
  0x18   : > { %540 = vmatprep.subr.mxu0 %v1232_v1  ;;  %1183 = vmatprep.subr.mxu1 %v1232_v1  ;;  %v249_v39 = vld [vmem:[%s1357_s28 + $0x240] sm:$0xff]  ;;  %v252_v41 = vld [vmem:[%s1357_s28 + $0x258] sm:$0xff]  ;;  %v187_v42 = vld [vmem:[%s1357_s28 + $0x50] sm:$0xff] }
  0x19   : > { %541 = vmatpush1.msra.mxu0 %v314_v7  ;;  %1202 = vmatpush1.msra.mxu1 %v314_v7  ;;  %v251_v43 = vld [vmem:[%s1357_s28 + $0x250] sm:$0xff]  ;;  %v190_v44 = vld [vmem:[%s1357_s28 + $0x68] sm:$0xff]  ;;  %v189_v46 = vld [vmem:[%s1357_s28 + $0x60] sm:$0xff] }
  0x1a   : > { %542 = vmatprep.subr.mxu0 %v1232_v1  ;;  %1184 = vmatprep.subr.mxu1 %v1232_v1  ;;  %v254_v45 = vld [vmem:[%s1357_s28 + $0x268] sm:$0xff]  ;;  %v253_v47 = vld [vmem:[%s1357_s28 + $0x260] sm:$0xff]  ;;  %v192_v48 = vld [vmem:[%s1357_s28 + $0x78] sm:$0xff] }
  0x1b   : > { %543 = vmatpush1.msra.mxu0 %v313_v8  ;;  %1203 = vmatpush1.msra.mxu1 %v313_v8  ;;  %v256_v49 = vld [vmem:[%s1357_s28 + $0x278] sm:$0xff]  ;;  %v191_v50 = vld [vmem:[%s1357_s28 + $0x70] sm:$0xff]  ;;  %v194_v52 = vld [vmem:[%s1357_s28 + $0x88] sm:$0xff] }
  0x1c   : > { %544 = vmatprep.subr.mxu0 %v1232_v1  ;;  %1185 = vmatprep.subr.mxu1 %v1232_v1  ;;  %v255_v51 = vld [vmem:[%s1357_s28 + $0x270] sm:$0xff]  ;;  %v258_v53 = vld [vmem:[%s1357_s28 + $0x288] sm:$0xff]  ;;  %v193_v54 = vld [vmem:[%s1357_s28 + $0x80] sm:$0xff] }
  0x1d   : > { %545 = vmatpush1.msra.mxu0 %v312_v9  ;;  %1204 = vmatpush1.msra.mxu1 %v312_v9  ;;  %v257_v55 = vld [vmem:[%s1357_s28 + $0x280] sm:$0xff]  ;;  %v196_v56 = vld [vmem:[%s1357_s28 + $0x98] sm:$0xff]  ;;  %v195_v58 = vld [vmem:[%s1357_s28 + $0x90] sm:$0xff] }
  0x1e   : > { %546 = vmatprep.subr.mxu0 %v1232_v1  ;;  %1186 = vmatprep.subr.mxu1 %v1232_v1  ;;  %v260_v57 = vld [vmem:[%s1357_s28 + $0x298] sm:$0xff]  ;;  %v259_v59 = vld [vmem:[%s1357_s28 + $0x290] sm:$0xff]  ;;  %v198_v60 = vld [vmem:[%s1357_s28 + $0xa8] sm:$0xff] }
  0x1f   : > { %547 = vmatpush1.msra.mxu0 %v311_v10  ;;  %1205 = vmatpush1.msra.mxu1 %v311_v10  ;;  %v262_v61 = vld [vmem:[%s1357_s28 + $0x2a8] sm:$0xff]  ;;  %v197_v62 = vld [vmem:[%s1357_s28 + $0xa0] sm:$0xff]  ;;  %v200_v0 = vld [vmem:[%s1357_s28 + $0xb8] sm:$0xff] }
  0x20   : > { %548 = vmatprep.subr.mxu0 %v1232_v1  ;;  %1187 = vmatprep.subr.mxu1 %v1232_v1  ;;  %v261_v63 = vld [vmem:[%s1357_s28 + $0x2a0] sm:$0xff]  ;;  %v199_v2 = vld [vmem:[%s1357_s28 + $0xb0] sm:$0xff]  ;;  %v202_v4 = vld [vmem:[%s1357_s28 + $0xc8] sm:$0xff] }
  0x21   : > { %549 = vmatpush1.msra.mxu0 %v310_v11  ;;  %1206 = vmatpush1.msra.mxu1 %v310_v11  ;;  %v263_v3 = vld [vmem:[%s1357_s28 + $0x2b0] sm:$0xff]  ;;  %v266_v5 = vld [vmem:[%s1357_s28 + $0x2c8] sm:$0xff]  ;;  %v201_v6 = vld [vmem:[%s1357_s28 + $0xc0] sm:$0xff] }
  0x22   : > { %550 = vmatprep.subr.mxu0 %v1232_v1  ;;  %1188 = vmatprep.subr.mxu1 %v1232_v1  ;;  %v265_v7 = vld [vmem:[%s1357_s28 + $0x2c0] sm:$0xff]  ;;  %v204_v8 = vld [vmem:[%s1357_s28 + $0xd8] sm:$0xff]  ;;  %v203_v10 = vld [vmem:[%s1357_s28 + $0xd0] sm:$0xff] }
  0x23   : > { %551 = vmatpush1.msra.mxu0 %v309_v12  ;;  %1207 = vmatpush1.msra.mxu1 %v309_v12  ;;  %v268_v9 = vld [vmem:[%s1357_s28 + $0x2d8] sm:$0xff]  ;;  %v267_v11 = vld [vmem:[%s1357_s28 + $0x2d0] sm:$0xff]  ;;  %v206_v12 = vld [vmem:[%s1357_s28 + $0xe8] sm:$0xff] }
  0x24   : > { %552 = vmatprep.subr.mxu0 %v1232_v1  ;;  %1189 = vmatprep.subr.mxu1 %v1232_v1 }
  0x25   : > { %553 = vmatpush1.msra.mxu0 %v308_v13  ;;  %1208 = vmatpush1.msra.mxu1 %v308_v13  ;;  %v270_v13 = vld [vmem:[%s1357_s28 + $0x2e8] sm:$0xff] }
  0x26   : > { %554 = vmatprep.subr.mxu0 %v1232_v1  ;;  %1190 = vmatprep.subr.mxu1 %v1232_v1 }
  0x27   : > { %555 = vmatpush1.msra.mxu0 %v307_v14  ;;  %1209 = vmatpush1.msra.mxu1 %v307_v14  ;;  %v205_v14 = vld [vmem:[%s1357_s28 + $0xe0] sm:$0xff] }
  0x28   : > { %556 = vmatprep.subr.mxu0 %v1232_v1  ;;  %1191 = vmatprep.subr.mxu1 %v1232_v1 }
  0x29   : > { %557 = vmatpush1.msra.mxu0 %v306_v15  ;;  %1210 = vmatpush1.msra.mxu1 %v306_v15  ;;  %v269_v15 = vld [vmem:[%s1357_s28 + $0x2e0] sm:$0xff] }
  0x2a   : > { %558 = vmatprep.subr.mxu0 %v1232_v1  ;;  %1192 = vmatprep.subr.mxu1 %v1232_v1 }
  0x2b   : > { %559 = vmatpush1.msra.mxu0 %v305_v16  ;;  %1211 = vmatpush1.msra.mxu1 %v305_v16  ;;  %v208_v16 = vld [vmem:[%s1357_s28 + $0xf8] sm:$0xff] }
  0x2c   : > { %586 = vmatprep.subr.mxu0 %v1232_v1  ;;  %1193 = vmatprep.subr.mxu1 %v1232_v1 }
  0x2d   : > { %1109 = vmatpush2.msk.msra.mxu0 %vm524_vm0, %v323_v17  ;;  %1212 = vmatpush2.msk.msra.mxu1 %vm524_vm0, %v323_v17  ;;  %v272_v17 = vld [vmem:[%s1357_s28 + $0x2f8] sm:$0xff] }
  0x2e   : > { %588 = vmatprep.subr.mxu0 %v1232_v1  ;;  %1194 = vmatprep.subr.mxu1 %v1232_v1 }
  0x2f   : > { %589 = vmatpush2.msra.mxu0 %v322_v18  ;;  %1213 = vmatpush2.msra.mxu1 %v322_v18  ;;  %v207_v18 = vld [vmem:[%s1357_s28 + $0xf0] sm:$0xff] }
  0x30   : > { %590 = vmatprep.subr.mxu0 %v1232_v1  ;;  %1195 = vmatprep.subr.mxu1 %v1232_v1  ;;  %v264_v1 = vld [vmem:[%s1357_s28 + $0x2b8] sm:$0xff] }
  0x31   : > { %591 = vmatpush2.msra.mxu0 %v321_v19  ;;  %1214 = vmatpush2.msra.mxu1 %v321_v19  ;;  %v271_v19 = vld [vmem:[%s1357_s28 + $0x2f0] sm:$0xff] }
  0x32   : > { %1110 = vmatprep.mubr.msk.f32.mxu0 %vm331_vm1, %v178_v20  ;;  %1142 = vmatprep.mubr.msk.f32.mxu1 %vm331_vm1, %v242_v21  ;;  %v210_v20 = vld [vmem:[%s1357_s28 + $0x108] sm:$0xff] }
  0x33   : > { %593 = vmatmul.mubr.f32.vlgmr.msra.gmra.mxu0 %v177_v22  ;;  %753 = vmatmul.mubr.f32.vlgmr.msra.gmra.mxu1 %v241_v23  ;;  %v274_v21 = vld [vmem:[%s1357_s28 + $0x308] sm:$0xff]  ;;  %v209_v22 = vld [vmem:[%s1357_s28 + $0x100] sm:$0xff] }
  0x34   : > { %1111 = vmatprep.mubr.msk.f32.mxu0 %vm331_vm1, %v180_v24  ;;  %1143 = vmatprep.mubr.msk.f32.mxu1 %vm331_vm1, %v244_v25  ;;  %v273_v23 = vld [vmem:[%s1357_s28 + $0x300] sm:$0xff]  ;;  %v212_v24 = vld [vmem:[%s1357_s28 + $0x118] sm:$0xff] }
  0x35   : > { %v276_v25 = vld [vmem:[%s1357_s28 + $0x318] sm:$0xff] }
  0x37   : > { %598 = vmatmul.mubr.f32.gmra.mxu0 %v179_v26  ;;  %758 = vmatmul.mubr.f32.gmra.mxu1 %v243_v27  ;;  %v211_v26 = vld [vmem:[%s1357_s28 + $0x110] sm:$0xff] }
  0x38   : > { %1112 = vmatprep.mubr.msk.f32.mxu0 %vm331_vm1, %v182_v28  ;;  %1144 = vmatprep.mubr.msk.f32.mxu1 %vm331_vm1, %v246_v29  ;;  %v275_v27 = vld [vmem:[%s1357_s28 + $0x310] sm:$0xff]  ;;  %v214_v28 = vld [vmem:[%s1357_s28 + $0x128] sm:$0xff] }
  0x39   : > { %v278_v29 = vld [vmem:[%s1357_s28 + $0x328] sm:$0xff] }
  0x3b   : > { %603 = vmatmul.mubr.f32.gmra.mxu0 %v181_v30  ;;  %763 = vmatmul.mubr.f32.gmra.mxu1 %v245_v31  ;;  %v213_v30 = vld [vmem:[%s1357_s28 + $0x120] sm:$0xff] }
  0x3c   : > { %1113 = vmatprep.mubr.msk.f32.mxu0 %vm331_vm1, %v184_v32  ;;  %1145 = vmatprep.mubr.msk.f32.mxu1 %vm331_vm1, %v248_v33  ;;  %v277_v31 = vld [vmem:[%s1357_s28 + $0x320] sm:$0xff]  ;;  %v216_v32 = vld [vmem:[%s1357_s28 + $0x138] sm:$0xff] }
  0x3d   : > { %v280_v33 = vld [vmem:[%s1357_s28 + $0x338] sm:$0xff] }
  0x3f   : > { %608 = vmatmul.mubr.f32.gmra.mxu0 %v183_v34  ;;  %768 = vmatmul.mubr.f32.gmra.mxu1 %v247_v35  ;;  %v215_v34 = vld [vmem:[%s1357_s28 + $0x130] sm:$0xff] }
  0x40   : > { %1114 = vmatprep.mubr.msk.f32.mxu0 %vm331_vm1, %v186_v36  ;;  %1146 = vmatprep.mubr.msk.f32.mxu1 %vm331_vm1, %v250_v37  ;;  %v279_v35 = vld [vmem:[%s1357_s28 + $0x330] sm:$0xff]  ;;  %v218_v36 = vld [vmem:[%s1357_s28 + $0x148] sm:$0xff] }
  0x41   : > { %v282_v37 = vld [vmem:[%s1357_s28 + $0x348] sm:$0xff] }
  0x43   : > { %613 = vmatmul.mubr.f32.gmra.mxu0 %v185_v38  ;;  %773 = vmatmul.mubr.f32.gmra.mxu1 %v249_v39  ;;  %v217_v38 = vld [vmem:[%s1357_s28 + $0x140] sm:$0xff] }
  0x44   : > { %1115 = vmatprep.mubr.msk.f32.mxu0 %vm331_vm1, %v188_v40  ;;  %1147 = vmatprep.mubr.msk.f32.mxu1 %vm331_vm1, %v252_v41  ;;  %v281_v39 = vld [vmem:[%s1357_s28 + $0x340] sm:$0xff]  ;;  %v220_v40 = vld [vmem:[%s1357_s28 + $0x158] sm:$0xff] }
  0x45   : > { %v284_v41 = vld [vmem:[%s1357_s28 + $0x358] sm:$0xff] }
  0x47   : > { %618 = vmatmul.mubr.f32.gmra.mxu0 %v187_v42  ;;  %778 = vmatmul.mubr.f32.gmra.mxu1 %v251_v43  ;;  %v219_v42 = vld [vmem:[%s1357_s28 + $0x150] sm:$0xff] }
  0x48   : > { %1116 = vmatprep.mubr.msk.f32.mxu0 %vm331_vm1, %v190_v44  ;;  %1148 = vmatprep.mubr.msk.f32.mxu1 %vm331_vm1, %v254_v45  ;;  %v283_v43 = vld [vmem:[%s1357_s28 + $0x350] sm:$0xff]  ;;  %v222_v44 = vld [vmem:[%s1357_s28 + $0x168] sm:$0xff] }
  0x49   : > { %v286_v45 = vld [vmem:[%s1357_s28 + $0x368] sm:$0xff] }
  0x4b   : > { %623 = vmatmul.mubr.f32.gmra.mxu0 %v189_v46  ;;  %783 = vmatmul.mubr.f32.gmra.mxu1 %v253_v47  ;;  %v221_v46 = vld [vmem:[%s1357_s28 + $0x160] sm:$0xff] }
  0x4c   : > { %1117 = vmatprep.mubr.msk.f32.mxu0 %vm331_vm1, %v192_v48  ;;  %1149 = vmatprep.mubr.msk.f32.mxu1 %vm331_vm1, %v256_v49  ;;  %v285_v47 = vld [vmem:[%s1357_s28 + $0x360] sm:$0xff]  ;;  %v224_v48 = vld [vmem:[%s1357_s28 + $0x178] sm:$0xff] }
  0x4d   : > { %v288_v49 = vld [vmem:[%s1357_s28 + $0x378] sm:$0xff] }
  0x4f   : > { %628 = vmatmul.mubr.f32.gmra.mxu0 %v191_v50  ;;  %788 = vmatmul.mubr.f32.gmra.mxu1 %v255_v51  ;;  %v223_v50 = vld [vmem:[%s1357_s28 + $0x170] sm:$0xff] }
  0x50   : > { %1118 = vmatprep.mubr.msk.f32.mxu0 %vm331_vm1, %v194_v52  ;;  %1150 = vmatprep.mubr.msk.f32.mxu1 %vm331_vm1, %v258_v53  ;;  %v287_v51 = vld [vmem:[%s1357_s28 + $0x370] sm:$0xff]  ;;  %v226_v52 = vld [vmem:[%s1357_s28 + $0x188] sm:$0xff] }
  0x51   : > { %v290_v53 = vld [vmem:[%s1357_s28 + $0x388] sm:$0xff] }
  0x53   : > { %633 = vmatmul.mubr.f32.gmra.mxu0 %v193_v54  ;;  %793 = vmatmul.mubr.f32.gmra.mxu1 %v257_v55  ;;  %v225_v54 = vld [vmem:[%s1357_s28 + $0x180] sm:$0xff] }
  0x54   : > { %1119 = vmatprep.mubr.msk.f32.mxu0 %vm331_vm1, %v196_v56  ;;  %1151 = vmatprep.mubr.msk.f32.mxu1 %vm331_vm1, %v260_v57  ;;  %v289_v55 = vld [vmem:[%s1357_s28 + $0x380] sm:$0xff]  ;;  %v228_v56 = vld [vmem:[%s1357_s28 + $0x198] sm:$0xff] }
  0x55   : > { %v292_v57 = vld [vmem:[%s1357_s28 + $0x398] sm:$0xff] }
  0x57   : > { %638 = vmatmul.mubr.f32.gmra.mxu0 %v195_v58  ;;  %798 = vmatmul.mubr.f32.gmra.mxu1 %v259_v59  ;;  %v227_v58 = vld [vmem:[%s1357_s28 + $0x190] sm:$0xff] }
  0x58   : > { %1120 = vmatprep.mubr.msk.f32.mxu0 %vm331_vm1, %v198_v60  ;;  %1152 = vmatprep.mubr.msk.f32.mxu1 %vm331_vm1, %v262_v61  ;;  %v291_v59 = vld [vmem:[%s1357_s28 + $0x390] sm:$0xff]  ;;  %v230_v60 = vld [vmem:[%s1357_s28 + $0x1a8] sm:$0xff] }
  0x59   : > { %v294_v61 = vld [vmem:[%s1357_s28 + $0x3a8] sm:$0xff] }
  0x5b   : > { %643 = vmatmul.mubr.f32.gmra.mxu0 %v197_v62  ;;  %803 = vmatmul.mubr.f32.gmra.mxu1 %v261_v63  ;;  %v229_v62 = vld [vmem:[%s1357_s28 + $0x1a0] sm:$0xff] }
  0x5c   : > { %1121 = vmatprep.mubr.msk.f32.mxu0 %vm331_vm1, %v200_v0  ;;  %1153 = vmatprep.mubr.msk.f32.mxu1 %vm331_vm1, %v264_v1  ;;  %v293_v63 = vld [vmem:[%s1357_s28 + $0x3a0] sm:$0xff]  ;;  %v232_v0 = vld [vmem:[%s1357_s28 + $0x1b8] sm:$0xff] }
  0x5d   : > { %v296_v1 = vld [vmem:[%s1357_s28 + $0x3b8] sm:$0xff] }
  0x5f   : > { %648 = vmatmul.mubr.f32.gmra.mxu0 %v199_v2  ;;  %808 = vmatmul.mubr.f32.gmra.mxu1 %v263_v3  ;;  %v231_v2 = vld [vmem:[%s1357_s28 + $0x1b0] sm:$0xff] }
  0x60   : > { %1122 = vmatprep.mubr.msk.f32.mxu0 %vm331_vm1, %v202_v4  ;;  %1154 = vmatprep.mubr.msk.f32.mxu1 %vm331_vm1, %v266_v5  ;;  %v295_v3 = vld [vmem:[%s1357_s28 + $0x3b0] sm:$0xff]  ;;  %v234_v4 = vld [vmem:[%s1357_s28 + $0x1c8] sm:$0xff] }
  0x61   : > { %v298_v5 = vld [vmem:[%s1357_s28 + $0x3c8] sm:$0xff] }
  0x63   : > { %653 = vmatmul.mubr.f32.gmra.mxu0 %v201_v6  ;;  %813 = vmatmul.mubr.f32.gmra.mxu1 %v265_v7  ;;  %v233_v6 = vld [vmem:[%s1357_s28 + $0x1c0] sm:$0xff] }
  0x64   : > { %1123 = vmatprep.mubr.msk.f32.mxu0 %vm331_vm1, %v204_v8  ;;  %1155 = vmatprep.mubr.msk.f32.mxu1 %vm331_vm1, %v268_v9  ;;  %v297_v7 = vld [vmem:[%s1357_s28 + $0x3c0] sm:$0xff]  ;;  %v236_v8 = vld [vmem:[%s1357_s28 + $0x1d8] sm:$0xff] }
  0x65   : > { %v300_v9 = vld [vmem:[%s1357_s28 + $0x3d8] sm:$0xff] }
  0x67   : > { %658 = vmatmul.mubr.f32.gmra.mxu0 %v203_v10  ;;  %818 = vmatmul.mubr.f32.gmra.mxu1 %v267_v11  ;;  %v235_v10 = vld [vmem:[%s1357_s28 + $0x1d0] sm:$0xff] }
  0x68   : > { %1124 = vmatprep.mubr.msk.f32.mxu0 %vm331_vm1, %v206_v12  ;;  %1156 = vmatprep.mubr.msk.f32.mxu1 %vm331_vm1, %v270_v13  ;;  %v299_v11 = vld [vmem:[%s1357_s28 + $0x3d0] sm:$0xff]  ;;  %v238_v12 = vld [vmem:[%s1357_s28 + $0x1e8] sm:$0xff] }
  0x69   : > { %v302_v13 = vld [vmem:[%s1357_s28 + $0x3e8] sm:$0xff] }
  0x6b   : > { %663 = vmatmul.mubr.f32.gmra.mxu0 %v205_v14  ;;  %823 = vmatmul.mubr.f32.gmra.mxu1 %v269_v15  ;;  %v237_v14 = vld [vmem:[%s1357_s28 + $0x1e0] sm:$0xff] }
  0x6c   : > { %1125 = vmatprep.mubr.msk.f32.mxu0 %vm331_vm1, %v208_v16  ;;  %1157 = vmatprep.mubr.msk.f32.mxu1 %vm331_vm1, %v272_v17  ;;  %v301_v15 = vld [vmem:[%s1357_s28 + $0x3e0] sm:$0xff]  ;;  %v240_v16 = vld [vmem:[%s1357_s28 + $0x1f8] sm:$0xff] }
  0x6d   : > { %v304_v17 = vld [vmem:[%s1357_s28 + $0x3f8] sm:$0xff] }
  0x6f   : > { %668 = vmatmul.mubr.f32.gmra.mxu0 %v207_v18  ;;  %828 = vmatmul.mubr.f32.gmra.mxu1 %v271_v19  ;;  %v239_v18 = vld [vmem:[%s1357_s28 + $0x1f0] sm:$0xff] }
  0x70   : > { %1126 = vmatprep.mubr.msk.f32.mxu0 %vm331_vm1, %v210_v20  ;;  %1158 = vmatprep.mubr.msk.f32.mxu1 %vm331_vm1, %v274_v21  ;;  %v303_v19 = vld [vmem:[%s1357_s28 + $0x3f0] sm:$0xff]  ;;  %v1561_v20 = vld [vmem:[%s1766_s2] ss:$0 sm:$0xff] }
  0x73   : > { %673 = vmatmul.mubr.f32.gmra.mxu0 %v209_v22  ;;  %833 = vmatmul.mubr.f32.gmra.mxu1 %v273_v23 }
  0x74   : > { %1127 = vmatprep.mubr.msk.f32.mxu0 %vm331_vm1, %v212_v24  ;;  %1159 = vmatprep.mubr.msk.f32.mxu1 %vm331_vm1, %v276_v25 }
  0x77   : > { %678 = vmatmul.mubr.f32.gmra.mxu0 %v211_v26  ;;  %838 = vmatmul.mubr.f32.gmra.mxu1 %v275_v27 }
  0x78   : > { %1128 = vmatprep.mubr.msk.f32.mxu0 %vm331_vm1, %v214_v28  ;;  %1160 = vmatprep.mubr.msk.f32.mxu1 %vm331_vm1, %v278_v29 }
  0x7b   : > { %683 = vmatmul.mubr.f32.gmra.mxu0 %v213_v30  ;;  %843 = vmatmul.mubr.f32.gmra.mxu1 %v277_v31 }
  0x7c   : > { %1129 = vmatprep.mubr.msk.f32.mxu0 %vm331_vm1, %v216_v32  ;;  %1161 = vmatprep.mubr.msk.f32.mxu1 %vm331_vm1, %v280_v33 }
  0x7f   : > { %688 = vmatmul.mubr.f32.gmra.mxu0 %v215_v34  ;;  %848 = vmatmul.mubr.f32.gmra.mxu1 %v279_v35 }
  0x80   : > { %1130 = vmatprep.mubr.msk.f32.mxu0 %vm331_vm1, %v218_v36  ;;  %1162 = vmatprep.mubr.msk.f32.mxu1 %vm331_vm1, %v282_v37 }
  0x83   : > { %693 = vmatmul.mubr.f32.gmra.mxu0 %v217_v38  ;;  %853 = vmatmul.mubr.f32.gmra.mxu1 %v281_v39 }
  0x84   : > { %1131 = vmatprep.mubr.msk.f32.mxu0 %vm331_vm1, %v220_v40  ;;  %1163 = vmatprep.mubr.msk.f32.mxu1 %vm331_vm1, %v284_v41 }
  0x87   : > { %698 = vmatmul.mubr.f32.gmra.mxu0 %v219_v42  ;;  %858 = vmatmul.mubr.f32.gmra.mxu1 %v283_v43 }
  0x88   : > { %1132 = vmatprep.mubr.msk.f32.mxu0 %vm331_vm1, %v222_v44  ;;  %1164 = vmatprep.mubr.msk.f32.mxu1 %vm331_vm1, %v286_v45 }
  0x8b   : > { %703 = vmatmul.mubr.f32.gmra.mxu0 %v221_v46  ;;  %863 = vmatmul.mubr.f32.gmra.mxu1 %v285_v47 }
  0x8c   : > { %1133 = vmatprep.mubr.msk.f32.mxu0 %vm331_vm1, %v224_v48  ;;  %1165 = vmatprep.mubr.msk.f32.mxu1 %vm331_vm1, %v288_v49 }
  0x8f   : > { %708 = vmatmul.mubr.f32.gmra.mxu0 %v223_v50  ;;  %868 = vmatmul.mubr.f32.gmra.mxu1 %v287_v51 }
  0x90   : > { %1134 = vmatprep.mubr.msk.f32.mxu0 %vm331_vm1, %v226_v52  ;;  %1166 = vmatprep.mubr.msk.f32.mxu1 %vm331_vm1, %v290_v53 }
  0x93   : > { %713 = vmatmul.mubr.f32.gmra.mxu0 %v225_v54  ;;  %873 = vmatmul.mubr.f32.gmra.mxu1 %v289_v55 }
  0x94   : > { %1135 = vmatprep.mubr.msk.f32.mxu0 %vm331_vm1, %v228_v56  ;;  %1167 = vmatprep.mubr.msk.f32.mxu1 %vm331_vm1, %v292_v57 }
  0x97   : > { %718 = vmatmul.mubr.f32.gmra.mxu0 %v227_v58  ;;  %878 = vmatmul.mubr.f32.gmra.mxu1 %v291_v59 }
  0x98   : > { %1136 = vmatprep.mubr.msk.f32.mxu0 %vm331_vm1, %v230_v60  ;;  %1168 = vmatprep.mubr.msk.f32.mxu1 %vm331_vm1, %v294_v61 }
  0x9b   : > { %723 = vmatmul.mubr.f32.gmra.mxu0 %v229_v62  ;;  %883 = vmatmul.mubr.f32.gmra.mxu1 %v293_v63 }
  0x9c   : > { %1137 = vmatprep.mubr.msk.f32.mxu0 %vm331_vm1, %v232_v0  ;;  %1169 = vmatprep.mubr.msk.f32.mxu1 %vm331_vm1, %v296_v1 }
  0x9f   : > { %728 = vmatmul.mubr.f32.gmra.mxu0 %v231_v2  ;;  %888 = vmatmul.mubr.f32.gmra.mxu1 %v295_v3 }
  0xa0   : > { %1138 = vmatprep.mubr.msk.f32.mxu0 %vm331_vm1, %v234_v4  ;;  %1170 = vmatprep.mubr.msk.f32.mxu1 %vm331_vm1, %v298_v5 }
  0xa3   : > { %733 = vmatmul.mubr.f32.gmra.mxu0 %v233_v6  ;;  %893 = vmatmul.mubr.f32.gmra.mxu1 %v297_v7 }
  0xa4   : > { %1139 = vmatprep.mubr.msk.f32.mxu0 %vm331_vm1, %v236_v8  ;;  %1171 = vmatprep.mubr.msk.f32.mxu1 %vm331_vm1, %v300_v9 }
  0xa7   : > { %738 = vmatmul.mubr.f32.gmra.mxu0 %v235_v10  ;;  %898 = vmatmul.mubr.f32.gmra.mxu1 %v299_v11 }
  0xa8   : > { %1140 = vmatprep.mubr.msk.f32.mxu0 %vm331_vm1, %v238_v12  ;;  %1172 = vmatprep.mubr.msk.f32.mxu1 %vm331_vm1, %v302_v13 }
  0xab   : > { %743 = vmatmul.mubr.f32.gmra.mxu0 %v237_v14  ;;  %903 = vmatmul.mubr.f32.gmra.mxu1 %v301_v15 }
  0xac   : > { %1141 = vmatprep.mubr.msk.f32.mxu0 %vm331_vm1, %v240_v16  ;;  %1173 = vmatprep.mubr.msk.f32.mxu1 %vm331_vm1, %v304_v17 }
  0xaf   : > { %748 = vmatmul.mubr.f32.gmra.mxu0 %v239_v18  ;;  %908 = vmatmul.mubr.f32.gmra.mxu1 %v303_v19 }
  0xf3   : > { %v594_v21 = vpop.f32.mrf.mxu0  ;;  %v754_v22 = vpop.f32.mrf.mxu1 }
  0xf4   : > { %v595_v23 = vadd.f32 %v1561_v20, %v594_v21  ;;  %v755_v24 = vadd.f32 %v1561_v20, %v754_v22 }
  0xf5   : > { %v596_v25 = vpop.f32.mrf.mxu0  ;;  %v756_v26 = vpop.f32.mrf.mxu1 }
  0xf6   : > { %v913_v27 = vmax.f32 %v595_v23, 0.0  ;;  %v945_v28 = vmax.f32 %v755_v24, 0.0 }
  0xf7   : > { %v599_v29 = vpop.f32.mrf.mxu0  ;;  %v759_v30 = vpop.f32.mrf.mxu1 }
  0xf8   : > { %978 = vst.msk [vmem:[%s1569_s10] sm:$0xff] %vm977_vm2, %v913_v27  ;;  %1010 = vst.msk [vmem:[%s1569_s10 + $0x100] sm:$0xff] %vm977_vm2, %v945_v28  ;;  %v600_v31 = vadd.f32 %v1561_v20, %v599_v29  ;;  %v760_v32 = vadd.f32 %v1561_v20, %v759_v30 }
  0xf9   : > { %v601_v33 = vpop.f32.mrf.mxu0  ;;  %v761_v34 = vpop.f32.mrf.mxu1 }
  0xfa   : > { %v914_v35 = vmax.f32 %v600_v31, 0.0  ;;  %v946_v36 = vmax.f32 %v760_v32, 0.0 }
  0xfb   : > { %v604_v37 = vpop.f32.mrf.mxu0  ;;  %v764_v38 = vpop.f32.mrf.mxu1 }
  0xfc   : > { %979 = vst.msk [vmem:[%s1569_s10 + $0x8] sm:$0xff] %vm977_vm2, %v914_v35  ;;  %1011 = vst.msk [vmem:[%s1569_s10 + $0x108] sm:$0xff] %vm977_vm2, %v946_v36  ;;  %v605_v39 = vadd.f32 %v1561_v20, %v604_v37  ;;  %v765_v40 = vadd.f32 %v1561_v20, %v764_v38 }
  0xfd   : > { %v606_v41 = vpop.f32.mrf.mxu0  ;;  %v766_v42 = vpop.f32.mrf.mxu1 }
  0xfe   : > { %v915_v43 = vmax.f32 %v605_v39, 0.0  ;;  %v947_v44 = vmax.f32 %v765_v40, 0.0 }
  0xff   : > { %v609_v45 = vpop.f32.mrf.mxu0  ;;  %v769_v46 = vpop.f32.mrf.mxu1 }
 0x100   : > { %980 = vst.msk [vmem:[%s1569_s10 + $0x10] sm:$0xff] %vm977_vm2, %v915_v43  ;;  %1012 = vst.msk [vmem:[%s1569_s10 + $0x110] sm:$0xff] %vm977_vm2, %v947_v44  ;;  %v610_v47 = vadd.f32 %v1561_v20, %v609_v45  ;;  %v770_v48 = vadd.f32 %v1561_v20, %v769_v46 }
 0x101   : > { %v611_v49 = vpop.f32.mrf.mxu0  ;;  %v771_v50 = vpop.f32.mrf.mxu1 }
 0x102   : > { %v916_v51 = vmax.f32 %v610_v47, 0.0  ;;  %v948_v52 = vmax.f32 %v770_v48, 0.0 }
 0x103   : > { %v614_v53 = vpop.f32.mrf.mxu0  ;;  %v774_v54 = vpop.f32.mrf.mxu1 }
 0x104   : > { %981 = vst.msk [vmem:[%s1569_s10 + $0x18] sm:$0xff] %vm977_vm2, %v916_v51  ;;  %1013 = vst.msk [vmem:[%s1569_s10 + $0x118] sm:$0xff] %vm977_vm2, %v948_v52  ;;  %v615_v55 = vadd.f32 %v1561_v20, %v614_v53  ;;  %v775_v56 = vadd.f32 %v1561_v20, %v774_v54 }
 0x105   : > { %v616_v57 = vpop.f32.mrf.mxu0  ;;  %v776_v58 = vpop.f32.mrf.mxu1 }
 0x106   : > { %v917_v59 = vmax.f32 %v615_v55, 0.0  ;;  %v949_v60 = vmax.f32 %v775_v56, 0.0 }
 0x107   : > { %v619_v61 = vpop.f32.mrf.mxu0  ;;  %v779_v62 = vpop.f32.mrf.mxu1 }
 0x108   : > { %982 = vst.msk [vmem:[%s1569_s10 + $0x20] sm:$0xff] %vm977_vm2, %v917_v59  ;;  %1014 = vst.msk [vmem:[%s1569_s10 + $0x120] sm:$0xff] %vm977_vm2, %v949_v60  ;;  %v620_v63 = vadd.f32 %v1561_v20, %v619_v61  ;;  %v780_v0 = vadd.f32 %v1561_v20, %v779_v62 }
 0x109   : > { %v621_v1 = vpop.f32.mrf.mxu0  ;;  %v781_v2 = vpop.f32.mrf.mxu1 }
 0x10a   : > { %v918_v3 = vmax.f32 %v620_v63, 0.0  ;;  %v950_v4 = vmax.f32 %v780_v0, 0.0 }
 0x10b   : > { %v624_v5 = vpop.f32.mrf.mxu0  ;;  %v784_v6 = vpop.f32.mrf.mxu1 }
 0x10c   : > { %983 = vst.msk [vmem:[%s1569_s10 + $0x28] sm:$0xff] %vm977_vm2, %v918_v3  ;;  %1015 = vst.msk [vmem:[%s1569_s10 + $0x128] sm:$0xff] %vm977_vm2, %v950_v4  ;;  %v625_v7 = vadd.f32 %v1561_v20, %v624_v5  ;;  %v785_v8 = vadd.f32 %v1561_v20, %v784_v6 }
 0x10d   : > { %v626_v9 = vpop.f32.mrf.mxu0  ;;  %v786_v10 = vpop.f32.mrf.mxu1 }
 0x10e   : > { %v919_v11 = vmax.f32 %v625_v7, 0.0  ;;  %v951_v12 = vmax.f32 %v785_v8, 0.0 }
 0x10f   : > { %v629_v13 = vpop.f32.mrf.mxu0  ;;  %v789_v14 = vpop.f32.mrf.mxu1 }
 0x110   : > { %984 = vst.msk [vmem:[%s1569_s10 + $0x30] sm:$0xff] %vm977_vm2, %v919_v11  ;;  %1016 = vst.msk [vmem:[%s1569_s10 + $0x130] sm:$0xff] %vm977_vm2, %v951_v12  ;;  %v630_v15 = vadd.f32 %v1561_v20, %v629_v13  ;;  %v790_v16 = vadd.f32 %v1561_v20, %v789_v14 }
 0x111   : > { %v631_v17 = vpop.f32.mrf.mxu0  ;;  %v791_v18 = vpop.f32.mrf.mxu1 }
 0x112   : > { %v920_v19 = vmax.f32 %v630_v15, 0.0  ;;  %v952_v21 = vmax.f32 %v790_v16, 0.0 }
 0x113   : > { %v634_v22 = vpop.f32.mrf.mxu0  ;;  %v794_v23 = vpop.f32.mrf.mxu1 }
 0x114   : > { %985 = vst.msk [vmem:[%s1569_s10 + $0x38] sm:$0xff] %vm977_vm2, %v920_v19  ;;  %1017 = vst.msk [vmem:[%s1569_s10 + $0x138] sm:$0xff] %vm977_vm2, %v952_v21  ;;  %v635_v24 = vadd.f32 %v1561_v20, %v634_v22  ;;  %v795_v25 = vadd.f32 %v1561_v20, %v794_v23 }
 0x115   : > { %v636_v26 = vpop.f32.mrf.mxu0  ;;  %v796_v27 = vpop.f32.mrf.mxu1 }
 0x116   : > { %v921_v28 = vmax.f32 %v635_v24, 0.0  ;;  %v953_v29 = vmax.f32 %v795_v25, 0.0 }
 0x117   : > { %v639_v30 = vpop.f32.mrf.mxu0  ;;  %v799_v31 = vpop.f32.mrf.mxu1 }
 0x118   : > { %986 = vst.msk [vmem:[%s1569_s10 + $0x40] sm:$0xff] %vm977_vm2, %v921_v28  ;;  %1018 = vst.msk [vmem:[%s1569_s10 + $0x140] sm:$0xff] %vm977_vm2, %v953_v29  ;;  %v640_v32 = vadd.f32 %v1561_v20, %v639_v30  ;;  %v800_v33 = vadd.f32 %v1561_v20, %v799_v31 }
 0x119   : > { %v641_v34 = vpop.f32.mrf.mxu0  ;;  %v801_v35 = vpop.f32.mrf.mxu1 }
 0x11a   : > { %v922_v36 = vmax.f32 %v640_v32, 0.0  ;;  %v954_v37 = vmax.f32 %v800_v33, 0.0 }
 0x11b   : > { %v644_v38 = vpop.f32.mrf.mxu0  ;;  %v804_v39 = vpop.f32.mrf.mxu1 }
 0x11c   : > { %987 = vst.msk [vmem:[%s1569_s10 + $0x48] sm:$0xff] %vm977_vm2, %v922_v36  ;;  %1019 = vst.msk [vmem:[%s1569_s10 + $0x148] sm:$0xff] %vm977_vm2, %v954_v37  ;;  %v645_v40 = vadd.f32 %v1561_v20, %v644_v38  ;;  %v805_v41 = vadd.f32 %v1561_v20, %v804_v39 }
 0x11d   : > { %v646_v42 = vpop.f32.mrf.mxu0  ;;  %v806_v43 = vpop.f32.mrf.mxu1 }
 0x11e   : > { %v923_v44 = vmax.f32 %v645_v40, 0.0  ;;  %v955_v45 = vmax.f32 %v805_v41, 0.0 }
 0x11f   : > { %v649_v46 = vpop.f32.mrf.mxu0  ;;  %v809_v47 = vpop.f32.mrf.mxu1 }
 0x120   : > { %988 = vst.msk [vmem:[%s1569_s10 + $0x50] sm:$0xff] %vm977_vm2, %v923_v44  ;;  %1020 = vst.msk [vmem:[%s1569_s10 + $0x150] sm:$0xff] %vm977_vm2, %v955_v45  ;;  %v650_v48 = vadd.f32 %v1561_v20, %v649_v46  ;;  %v810_v49 = vadd.f32 %v1561_v20, %v809_v47 }
 0x121   : > { %v651_v50 = vpop.f32.mrf.mxu0  ;;  %v811_v51 = vpop.f32.mrf.mxu1 }
 0x122   : > { %v924_v52 = vmax.f32 %v650_v48, 0.0  ;;  %v956_v53 = vmax.f32 %v810_v49, 0.0 }
 0x123   : > { %v654_v54 = vpop.f32.mrf.mxu0  ;;  %v814_v55 = vpop.f32.mrf.mxu1 }
 0x124   : > { %989 = vst.msk [vmem:[%s1569_s10 + $0x58] sm:$0xff] %vm977_vm2, %v924_v52  ;;  %1021 = vst.msk [vmem:[%s1569_s10 + $0x158] sm:$0xff] %vm977_vm2, %v956_v53  ;;  %v655_v56 = vadd.f32 %v1561_v20, %v654_v54  ;;  %v815_v57 = vadd.f32 %v1561_v20, %v814_v55 }
 0x125   : > { %v656_v58 = vpop.f32.mrf.mxu0  ;;  %v816_v59 = vpop.f32.mrf.mxu1 }
 0x126   : > { %v925_v60 = vmax.f32 %v655_v56, 0.0  ;;  %v957_v61 = vmax.f32 %v815_v57, 0.0 }
 0x127   : > { %v659_v62 = vpop.f32.mrf.mxu0  ;;  %v819_v63 = vpop.f32.mrf.mxu1 }
 0x128   : > { %990 = vst.msk [vmem:[%s1569_s10 + $0x60] sm:$0xff] %vm977_vm2, %v925_v60  ;;  %1022 = vst.msk [vmem:[%s1569_s10 + $0x160] sm:$0xff] %vm977_vm2, %v957_v61  ;;  %v660_v0 = vadd.f32 %v1561_v20, %v659_v62  ;;  %v820_v1 = vadd.f32 %v1561_v20, %v819_v63 }
 0x129   : > { %v661_v2 = vpop.f32.mrf.mxu0  ;;  %v821_v3 = vpop.f32.mrf.mxu1 }
 0x12a   : > { %v926_v4 = vmax.f32 %v660_v0, 0.0  ;;  %v958_v5 = vmax.f32 %v820_v1, 0.0 }
 0x12b   : > { %v664_v6 = vpop.f32.mrf.mxu0  ;;  %v824_v7 = vpop.f32.mrf.mxu1 }
 0x12c   : > { %991 = vst.msk [vmem:[%s1569_s10 + $0x68] sm:$0xff] %vm977_vm2, %v926_v4  ;;  %1023 = vst.msk [vmem:[%s1569_s10 + $0x168] sm:$0xff] %vm977_vm2, %v958_v5  ;;  %v665_v8 = vadd.f32 %v1561_v20, %v664_v6  ;;  %v825_v9 = vadd.f32 %v1561_v20, %v824_v7 }
 0x12d   : > { %v666_v10 = vpop.f32.mrf.mxu0  ;;  %v826_v11 = vpop.f32.mrf.mxu1 }
 0x12e   : > { %v927_v12 = vmax.f32 %v665_v8, 0.0  ;;  %v959_v13 = vmax.f32 %v825_v9, 0.0 }
 0x12f   : > { %v669_v14 = vpop.f32.mrf.mxu0  ;;  %v829_v15 = vpop.f32.mrf.mxu1 }
 0x130   : > { %992 = vst.msk [vmem:[%s1569_s10 + $0x70] sm:$0xff] %vm977_vm2, %v927_v12  ;;  %1024 = vst.msk [vmem:[%s1569_s10 + $0x170] sm:$0xff] %vm977_vm2, %v959_v13  ;;  %v670_v16 = vadd.f32 %v1561_v20, %v669_v14  ;;  %v830_v17 = vadd.f32 %v1561_v20, %v829_v15 }
 0x131   : > { %v671_v18 = vpop.f32.mrf.mxu0  ;;  %v831_v19 = vpop.f32.mrf.mxu1 }
 0x132   : > { %v928_v21 = vmax.f32 %v670_v16, 0.0  ;;  %v960_v22 = vmax.f32 %v830_v17, 0.0 }
 0x133   : > { %v674_v23 = vpop.f32.mrf.mxu0  ;;  %v834_v24 = vpop.f32.mrf.mxu1 }
 0x134   : > { %993 = vst.msk [vmem:[%s1569_s10 + $0x78] sm:$0xff] %vm977_vm2, %v928_v21  ;;  %1025 = vst.msk [vmem:[%s1569_s10 + $0x178] sm:$0xff] %vm977_vm2, %v960_v22  ;;  %v675_v25 = vadd.f32 %v1561_v20, %v674_v23  ;;  %v835_v26 = vadd.f32 %v1561_v20, %v834_v24 }
 0x135   : > { %v676_v27 = vpop.f32.mrf.mxu0  ;;  %v836_v28 = vpop.f32.mrf.mxu1 }
 0x136   : > { %v929_v29 = vmax.f32 %v675_v25, 0.0  ;;  %v961_v30 = vmax.f32 %v835_v26, 0.0 }
 0x137   : > { %v679_v31 = vpop.f32.mrf.mxu0  ;;  %v839_v32 = vpop.f32.mrf.mxu1 }
 0x138   : > { %994 = vst.msk [vmem:[%s1569_s10 + $0x80] sm:$0xff] %vm977_vm2, %v929_v29  ;;  %1026 = vst.msk [vmem:[%s1569_s10 + $0x180] sm:$0xff] %vm977_vm2, %v961_v30  ;;  %v680_v33 = vadd.f32 %v1561_v20, %v679_v31  ;;  %v840_v34 = vadd.f32 %v1561_v20, %v839_v32 }
 0x139   : > { %v681_v35 = vpop.f32.mrf.mxu0  ;;  %v841_v36 = vpop.f32.mrf.mxu1 }
 0x13a   : > { %v930_v37 = vmax.f32 %v680_v33, 0.0  ;;  %v962_v38 = vmax.f32 %v840_v34, 0.0 }
 0x13b   : > { %v684_v39 = vpop.f32.mrf.mxu0  ;;  %v844_v40 = vpop.f32.mrf.mxu1 }
 0x13c   : > { %995 = vst.msk [vmem:[%s1569_s10 + $0x88] sm:$0xff] %vm977_vm2, %v930_v37  ;;  %1027 = vst.msk [vmem:[%s1569_s10 + $0x188] sm:$0xff] %vm977_vm2, %v962_v38  ;;  %v685_v41 = vadd.f32 %v1561_v20, %v684_v39  ;;  %v845_v42 = vadd.f32 %v1561_v20, %v844_v40 }
 0x13d   : > { %v686_v43 = vpop.f32.mrf.mxu0  ;;  %v846_v44 = vpop.f32.mrf.mxu1 }
 0x13e   : > { %v931_v45 = vmax.f32 %v685_v41, 0.0  ;;  %v963_v46 = vmax.f32 %v845_v42, 0.0 }
 0x13f   : > { %v689_v47 = vpop.f32.mrf.mxu0  ;;  %v849_v48 = vpop.f32.mrf.mxu1 }
 0x140   : > { %996 = vst.msk [vmem:[%s1569_s10 + $0x90] sm:$0xff] %vm977_vm2, %v931_v45  ;;  %1028 = vst.msk [vmem:[%s1569_s10 + $0x190] sm:$0xff] %vm977_vm2, %v963_v46  ;;  %v690_v49 = vadd.f32 %v1561_v20, %v689_v47  ;;  %v850_v50 = vadd.f32 %v1561_v20, %v849_v48 }
 0x141   : > { %v691_v51 = vpop.f32.mrf.mxu0  ;;  %v851_v52 = vpop.f32.mrf.mxu1 }
 0x142   : > { %v932_v53 = vmax.f32 %v690_v49, 0.0  ;;  %v964_v54 = vmax.f32 %v850_v50, 0.0 }
 0x143   : > { %v694_v55 = vpop.f32.mrf.mxu0  ;;  %v854_v56 = vpop.f32.mrf.mxu1 }
 0x144   : > { %997 = vst.msk [vmem:[%s1569_s10 + $0x98] sm:$0xff] %vm977_vm2, %v932_v53  ;;  %1029 = vst.msk [vmem:[%s1569_s10 + $0x198] sm:$0xff] %vm977_vm2, %v964_v54  ;;  %v695_v57 = vadd.f32 %v1561_v20, %v694_v55  ;;  %v855_v58 = vadd.f32 %v1561_v20, %v854_v56 }
 0x145   : > { %v696_v59 = vpop.f32.mrf.mxu0  ;;  %v856_v60 = vpop.f32.mrf.mxu1 }
 0x146   : > { %v933_v61 = vmax.f32 %v695_v57, 0.0  ;;  %v965_v62 = vmax.f32 %v855_v58, 0.0 }
 0x147   : > { %v699_v63 = vpop.f32.mrf.mxu0  ;;  %v859_v0 = vpop.f32.mrf.mxu1 }
 0x148   : > { %998 = vst.msk [vmem:[%s1569_s10 + $0xa0] sm:$0xff] %vm977_vm2, %v933_v61  ;;  %1030 = vst.msk [vmem:[%s1569_s10 + $0x1a0] sm:$0xff] %vm977_vm2, %v965_v62  ;;  %v700_v1 = vadd.f32 %v1561_v20, %v699_v63  ;;  %v860_v2 = vadd.f32 %v1561_v20, %v859_v0 }
 0x149   : > { %v701_v3 = vpop.f32.mrf.mxu0  ;;  %v861_v4 = vpop.f32.mrf.mxu1 }
 0x14a   : > { %v934_v5 = vmax.f32 %v700_v1, 0.0  ;;  %v966_v6 = vmax.f32 %v860_v2, 0.0 }
 0x14b   : > { %v704_v7 = vpop.f32.mrf.mxu0  ;;  %v864_v8 = vpop.f32.mrf.mxu1 }
 0x14c   : > { %999 = vst.msk [vmem:[%s1569_s10 + $0xa8] sm:$0xff] %vm977_vm2, %v934_v5  ;;  %1031 = vst.msk [vmem:[%s1569_s10 + $0x1a8] sm:$0xff] %vm977_vm2, %v966_v6  ;;  %v705_v9 = vadd.f32 %v1561_v20, %v704_v7  ;;  %v865_v10 = vadd.f32 %v1561_v20, %v864_v8 }
 0x14d   : > { %v706_v11 = vpop.f32.mrf.mxu0  ;;  %v866_v12 = vpop.f32.mrf.mxu1 }
 0x14e   : > { %v935_v13 = vmax.f32 %v705_v9, 0.0  ;;  %v967_v14 = vmax.f32 %v865_v10, 0.0 }
 0x14f   : > { %v709_v15 = vpop.f32.mrf.mxu0  ;;  %v869_v16 = vpop.f32.mrf.mxu1 }
 0x150   : > { %1000 = vst.msk [vmem:[%s1569_s10 + $0xb0] sm:$0xff] %vm977_vm2, %v935_v13  ;;  %1032 = vst.msk [vmem:[%s1569_s10 + $0x1b0] sm:$0xff] %vm977_vm2, %v967_v14  ;;  %v710_v17 = vadd.f32 %v1561_v20, %v709_v15  ;;  %v870_v18 = vadd.f32 %v1561_v20, %v869_v16 }
 0x151   : > { %v711_v19 = vpop.f32.mrf.mxu0  ;;  %v871_v21 = vpop.f32.mrf.mxu1 }
 0x152   : > { %v936_v22 = vmax.f32 %v710_v17, 0.0  ;;  %v968_v23 = vmax.f32 %v870_v18, 0.0 }
 0x153   : > { %v714_v24 = vpop.f32.mrf.mxu0  ;;  %v874_v25 = vpop.f32.mrf.mxu1 }
 0x154   : > { %1001 = vst.msk [vmem:[%s1569_s10 + $0xb8] sm:$0xff] %vm977_vm2, %v936_v22  ;;  %1033 = vst.msk [vmem:[%s1569_s10 + $0x1b8] sm:$0xff] %vm977_vm2, %v968_v23  ;;  %v715_v26 = vadd.f32 %v1561_v20, %v714_v24  ;;  %v875_v27 = vadd.f32 %v1561_v20, %v874_v25 }
 0x155   : > { %v716_v28 = vpop.f32.mrf.mxu0  ;;  %v876_v29 = vpop.f32.mrf.mxu1 }
 0x156   : > { %v937_v30 = vmax.f32 %v715_v26, 0.0  ;;  %v969_v31 = vmax.f32 %v875_v27, 0.0 }
 0x157   : > { %v719_v32 = vpop.f32.mrf.mxu0  ;;  %v879_v33 = vpop.f32.mrf.mxu1 }
 0x158   : > { %1002 = vst.msk [vmem:[%s1569_s10 + $0xc0] sm:$0xff] %vm977_vm2, %v937_v30  ;;  %1034 = vst.msk [vmem:[%s1569_s10 + $0x1c0] sm:$0xff] %vm977_vm2, %v969_v31  ;;  %v720_v34 = vadd.f32 %v1561_v20, %v719_v32  ;;  %v880_v35 = vadd.f32 %v1561_v20, %v879_v33 }
 0x159   : > { %v721_v36 = vpop.f32.mrf.mxu0  ;;  %v881_v37 = vpop.f32.mrf.mxu1 }
 0x15a   : > { %v938_v38 = vmax.f32 %v720_v34, 0.0  ;;  %v970_v39 = vmax.f32 %v880_v35, 0.0 }
 0x15b   : > { %v724_v40 = vpop.f32.mrf.mxu0  ;;  %v884_v41 = vpop.f32.mrf.mxu1 }
 0x15c   : > { %1003 = vst.msk [vmem:[%s1569_s10 + $0xc8] sm:$0xff] %vm977_vm2, %v938_v38  ;;  %1035 = vst.msk [vmem:[%s1569_s10 + $0x1c8] sm:$0xff] %vm977_vm2, %v970_v39  ;;  %v725_v42 = vadd.f32 %v1561_v20, %v724_v40  ;;  %v885_v43 = vadd.f32 %v1561_v20, %v884_v41 }
 0x15d   : > { %v726_v44 = vpop.f32.mrf.mxu0  ;;  %v886_v45 = vpop.f32.mrf.mxu1 }
 0x15e   : > { %v939_v46 = vmax.f32 %v725_v42, 0.0  ;;  %v971_v47 = vmax.f32 %v885_v43, 0.0 }
 0x15f   : > { %v729_v48 = vpop.f32.mrf.mxu0  ;;  %v889_v49 = vpop.f32.mrf.mxu1 }
 0x160   : > { %1004 = vst.msk [vmem:[%s1569_s10 + $0xd0] sm:$0xff] %vm977_vm2, %v939_v46  ;;  %1036 = vst.msk [vmem:[%s1569_s10 + $0x1d0] sm:$0xff] %vm977_vm2, %v971_v47  ;;  %v730_v50 = vadd.f32 %v1561_v20, %v729_v48  ;;  %v890_v51 = vadd.f32 %v1561_v20, %v889_v49 }
 0x161   : > { %v731_v52 = vpop.f32.mrf.mxu0  ;;  %v891_v53 = vpop.f32.mrf.mxu1 }
 0x162   : > { %v940_v54 = vmax.f32 %v730_v50, 0.0  ;;  %v972_v55 = vmax.f32 %v890_v51, 0.0 }
 0x163   : > { %v734_v56 = vpop.f32.mrf.mxu0  ;;  %v894_v57 = vpop.f32.mrf.mxu1 }
 0x164   : > { %1005 = vst.msk [vmem:[%s1569_s10 + $0xd8] sm:$0xff] %vm977_vm2, %v940_v54  ;;  %1037 = vst.msk [vmem:[%s1569_s10 + $0x1d8] sm:$0xff] %vm977_vm2, %v972_v55  ;;  %v735_v58 = vadd.f32 %v1561_v20, %v734_v56  ;;  %v895_v59 = vadd.f32 %v1561_v20, %v894_v57 }
 0x165   : > { %v736_v60 = vpop.f32.mrf.mxu0  ;;  %v896_v61 = vpop.f32.mrf.mxu1 }
 0x166   : > { %v941_v62 = vmax.f32 %v735_v58, 0.0  ;;  %v973_v63 = vmax.f32 %v895_v59, 0.0 }
 0x167   : > { %v739_v0 = vpop.f32.mrf.mxu0  ;;  %v899_v1 = vpop.f32.mrf.mxu1 }
 0x168   : > { %1006 = vst.msk [vmem:[%s1569_s10 + $0xe0] sm:$0xff] %vm977_vm2, %v941_v62  ;;  %1038 = vst.msk [vmem:[%s1569_s10 + $0x1e0] sm:$0xff] %vm977_vm2, %v973_v63  ;;  %v740_v2 = vadd.f32 %v1561_v20, %v739_v0  ;;  %v900_v3 = vadd.f32 %v1561_v20, %v899_v1 }
 0x169   : > { %v741_v4 = vpop.f32.mrf.mxu0  ;;  %v901_v5 = vpop.f32.mrf.mxu1 }
 0x16a   : > { %v942_v6 = vmax.f32 %v740_v2, 0.0  ;;  %v974_v7 = vmax.f32 %v900_v3, 0.0 }
 0x16b   : > { %v744_v8 = vpop.f32.mrf.mxu0  ;;  %v904_v9 = vpop.f32.mrf.mxu1 }
 0x16c   : > { %1007 = vst.msk [vmem:[%s1569_s10 + $0xe8] sm:$0xff] %vm977_vm2, %v942_v6  ;;  %1039 = vst.msk [vmem:[%s1569_s10 + $0x1e8] sm:$0xff] %vm977_vm2, %v974_v7  ;;  %v745_v10 = vadd.f32 %v1561_v20, %v744_v8  ;;  %v905_v11 = vadd.f32 %v1561_v20, %v904_v9 }
 0x16d   : > { %v746_v12 = vpop.f32.mrf.mxu0  ;;  %v906_v13 = vpop.f32.mrf.mxu1 }
 0x16e   : > { %v943_v14 = vmax.f32 %v745_v10, 0.0  ;;  %v975_v15 = vmax.f32 %v905_v11, 0.0 }
 0x16f   : > { %v749_v16 = vpop.f32.mrf.mxu0  ;;  %v909_v17 = vpop.f32.mrf.mxu1 }
 0x170   : > { %1008 = vst.msk [vmem:[%s1569_s10 + $0xf0] sm:$0xff] %vm977_vm2, %v943_v14  ;;  %1040 = vst.msk [vmem:[%s1569_s10 + $0x1f0] sm:$0xff] %vm977_vm2, %v975_v15  ;;  %v750_v18 = vadd.f32 %v1561_v20, %v749_v16  ;;  %v910_v19 = vadd.f32 %v1561_v20, %v909_v17 }
 0x171   : > { %v751_v21 = vpop.f32.mrf.mxu0  ;;  %v911_v22 = vpop.f32.mrf.mxu1 }
 0x172   : > { %v944_v23 = vmax.f32 %v750_v18, 0.0  ;;  %v976_v24 = vmax.f32 %v910_v19, 0.0 }
 0x174   : > { %1009 = vst.msk [vmem:[%s1569_s10 + $0xf8] sm:$0xff] %vm977_vm2, %v944_v23  ;;  %1041 = vst.msk [vmem:[%s1569_s10 + $0x1f8] sm:$0xff] %vm977_vm2, %v976_v24 }
 0x175 PF: > { %s13_s12 = sadd.s32 1, %s1230_s12  }
 0x176   : > { %p10_p4 = scmp.ge.s32.totalorder %s13_s12, 14  }
 0x178   :  { %12 = sbr.rel (!%p10_p4) target bundleno = 1 (0x1), region = 62 }

// kernel: japaness_discriminator_forward.6
= control target key start
LH: loop header
LB: loop body
LE: loop exit
PB: predicated region body
PF: predicated region fallthrough
CT: control target
= control target key end

     0   :  { %s1212_s12 = smov 0   ;;  %s1729_s0 = inlined_call_operand.vmem [shape: f32[5280,200], index: 0, kind: input, shape index: {}]   ;;  %s1730_s1 = inlined_call_operand.vmem [shape: f32[200,16], index: 1, kind: input, shape index: {}]   ;;  %s1731_s2 = inlined_call_operand.vmem [shape: f32[1,16], index: 2, kind: input, shape index: {}]   ;;  %s1732_s3 = inlined_call_operand.vmem [shape: f32[5280,16], index: 3, kind: output, shape index: {}]  }
   0x1 LB: > { %s1052_s13 = sadd.s32 4294967295, %s1189_s12   ;;  %p1056_p0 = scmp.ge.s32.totalorder %s1189_s12, 1  ;;  %s1189_s12 = sphi %s1212_s12, %s13_s12  }
   0x2   : > { %p139_p1 = scmp.lt.s32.totalorder %s1189_s12, 12 }
   0x4   : > { %p140_p2 = pnand %p1056_p0, %p139_p1 }
   0x5   : > { %s164_s21 = smul.u32 (!%p140_p2), 60, %s1052_s13 }
   0x6   : > { %143 = sbr.rel (%p140_p2) target bundleno = 377 (0x179), region = 32 }
   0x7   : > { %p165_p3 = scmp.lt.s32.totalorder (!%p140_p2), %s164_s21, 659 }
   0xb   : > { %v312_v0 = vld [vmem:[%s1730_s1 + $0x78] sm:$0xff]  ;;  %v1191_v1 = vmov 0.0   ;;  %v311_v2 = vld [vmem:[%s1730_s1 + $0x70] sm:$0xff]  ;;  %v310_v3 = vld [vmem:[%s1730_s1 + $0x68] sm:$0xff]  ;;  %s1734_s21 = smov (!%p165_p3, %s164_s21), 659  ;;  %vm329_vm0 = vcmask 588800  }
   0xc   : > { %510 = vmatprep.subr.mxu0 %v1191_v1  ;;  %1124 = vmatprep.subr.mxu1 %v1191_v1  ;;  %v309_v4 = vld [vmem:[%s1730_s1 + $0x60] sm:$0xff]  ;;  %v308_v5 = vld [vmem:[%s1730_s1 + $0x58] sm:$0xff]  ;;  %v307_v6 = vld [vmem:[%s1730_s1 + $0x50] sm:$0xff]  ;;  %s1123_s6 = sshll.u32 %s1734_s21, 4  ;;  %s1059_s20 = sshll.u32 %s1734_s21, 3  ;;  %vm935_vm1 = vcmask 130048  }
   0xd   : > { %511 = vmatpush1.msra.mxu0 %v312_v0  ;;  %1149 = vmatpush1.msra.mxu1 %v312_v0  ;;  %v306_v7 = vld [vmem:[%s1730_s1 + $0x48] sm:$0xff]  ;;  %v305_v8 = vld [vmem:[%s1730_s1 + $0x40] sm:$0xff]  ;;  %v304_v9 = vld [vmem:[%s1730_s1 + $0x38] sm:$0xff]  ;;  %s1346_s15 = scalar_lea.vmem %s1729_s0, %s1123_s6  ;;  %s1546_s24 = scalar_lea.vmem %s1732_s3, %s1059_s20 }
   0xe   : > { %512 = vmatprep.subr.mxu0 %v1191_v1  ;;  %1125 = vmatprep.subr.mxu1 %v1191_v1  ;;  %v303_v10 = vld [vmem:[%s1730_s1 + $0x30] sm:$0xff]  ;;  %v302_v11 = vld [vmem:[%s1730_s1 + $0x28] sm:$0xff]  ;;  %v301_v12 = vld [vmem:[%s1730_s1 + $0x20] sm:$0xff] }
   0xf   : > { %513 = vmatpush1.msra.mxu0 %v311_v2  ;;  %1150 = vmatpush1.msra.mxu1 %v311_v2  ;;  %v300_v13 = vld [vmem:[%s1730_s1 + $0x18] sm:$0xff]  ;;  %v299_v14 = vld [vmem:[%s1730_s1 + $0x10] sm:$0xff]  ;;  %v298_v15 = vld [vmem:[%s1730_s1 + $0x8] sm:$0xff] }
  0x10   : > { %514 = vmatprep.subr.mxu0 %v1191_v1  ;;  %1126 = vmatprep.subr.mxu1 %v1191_v1  ;;  %v297_v16 = vld [vmem:[%s1730_s1] sm:$0xff]  ;;  %v320_v18 = vld [vmem:[%s1730_s1 + $0xb8] sm:$0xff]  ;;  %v319_v19 = vld [vmem:[%s1730_s1 + $0xb0] sm:$0xff] }
  0x11   : > { %515 = vmatpush1.msra.mxu0 %v310_v3  ;;  %1151 = vmatpush1.msra.mxu1 %v310_v3  ;;  %v321_v17 = vld [vmem:[%s1730_s1 + $0xc0] sm:$0xff]  ;;  %v318_v20 = vld [vmem:[%s1730_s1 + $0xa8] sm:$0xff]  ;;  %v316_v22 = vld [vmem:[%s1730_s1 + $0x98] sm:$0xff] }
  0x12   : > { %516 = vmatprep.subr.mxu0 %v1191_v1  ;;  %1127 = vmatprep.subr.mxu1 %v1191_v1  ;;  %v317_v21 = vld [vmem:[%s1730_s1 + $0xa0] sm:$0xff]  ;;  %v315_v23 = vld [vmem:[%s1730_s1 + $0x90] sm:$0xff]  ;;  %v314_v24 = vld [vmem:[%s1730_s1 + $0x88] sm:$0xff] }
  0x13   : > { %517 = vmatpush1.msra.mxu0 %v309_v4  ;;  %1152 = vmatpush1.msra.mxu1 %v309_v4  ;;  %v313_v25 = vld [vmem:[%s1730_s1 + $0x80] sm:$0xff]  ;;  %v178_v26 = vld [vmem:[%s1346_s15 + $0x8] sm:$0xff]  ;;  %v180_v30 = vld [vmem:[%s1346_s15 + $0x18] sm:$0xff] }
  0x14   : > { %518 = vmatprep.subr.mxu0 %v1191_v1  ;;  %1128 = vmatprep.subr.mxu1 %v1191_v1  ;;  %v238_v27 = vld [vmem:[%s1346_s15 + $0x1e8] sm:$0xff]  ;;  %v177_v28 = vld [vmem:[%s1346_s15] sm:$0xff]  ;;  %v240_v31 = vld [vmem:[%s1346_s15 + $0x1f8] sm:$0xff] }
  0x15   : > { %519 = vmatpush1.msra.mxu0 %v308_v5  ;;  %1153 = vmatpush1.msra.mxu1 %v308_v5  ;;  %v237_v29 = vld [vmem:[%s1346_s15 + $0x1e0] sm:$0xff]  ;;  %v179_v32 = vld [vmem:[%s1346_s15 + $0x10] sm:$0xff]  ;;  %v182_v34 = vld [vmem:[%s1346_s15 + $0x28] sm:$0xff] }
  0x16   : > { %520 = vmatprep.subr.mxu0 %v1191_v1  ;;  %1129 = vmatprep.subr.mxu1 %v1191_v1  ;;  %v239_v33 = vld [vmem:[%s1346_s15 + $0x1f0] sm:$0xff]  ;;  %v242_v35 = vld [vmem:[%s1346_s15 + $0x208] sm:$0xff]  ;;  %v181_v36 = vld [vmem:[%s1346_s15 + $0x20] sm:$0xff] }
  0x17   : > { %521 = vmatpush1.msra.mxu0 %v307_v6  ;;  %1154 = vmatpush1.msra.mxu1 %v307_v6  ;;  %v241_v37 = vld [vmem:[%s1346_s15 + $0x200] sm:$0xff]  ;;  %v184_v38 = vld [vmem:[%s1346_s15 + $0x38] sm:$0xff]  ;;  %v183_v40 = vld [vmem:[%s1346_s15 + $0x30] sm:$0xff] }
  0x18   : > { %522 = vmatprep.subr.mxu0 %v1191_v1  ;;  %1130 = vmatprep.subr.mxu1 %v1191_v1  ;;  %v244_v39 = vld [vmem:[%s1346_s15 + $0x218] sm:$0xff]  ;;  %v243_v41 = vld [vmem:[%s1346_s15 + $0x210] sm:$0xff]  ;;  %v186_v42 = vld [vmem:[%s1346_s15 + $0x48] sm:$0xff] }
  0x19   : > { %523 = vmatpush1.msra.mxu0 %v306_v7  ;;  %1155 = vmatpush1.msra.mxu1 %v306_v7  ;;  %v246_v43 = vld [vmem:[%s1346_s15 + $0x228] sm:$0xff]  ;;  %v185_v44 = vld [vmem:[%s1346_s15 + $0x40] sm:$0xff]  ;;  %v188_v46 = vld [vmem:[%s1346_s15 + $0x58] sm:$0xff] }
  0x1a   : > { %524 = vmatprep.subr.mxu0 %v1191_v1  ;;  %1131 = vmatprep.subr.mxu1 %v1191_v1  ;;  %v245_v45 = vld [vmem:[%s1346_s15 + $0x220] sm:$0xff]  ;;  %v248_v47 = vld [vmem:[%s1346_s15 + $0x238] sm:$0xff]  ;;  %v187_v48 = vld [vmem:[%s1346_s15 + $0x50] sm:$0xff] }
  0x1b   : > { %525 = vmatpush1.msra.mxu0 %v305_v8  ;;  %1156 = vmatpush1.msra.mxu1 %v305_v8  ;;  %v247_v49 = vld [vmem:[%s1346_s15 + $0x230] sm:$0xff]  ;;  %v190_v50 = vld [vmem:[%s1346_s15 + $0x68] sm:$0xff]  ;;  %v189_v52 = vld [vmem:[%s1346_s15 + $0x60] sm:$0xff] }
  0x1c   : > { %526 = vmatprep.subr.mxu0 %v1191_v1  ;;  %1132 = vmatprep.subr.mxu1 %v1191_v1  ;;  %v250_v51 = vld [vmem:[%s1346_s15 + $0x248] sm:$0xff]  ;;  %v249_v53 = vld [vmem:[%s1346_s15 + $0x240] sm:$0xff]  ;;  %v192_v54 = vld [vmem:[%s1346_s15 + $0x78] sm:$0xff] }
  0x1d   : > { %527 = vmatpush1.msra.mxu0 %v304_v9  ;;  %1157 = vmatpush1.msra.mxu1 %v304_v9  ;;  %v252_v55 = vld [vmem:[%s1346_s15 + $0x258] sm:$0xff]  ;;  %v191_v56 = vld [vmem:[%s1346_s15 + $0x70] sm:$0xff]  ;;  %v194_v58 = vld [vmem:[%s1346_s15 + $0x88] sm:$0xff] }
  0x1e   : > { %528 = vmatprep.subr.mxu0 %v1191_v1  ;;  %1133 = vmatprep.subr.mxu1 %v1191_v1  ;;  %v251_v57 = vld [vmem:[%s1346_s15 + $0x250] sm:$0xff]  ;;  %v254_v59 = vld [vmem:[%s1346_s15 + $0x268] sm:$0xff]  ;;  %v193_v60 = vld [vmem:[%s1346_s15 + $0x80] sm:$0xff] }
  0x1f   : > { %529 = vmatpush1.msra.mxu0 %v303_v10  ;;  %1158 = vmatpush1.msra.mxu1 %v303_v10  ;;  %v253_v61 = vld [vmem:[%s1346_s15 + $0x260] sm:$0xff]  ;;  %v196_v62 = vld [vmem:[%s1346_s15 + $0x98] sm:$0xff]  ;;  %v195_v0 = vld [vmem:[%s1346_s15 + $0x90] sm:$0xff] }
  0x20   : > { %530 = vmatprep.subr.mxu0 %v1191_v1  ;;  %1134 = vmatprep.subr.mxu1 %v1191_v1  ;;  %v256_v63 = vld [vmem:[%s1346_s15 + $0x278] sm:$0xff]  ;;  %v198_v2 = vld [vmem:[%s1346_s15 + $0xa8] sm:$0xff]  ;;  %v197_v4 = vld [vmem:[%s1346_s15 + $0xa0] sm:$0xff] }
  0x21   : > { %531 = vmatpush1.msra.mxu0 %v302_v11  ;;  %1159 = vmatpush1.msra.mxu1 %v302_v11  ;;  %v258_v3 = vld [vmem:[%s1346_s15 + $0x288] sm:$0xff]  ;;  %v257_v5 = vld [vmem:[%s1346_s15 + $0x280] sm:$0xff]  ;;  %v200_v6 = vld [vmem:[%s1346_s15 + $0xb8] sm:$0xff] }
  0x22   : > { %532 = vmatprep.subr.mxu0 %v1191_v1  ;;  %1135 = vmatprep.subr.mxu1 %v1191_v1  ;;  %v260_v7 = vld [vmem:[%s1346_s15 + $0x298] sm:$0xff]  ;;  %v199_v8 = vld [vmem:[%s1346_s15 + $0xb0] sm:$0xff]  ;;  %v202_v10 = vld [vmem:[%s1346_s15 + $0xc8] sm:$0xff] }
  0x23   : > { %533 = vmatpush1.msra.mxu0 %v301_v12  ;;  %1160 = vmatpush1.msra.mxu1 %v301_v12  ;;  %v259_v9 = vld [vmem:[%s1346_s15 + $0x290] sm:$0xff]  ;;  %v262_v11 = vld [vmem:[%s1346_s15 + $0x2a8] sm:$0xff]  ;;  %v201_v12 = vld [vmem:[%s1346_s15 + $0xc0] sm:$0xff] }
  0x24   : > { %534 = vmatprep.subr.mxu0 %v1191_v1  ;;  %1136 = vmatprep.subr.mxu1 %v1191_v1 }
  0x25   : > { %535 = vmatpush1.msra.mxu0 %v300_v13  ;;  %1161 = vmatpush1.msra.mxu1 %v300_v13  ;;  %v261_v13 = vld [vmem:[%s1346_s15 + $0x2a0] sm:$0xff] }
  0x26   : > { %536 = vmatprep.subr.mxu0 %v1191_v1  ;;  %1137 = vmatprep.subr.mxu1 %v1191_v1 }
  0x27   : > { %537 = vmatpush1.msra.mxu0 %v299_v14  ;;  %1162 = vmatpush1.msra.mxu1 %v299_v14  ;;  %v204_v14 = vld [vmem:[%s1346_s15 + $0xd8] sm:$0xff] }
  0x28   : > { %538 = vmatprep.subr.mxu0 %v1191_v1  ;;  %1138 = vmatprep.subr.mxu1 %v1191_v1 }
  0x29   : > { %539 = vmatpush1.msra.mxu0 %v298_v15  ;;  %1163 = vmatpush1.msra.mxu1 %v298_v15  ;;  %v264_v15 = vld [vmem:[%s1346_s15 + $0x2b8] sm:$0xff] }
  0x2a   : > { %540 = vmatprep.subr.mxu0 %v1191_v1  ;;  %1139 = vmatprep.subr.mxu1 %v1191_v1 }
  0x2b   : > { %541 = vmatpush1.msra.mxu0 %v297_v16  ;;  %1164 = vmatpush1.msra.mxu1 %v297_v16  ;;  %v203_v16 = vld [vmem:[%s1346_s15 + $0xd0] sm:$0xff] }
  0x2c   : > { %556 = vmatprep.subr.mxu0 %v1191_v1  ;;  %1140 = vmatprep.subr.mxu1 %v1191_v1 }
  0x2d   : > { %557 = vmatpush2.msra.mxu0 %v321_v17  ;;  %1165 = vmatpush2.msra.mxu1 %v321_v17  ;;  %v263_v17 = vld [vmem:[%s1346_s15 + $0x2b0] sm:$0xff] }
  0x2e   : > { %558 = vmatprep.subr.mxu0 %v1191_v1  ;;  %1141 = vmatprep.subr.mxu1 %v1191_v1 }
  0x2f   : > { %559 = vmatpush2.msra.mxu0 %v320_v18  ;;  %1166 = vmatpush2.msra.mxu1 %v320_v18  ;;  %v206_v18 = vld [vmem:[%s1346_s15 + $0xe8] sm:$0xff] }
  0x30   : > { %560 = vmatprep.subr.mxu0 %v1191_v1  ;;  %1142 = vmatprep.subr.mxu1 %v1191_v1 }
  0x31   : > { %561 = vmatpush2.msra.mxu0 %v319_v19  ;;  %1167 = vmatpush2.msra.mxu1 %v319_v19  ;;  %v266_v19 = vld [vmem:[%s1346_s15 + $0x2c8] sm:$0xff] }
  0x32   : > { %562 = vmatprep.subr.mxu0 %v1191_v1  ;;  %1143 = vmatprep.subr.mxu1 %v1191_v1 }
  0x33   : > { %563 = vmatpush2.msra.mxu0 %v318_v20  ;;  %1168 = vmatpush2.msra.mxu1 %v318_v20  ;;  %v205_v20 = vld [vmem:[%s1346_s15 + $0xe0] sm:$0xff] }
  0x34   : > { %564 = vmatprep.subr.mxu0 %v1191_v1  ;;  %1144 = vmatprep.subr.mxu1 %v1191_v1 }
  0x35   : > { %565 = vmatpush2.msra.mxu0 %v317_v21  ;;  %1169 = vmatpush2.msra.mxu1 %v317_v21  ;;  %v265_v21 = vld [vmem:[%s1346_s15 + $0x2c0] sm:$0xff] }
  0x36   : > { %566 = vmatprep.subr.mxu0 %v1191_v1  ;;  %1145 = vmatprep.subr.mxu1 %v1191_v1 }
  0x37   : > { %567 = vmatpush2.msra.mxu0 %v316_v22  ;;  %1170 = vmatpush2.msra.mxu1 %v316_v22  ;;  %v208_v22 = vld [vmem:[%s1346_s15 + $0xf8] sm:$0xff] }
  0x38   : > { %568 = vmatprep.subr.mxu0 %v1191_v1  ;;  %1146 = vmatprep.subr.mxu1 %v1191_v1 }
  0x39   : > { %569 = vmatpush2.msra.mxu0 %v315_v23  ;;  %1171 = vmatpush2.msra.mxu1 %v315_v23  ;;  %v268_v23 = vld [vmem:[%s1346_s15 + $0x2d8] sm:$0xff] }
  0x3a   : > { %570 = vmatprep.subr.mxu0 %v1191_v1  ;;  %1147 = vmatprep.subr.mxu1 %v1191_v1 }
  0x3b   : > { %571 = vmatpush2.msra.mxu0 %v314_v24  ;;  %1172 = vmatpush2.msra.mxu1 %v314_v24  ;;  %v207_v24 = vld [vmem:[%s1346_s15 + $0xf0] sm:$0xff] }
  0x3c   : > { %572 = vmatprep.subr.mxu0 %v1191_v1  ;;  %1148 = vmatprep.subr.mxu1 %v1191_v1  ;;  %v255_v1 = vld [vmem:[%s1346_s15 + $0x270] sm:$0xff] }
  0x3d   : > { %573 = vmatpush2.msra.mxu0 %v313_v25  ;;  %1173 = vmatpush2.msra.mxu1 %v313_v25  ;;  %v267_v25 = vld [vmem:[%s1346_s15 + $0x2d0] sm:$0xff] }
  0x3e   : > { %1061 = vmatprep.mubr.msk.f32.mxu0 %vm329_vm0, %v178_v26  ;;  %1091 = vmatprep.mubr.msk.f32.mxu1 %vm329_vm0, %v238_v27  ;;  %v210_v26 = vld [vmem:[%s1346_s15 + $0x108] sm:$0xff] }
  0x3f   : > { %575 = vmatmul.mubr.f32.vlgmr.msra.gmra.mxu0 %v177_v28  ;;  %725 = vmatmul.mubr.f32.vlgmr.msra.gmra.mxu1 %v237_v29  ;;  %v270_v27 = vld [vmem:[%s1346_s15 + $0x2e8] sm:$0xff]  ;;  %v209_v28 = vld [vmem:[%s1346_s15 + $0x100] sm:$0xff] }
  0x40   : > { %1062 = vmatprep.mubr.msk.f32.mxu0 %vm329_vm0, %v180_v30  ;;  %1092 = vmatprep.mubr.msk.f32.mxu1 %vm329_vm0, %v240_v31  ;;  %v269_v29 = vld [vmem:[%s1346_s15 + $0x2e0] sm:$0xff]  ;;  %v212_v30 = vld [vmem:[%s1346_s15 + $0x118] sm:$0xff] }
  0x41   : > { %v272_v31 = vld [vmem:[%s1346_s15 + $0x2f8] sm:$0xff] }
  0x43   : > { %580 = vmatmul.mubr.f32.gmra.mxu0 %v179_v32  ;;  %730 = vmatmul.mubr.f32.gmra.mxu1 %v239_v33  ;;  %v211_v32 = vld [vmem:[%s1346_s15 + $0x110] sm:$0xff] }
  0x44   : > { %1063 = vmatprep.mubr.msk.f32.mxu0 %vm329_vm0, %v182_v34  ;;  %1093 = vmatprep.mubr.msk.f32.mxu1 %vm329_vm0, %v242_v35  ;;  %v271_v33 = vld [vmem:[%s1346_s15 + $0x2f0] sm:$0xff]  ;;  %v214_v34 = vld [vmem:[%s1346_s15 + $0x128] sm:$0xff] }
  0x45   : > { %v274_v35 = vld [vmem:[%s1346_s15 + $0x308] sm:$0xff] }
  0x47   : > { %585 = vmatmul.mubr.f32.gmra.mxu0 %v181_v36  ;;  %735 = vmatmul.mubr.f32.gmra.mxu1 %v241_v37  ;;  %v213_v36 = vld [vmem:[%s1346_s15 + $0x120] sm:$0xff] }
  0x48   : > { %1064 = vmatprep.mubr.msk.f32.mxu0 %vm329_vm0, %v184_v38  ;;  %1094 = vmatprep.mubr.msk.f32.mxu1 %vm329_vm0, %v244_v39  ;;  %v273_v37 = vld [vmem:[%s1346_s15 + $0x300] sm:$0xff]  ;;  %v216_v38 = vld [vmem:[%s1346_s15 + $0x138] sm:$0xff] }
  0x49   : > { %v276_v39 = vld [vmem:[%s1346_s15 + $0x318] sm:$0xff] }
  0x4b   : > { %590 = vmatmul.mubr.f32.gmra.mxu0 %v183_v40  ;;  %740 = vmatmul.mubr.f32.gmra.mxu1 %v243_v41  ;;  %v215_v40 = vld [vmem:[%s1346_s15 + $0x130] sm:$0xff] }
  0x4c   : > { %1065 = vmatprep.mubr.msk.f32.mxu0 %vm329_vm0, %v186_v42  ;;  %1095 = vmatprep.mubr.msk.f32.mxu1 %vm329_vm0, %v246_v43  ;;  %v275_v41 = vld [vmem:[%s1346_s15 + $0x310] sm:$0xff]  ;;  %v218_v42 = vld [vmem:[%s1346_s15 + $0x148] sm:$0xff] }
  0x4d   : > { %v278_v43 = vld [vmem:[%s1346_s15 + $0x328] sm:$0xff] }
  0x4f   : > { %595 = vmatmul.mubr.f32.gmra.mxu0 %v185_v44  ;;  %745 = vmatmul.mubr.f32.gmra.mxu1 %v245_v45  ;;  %v217_v44 = vld [vmem:[%s1346_s15 + $0x140] sm:$0xff] }
  0x50   : > { %1066 = vmatprep.mubr.msk.f32.mxu0 %vm329_vm0, %v188_v46  ;;  %1096 = vmatprep.mubr.msk.f32.mxu1 %vm329_vm0, %v248_v47  ;;  %v277_v45 = vld [vmem:[%s1346_s15 + $0x320] sm:$0xff]  ;;  %v220_v46 = vld [vmem:[%s1346_s15 + $0x158] sm:$0xff] }
  0x51   : > { %v280_v47 = vld [vmem:[%s1346_s15 + $0x338] sm:$0xff] }
  0x53   : > { %600 = vmatmul.mubr.f32.gmra.mxu0 %v187_v48  ;;  %750 = vmatmul.mubr.f32.gmra.mxu1 %v247_v49  ;;  %v219_v48 = vld [vmem:[%s1346_s15 + $0x150] sm:$0xff] }
  0x54   : > { %1067 = vmatprep.mubr.msk.f32.mxu0 %vm329_vm0, %v190_v50  ;;  %1097 = vmatprep.mubr.msk.f32.mxu1 %vm329_vm0, %v250_v51  ;;  %v279_v49 = vld [vmem:[%s1346_s15 + $0x330] sm:$0xff]  ;;  %v222_v50 = vld [vmem:[%s1346_s15 + $0x168] sm:$0xff] }
  0x55   : > { %v282_v51 = vld [vmem:[%s1346_s15 + $0x348] sm:$0xff] }
  0x57   : > { %605 = vmatmul.mubr.f32.gmra.mxu0 %v189_v52  ;;  %755 = vmatmul.mubr.f32.gmra.mxu1 %v249_v53  ;;  %v221_v52 = vld [vmem:[%s1346_s15 + $0x160] sm:$0xff] }
  0x58   : > { %1068 = vmatprep.mubr.msk.f32.mxu0 %vm329_vm0, %v192_v54  ;;  %1098 = vmatprep.mubr.msk.f32.mxu1 %vm329_vm0, %v252_v55  ;;  %v281_v53 = vld [vmem:[%s1346_s15 + $0x340] sm:$0xff]  ;;  %v224_v54 = vld [vmem:[%s1346_s15 + $0x178] sm:$0xff] }
  0x59   : > { %v284_v55 = vld [vmem:[%s1346_s15 + $0x358] sm:$0xff] }
  0x5b   : > { %610 = vmatmul.mubr.f32.gmra.mxu0 %v191_v56  ;;  %760 = vmatmul.mubr.f32.gmra.mxu1 %v251_v57  ;;  %v223_v56 = vld [vmem:[%s1346_s15 + $0x170] sm:$0xff] }
  0x5c   : > { %1069 = vmatprep.mubr.msk.f32.mxu0 %vm329_vm0, %v194_v58  ;;  %1099 = vmatprep.mubr.msk.f32.mxu1 %vm329_vm0, %v254_v59  ;;  %v283_v57 = vld [vmem:[%s1346_s15 + $0x350] sm:$0xff]  ;;  %v226_v58 = vld [vmem:[%s1346_s15 + $0x188] sm:$0xff] }
  0x5d   : > { %v286_v59 = vld [vmem:[%s1346_s15 + $0x368] sm:$0xff] }
  0x5f   : > { %615 = vmatmul.mubr.f32.gmra.mxu0 %v193_v60  ;;  %765 = vmatmul.mubr.f32.gmra.mxu1 %v253_v61  ;;  %v225_v60 = vld [vmem:[%s1346_s15 + $0x180] sm:$0xff] }
  0x60   : > { %1070 = vmatprep.mubr.msk.f32.mxu0 %vm329_vm0, %v196_v62  ;;  %1100 = vmatprep.mubr.msk.f32.mxu1 %vm329_vm0, %v256_v63  ;;  %v285_v61 = vld [vmem:[%s1346_s15 + $0x360] sm:$0xff]  ;;  %v228_v62 = vld [vmem:[%s1346_s15 + $0x198] sm:$0xff] }
  0x61   : > { %v288_v63 = vld [vmem:[%s1346_s15 + $0x378] sm:$0xff] }
  0x63   : > { %620 = vmatmul.mubr.f32.gmra.mxu0 %v195_v0  ;;  %770 = vmatmul.mubr.f32.gmra.mxu1 %v255_v1  ;;  %v227_v0 = vld [vmem:[%s1346_s15 + $0x190] sm:$0xff] }
  0x64   : > { %1071 = vmatprep.mubr.msk.f32.mxu0 %vm329_vm0, %v198_v2  ;;  %1101 = vmatprep.mubr.msk.f32.mxu1 %vm329_vm0, %v258_v3  ;;  %v287_v1 = vld [vmem:[%s1346_s15 + $0x370] sm:$0xff]  ;;  %v230_v2 = vld [vmem:[%s1346_s15 + $0x1a8] sm:$0xff] }
  0x65   : > { %v290_v3 = vld [vmem:[%s1346_s15 + $0x388] sm:$0xff] }
  0x67   : > { %625 = vmatmul.mubr.f32.gmra.mxu0 %v197_v4  ;;  %775 = vmatmul.mubr.f32.gmra.mxu1 %v257_v5  ;;  %v229_v4 = vld [vmem:[%s1346_s15 + $0x1a0] sm:$0xff] }
  0x68   : > { %1072 = vmatprep.mubr.msk.f32.mxu0 %vm329_vm0, %v200_v6  ;;  %1102 = vmatprep.mubr.msk.f32.mxu1 %vm329_vm0, %v260_v7  ;;  %v289_v5 = vld [vmem:[%s1346_s15 + $0x380] sm:$0xff]  ;;  %v232_v6 = vld [vmem:[%s1346_s15 + $0x1b8] sm:$0xff] }
  0x69   : > { %v292_v7 = vld [vmem:[%s1346_s15 + $0x398] sm:$0xff] }
  0x6b   : > { %630 = vmatmul.mubr.f32.gmra.mxu0 %v199_v8  ;;  %780 = vmatmul.mubr.f32.gmra.mxu1 %v259_v9  ;;  %v231_v8 = vld [vmem:[%s1346_s15 + $0x1b0] sm:$0xff] }
  0x6c   : > { %1073 = vmatprep.mubr.msk.f32.mxu0 %vm329_vm0, %v202_v10  ;;  %1103 = vmatprep.mubr.msk.f32.mxu1 %vm329_vm0, %v262_v11  ;;  %v291_v9 = vld [vmem:[%s1346_s15 + $0x390] sm:$0xff]  ;;  %v234_v10 = vld [vmem:[%s1346_s15 + $0x1c8] sm:$0xff] }
  0x6d   : > { %v294_v11 = vld [vmem:[%s1346_s15 + $0x3a8] sm:$0xff] }
  0x6f   : > { %635 = vmatmul.mubr.f32.gmra.mxu0 %v201_v12  ;;  %785 = vmatmul.mubr.f32.gmra.mxu1 %v261_v13  ;;  %v233_v12 = vld [vmem:[%s1346_s15 + $0x1c0] sm:$0xff] }
  0x70   : > { %1074 = vmatprep.mubr.msk.f32.mxu0 %vm329_vm0, %v204_v14  ;;  %1104 = vmatprep.mubr.msk.f32.mxu1 %vm329_vm0, %v264_v15  ;;  %v293_v13 = vld [vmem:[%s1346_s15 + $0x3a0] sm:$0xff]  ;;  %v236_v14 = vld [vmem:[%s1346_s15 + $0x1d8] sm:$0xff] }
  0x71   : > { %v296_v15 = vld [vmem:[%s1346_s15 + $0x3b8] sm:$0xff] }
  0x73   : > { %640 = vmatmul.mubr.f32.gmra.mxu0 %v203_v16  ;;  %790 = vmatmul.mubr.f32.gmra.mxu1 %v263_v17  ;;  %v235_v16 = vld [vmem:[%s1346_s15 + $0x1d0] sm:$0xff] }
  0x74   : > { %1075 = vmatprep.mubr.msk.f32.mxu0 %vm329_vm0, %v206_v18  ;;  %1105 = vmatprep.mubr.msk.f32.mxu1 %vm329_vm0, %v266_v19  ;;  %v295_v17 = vld [vmem:[%s1346_s15 + $0x3b0] sm:$0xff]  ;;  %v1538_v18 = vld [vmem:[%s1731_s2] ss:$0 sm:$0xff] }
  0x77   : > { %645 = vmatmul.mubr.f32.gmra.mxu0 %v205_v20  ;;  %795 = vmatmul.mubr.f32.gmra.mxu1 %v265_v21 }
  0x78   : > { %1076 = vmatprep.mubr.msk.f32.mxu0 %vm329_vm0, %v208_v22  ;;  %1106 = vmatprep.mubr.msk.f32.mxu1 %vm329_vm0, %v268_v23 }
  0x7b   : > { %650 = vmatmul.mubr.f32.gmra.mxu0 %v207_v24  ;;  %800 = vmatmul.mubr.f32.gmra.mxu1 %v267_v25 }
  0x7c   : > { %1077 = vmatprep.mubr.msk.f32.mxu0 %vm329_vm0, %v210_v26  ;;  %1107 = vmatprep.mubr.msk.f32.mxu1 %vm329_vm0, %v270_v27 }
  0x7f   : > { %655 = vmatmul.mubr.f32.gmra.mxu0 %v209_v28  ;;  %805 = vmatmul.mubr.f32.gmra.mxu1 %v269_v29 }
  0x80   : > { %1078 = vmatprep.mubr.msk.f32.mxu0 %vm329_vm0, %v212_v30  ;;  %1108 = vmatprep.mubr.msk.f32.mxu1 %vm329_vm0, %v272_v31 }
  0x83   : > { %660 = vmatmul.mubr.f32.gmra.mxu0 %v211_v32  ;;  %810 = vmatmul.mubr.f32.gmra.mxu1 %v271_v33 }
  0x84   : > { %1079 = vmatprep.mubr.msk.f32.mxu0 %vm329_vm0, %v214_v34  ;;  %1109 = vmatprep.mubr.msk.f32.mxu1 %vm329_vm0, %v274_v35 }
  0x87   : > { %665 = vmatmul.mubr.f32.gmra.mxu0 %v213_v36  ;;  %815 = vmatmul.mubr.f32.gmra.mxu1 %v273_v37 }
  0x88   : > { %1080 = vmatprep.mubr.msk.f32.mxu0 %vm329_vm0, %v216_v38  ;;  %1110 = vmatprep.mubr.msk.f32.mxu1 %vm329_vm0, %v276_v39 }
  0x8b   : > { %670 = vmatmul.mubr.f32.gmra.mxu0 %v215_v40  ;;  %820 = vmatmul.mubr.f32.gmra.mxu1 %v275_v41 }
  0x8c   : > { %1081 = vmatprep.mubr.msk.f32.mxu0 %vm329_vm0, %v218_v42  ;;  %1111 = vmatprep.mubr.msk.f32.mxu1 %vm329_vm0, %v278_v43 }
  0x8f   : > { %675 = vmatmul.mubr.f32.gmra.mxu0 %v217_v44  ;;  %825 = vmatmul.mubr.f32.gmra.mxu1 %v277_v45 }
  0x90   : > { %1082 = vmatprep.mubr.msk.f32.mxu0 %vm329_vm0, %v220_v46  ;;  %1112 = vmatprep.mubr.msk.f32.mxu1 %vm329_vm0, %v280_v47 }
  0x93   : > { %680 = vmatmul.mubr.f32.gmra.mxu0 %v219_v48  ;;  %830 = vmatmul.mubr.f32.gmra.mxu1 %v279_v49 }
  0x94   : > { %1083 = vmatprep.mubr.msk.f32.mxu0 %vm329_vm0, %v222_v50  ;;  %1113 = vmatprep.mubr.msk.f32.mxu1 %vm329_vm0, %v282_v51 }
  0x97   : > { %685 = vmatmul.mubr.f32.gmra.mxu0 %v221_v52  ;;  %835 = vmatmul.mubr.f32.gmra.mxu1 %v281_v53 }
  0x98   : > { %1084 = vmatprep.mubr.msk.f32.mxu0 %vm329_vm0, %v224_v54  ;;  %1114 = vmatprep.mubr.msk.f32.mxu1 %vm329_vm0, %v284_v55 }
  0x9b   : > { %690 = vmatmul.mubr.f32.gmra.mxu0 %v223_v56  ;;  %840 = vmatmul.mubr.f32.gmra.mxu1 %v283_v57 }
  0x9c   : > { %1085 = vmatprep.mubr.msk.f32.mxu0 %vm329_vm0, %v226_v58  ;;  %1115 = vmatprep.mubr.msk.f32.mxu1 %vm329_vm0, %v286_v59 }
  0x9f   : > { %695 = vmatmul.mubr.f32.gmra.mxu0 %v225_v60  ;;  %845 = vmatmul.mubr.f32.gmra.mxu1 %v285_v61 }
  0xa0   : > { %1086 = vmatprep.mubr.msk.f32.mxu0 %vm329_vm0, %v228_v62  ;;  %1116 = vmatprep.mubr.msk.f32.mxu1 %vm329_vm0, %v288_v63 }
  0xa3   : > { %700 = vmatmul.mubr.f32.gmra.mxu0 %v227_v0  ;;  %850 = vmatmul.mubr.f32.gmra.mxu1 %v287_v1 }
  0xa4   : > { %1087 = vmatprep.mubr.msk.f32.mxu0 %vm329_vm0, %v230_v2  ;;  %1117 = vmatprep.mubr.msk.f32.mxu1 %vm329_vm0, %v290_v3 }
  0xa7   : > { %705 = vmatmul.mubr.f32.gmra.mxu0 %v229_v4  ;;  %855 = vmatmul.mubr.f32.gmra.mxu1 %v289_v5 }
  0xa8   : > { %1088 = vmatprep.mubr.msk.f32.mxu0 %vm329_vm0, %v232_v6  ;;  %1118 = vmatprep.mubr.msk.f32.mxu1 %vm329_vm0, %v292_v7 }
  0xab   : > { %710 = vmatmul.mubr.f32.gmra.mxu0 %v231_v8  ;;  %860 = vmatmul.mubr.f32.gmra.mxu1 %v291_v9 }
  0xac   : > { %1089 = vmatprep.mubr.msk.f32.mxu0 %vm329_vm0, %v234_v10  ;;  %1119 = vmatprep.mubr.msk.f32.mxu1 %vm329_vm0, %v294_v11 }
  0xaf   : > { %715 = vmatmul.mubr.f32.gmra.mxu0 %v233_v12  ;;  %865 = vmatmul.mubr.f32.gmra.mxu1 %v293_v13 }
  0xb0   : > { %1090 = vmatprep.mubr.msk.f32.mxu0 %vm329_vm0, %v236_v14  ;;  %1120 = vmatprep.mubr.msk.f32.mxu1 %vm329_vm0, %v296_v15 }
  0xb3   : > { %720 = vmatmul.mubr.f32.gmra.mxu0 %v235_v16  ;;  %870 = vmatmul.mubr.f32.gmra.mxu1 %v295_v17 }
  0xff   : > { %v576_v19 = vpop.f32.mrf.mxu0  ;;  %v726_v20 = vpop.f32.mrf.mxu1 }
 0x100   : > { %v577_v21 = vadd.f32 %v1538_v18, %v576_v19  ;;  %v727_v22 = vadd.f32 %v1538_v18, %v726_v20 }
 0x101   : > { %v578_v23 = vpop.f32.mrf.mxu0  ;;  %v728_v24 = vpop.f32.mrf.mxu1 }
 0x102   : > { %v875_v25 = vmax.f32 %v577_v21, 0.0  ;;  %v905_v26 = vmax.f32 %v727_v22, 0.0 }
 0x103   : > { %v581_v27 = vpop.f32.mrf.mxu0  ;;  %v731_v28 = vpop.f32.mrf.mxu1 }
 0x104   : > { %936 = vst.msk [vmem:[%s1546_s24] sm:$0xff] %vm935_vm1, %v875_v25  ;;  %966 = vst.msk [vmem:[%s1546_s24 + $0xf0] sm:$0xff] %vm935_vm1, %v905_v26  ;;  %v582_v29 = vadd.f32 %v1538_v18, %v581_v27  ;;  %v732_v30 = vadd.f32 %v1538_v18, %v731_v28 }
 0x105   : > { %v583_v31 = vpop.f32.mrf.mxu0  ;;  %v733_v32 = vpop.f32.mrf.mxu1 }
 0x106   : > { %v876_v33 = vmax.f32 %v582_v29, 0.0  ;;  %v906_v34 = vmax.f32 %v732_v30, 0.0 }
 0x107   : > { %v586_v35 = vpop.f32.mrf.mxu0  ;;  %v736_v36 = vpop.f32.mrf.mxu1 }
 0x108   : > { %937 = vst.msk [vmem:[%s1546_s24 + $0x8] sm:$0xff] %vm935_vm1, %v876_v33  ;;  %967 = vst.msk [vmem:[%s1546_s24 + $0xf8] sm:$0xff] %vm935_vm1, %v906_v34  ;;  %v587_v37 = vadd.f32 %v1538_v18, %v586_v35  ;;  %v737_v38 = vadd.f32 %v1538_v18, %v736_v36 }
 0x109   : > { %v588_v39 = vpop.f32.mrf.mxu0  ;;  %v738_v40 = vpop.f32.mrf.mxu1 }
 0x10a   : > { %v877_v41 = vmax.f32 %v587_v37, 0.0  ;;  %v907_v42 = vmax.f32 %v737_v38, 0.0 }
 0x10b   : > { %v591_v43 = vpop.f32.mrf.mxu0  ;;  %v741_v44 = vpop.f32.mrf.mxu1 }
 0x10c   : > { %938 = vst.msk [vmem:[%s1546_s24 + $0x10] sm:$0xff] %vm935_vm1, %v877_v41  ;;  %968 = vst.msk [vmem:[%s1546_s24 + $0x100] sm:$0xff] %vm935_vm1, %v907_v42  ;;  %v592_v45 = vadd.f32 %v1538_v18, %v591_v43  ;;  %v742_v46 = vadd.f32 %v1538_v18, %v741_v44 }
 0x10d   : > { %v593_v47 = vpop.f32.mrf.mxu0  ;;  %v743_v48 = vpop.f32.mrf.mxu1 }
 0x10e   : > { %v878_v49 = vmax.f32 %v592_v45, 0.0  ;;  %v908_v50 = vmax.f32 %v742_v46, 0.0 }
 0x10f   : > { %v596_v51 = vpop.f32.mrf.mxu0  ;;  %v746_v52 = vpop.f32.mrf.mxu1 }
 0x110   : > { %939 = vst.msk [vmem:[%s1546_s24 + $0x18] sm:$0xff] %vm935_vm1, %v878_v49  ;;  %969 = vst.msk [vmem:[%s1546_s24 + $0x108] sm:$0xff] %vm935_vm1, %v908_v50  ;;  %v597_v53 = vadd.f32 %v1538_v18, %v596_v51  ;;  %v747_v54 = vadd.f32 %v1538_v18, %v746_v52 }
 0x111   : > { %v598_v55 = vpop.f32.mrf.mxu0  ;;  %v748_v56 = vpop.f32.mrf.mxu1 }
 0x112   : > { %v879_v57 = vmax.f32 %v597_v53, 0.0  ;;  %v909_v58 = vmax.f32 %v747_v54, 0.0 }
 0x113   : > { %v601_v59 = vpop.f32.mrf.mxu0  ;;  %v751_v60 = vpop.f32.mrf.mxu1 }
 0x114   : > { %940 = vst.msk [vmem:[%s1546_s24 + $0x20] sm:$0xff] %vm935_vm1, %v879_v57  ;;  %970 = vst.msk [vmem:[%s1546_s24 + $0x110] sm:$0xff] %vm935_vm1, %v909_v58  ;;  %v602_v61 = vadd.f32 %v1538_v18, %v601_v59  ;;  %v752_v62 = vadd.f32 %v1538_v18, %v751_v60 }
 0x115   : > { %v603_v63 = vpop.f32.mrf.mxu0  ;;  %v753_v0 = vpop.f32.mrf.mxu1 }
 0x116   : > { %v880_v1 = vmax.f32 %v602_v61, 0.0  ;;  %v910_v2 = vmax.f32 %v752_v62, 0.0 }
 0x117   : > { %v606_v3 = vpop.f32.mrf.mxu0  ;;  %v756_v4 = vpop.f32.mrf.mxu1 }
 0x118   : > { %941 = vst.msk [vmem:[%s1546_s24 + $0x28] sm:$0xff] %vm935_vm1, %v880_v1  ;;  %971 = vst.msk [vmem:[%s1546_s24 + $0x118] sm:$0xff] %vm935_vm1, %v910_v2  ;;  %v607_v5 = vadd.f32 %v1538_v18, %v606_v3  ;;  %v757_v6 = vadd.f32 %v1538_v18, %v756_v4 }
 0x119   : > { %v608_v7 = vpop.f32.mrf.mxu0  ;;  %v758_v8 = vpop.f32.mrf.mxu1 }
 0x11a   : > { %v881_v9 = vmax.f32 %v607_v5, 0.0  ;;  %v911_v10 = vmax.f32 %v757_v6, 0.0 }
 0x11b   : > { %v611_v11 = vpop.f32.mrf.mxu0  ;;  %v761_v12 = vpop.f32.mrf.mxu1 }
 0x11c   : > { %942 = vst.msk [vmem:[%s1546_s24 + $0x30] sm:$0xff] %vm935_vm1, %v881_v9  ;;  %972 = vst.msk [vmem:[%s1546_s24 + $0x120] sm:$0xff] %vm935_vm1, %v911_v10  ;;  %v612_v13 = vadd.f32 %v1538_v18, %v611_v11  ;;  %v762_v14 = vadd.f32 %v1538_v18, %v761_v12 }
 0x11d   : > { %v613_v15 = vpop.f32.mrf.mxu0  ;;  %v763_v16 = vpop.f32.mrf.mxu1 }
 0x11e   : > { %v882_v17 = vmax.f32 %v612_v13, 0.0  ;;  %v912_v19 = vmax.f32 %v762_v14, 0.0 }
 0x11f   : > { %v616_v20 = vpop.f32.mrf.mxu0  ;;  %v766_v21 = vpop.f32.mrf.mxu1 }
 0x120   : > { %943 = vst.msk [vmem:[%s1546_s24 + $0x38] sm:$0xff] %vm935_vm1, %v882_v17  ;;  %973 = vst.msk [vmem:[%s1546_s24 + $0x128] sm:$0xff] %vm935_vm1, %v912_v19  ;;  %v617_v22 = vadd.f32 %v1538_v18, %v616_v20  ;;  %v767_v23 = vadd.f32 %v1538_v18, %v766_v21 }
 0x121   : > { %v618_v24 = vpop.f32.mrf.mxu0  ;;  %v768_v25 = vpop.f32.mrf.mxu1 }
 0x122   : > { %v883_v26 = vmax.f32 %v617_v22, 0.0  ;;  %v913_v27 = vmax.f32 %v767_v23, 0.0 }
 0x123   : > { %v621_v28 = vpop.f32.mrf.mxu0  ;;  %v771_v29 = vpop.f32.mrf.mxu1 }
 0x124   : > { %944 = vst.msk [vmem:[%s1546_s24 + $0x40] sm:$0xff] %vm935_vm1, %v883_v26  ;;  %974 = vst.msk [vmem:[%s1546_s24 + $0x130] sm:$0xff] %vm935_vm1, %v913_v27  ;;  %v622_v30 = vadd.f32 %v1538_v18, %v621_v28  ;;  %v772_v31 = vadd.f32 %v1538_v18, %v771_v29 }
 0x125   : > { %v623_v32 = vpop.f32.mrf.mxu0  ;;  %v773_v33 = vpop.f32.mrf.mxu1 }
 0x126   : > { %v884_v34 = vmax.f32 %v622_v30, 0.0  ;;  %v914_v35 = vmax.f32 %v772_v31, 0.0 }
 0x127   : > { %v626_v36 = vpop.f32.mrf.mxu0  ;;  %v776_v37 = vpop.f32.mrf.mxu1 }
 0x128   : > { %945 = vst.msk [vmem:[%s1546_s24 + $0x48] sm:$0xff] %vm935_vm1, %v884_v34  ;;  %975 = vst.msk [vmem:[%s1546_s24 + $0x138] sm:$0xff] %vm935_vm1, %v914_v35  ;;  %v627_v38 = vadd.f32 %v1538_v18, %v626_v36  ;;  %v777_v39 = vadd.f32 %v1538_v18, %v776_v37 }
 0x129   : > { %v628_v40 = vpop.f32.mrf.mxu0  ;;  %v778_v41 = vpop.f32.mrf.mxu1 }
 0x12a   : > { %v885_v42 = vmax.f32 %v627_v38, 0.0  ;;  %v915_v43 = vmax.f32 %v777_v39, 0.0 }
 0x12b   : > { %v631_v44 = vpop.f32.mrf.mxu0  ;;  %v781_v45 = vpop.f32.mrf.mxu1 }
 0x12c   : > { %946 = vst.msk [vmem:[%s1546_s24 + $0x50] sm:$0xff] %vm935_vm1, %v885_v42  ;;  %976 = vst.msk [vmem:[%s1546_s24 + $0x140] sm:$0xff] %vm935_vm1, %v915_v43  ;;  %v632_v46 = vadd.f32 %v1538_v18, %v631_v44  ;;  %v782_v47 = vadd.f32 %v1538_v18, %v781_v45 }
 0x12d   : > { %v633_v48 = vpop.f32.mrf.mxu0  ;;  %v783_v49 = vpop.f32.mrf.mxu1 }
 0x12e   : > { %v886_v50 = vmax.f32 %v632_v46, 0.0  ;;  %v916_v51 = vmax.f32 %v782_v47, 0.0 }
 0x12f   : > { %v636_v52 = vpop.f32.mrf.mxu0  ;;  %v786_v53 = vpop.f32.mrf.mxu1 }
 0x130   : > { %947 = vst.msk [vmem:[%s1546_s24 + $0x58] sm:$0xff] %vm935_vm1, %v886_v50  ;;  %977 = vst.msk [vmem:[%s1546_s24 + $0x148] sm:$0xff] %vm935_vm1, %v916_v51  ;;  %v637_v54 = vadd.f32 %v1538_v18, %v636_v52  ;;  %v787_v55 = vadd.f32 %v1538_v18, %v786_v53 }
 0x131   : > { %v638_v56 = vpop.f32.mrf.mxu0  ;;  %v788_v57 = vpop.f32.mrf.mxu1 }
 0x132   : > { %v887_v58 = vmax.f32 %v637_v54, 0.0  ;;  %v917_v59 = vmax.f32 %v787_v55, 0.0 }
 0x133   : > { %v641_v60 = vpop.f32.mrf.mxu0  ;;  %v791_v61 = vpop.f32.mrf.mxu1 }
 0x134   : > { %948 = vst.msk [vmem:[%s1546_s24 + $0x60] sm:$0xff] %vm935_vm1, %v887_v58  ;;  %978 = vst.msk [vmem:[%s1546_s24 + $0x150] sm:$0xff] %vm935_vm1, %v917_v59  ;;  %v642_v62 = vadd.f32 %v1538_v18, %v641_v60  ;;  %v792_v63 = vadd.f32 %v1538_v18, %v791_v61 }
 0x135   : > { %v643_v0 = vpop.f32.mrf.mxu0  ;;  %v793_v1 = vpop.f32.mrf.mxu1 }
 0x136   : > { %v888_v2 = vmax.f32 %v642_v62, 0.0  ;;  %v918_v3 = vmax.f32 %v792_v63, 0.0 }
 0x137   : > { %v646_v4 = vpop.f32.mrf.mxu0  ;;  %v796_v5 = vpop.f32.mrf.mxu1 }
 0x138   : > { %949 = vst.msk [vmem:[%s1546_s24 + $0x68] sm:$0xff] %vm935_vm1, %v888_v2  ;;  %979 = vst.msk [vmem:[%s1546_s24 + $0x158] sm:$0xff] %vm935_vm1, %v918_v3  ;;  %v647_v6 = vadd.f32 %v1538_v18, %v646_v4  ;;  %v797_v7 = vadd.f32 %v1538_v18, %v796_v5 }
 0x139   : > { %v648_v8 = vpop.f32.mrf.mxu0  ;;  %v798_v9 = vpop.f32.mrf.mxu1 }
 0x13a   : > { %v889_v10 = vmax.f32 %v647_v6, 0.0  ;;  %v919_v11 = vmax.f32 %v797_v7, 0.0 }
 0x13b   : > { %v651_v12 = vpop.f32.mrf.mxu0  ;;  %v801_v13 = vpop.f32.mrf.mxu1 }
 0x13c   : > { %950 = vst.msk [vmem:[%s1546_s24 + $0x70] sm:$0xff] %vm935_vm1, %v889_v10  ;;  %980 = vst.msk [vmem:[%s1546_s24 + $0x160] sm:$0xff] %vm935_vm1, %v919_v11  ;;  %v652_v14 = vadd.f32 %v1538_v18, %v651_v12  ;;  %v802_v15 = vadd.f32 %v1538_v18, %v801_v13 }
 0x13d   : > { %v653_v16 = vpop.f32.mrf.mxu0  ;;  %v803_v17 = vpop.f32.mrf.mxu1 }
 0x13e   : > { %v890_v19 = vmax.f32 %v652_v14, 0.0  ;;  %v920_v20 = vmax.f32 %v802_v15, 0.0 }
 0x13f   : > { %v656_v21 = vpop.f32.mrf.mxu0  ;;  %v806_v22 = vpop.f32.mrf.mxu1 }
 0x140   : > { %951 = vst.msk [vmem:[%s1546_s24 + $0x78] sm:$0xff] %vm935_vm1, %v890_v19  ;;  %981 = vst.msk [vmem:[%s1546_s24 + $0x168] sm:$0xff] %vm935_vm1, %v920_v20  ;;  %v657_v23 = vadd.f32 %v1538_v18, %v656_v21  ;;  %v807_v24 = vadd.f32 %v1538_v18, %v806_v22 }
 0x141   : > { %v658_v25 = vpop.f32.mrf.mxu0  ;;  %v808_v26 = vpop.f32.mrf.mxu1 }
 0x142   : > { %v891_v27 = vmax.f32 %v657_v23, 0.0  ;;  %v921_v28 = vmax.f32 %v807_v24, 0.0 }
 0x143   : > { %v661_v29 = vpop.f32.mrf.mxu0  ;;  %v811_v30 = vpop.f32.mrf.mxu1 }
 0x144   : > { %952 = vst.msk [vmem:[%s1546_s24 + $0x80] sm:$0xff] %vm935_vm1, %v891_v27  ;;  %982 = vst.msk [vmem:[%s1546_s24 + $0x170] sm:$0xff] %vm935_vm1, %v921_v28  ;;  %v662_v31 = vadd.f32 %v1538_v18, %v661_v29  ;;  %v812_v32 = vadd.f32 %v1538_v18, %v811_v30 }
 0x145   : > { %v663_v33 = vpop.f32.mrf.mxu0  ;;  %v813_v34 = vpop.f32.mrf.mxu1 }
 0x146   : > { %v892_v35 = vmax.f32 %v662_v31, 0.0  ;;  %v922_v36 = vmax.f32 %v812_v32, 0.0 }
 0x147   : > { %v666_v37 = vpop.f32.mrf.mxu0  ;;  %v816_v38 = vpop.f32.mrf.mxu1 }
 0x148   : > { %953 = vst.msk [vmem:[%s1546_s24 + $0x88] sm:$0xff] %vm935_vm1, %v892_v35  ;;  %983 = vst.msk [vmem:[%s1546_s24 + $0x178] sm:$0xff] %vm935_vm1, %v922_v36  ;;  %v667_v39 = vadd.f32 %v1538_v18, %v666_v37  ;;  %v817_v40 = vadd.f32 %v1538_v18, %v816_v38 }
 0x149   : > { %v668_v41 = vpop.f32.mrf.mxu0  ;;  %v818_v42 = vpop.f32.mrf.mxu1 }
 0x14a   : > { %v893_v43 = vmax.f32 %v667_v39, 0.0  ;;  %v923_v44 = vmax.f32 %v817_v40, 0.0 }
 0x14b   : > { %v671_v45 = vpop.f32.mrf.mxu0  ;;  %v821_v46 = vpop.f32.mrf.mxu1 }
 0x14c   : > { %954 = vst.msk [vmem:[%s1546_s24 + $0x90] sm:$0xff] %vm935_vm1, %v893_v43  ;;  %984 = vst.msk [vmem:[%s1546_s24 + $0x180] sm:$0xff] %vm935_vm1, %v923_v44  ;;  %v672_v47 = vadd.f32 %v1538_v18, %v671_v45  ;;  %v822_v48 = vadd.f32 %v1538_v18, %v821_v46 }
 0x14d   : > { %v673_v49 = vpop.f32.mrf.mxu0  ;;  %v823_v50 = vpop.f32.mrf.mxu1 }
 0x14e   : > { %v894_v51 = vmax.f32 %v672_v47, 0.0  ;;  %v924_v52 = vmax.f32 %v822_v48, 0.0 }
 0x14f   : > { %v676_v53 = vpop.f32.mrf.mxu0  ;;  %v826_v54 = vpop.f32.mrf.mxu1 }
 0x150   : > { %955 = vst.msk [vmem:[%s1546_s24 + $0x98] sm:$0xff] %vm935_vm1, %v894_v51  ;;  %985 = vst.msk [vmem:[%s1546_s24 + $0x188] sm:$0xff] %vm935_vm1, %v924_v52  ;;  %v677_v55 = vadd.f32 %v1538_v18, %v676_v53  ;;  %v827_v56 = vadd.f32 %v1538_v18, %v826_v54 }
 0x151   : > { %v678_v57 = vpop.f32.mrf.mxu0  ;;  %v828_v58 = vpop.f32.mrf.mxu1 }
 0x152   : > { %v895_v59 = vmax.f32 %v677_v55, 0.0  ;;  %v925_v60 = vmax.f32 %v827_v56, 0.0 }
 0x153   : > { %v681_v61 = vpop.f32.mrf.mxu0  ;;  %v831_v62 = vpop.f32.mrf.mxu1 }
 0x154   : > { %956 = vst.msk [vmem:[%s1546_s24 + $0xa0] sm:$0xff] %vm935_vm1, %v895_v59  ;;  %986 = vst.msk [vmem:[%s1546_s24 + $0x190] sm:$0xff] %vm935_vm1, %v925_v60  ;;  %v682_v63 = vadd.f32 %v1538_v18, %v681_v61  ;;  %v832_v0 = vadd.f32 %v1538_v18, %v831_v62 }
 0x155   : > { %v683_v1 = vpop.f32.mrf.mxu0  ;;  %v833_v2 = vpop.f32.mrf.mxu1 }
 0x156   : > { %v896_v3 = vmax.f32 %v682_v63, 0.0  ;;  %v926_v4 = vmax.f32 %v832_v0, 0.0 }
 0x157   : > { %v686_v5 = vpop.f32.mrf.mxu0  ;;  %v836_v6 = vpop.f32.mrf.mxu1 }
 0x158   : > { %957 = vst.msk [vmem:[%s1546_s24 + $0xa8] sm:$0xff] %vm935_vm1, %v896_v3  ;;  %987 = vst.msk [vmem:[%s1546_s24 + $0x198] sm:$0xff] %vm935_vm1, %v926_v4  ;;  %v687_v7 = vadd.f32 %v1538_v18, %v686_v5  ;;  %v837_v8 = vadd.f32 %v1538_v18, %v836_v6 }
 0x159   : > { %v688_v9 = vpop.f32.mrf.mxu0  ;;  %v838_v10 = vpop.f32.mrf.mxu1 }
 0x15a   : > { %v897_v11 = vmax.f32 %v687_v7, 0.0  ;;  %v927_v12 = vmax.f32 %v837_v8, 0.0 }
 0x15b   : > { %v691_v13 = vpop.f32.mrf.mxu0  ;;  %v841_v14 = vpop.f32.mrf.mxu1 }
 0x15c   : > { %958 = vst.msk [vmem:[%s1546_s24 + $0xb0] sm:$0xff] %vm935_vm1, %v897_v11  ;;  %988 = vst.msk [vmem:[%s1546_s24 + $0x1a0] sm:$0xff] %vm935_vm1, %v927_v12  ;;  %v692_v15 = vadd.f32 %v1538_v18, %v691_v13  ;;  %v842_v16 = vadd.f32 %v1538_v18, %v841_v14 }
 0x15d   : > { %v693_v17 = vpop.f32.mrf.mxu0  ;;  %v843_v19 = vpop.f32.mrf.mxu1 }
 0x15e   : > { %v898_v20 = vmax.f32 %v692_v15, 0.0  ;;  %v928_v21 = vmax.f32 %v842_v16, 0.0 }
 0x15f   : > { %v696_v22 = vpop.f32.mrf.mxu0  ;;  %v846_v23 = vpop.f32.mrf.mxu1 }
 0x160   : > { %959 = vst.msk [vmem:[%s1546_s24 + $0xb8] sm:$0xff] %vm935_vm1, %v898_v20  ;;  %989 = vst.msk [vmem:[%s1546_s24 + $0x1a8] sm:$0xff] %vm935_vm1, %v928_v21  ;;  %v697_v24 = vadd.f32 %v1538_v18, %v696_v22  ;;  %v847_v25 = vadd.f32 %v1538_v18, %v846_v23 }
 0x161   : > { %v698_v26 = vpop.f32.mrf.mxu0  ;;  %v848_v27 = vpop.f32.mrf.mxu1 }
 0x162   : > { %v899_v28 = vmax.f32 %v697_v24, 0.0  ;;  %v929_v29 = vmax.f32 %v847_v25, 0.0 }
 0x163   : > { %v701_v30 = vpop.f32.mrf.mxu0  ;;  %v851_v31 = vpop.f32.mrf.mxu1 }
 0x164   : > { %960 = vst.msk [vmem:[%s1546_s24 + $0xc0] sm:$0xff] %vm935_vm1, %v899_v28  ;;  %990 = vst.msk [vmem:[%s1546_s24 + $0x1b0] sm:$0xff] %vm935_vm1, %v929_v29  ;;  %v702_v32 = vadd.f32 %v1538_v18, %v701_v30  ;;  %v852_v33 = vadd.f32 %v1538_v18, %v851_v31 }
 0x165   : > { %v703_v34 = vpop.f32.mrf.mxu0  ;;  %v853_v35 = vpop.f32.mrf.mxu1 }
 0x166   : > { %v900_v36 = vmax.f32 %v702_v32, 0.0  ;;  %v930_v37 = vmax.f32 %v852_v33, 0.0 }
 0x167   : > { %v706_v38 = vpop.f32.mrf.mxu0  ;;  %v856_v39 = vpop.f32.mrf.mxu1 }
 0x168   : > { %961 = vst.msk [vmem:[%s1546_s24 + $0xc8] sm:$0xff] %vm935_vm1, %v900_v36  ;;  %991 = vst.msk [vmem:[%s1546_s24 + $0x1b8] sm:$0xff] %vm935_vm1, %v930_v37  ;;  %v707_v40 = vadd.f32 %v1538_v18, %v706_v38  ;;  %v857_v41 = vadd.f32 %v1538_v18, %v856_v39 }
 0x169   : > { %v708_v42 = vpop.f32.mrf.mxu0  ;;  %v858_v43 = vpop.f32.mrf.mxu1 }
 0x16a   : > { %v901_v44 = vmax.f32 %v707_v40, 0.0  ;;  %v931_v45 = vmax.f32 %v857_v41, 0.0 }
 0x16b   : > { %v711_v46 = vpop.f32.mrf.mxu0  ;;  %v861_v47 = vpop.f32.mrf.mxu1 }
 0x16c   : > { %962 = vst.msk [vmem:[%s1546_s24 + $0xd0] sm:$0xff] %vm935_vm1, %v901_v44  ;;  %992 = vst.msk [vmem:[%s1546_s24 + $0x1c0] sm:$0xff] %vm935_vm1, %v931_v45  ;;  %v712_v48 = vadd.f32 %v1538_v18, %v711_v46  ;;  %v862_v49 = vadd.f32 %v1538_v18, %v861_v47 }
 0x16d   : > { %v713_v50 = vpop.f32.mrf.mxu0  ;;  %v863_v51 = vpop.f32.mrf.mxu1 }
 0x16e   : > { %v902_v52 = vmax.f32 %v712_v48, 0.0  ;;  %v932_v53 = vmax.f32 %v862_v49, 0.0 }
 0x16f   : > { %v716_v54 = vpop.f32.mrf.mxu0  ;;  %v866_v55 = vpop.f32.mrf.mxu1 }
 0x170   : > { %963 = vst.msk [vmem:[%s1546_s24 + $0xd8] sm:$0xff] %vm935_vm1, %v902_v52  ;;  %993 = vst.msk [vmem:[%s1546_s24 + $0x1c8] sm:$0xff] %vm935_vm1, %v932_v53  ;;  %v717_v56 = vadd.f32 %v1538_v18, %v716_v54  ;;  %v867_v57 = vadd.f32 %v1538_v18, %v866_v55 }
 0x171   : > { %v718_v58 = vpop.f32.mrf.mxu0  ;;  %v868_v59 = vpop.f32.mrf.mxu1 }
 0x172   : > { %v903_v60 = vmax.f32 %v717_v56, 0.0  ;;  %v933_v61 = vmax.f32 %v867_v57, 0.0 }
 0x173   : > { %v721_v62 = vpop.f32.mrf.mxu0  ;;  %v871_v63 = vpop.f32.mrf.mxu1 }
 0x174   : > { %964 = vst.msk [vmem:[%s1546_s24 + $0xe0] sm:$0xff] %vm935_vm1, %v903_v60  ;;  %994 = vst.msk [vmem:[%s1546_s24 + $0x1d0] sm:$0xff] %vm935_vm1, %v933_v61  ;;  %v722_v0 = vadd.f32 %v1538_v18, %v721_v62  ;;  %v872_v1 = vadd.f32 %v1538_v18, %v871_v63 }
 0x175   : > { %v723_v2 = vpop.f32.mrf.mxu0  ;;  %v873_v3 = vpop.f32.mrf.mxu1 }
 0x176   : > { %v904_v4 = vmax.f32 %v722_v0, 0.0  ;;  %v934_v5 = vmax.f32 %v872_v1, 0.0 }
 0x178   : > { %965 = vst.msk [vmem:[%s1546_s24 + $0xe8] sm:$0xff] %vm935_vm1, %v904_v4  ;;  %995 = vst.msk [vmem:[%s1546_s24 + $0x1d8] sm:$0xff] %vm935_vm1, %v934_v5 }
 0x179 PF: > { %s13_s12 = sadd.s32 1, %s1189_s12  }
 0x17a   : > { %p10_p4 = scmp.ge.s32.totalorder %s13_s12, 13  }
 0x17c   :  { %12 = sbr.rel (!%p10_p4) target bundleno = 1 (0x1), region = 62 }

// kernel: japaness_discriminator_forward.7
= control target key start
LH: loop header
LB: loop body
LE: loop exit
PB: predicated region body
PF: predicated region fallthrough
CT: control target
= control target key end

     0   :  { %s1100_s12 = smov 0   ;;  %s1540_s0 = inlined_call_operand.vmem [shape: f32[1272,144], index: 0, kind: input, shape index: {}]   ;;  %s1541_s1 = inlined_call_operand.vmem [shape: f32[144,32], index: 1, kind: input, shape index: {}]   ;;  %s1542_s2 = inlined_call_operand.vmem [shape: f32[1,32], index: 2, kind: input, shape index: {}]   ;;  %s1543_s3 = inlined_call_operand.vmem [shape: f32[1272,32], index: 3, kind: output, shape index: {}]  }
   0x1 LB: > { %s961_s13 = sadd.s32 4294967295, %s1077_s12   ;;  %p965_p0 = scmp.ge.s32.totalorder %s1077_s12, 1  ;;  %s1077_s12 = sphi %s1100_s12, %s13_s12  }
   0x2   : > { %p139_p1 = scmp.lt.s32.totalorder %s1077_s12, 4 }
   0x4   : > { %p140_p2 = pnand %p965_p0, %p139_p1 }
   0x5   : > { %s164_s30 = smul.u32 (!%p140_p2), 53, %s961_s13 }
   0x6   : > { %143 = sbr.rel (%p140_p2) target bundleno = 350 (0x15e), region = 32 }
   0x7   : > { %p165_p3 = scmp.lt.s32.totalorder (!%p140_p2), %s164_s30, 158 }
   0xb   : > { %v298_v0 = vld [vmem:[%s1541_s1 + $0x78] sm:$0xff]  ;;  %v1079_v1 = vmov 0.0   ;;  %v297_v2 = vld [vmem:[%s1541_s1 + $0x70] sm:$0xff]  ;;  %v296_v3 = vld [vmem:[%s1541_s1 + $0x68] sm:$0xff]  ;;  %s1545_s30 = smov (!%p165_p3, %s164_s30), 158  ;;  %vm308_vm0 = vcmask 130048  }
   0xc   : > { %468 = vmatprep.subr.mxu0 %v1079_v1  ;;  %1026 = vmatprep.subr.mxu1 %v1079_v1  ;;  %v295_v4 = vld [vmem:[%s1541_s1 + $0x60] sm:$0xff]  ;;  %v294_v5 = vld [vmem:[%s1541_s1 + $0x58] sm:$0xff]  ;;  %v293_v6 = vld [vmem:[%s1541_s1 + $0x50] sm:$0xff]  ;;  %s1025_s17 = sshll.u32 %s1545_s30, 4  ;;  %s968_s5 = sshll.u32 %s1545_s30, 3  ;;  %vm851_vm1 = vcmask 261120  }
   0xd   : > { %469 = vmatpush1.msra.mxu0 %v298_v0  ;;  %1044 = vmatpush1.msra.mxu1 %v298_v0  ;;  %v292_v7 = vld [vmem:[%s1541_s1 + $0x48] sm:$0xff]  ;;  %v291_v8 = vld [vmem:[%s1541_s1 + $0x40] sm:$0xff]  ;;  %v290_v9 = vld [vmem:[%s1541_s1 + $0x38] sm:$0xff]  ;;  %s1194_s24 = scalar_lea.vmem %s1540_s0, %s1025_s17  ;;  %s1377_s8 = scalar_lea.vmem %s1543_s3, %s968_s5 }
   0xe   : > { %470 = vmatprep.subr.mxu0 %v1079_v1  ;;  %1027 = vmatprep.subr.mxu1 %v1079_v1  ;;  %v289_v10 = vld [vmem:[%s1541_s1 + $0x30] sm:$0xff]  ;;  %v288_v11 = vld [vmem:[%s1541_s1 + $0x28] sm:$0xff]  ;;  %v287_v12 = vld [vmem:[%s1541_s1 + $0x20] sm:$0xff] }
   0xf   : > { %471 = vmatpush1.msra.mxu0 %v297_v2  ;;  %1045 = vmatpush1.msra.mxu1 %v297_v2  ;;  %v286_v13 = vld [vmem:[%s1541_s1 + $0x18] sm:$0xff]  ;;  %v285_v14 = vld [vmem:[%s1541_s1 + $0x10] sm:$0xff]  ;;  %v284_v15 = vld [vmem:[%s1541_s1 + $0x8] sm:$0xff] }
  0x10   : > { %472 = vmatprep.subr.mxu0 %v1079_v1  ;;  %1028 = vmatprep.subr.mxu1 %v1079_v1  ;;  %v283_v16 = vld [vmem:[%s1541_s1] sm:$0xff]  ;;  %v300_v17 = vld [vmem:[%s1541_s1 + $0x88] sm:$0xff]  ;;  %v232_v21 = vld [vmem:[%s1194_s24 + $0x1b8] sm:$0xff] }
  0x11   : > { %473 = vmatpush1.msra.mxu0 %v296_v3  ;;  %1046 = vmatpush1.msra.mxu1 %v296_v3  ;;  %v178_v18 = vld [vmem:[%s1194_s24 + $0x8] sm:$0xff]  ;;  %v299_v19 = vld [vmem:[%s1541_s1 + $0x80] sm:$0xff]  ;;  %v180_v22 = vld [vmem:[%s1194_s24 + $0x18] sm:$0xff] }
  0x12   : > { %474 = vmatprep.subr.mxu0 %v1079_v1  ;;  %1029 = vmatprep.subr.mxu1 %v1079_v1  ;;  %v177_v20 = vld [vmem:[%s1194_s24] sm:$0xff]  ;;  %v231_v23 = vld [vmem:[%s1194_s24 + $0x1b0] sm:$0xff]  ;;  %v234_v24 = vld [vmem:[%s1194_s24 + $0x1c8] sm:$0xff] }
  0x13   : > { %475 = vmatpush1.msra.mxu0 %v295_v4  ;;  %1047 = vmatpush1.msra.mxu1 %v295_v4  ;;  %v179_v25 = vld [vmem:[%s1194_s24 + $0x10] sm:$0xff]  ;;  %v182_v26 = vld [vmem:[%s1194_s24 + $0x28] sm:$0xff]  ;;  %v233_v27 = vld [vmem:[%s1194_s24 + $0x1c0] sm:$0xff] }
  0x14   : > { %476 = vmatprep.subr.mxu0 %v1079_v1  ;;  %1030 = vmatprep.subr.mxu1 %v1079_v1  ;;  %v236_v28 = vld [vmem:[%s1194_s24 + $0x1d8] sm:$0xff]  ;;  %v181_v29 = vld [vmem:[%s1194_s24 + $0x20] sm:$0xff]  ;;  %v235_v31 = vld [vmem:[%s1194_s24 + $0x1d0] sm:$0xff] }
  0x15   : > { %477 = vmatpush1.msra.mxu0 %v294_v5  ;;  %1048 = vmatpush1.msra.mxu1 %v294_v5  ;;  %v184_v30 = vld [vmem:[%s1194_s24 + $0x38] sm:$0xff]  ;;  %v238_v32 = vld [vmem:[%s1194_s24 + $0x1e8] sm:$0xff]  ;;  %v183_v33 = vld [vmem:[%s1194_s24 + $0x30] sm:$0xff] }
  0x16   : > { %478 = vmatprep.subr.mxu0 %v1079_v1  ;;  %1031 = vmatprep.subr.mxu1 %v1079_v1  ;;  %v186_v34 = vld [vmem:[%s1194_s24 + $0x48] sm:$0xff]  ;;  %v237_v35 = vld [vmem:[%s1194_s24 + $0x1e0] sm:$0xff]  ;;  %v240_v36 = vld [vmem:[%s1194_s24 + $0x1f8] sm:$0xff] }
  0x17   : > { %479 = vmatpush1.msra.mxu0 %v293_v6  ;;  %1049 = vmatpush1.msra.mxu1 %v293_v6  ;;  %v185_v37 = vld [vmem:[%s1194_s24 + $0x40] sm:$0xff]  ;;  %v188_v38 = vld [vmem:[%s1194_s24 + $0x58] sm:$0xff]  ;;  %v239_v39 = vld [vmem:[%s1194_s24 + $0x1f0] sm:$0xff] }
  0x18   : > { %480 = vmatprep.subr.mxu0 %v1079_v1  ;;  %1032 = vmatprep.subr.mxu1 %v1079_v1  ;;  %v242_v40 = vld [vmem:[%s1194_s24 + $0x208] sm:$0xff]  ;;  %v187_v41 = vld [vmem:[%s1194_s24 + $0x50] sm:$0xff]  ;;  %v241_v43 = vld [vmem:[%s1194_s24 + $0x200] sm:$0xff] }
  0x19   : > { %481 = vmatpush1.msra.mxu0 %v292_v7  ;;  %1050 = vmatpush1.msra.mxu1 %v292_v7  ;;  %v190_v42 = vld [vmem:[%s1194_s24 + $0x68] sm:$0xff]  ;;  %v244_v44 = vld [vmem:[%s1194_s24 + $0x218] sm:$0xff]  ;;  %v189_v45 = vld [vmem:[%s1194_s24 + $0x60] sm:$0xff] }
  0x1a   : > { %482 = vmatprep.subr.mxu0 %v1079_v1  ;;  %1033 = vmatprep.subr.mxu1 %v1079_v1  ;;  %v192_v46 = vld [vmem:[%s1194_s24 + $0x78] sm:$0xff]  ;;  %v243_v47 = vld [vmem:[%s1194_s24 + $0x210] sm:$0xff]  ;;  %v246_v48 = vld [vmem:[%s1194_s24 + $0x228] sm:$0xff] }
  0x1b   : > { %483 = vmatpush1.msra.mxu0 %v291_v8  ;;  %1051 = vmatpush1.msra.mxu1 %v291_v8  ;;  %v191_v49 = vld [vmem:[%s1194_s24 + $0x70] sm:$0xff]  ;;  %v194_v50 = vld [vmem:[%s1194_s24 + $0x88] sm:$0xff]  ;;  %v245_v51 = vld [vmem:[%s1194_s24 + $0x220] sm:$0xff] }
  0x1c   : > { %484 = vmatprep.subr.mxu0 %v1079_v1  ;;  %1034 = vmatprep.subr.mxu1 %v1079_v1  ;;  %v248_v52 = vld [vmem:[%s1194_s24 + $0x238] sm:$0xff]  ;;  %v193_v53 = vld [vmem:[%s1194_s24 + $0x80] sm:$0xff]  ;;  %v247_v55 = vld [vmem:[%s1194_s24 + $0x230] sm:$0xff] }
  0x1d   : > { %485 = vmatpush1.msra.mxu0 %v290_v9  ;;  %1052 = vmatpush1.msra.mxu1 %v290_v9  ;;  %v196_v54 = vld [vmem:[%s1194_s24 + $0x98] sm:$0xff]  ;;  %v250_v56 = vld [vmem:[%s1194_s24 + $0x248] sm:$0xff]  ;;  %v195_v57 = vld [vmem:[%s1194_s24 + $0x90] sm:$0xff] }
  0x1e   : > { %486 = vmatprep.subr.mxu0 %v1079_v1  ;;  %1035 = vmatprep.subr.mxu1 %v1079_v1  ;;  %v198_v58 = vld [vmem:[%s1194_s24 + $0xa8] sm:$0xff]  ;;  %v249_v59 = vld [vmem:[%s1194_s24 + $0x240] sm:$0xff]  ;;  %v252_v60 = vld [vmem:[%s1194_s24 + $0x258] sm:$0xff] }
  0x1f   : > { %487 = vmatpush1.msra.mxu0 %v289_v10  ;;  %1053 = vmatpush1.msra.mxu1 %v289_v10  ;;  %v197_v61 = vld [vmem:[%s1194_s24 + $0xa0] sm:$0xff]  ;;  %v200_v62 = vld [vmem:[%s1194_s24 + $0xb8] sm:$0xff]  ;;  %v251_v63 = vld [vmem:[%s1194_s24 + $0x250] sm:$0xff] }
  0x20   : > { %488 = vmatprep.subr.mxu0 %v1079_v1  ;;  %1036 = vmatprep.subr.mxu1 %v1079_v1  ;;  %v254_v0 = vld [vmem:[%s1194_s24 + $0x268] sm:$0xff]  ;;  %v253_v3 = vld [vmem:[%s1194_s24 + $0x260] sm:$0xff]  ;;  %v256_v4 = vld [vmem:[%s1194_s24 + $0x278] sm:$0xff] }
  0x21   : > { %489 = vmatpush1.msra.mxu0 %v288_v11  ;;  %1054 = vmatpush1.msra.mxu1 %v288_v11  ;;  %v202_v2 = vld [vmem:[%s1194_s24 + $0xc8] sm:$0xff]  ;;  %v201_v5 = vld [vmem:[%s1194_s24 + $0xc0] sm:$0xff]  ;;  %v204_v6 = vld [vmem:[%s1194_s24 + $0xd8] sm:$0xff] }
  0x22   : > { %490 = vmatprep.subr.mxu0 %v1079_v1  ;;  %1037 = vmatprep.subr.mxu1 %v1079_v1  ;;  %v255_v7 = vld [vmem:[%s1194_s24 + $0x270] sm:$0xff]  ;;  %v258_v8 = vld [vmem:[%s1194_s24 + $0x288] sm:$0xff]  ;;  %v257_v11 = vld [vmem:[%s1194_s24 + $0x280] sm:$0xff] }
  0x23   : > { %491 = vmatpush1.msra.mxu0 %v287_v12  ;;  %1055 = vmatpush1.msra.mxu1 %v287_v12  ;;  %v203_v9 = vld [vmem:[%s1194_s24 + $0xd0] sm:$0xff]  ;;  %v206_v10 = vld [vmem:[%s1194_s24 + $0xe8] sm:$0xff]  ;;  %v260_v12 = vld [vmem:[%s1194_s24 + $0x298] sm:$0xff] }
  0x24   : > { %492 = vmatprep.subr.mxu0 %v1079_v1  ;;  %1038 = vmatprep.subr.mxu1 %v1079_v1 }
  0x25   : > { %493 = vmatpush1.msra.mxu0 %v286_v13  ;;  %1056 = vmatpush1.msra.mxu1 %v286_v13  ;;  %v205_v13 = vld [vmem:[%s1194_s24 + $0xe0] sm:$0xff] }
  0x26   : > { %494 = vmatprep.subr.mxu0 %v1079_v1  ;;  %1039 = vmatprep.subr.mxu1 %v1079_v1 }
  0x27   : > { %495 = vmatpush1.msra.mxu0 %v285_v14  ;;  %1057 = vmatpush1.msra.mxu1 %v285_v14  ;;  %v208_v14 = vld [vmem:[%s1194_s24 + $0xf8] sm:$0xff] }
  0x28   : > { %496 = vmatprep.subr.mxu0 %v1079_v1  ;;  %1040 = vmatprep.subr.mxu1 %v1079_v1 }
  0x29   : > { %497 = vmatpush1.msra.mxu0 %v284_v15  ;;  %1058 = vmatpush1.msra.mxu1 %v284_v15  ;;  %v259_v15 = vld [vmem:[%s1194_s24 + $0x290] sm:$0xff] }
  0x2a   : > { %498 = vmatprep.subr.mxu0 %v1079_v1  ;;  %1041 = vmatprep.subr.mxu1 %v1079_v1 }
  0x2b   : > { %499 = vmatpush1.msra.mxu0 %v283_v16  ;;  %1059 = vmatpush1.msra.mxu1 %v283_v16  ;;  %v262_v16 = vld [vmem:[%s1194_s24 + $0x2a8] sm:$0xff] }
  0x2c   : > { %528 = vmatprep.subr.mxu0 %v1079_v1  ;;  %1042 = vmatprep.subr.mxu1 %v1079_v1 }
  0x2d   : > { %529 = vmatpush2.msra.mxu0 %v300_v17  ;;  %1060 = vmatpush2.msra.mxu1 %v300_v17  ;;  %v207_v17 = vld [vmem:[%s1194_s24 + $0xf0] sm:$0xff] }
  0x2e   : > { %530 = vmatprep.subr.mxu0 %v1079_v1  ;;  %970 = vmatprep.mubr.msk.f32.mxu0 %vm308_vm0, %v178_v18  ;;  %v210_v18 = vld [vmem:[%s1194_s24 + $0x108] sm:$0xff] }
  0x2f   : > { %531 = vmatpush2.msra.mxu0 %v299_v19  ;;  %1043 = vmatprep.subr.mxu1 %v1079_v1  ;;  %v199_v1 = vld [vmem:[%s1194_s24 + $0xb0] sm:$0xff] }
  0x30   : > { %533 = vmatmul.mubr.f32.vlgmr.msra.gmra.mxu0 %v177_v20  ;;  %1061 = vmatpush2.msra.mxu1 %v299_v19  ;;  %v261_v19 = vld [vmem:[%s1194_s24 + $0x2a0] sm:$0xff]  ;;  %v264_v20 = vld [vmem:[%s1194_s24 + $0x2b8] sm:$0xff] }
  0x31   : > { %997 = vmatprep.mubr.msk.f32.mxu1 %vm308_vm0, %v232_v21  ;;  %971 = vmatprep.mubr.msk.f32.mxu0 %vm308_vm0, %v180_v22  ;;  %v209_v21 = vld [vmem:[%s1194_s24 + $0x100] sm:$0xff]  ;;  %v212_v22 = vld [vmem:[%s1194_s24 + $0x118] sm:$0xff] }
  0x32   : > { %668 = vmatmul.mubr.f32.vlgmr.msra.gmra.mxu1 %v231_v23  ;;  %v263_v23 = vld [vmem:[%s1194_s24 + $0x2b0] sm:$0xff] }
  0x33   : > { %998 = vmatprep.mubr.msk.f32.mxu1 %vm308_vm0, %v234_v24  ;;  %v266_v24 = vld [vmem:[%s1194_s24 + $0x2c8] sm:$0xff] }
  0x34   : > { %538 = vmatmul.mubr.f32.gmra.mxu0 %v179_v25  ;;  %v211_v25 = vld [vmem:[%s1194_s24 + $0x110] sm:$0xff] }
  0x35   : > { %972 = vmatprep.mubr.msk.f32.mxu0 %vm308_vm0, %v182_v26  ;;  %v214_v26 = vld [vmem:[%s1194_s24 + $0x128] sm:$0xff] }
  0x36   : > { %673 = vmatmul.mubr.f32.gmra.mxu1 %v233_v27  ;;  %v265_v27 = vld [vmem:[%s1194_s24 + $0x2c0] sm:$0xff] }
  0x37   : > { %999 = vmatprep.mubr.msk.f32.mxu1 %vm308_vm0, %v236_v28  ;;  %v268_v28 = vld [vmem:[%s1194_s24 + $0x2d8] sm:$0xff] }
  0x38   : > { %543 = vmatmul.mubr.f32.gmra.mxu0 %v181_v29  ;;  %v213_v29 = vld [vmem:[%s1194_s24 + $0x120] sm:$0xff] }
  0x39   : > { %973 = vmatprep.mubr.msk.f32.mxu0 %vm308_vm0, %v184_v30  ;;  %v216_v30 = vld [vmem:[%s1194_s24 + $0x138] sm:$0xff] }
  0x3a   : > { %678 = vmatmul.mubr.f32.gmra.mxu1 %v235_v31  ;;  %v267_v31 = vld [vmem:[%s1194_s24 + $0x2d0] sm:$0xff] }
  0x3b   : > { %1000 = vmatprep.mubr.msk.f32.mxu1 %vm308_vm0, %v238_v32  ;;  %v270_v32 = vld [vmem:[%s1194_s24 + $0x2e8] sm:$0xff] }
  0x3c   : > { %548 = vmatmul.mubr.f32.gmra.mxu0 %v183_v33  ;;  %v215_v33 = vld [vmem:[%s1194_s24 + $0x130] sm:$0xff] }
  0x3d   : > { %974 = vmatprep.mubr.msk.f32.mxu0 %vm308_vm0, %v186_v34  ;;  %v218_v34 = vld [vmem:[%s1194_s24 + $0x148] sm:$0xff] }
  0x3e   : > { %683 = vmatmul.mubr.f32.gmra.mxu1 %v237_v35  ;;  %v269_v35 = vld [vmem:[%s1194_s24 + $0x2e0] sm:$0xff] }
  0x3f   : > { %1001 = vmatprep.mubr.msk.f32.mxu1 %vm308_vm0, %v240_v36  ;;  %v272_v36 = vld [vmem:[%s1194_s24 + $0x2f8] sm:$0xff] }
  0x40   : > { %553 = vmatmul.mubr.f32.gmra.mxu0 %v185_v37  ;;  %v217_v37 = vld [vmem:[%s1194_s24 + $0x140] sm:$0xff] }
  0x41   : > { %975 = vmatprep.mubr.msk.f32.mxu0 %vm308_vm0, %v188_v38  ;;  %v220_v38 = vld [vmem:[%s1194_s24 + $0x158] sm:$0xff] }
  0x42   : > { %688 = vmatmul.mubr.f32.gmra.mxu1 %v239_v39  ;;  %v271_v39 = vld [vmem:[%s1194_s24 + $0x2f0] sm:$0xff] }
  0x43   : > { %1002 = vmatprep.mubr.msk.f32.mxu1 %vm308_vm0, %v242_v40  ;;  %v274_v40 = vld [vmem:[%s1194_s24 + $0x308] sm:$0xff] }
  0x44   : > { %558 = vmatmul.mubr.f32.gmra.mxu0 %v187_v41  ;;  %v219_v41 = vld [vmem:[%s1194_s24 + $0x150] sm:$0xff] }
  0x45   : > { %976 = vmatprep.mubr.msk.f32.mxu0 %vm308_vm0, %v190_v42  ;;  %v222_v42 = vld [vmem:[%s1194_s24 + $0x168] sm:$0xff] }
  0x46   : > { %693 = vmatmul.mubr.f32.gmra.mxu1 %v241_v43  ;;  %v273_v43 = vld [vmem:[%s1194_s24 + $0x300] sm:$0xff] }
  0x47   : > { %1003 = vmatprep.mubr.msk.f32.mxu1 %vm308_vm0, %v244_v44  ;;  %v276_v44 = vld [vmem:[%s1194_s24 + $0x318] sm:$0xff] }
  0x48   : > { %563 = vmatmul.mubr.f32.gmra.mxu0 %v189_v45  ;;  %v221_v45 = vld [vmem:[%s1194_s24 + $0x160] sm:$0xff] }
  0x49   : > { %977 = vmatprep.mubr.msk.f32.mxu0 %vm308_vm0, %v192_v46  ;;  %v224_v46 = vld [vmem:[%s1194_s24 + $0x178] sm:$0xff] }
  0x4a   : > { %698 = vmatmul.mubr.f32.gmra.mxu1 %v243_v47  ;;  %v275_v47 = vld [vmem:[%s1194_s24 + $0x310] sm:$0xff] }
  0x4b   : > { %1004 = vmatprep.mubr.msk.f32.mxu1 %vm308_vm0, %v246_v48  ;;  %v278_v48 = vld [vmem:[%s1194_s24 + $0x328] sm:$0xff] }
  0x4c   : > { %568 = vmatmul.mubr.f32.gmra.mxu0 %v191_v49  ;;  %v223_v49 = vld [vmem:[%s1194_s24 + $0x170] sm:$0xff] }
  0x4d   : > { %978 = vmatprep.mubr.msk.f32.mxu0 %vm308_vm0, %v194_v50  ;;  %v226_v50 = vld [vmem:[%s1194_s24 + $0x188] sm:$0xff] }
  0x4e   : > { %703 = vmatmul.mubr.f32.gmra.mxu1 %v245_v51  ;;  %v277_v51 = vld [vmem:[%s1194_s24 + $0x320] sm:$0xff] }
  0x4f   : > { %1005 = vmatprep.mubr.msk.f32.mxu1 %vm308_vm0, %v248_v52  ;;  %v280_v52 = vld [vmem:[%s1194_s24 + $0x338] sm:$0xff] }
  0x50   : > { %573 = vmatmul.mubr.f32.gmra.mxu0 %v193_v53  ;;  %v225_v53 = vld [vmem:[%s1194_s24 + $0x180] sm:$0xff] }
  0x51   : > { %979 = vmatprep.mubr.msk.f32.mxu0 %vm308_vm0, %v196_v54  ;;  %v228_v54 = vld [vmem:[%s1194_s24 + $0x198] sm:$0xff] }
  0x52   : > { %708 = vmatmul.mubr.f32.gmra.mxu1 %v247_v55  ;;  %v279_v55 = vld [vmem:[%s1194_s24 + $0x330] sm:$0xff] }
  0x53   : > { %1006 = vmatprep.mubr.msk.f32.mxu1 %vm308_vm0, %v250_v56  ;;  %v282_v56 = vld [vmem:[%s1194_s24 + $0x348] sm:$0xff] }
  0x54   : > { %578 = vmatmul.mubr.f32.gmra.mxu0 %v195_v57  ;;  %v227_v57 = vld [vmem:[%s1194_s24 + $0x190] sm:$0xff] }
  0x55   : > { %980 = vmatprep.mubr.msk.f32.mxu0 %vm308_vm0, %v198_v58  ;;  %v230_v58 = vld [vmem:[%s1194_s24 + $0x1a8] sm:$0xff] }
  0x56   : > { %713 = vmatmul.mubr.f32.gmra.mxu1 %v249_v59  ;;  %v281_v59 = vld [vmem:[%s1194_s24 + $0x340] sm:$0xff] }
  0x57   : > { %1007 = vmatprep.mubr.msk.f32.mxu1 %vm308_vm0, %v252_v60  ;;  %v229_v60 = vld [vmem:[%s1194_s24 + $0x1a0] sm:$0xff] }
  0x58   : > { %583 = vmatmul.mubr.f32.gmra.mxu0 %v197_v61  ;;  %v1370_v61 = vld [vmem:[%s1542_s2] ss:$0 sm:$0xff] }
  0x59   : > { %981 = vmatprep.mubr.msk.f32.mxu0 %vm308_vm0, %v200_v62 }
  0x5a   : > { %718 = vmatmul.mubr.f32.gmra.mxu1 %v251_v63 }
  0x5b   : > { %1008 = vmatprep.mubr.msk.f32.mxu1 %vm308_vm0, %v254_v0 }
  0x5c   : > { %588 = vmatmul.mubr.f32.gmra.mxu0 %v199_v1 }
  0x5d   : > { %982 = vmatprep.mubr.msk.f32.mxu0 %vm308_vm0, %v202_v2 }
  0x5e   : > { %723 = vmatmul.mubr.f32.gmra.mxu1 %v253_v3 }
  0x5f   : > { %1009 = vmatprep.mubr.msk.f32.mxu1 %vm308_vm0, %v256_v4 }
  0x60   : > { %593 = vmatmul.mubr.f32.gmra.mxu0 %v201_v5 }
  0x61   : > { %983 = vmatprep.mubr.msk.f32.mxu0 %vm308_vm0, %v204_v6 }
  0x62   : > { %728 = vmatmul.mubr.f32.gmra.mxu1 %v255_v7 }
  0x63   : > { %1010 = vmatprep.mubr.msk.f32.mxu1 %vm308_vm0, %v258_v8 }
  0x64   : > { %598 = vmatmul.mubr.f32.gmra.mxu0 %v203_v9 }
  0x65   : > { %984 = vmatprep.mubr.msk.f32.mxu0 %vm308_vm0, %v206_v10 }
  0x66   : > { %733 = vmatmul.mubr.f32.gmra.mxu1 %v257_v11 }
  0x67   : > { %1011 = vmatprep.mubr.msk.f32.mxu1 %vm308_vm0, %v260_v12 }
  0x68   : > { %603 = vmatmul.mubr.f32.gmra.mxu0 %v205_v13 }
  0x69   : > { %985 = vmatprep.mubr.msk.f32.mxu0 %vm308_vm0, %v208_v14 }
  0x6a   : > { %738 = vmatmul.mubr.f32.gmra.mxu1 %v259_v15 }
  0x6b   : > { %1012 = vmatprep.mubr.msk.f32.mxu1 %vm308_vm0, %v262_v16 }
  0x6c   : > { %608 = vmatmul.mubr.f32.gmra.mxu0 %v207_v17 }
  0x6d   : > { %986 = vmatprep.mubr.msk.f32.mxu0 %vm308_vm0, %v210_v18 }
  0x6e   : > { %743 = vmatmul.mubr.f32.gmra.mxu1 %v261_v19 }
  0x6f   : > { %1013 = vmatprep.mubr.msk.f32.mxu1 %vm308_vm0, %v264_v20 }
  0x70   : > { %613 = vmatmul.mubr.f32.gmra.mxu0 %v209_v21 }
  0x71   : > { %987 = vmatprep.mubr.msk.f32.mxu0 %vm308_vm0, %v212_v22 }
  0x72   : > { %748 = vmatmul.mubr.f32.gmra.mxu1 %v263_v23 }
  0x73   : > { %1014 = vmatprep.mubr.msk.f32.mxu1 %vm308_vm0, %v266_v24 }
  0x74   : > { %618 = vmatmul.mubr.f32.gmra.mxu0 %v211_v25 }
  0x75   : > { %988 = vmatprep.mubr.msk.f32.mxu0 %vm308_vm0, %v214_v26 }
  0x76   : > { %753 = vmatmul.mubr.f32.gmra.mxu1 %v265_v27 }
  0x77   : > { %1015 = vmatprep.mubr.msk.f32.mxu1 %vm308_vm0, %v268_v28 }
  0x78   : > { %623 = vmatmul.mubr.f32.gmra.mxu0 %v213_v29 }
  0x79   : > { %989 = vmatprep.mubr.msk.f32.mxu0 %vm308_vm0, %v216_v30 }
  0x7a   : > { %758 = vmatmul.mubr.f32.gmra.mxu1 %v267_v31 }
  0x7b   : > { %1016 = vmatprep.mubr.msk.f32.mxu1 %vm308_vm0, %v270_v32 }
  0x7c   : > { %628 = vmatmul.mubr.f32.gmra.mxu0 %v215_v33 }
  0x7d   : > { %990 = vmatprep.mubr.msk.f32.mxu0 %vm308_vm0, %v218_v34 }
  0x7e   : > { %763 = vmatmul.mubr.f32.gmra.mxu1 %v269_v35 }
  0x7f   : > { %1017 = vmatprep.mubr.msk.f32.mxu1 %vm308_vm0, %v272_v36 }
  0x80   : > { %633 = vmatmul.mubr.f32.gmra.mxu0 %v217_v37 }
  0x81   : > { %991 = vmatprep.mubr.msk.f32.mxu0 %vm308_vm0, %v220_v38 }
  0x82   : > { %768 = vmatmul.mubr.f32.gmra.mxu1 %v271_v39 }
  0x83   : > { %1018 = vmatprep.mubr.msk.f32.mxu1 %vm308_vm0, %v274_v40 }
  0x84   : > { %638 = vmatmul.mubr.f32.gmra.mxu0 %v219_v41 }
  0x85   : > { %992 = vmatprep.mubr.msk.f32.mxu0 %vm308_vm0, %v222_v42 }
  0x86   : > { %773 = vmatmul.mubr.f32.gmra.mxu1 %v273_v43 }
  0x87   : > { %1019 = vmatprep.mubr.msk.f32.mxu1 %vm308_vm0, %v276_v44 }
  0x88   : > { %643 = vmatmul.mubr.f32.gmra.mxu0 %v221_v45 }
  0x89   : > { %993 = vmatprep.mubr.msk.f32.mxu0 %vm308_vm0, %v224_v46 }
  0x8a   : > { %778 = vmatmul.mubr.f32.gmra.mxu1 %v275_v47 }
  0x8b   : > { %1020 = vmatprep.mubr.msk.f32.mxu1 %vm308_vm0, %v278_v48 }
  0x8c   : > { %648 = vmatmul.mubr.f32.gmra.mxu0 %v223_v49 }
  0x8d   : > { %994 = vmatprep.mubr.msk.f32.mxu0 %vm308_vm0, %v226_v50 }
  0x8e   : > { %783 = vmatmul.mubr.f32.gmra.mxu1 %v277_v51 }
  0x8f   : > { %1021 = vmatprep.mubr.msk.f32.mxu1 %vm308_vm0, %v280_v52 }
  0x90   : > { %653 = vmatmul.mubr.f32.gmra.mxu0 %v225_v53 }
  0x91   : > { %995 = vmatprep.mubr.msk.f32.mxu0 %vm308_vm0, %v228_v54 }
  0x92   : > { %788 = vmatmul.mubr.f32.gmra.mxu1 %v279_v55 }
  0x93   : > { %1022 = vmatprep.mubr.msk.f32.mxu1 %vm308_vm0, %v282_v56 }
  0x94   : > { %658 = vmatmul.mubr.f32.gmra.mxu0 %v227_v57 }
  0x95   : > { %996 = vmatprep.mubr.msk.f32.mxu0 %vm308_vm0, %v230_v58 }
  0x96   : > { %793 = vmatmul.mubr.f32.gmra.mxu1 %v281_v59 }
  0x98   : > { %663 = vmatmul.mubr.f32.gmra.mxu0 %v229_v60 }
  0xf0   : > { %v534_v62 = vpop.f32.mrf.mxu0 }
  0xf1   : > { %v535_v63 = vadd.f32 %v1370_v61, %v534_v62 }
  0xf2   : > { %v536_v0 = vpop.f32.mrf.mxu0  ;;  %v669_v1 = vpop.f32.mrf.mxu1 }
  0xf3   : > { %v798_v2 = vmax.f32 %v535_v63, 0.0  ;;  %v670_v3 = vadd.f32 %v1370_v61, %v669_v1 }
  0xf4   : > { %v539_v4 = vpop.f32.mrf.mxu0  ;;  %v671_v5 = vpop.f32.mrf.mxu1 }
  0xf5   : > { %852 = vst.msk [vmem:[%s1377_s8] sm:$0xff] %vm851_vm1, %v798_v2  ;;  %v825_v6 = vmax.f32 %v670_v3, 0.0  ;;  %v540_v7 = vadd.f32 %v1370_v61, %v539_v4 }
  0xf6   : > { %v541_v8 = vpop.f32.mrf.mxu0  ;;  %v674_v9 = vpop.f32.mrf.mxu1 }
  0xf7   : > { %879 = vst.msk [vmem:[%s1377_s8 + $0xd8] sm:$0xff] %vm851_vm1, %v825_v6  ;;  %v799_v10 = vmax.f32 %v540_v7, 0.0  ;;  %v675_v11 = vadd.f32 %v1370_v61, %v674_v9 }
  0xf8   : > { %v544_v12 = vpop.f32.mrf.mxu0  ;;  %v676_v13 = vpop.f32.mrf.mxu1 }
  0xf9   : > { %853 = vst.msk [vmem:[%s1377_s8 + $0x8] sm:$0xff] %vm851_vm1, %v799_v10  ;;  %v826_v14 = vmax.f32 %v675_v11, 0.0  ;;  %v545_v15 = vadd.f32 %v1370_v61, %v544_v12 }
  0xfa   : > { %v546_v16 = vpop.f32.mrf.mxu0  ;;  %v679_v17 = vpop.f32.mrf.mxu1 }
  0xfb   : > { %880 = vst.msk [vmem:[%s1377_s8 + $0xe0] sm:$0xff] %vm851_vm1, %v826_v14  ;;  %v800_v18 = vmax.f32 %v545_v15, 0.0  ;;  %v680_v19 = vadd.f32 %v1370_v61, %v679_v17 }
  0xfc   : > { %v549_v20 = vpop.f32.mrf.mxu0  ;;  %v681_v21 = vpop.f32.mrf.mxu1 }
  0xfd   : > { %854 = vst.msk [vmem:[%s1377_s8 + $0x10] sm:$0xff] %vm851_vm1, %v800_v18  ;;  %v827_v22 = vmax.f32 %v680_v19, 0.0  ;;  %v550_v23 = vadd.f32 %v1370_v61, %v549_v20 }
  0xfe   : > { %v551_v24 = vpop.f32.mrf.mxu0  ;;  %v684_v25 = vpop.f32.mrf.mxu1 }
  0xff   : > { %881 = vst.msk [vmem:[%s1377_s8 + $0xe8] sm:$0xff] %vm851_vm1, %v827_v22  ;;  %v801_v26 = vmax.f32 %v550_v23, 0.0  ;;  %v685_v27 = vadd.f32 %v1370_v61, %v684_v25 }
 0x100   : > { %v554_v28 = vpop.f32.mrf.mxu0  ;;  %v686_v29 = vpop.f32.mrf.mxu1 }
 0x101   : > { %855 = vst.msk [vmem:[%s1377_s8 + $0x18] sm:$0xff] %vm851_vm1, %v801_v26  ;;  %v828_v30 = vmax.f32 %v685_v27, 0.0  ;;  %v555_v31 = vadd.f32 %v1370_v61, %v554_v28 }
 0x102   : > { %v556_v32 = vpop.f32.mrf.mxu0  ;;  %v689_v33 = vpop.f32.mrf.mxu1 }
 0x103   : > { %882 = vst.msk [vmem:[%s1377_s8 + $0xf0] sm:$0xff] %vm851_vm1, %v828_v30  ;;  %v802_v34 = vmax.f32 %v555_v31, 0.0  ;;  %v690_v35 = vadd.f32 %v1370_v61, %v689_v33 }
 0x104   : > { %v559_v36 = vpop.f32.mrf.mxu0  ;;  %v691_v37 = vpop.f32.mrf.mxu1 }
 0x105   : > { %856 = vst.msk [vmem:[%s1377_s8 + $0x20] sm:$0xff] %vm851_vm1, %v802_v34  ;;  %v829_v38 = vmax.f32 %v690_v35, 0.0  ;;  %v560_v39 = vadd.f32 %v1370_v61, %v559_v36 }
 0x106   : > { %v561_v40 = vpop.f32.mrf.mxu0  ;;  %v694_v41 = vpop.f32.mrf.mxu1 }
 0x107   : > { %883 = vst.msk [vmem:[%s1377_s8 + $0xf8] sm:$0xff] %vm851_vm1, %v829_v38  ;;  %v803_v42 = vmax.f32 %v560_v39, 0.0  ;;  %v695_v43 = vadd.f32 %v1370_v61, %v694_v41 }
 0x108   : > { %v564_v44 = vpop.f32.mrf.mxu0  ;;  %v696_v45 = vpop.f32.mrf.mxu1 }
 0x109   : > { %857 = vst.msk [vmem:[%s1377_s8 + $0x28] sm:$0xff] %vm851_vm1, %v803_v42  ;;  %v830_v46 = vmax.f32 %v695_v43, 0.0  ;;  %v565_v47 = vadd.f32 %v1370_v61, %v564_v44 }
 0x10a   : > { %v566_v48 = vpop.f32.mrf.mxu0  ;;  %v699_v49 = vpop.f32.mrf.mxu1 }
 0x10b   : > { %884 = vst.msk [vmem:[%s1377_s8 + $0x100] sm:$0xff] %vm851_vm1, %v830_v46  ;;  %v804_v50 = vmax.f32 %v565_v47, 0.0  ;;  %v700_v51 = vadd.f32 %v1370_v61, %v699_v49 }
 0x10c   : > { %v569_v52 = vpop.f32.mrf.mxu0  ;;  %v701_v53 = vpop.f32.mrf.mxu1 }
 0x10d   : > { %858 = vst.msk [vmem:[%s1377_s8 + $0x30] sm:$0xff] %vm851_vm1, %v804_v50  ;;  %v831_v54 = vmax.f32 %v700_v51, 0.0  ;;  %v570_v55 = vadd.f32 %v1370_v61, %v569_v52 }
 0x10e   : > { %v571_v56 = vpop.f32.mrf.mxu0  ;;  %v704_v57 = vpop.f32.mrf.mxu1 }
 0x10f   : > { %885 = vst.msk [vmem:[%s1377_s8 + $0x108] sm:$0xff] %vm851_vm1, %v831_v54  ;;  %v805_v58 = vmax.f32 %v570_v55, 0.0  ;;  %v705_v59 = vadd.f32 %v1370_v61, %v704_v57 }
 0x110   : > { %v574_v60 = vpop.f32.mrf.mxu0  ;;  %v706_v62 = vpop.f32.mrf.mxu1 }
 0x111   : > { %859 = vst.msk [vmem:[%s1377_s8 + $0x38] sm:$0xff] %vm851_vm1, %v805_v58  ;;  %v832_v63 = vmax.f32 %v705_v59, 0.0  ;;  %v575_v0 = vadd.f32 %v1370_v61, %v574_v60 }
 0x112   : > { %v576_v1 = vpop.f32.mrf.mxu0  ;;  %v709_v2 = vpop.f32.mrf.mxu1 }
 0x113   : > { %886 = vst.msk [vmem:[%s1377_s8 + $0x110] sm:$0xff] %vm851_vm1, %v832_v63  ;;  %v806_v3 = vmax.f32 %v575_v0, 0.0  ;;  %v710_v4 = vadd.f32 %v1370_v61, %v709_v2 }
 0x114   : > { %v579_v5 = vpop.f32.mrf.mxu0  ;;  %v711_v6 = vpop.f32.mrf.mxu1 }
 0x115   : > { %860 = vst.msk [vmem:[%s1377_s8 + $0x40] sm:$0xff] %vm851_vm1, %v806_v3  ;;  %v833_v7 = vmax.f32 %v710_v4, 0.0  ;;  %v580_v8 = vadd.f32 %v1370_v61, %v579_v5 }
 0x116   : > { %v581_v9 = vpop.f32.mrf.mxu0  ;;  %v714_v10 = vpop.f32.mrf.mxu1 }
 0x117   : > { %887 = vst.msk [vmem:[%s1377_s8 + $0x118] sm:$0xff] %vm851_vm1, %v833_v7  ;;  %v807_v11 = vmax.f32 %v580_v8, 0.0  ;;  %v715_v12 = vadd.f32 %v1370_v61, %v714_v10 }
 0x118   : > { %v584_v13 = vpop.f32.mrf.mxu0  ;;  %v716_v14 = vpop.f32.mrf.mxu1 }
 0x119   : > { %861 = vst.msk [vmem:[%s1377_s8 + $0x48] sm:$0xff] %vm851_vm1, %v807_v11  ;;  %v834_v15 = vmax.f32 %v715_v12, 0.0  ;;  %v585_v16 = vadd.f32 %v1370_v61, %v584_v13 }
 0x11a   : > { %v586_v17 = vpop.f32.mrf.mxu0  ;;  %v719_v18 = vpop.f32.mrf.mxu1 }
 0x11b   : > { %888 = vst.msk [vmem:[%s1377_s8 + $0x120] sm:$0xff] %vm851_vm1, %v834_v15  ;;  %v808_v19 = vmax.f32 %v585_v16, 0.0  ;;  %v720_v20 = vadd.f32 %v1370_v61, %v719_v18 }
 0x11c   : > { %v589_v21 = vpop.f32.mrf.mxu0  ;;  %v721_v22 = vpop.f32.mrf.mxu1 }
 0x11d   : > { %862 = vst.msk [vmem:[%s1377_s8 + $0x50] sm:$0xff] %vm851_vm1, %v808_v19  ;;  %v835_v23 = vmax.f32 %v720_v20, 0.0  ;;  %v590_v24 = vadd.f32 %v1370_v61, %v589_v21 }
 0x11e   : > { %v591_v25 = vpop.f32.mrf.mxu0  ;;  %v724_v26 = vpop.f32.mrf.mxu1 }
 0x11f   : > { %889 = vst.msk [vmem:[%s1377_s8 + $0x128] sm:$0xff] %vm851_vm1, %v835_v23  ;;  %v809_v27 = vmax.f32 %v590_v24, 0.0  ;;  %v725_v28 = vadd.f32 %v1370_v61, %v724_v26 }
 0x120   : > { %v594_v29 = vpop.f32.mrf.mxu0  ;;  %v726_v30 = vpop.f32.mrf.mxu1 }
 0x121   : > { %863 = vst.msk [vmem:[%s1377_s8 + $0x58] sm:$0xff] %vm851_vm1, %v809_v27  ;;  %v836_v31 = vmax.f32 %v725_v28, 0.0  ;;  %v595_v32 = vadd.f32 %v1370_v61, %v594_v29 }
 0x122   : > { %v596_v33 = vpop.f32.mrf.mxu0  ;;  %v729_v34 = vpop.f32.mrf.mxu1 }
 0x123   : > { %890 = vst.msk [vmem:[%s1377_s8 + $0x130] sm:$0xff] %vm851_vm1, %v836_v31  ;;  %v810_v35 = vmax.f32 %v595_v32, 0.0  ;;  %v730_v36 = vadd.f32 %v1370_v61, %v729_v34 }
 0x124   : > { %v599_v37 = vpop.f32.mrf.mxu0  ;;  %v731_v38 = vpop.f32.mrf.mxu1 }
 0x125   : > { %864 = vst.msk [vmem:[%s1377_s8 + $0x60] sm:$0xff] %vm851_vm1, %v810_v35  ;;  %v837_v39 = vmax.f32 %v730_v36, 0.0  ;;  %v600_v40 = vadd.f32 %v1370_v61, %v599_v37 }
 0x126   : > { %v601_v41 = vpop.f32.mrf.mxu0  ;;  %v734_v42 = vpop.f32.mrf.mxu1 }
 0x127   : > { %891 = vst.msk [vmem:[%s1377_s8 + $0x138] sm:$0xff] %vm851_vm1, %v837_v39  ;;  %v811_v43 = vmax.f32 %v600_v40, 0.0  ;;  %v735_v44 = vadd.f32 %v1370_v61, %v734_v42 }
 0x128   : > { %v604_v45 = vpop.f32.mrf.mxu0  ;;  %v736_v46 = vpop.f32.mrf.mxu1 }
 0x129   : > { %865 = vst.msk [vmem:[%s1377_s8 + $0x68] sm:$0xff] %vm851_vm1, %v811_v43  ;;  %v838_v47 = vmax.f32 %v735_v44, 0.0  ;;  %v605_v48 = vadd.f32 %v1370_v61, %v604_v45 }
 0x12a   : > { %v606_v49 = vpop.f32.mrf.mxu0  ;;  %v739_v50 = vpop.f32.mrf.mxu1 }
 0x12b   : > { %892 = vst.msk [vmem:[%s1377_s8 + $0x140] sm:$0xff] %vm851_vm1, %v838_v47  ;;  %v812_v51 = vmax.f32 %v605_v48, 0.0  ;;  %v740_v52 = vadd.f32 %v1370_v61, %v739_v50 }
 0x12c   : > { %v609_v53 = vpop.f32.mrf.mxu0  ;;  %v741_v54 = vpop.f32.mrf.mxu1 }
 0x12d   : > { %866 = vst.msk [vmem:[%s1377_s8 + $0x70] sm:$0xff] %vm851_vm1, %v812_v51  ;;  %v839_v55 = vmax.f32 %v740_v52, 0.0  ;;  %v610_v56 = vadd.f32 %v1370_v61, %v609_v53 }
 0x12e   : > { %v611_v57 = vpop.f32.mrf.mxu0  ;;  %v744_v58 = vpop.f32.mrf.mxu1 }
 0x12f   : > { %893 = vst.msk [vmem:[%s1377_s8 + $0x148] sm:$0xff] %vm851_vm1, %v839_v55  ;;  %v813_v59 = vmax.f32 %v610_v56, 0.0  ;;  %v745_v60 = vadd.f32 %v1370_v61, %v744_v58 }
 0x130   : > { %v614_v62 = vpop.f32.mrf.mxu0  ;;  %v746_v63 = vpop.f32.mrf.mxu1 }
 0x131   : > { %867 = vst.msk [vmem:[%s1377_s8 + $0x78] sm:$0xff] %vm851_vm1, %v813_v59  ;;  %v840_v0 = vmax.f32 %v745_v60, 0.0  ;;  %v615_v1 = vadd.f32 %v1370_v61, %v614_v62 }
 0x132   : > { %v616_v2 = vpop.f32.mrf.mxu0  ;;  %v749_v3 = vpop.f32.mrf.mxu1 }
 0x133   : > { %894 = vst.msk [vmem:[%s1377_s8 + $0x150] sm:$0xff] %vm851_vm1, %v840_v0  ;;  %v814_v4 = vmax.f32 %v615_v1, 0.0  ;;  %v750_v5 = vadd.f32 %v1370_v61, %v749_v3 }
 0x134   : > { %v619_v6 = vpop.f32.mrf.mxu0  ;;  %v751_v7 = vpop.f32.mrf.mxu1 }
 0x135   : > { %868 = vst.msk [vmem:[%s1377_s8 + $0x80] sm:$0xff] %vm851_vm1, %v814_v4  ;;  %v841_v8 = vmax.f32 %v750_v5, 0.0  ;;  %v620_v9 = vadd.f32 %v1370_v61, %v619_v6 }
 0x136   : > { %v621_v10 = vpop.f32.mrf.mxu0  ;;  %v754_v11 = vpop.f32.mrf.mxu1 }
 0x137   : > { %895 = vst.msk [vmem:[%s1377_s8 + $0x158] sm:$0xff] %vm851_vm1, %v841_v8  ;;  %v815_v12 = vmax.f32 %v620_v9, 0.0  ;;  %v755_v13 = vadd.f32 %v1370_v61, %v754_v11 }
 0x138   : > { %v624_v14 = vpop.f32.mrf.mxu0  ;;  %v756_v15 = vpop.f32.mrf.mxu1 }
 0x139   : > { %869 = vst.msk [vmem:[%s1377_s8 + $0x88] sm:$0xff] %vm851_vm1, %v815_v12  ;;  %v842_v16 = vmax.f32 %v755_v13, 0.0  ;;  %v625_v17 = vadd.f32 %v1370_v61, %v624_v14 }
 0x13a   : > { %v626_v18 = vpop.f32.mrf.mxu0  ;;  %v759_v19 = vpop.f32.mrf.mxu1 }
 0x13b   : > { %896 = vst.msk [vmem:[%s1377_s8 + $0x160] sm:$0xff] %vm851_vm1, %v842_v16  ;;  %v816_v20 = vmax.f32 %v625_v17, 0.0  ;;  %v760_v21 = vadd.f32 %v1370_v61, %v759_v19 }
 0x13c   : > { %v629_v22 = vpop.f32.mrf.mxu0  ;;  %v761_v23 = vpop.f32.mrf.mxu1 }
 0x13d   : > { %870 = vst.msk [vmem:[%s1377_s8 + $0x90] sm:$0xff] %vm851_vm1, %v816_v20  ;;  %v843_v24 = vmax.f32 %v760_v21, 0.0  ;;  %v630_v25 = vadd.f32 %v1370_v61, %v629_v22 }
 0x13e   : > { %v631_v26 = vpop.f32.mrf.mxu0  ;;  %v764_v27 = vpop.f32.mrf.mxu1 }
 0x13f   : > { %897 = vst.msk [vmem:[%s1377_s8 + $0x168] sm:$0xff] %vm851_vm1, %v843_v24  ;;  %v817_v28 = vmax.f32 %v630_v25, 0.0  ;;  %v765_v29 = vadd.f32 %v1370_v61, %v764_v27 }
 0x140   : > { %v634_v30 = vpop.f32.mrf.mxu0  ;;  %v766_v31 = vpop.f32.mrf.mxu1 }
 0x141   : > { %871 = vst.msk [vmem:[%s1377_s8 + $0x98] sm:$0xff] %vm851_vm1, %v817_v28  ;;  %v844_v32 = vmax.f32 %v765_v29, 0.0  ;;  %v635_v33 = vadd.f32 %v1370_v61, %v634_v30 }
 0x142   : > { %v636_v34 = vpop.f32.mrf.mxu0  ;;  %v769_v35 = vpop.f32.mrf.mxu1 }
 0x143   : > { %898 = vst.msk [vmem:[%s1377_s8 + $0x170] sm:$0xff] %vm851_vm1, %v844_v32  ;;  %v818_v36 = vmax.f32 %v635_v33, 0.0  ;;  %v770_v37 = vadd.f32 %v1370_v61, %v769_v35 }
 0x144   : > { %v639_v38 = vpop.f32.mrf.mxu0  ;;  %v771_v39 = vpop.f32.mrf.mxu1 }
 0x145   : > { %872 = vst.msk [vmem:[%s1377_s8 + $0xa0] sm:$0xff] %vm851_vm1, %v818_v36  ;;  %v845_v40 = vmax.f32 %v770_v37, 0.0  ;;  %v640_v41 = vadd.f32 %v1370_v61, %v639_v38 }
 0x146   : > { %v641_v42 = vpop.f32.mrf.mxu0  ;;  %v774_v43 = vpop.f32.mrf.mxu1 }
 0x147   : > { %899 = vst.msk [vmem:[%s1377_s8 + $0x178] sm:$0xff] %vm851_vm1, %v845_v40  ;;  %v819_v44 = vmax.f32 %v640_v41, 0.0  ;;  %v775_v45 = vadd.f32 %v1370_v61, %v774_v43 }
 0x148   : > { %v644_v46 = vpop.f32.mrf.mxu0  ;;  %v776_v47 = vpop.f32.mrf.mxu1 }
 0x149   : > { %873 = vst.msk [vmem:[%s1377_s8 + $0xa8] sm:$0xff] %vm851_vm1, %v819_v44  ;;  %v846_v48 = vmax.f32 %v775_v45, 0.0  ;;  %v645_v49 = vadd.f32 %v1370_v61, %v644_v46 }
 0x14a   : > { %v646_v50 = vpop.f32.mrf.mxu0  ;;  %v779_v51 = vpop.f32.mrf.mxu1 }
 0x14b   : > { %900 = vst.msk [vmem:[%s1377_s8 + $0x180] sm:$0xff] %vm851_vm1, %v846_v48  ;;  %v820_v52 = vmax.f32 %v645_v49, 0.0  ;;  %v780_v53 = vadd.f32 %v1370_v61, %v779_v51 }
 0x14c   : > { %v649_v54 = vpop.f32.mrf.mxu0  ;;  %v781_v55 = vpop.f32.mrf.mxu1 }
 0x14d   : > { %874 = vst.msk [vmem:[%s1377_s8 + $0xb0] sm:$0xff] %vm851_vm1, %v820_v52  ;;  %v847_v56 = vmax.f32 %v780_v53, 0.0  ;;  %v650_v57 = vadd.f32 %v1370_v61, %v649_v54 }
 0x14e   : > { %v651_v58 = vpop.f32.mrf.mxu0  ;;  %v784_v59 = vpop.f32.mrf.mxu1 }
 0x14f   : > { %901 = vst.msk [vmem:[%s1377_s8 + $0x188] sm:$0xff] %vm851_vm1, %v847_v56  ;;  %v821_v60 = vmax.f32 %v650_v57, 0.0  ;;  %v785_v62 = vadd.f32 %v1370_v61, %v784_v59 }
 0x150   : > { %v654_v63 = vpop.f32.mrf.mxu0  ;;  %v786_v0 = vpop.f32.mrf.mxu1 }
 0x151   : > { %875 = vst.msk [vmem:[%s1377_s8 + $0xb8] sm:$0xff] %vm851_vm1, %v821_v60  ;;  %v848_v1 = vmax.f32 %v785_v62, 0.0  ;;  %v655_v2 = vadd.f32 %v1370_v61, %v654_v63 }
 0x152   : > { %v656_v3 = vpop.f32.mrf.mxu0  ;;  %v789_v4 = vpop.f32.mrf.mxu1 }
 0x153   : > { %902 = vst.msk [vmem:[%s1377_s8 + $0x190] sm:$0xff] %vm851_vm1, %v848_v1  ;;  %v822_v5 = vmax.f32 %v655_v2, 0.0  ;;  %v790_v6 = vadd.f32 %v1370_v61, %v789_v4 }
 0x154   : > { %v659_v7 = vpop.f32.mrf.mxu0  ;;  %v791_v8 = vpop.f32.mrf.mxu1 }
 0x155   : > { %876 = vst.msk [vmem:[%s1377_s8 + $0xc0] sm:$0xff] %vm851_vm1, %v822_v5  ;;  %v849_v9 = vmax.f32 %v790_v6, 0.0  ;;  %v660_v10 = vadd.f32 %v1370_v61, %v659_v7 }
 0x156   : > { %v661_v11 = vpop.f32.mrf.mxu0  ;;  %v794_v12 = vpop.f32.mrf.mxu1 }
 0x157   : > { %903 = vst.msk [vmem:[%s1377_s8 + $0x198] sm:$0xff] %vm851_vm1, %v849_v9  ;;  %v823_v13 = vmax.f32 %v660_v10, 0.0  ;;  %v795_v14 = vadd.f32 %v1370_v61, %v794_v12 }
 0x158   : > { %v664_v15 = vpop.f32.mrf.mxu0  ;;  %v796_v16 = vpop.f32.mrf.mxu1 }
 0x159   : > { %877 = vst.msk [vmem:[%s1377_s8 + $0xc8] sm:$0xff] %vm851_vm1, %v823_v13  ;;  %v850_v17 = vmax.f32 %v795_v14, 0.0  ;;  %v665_v18 = vadd.f32 %v1370_v61, %v664_v15 }
 0x15a   : > { %v666_v19 = vpop.f32.mrf.mxu0 }
 0x15b   : > { %904 = vst.msk [vmem:[%s1377_s8 + $0x1a0] sm:$0xff] %vm851_vm1, %v850_v17  ;;  %v824_v20 = vmax.f32 %v665_v18, 0.0 }
 0x15d   : > { %878 = vst.msk [vmem:[%s1377_s8 + $0xd0] sm:$0xff] %vm851_vm1, %v824_v20 }
 0x15e PF: > { %s13_s12 = sadd.s32 1, %s1077_s12  }
 0x15f   : > { %p10_p4 = scmp.ge.s32.totalorder %s13_s12, 5  }
 0x161   :  { %12 = sbr.rel (!%p10_p4) target bundleno = 1 (0x1), region = 62 }

// kernel: japaness_discriminator_forward.8
= control target key start
LH: loop header
LB: loop body
LE: loop exit
PB: predicated region body
PF: predicated region fallthrough
CT: control target
= control target key end

     0   :  { %s1506_s12 = smov 0   ;;  %s2217_s0 = inlined_call_operand.vmem [shape: f32[1080,288], index: 0, kind: input, shape index: {}]   ;;  %s2218_s1 = inlined_call_operand.vmem [shape: f32[288,64], index: 1, kind: input, shape index: {}]   ;;  %s2219_s2 = inlined_call_operand.vmem [shape: f32[1,64], index: 2, kind: input, shape index: {}]   ;;  %s2220_s3 = inlined_call_operand.vmem [shape: f32[1080,64], index: 3, kind: output, shape index: {}]  }
   0x1 LB: > { %s1218_s13 = sadd.s32 4294967295, %s1482_s12   ;;  %p1222_p0 = scmp.ge.s32.totalorder %s1482_s12, 1  ;;  %s1482_s12 = sphi %s1506_s12, %s13_s12  }
   0x2   : > { %p139_p1 = scmp.lt.s32.totalorder %s1482_s12, 4 }
   0x4   : > { %p140_p2 = pnand %p1222_p0, %p139_p1 }
   0x5   : > { %s164_s16 = smul.u32 (!%p140_p2), 45, %s1218_s13 }
   0x6   : > { %143 = sbr.rel (%p140_p2) target bundleno = 452 (0x1c4), region = 32 }
   0x7   : > { %p165_p3 = scmp.lt.s32.totalorder (!%p140_p2), %s164_s16, 134 }
   0xb   : > { %v327_v0 = vld [vmem:[%s2218_s1 + $0x78] sm:$0xff]  ;;  %v1484_v1 = vmov 0.0   ;;  %v326_v2 = vld [vmem:[%s2218_s1 + $0x70] sm:$0xff]  ;;  %vm1485_vm0 = vmmov 0   ;;  %v325_v3 = vld [vmem:[%s2218_s1 + $0x68] sm:$0xff]  ;;  %s2222_s16 = smov (!%p165_p3, %s164_s16), 134 }
   0xc   : > { %491 = vmatprep.subr.mxu0 %v1484_v1  ;;  %1322 = vmatprep.subr.mxu1 %v1484_v1  ;;  %v324_v4 = vld [vmem:[%s2218_s1 + $0x60] sm:$0xff]  ;;  %s1465_s23 = smul.u32 24, %s2222_s16  ;;  %v323_v5 = vld [vmem:[%s2218_s1 + $0x58] sm:$0xff]  ;;  %v322_v6 = vld [vmem:[%s2218_s1 + $0x50] sm:$0xff]  ;;  %vm355_vm1 = vcmask 261120   ;;  %vm1116_vm2 = vcmask 523264  }
   0xd   : > { %492 = vmatpush1.msra.mxu0 %v327_v0  ;;  %1330 = vmatprep.mubr.msk.f32.mxu1 %vm1485_vm0, %v1484_v1  ;;  %v347_v7 = vld [vmem:[%s2218_s1 + $0x118] sm:$0xff]  ;;  %v346_v8 = vld [vmem:[%s2218_s1 + $0x110] sm:$0xff]  ;;  %v321_v9 = vld [vmem:[%s2218_s1 + $0x48] sm:$0xff] }
   0xe   : > { %493 = vmatprep.subr.mxu0 %v1484_v1  ;;  %1323 = vmatpush3.msra.mxu1 %v347_v7  ;;  %s1552_s7 = scalar_lea.vmem %s2217_s0, %s1465_s23  ;;  %v345_v10 = vld [vmem:[%s2218_s1 + $0x108] sm:$0xff]  ;;  %v320_v11 = vld [vmem:[%s2218_s1 + $0x40] sm:$0xff]  ;;  %v319_v14 = vld [vmem:[%s2218_s1 + $0x38] sm:$0xff] }
   0xf   : > { %494 = vmatpush1.msra.mxu0 %v326_v2  ;;  %1324 = vmatprep.subr.mxu1 %v1484_v1  ;;  %v178_v12 = vld [vmem:[%s1552_s7 + $0x8] sm:$0xff]  ;;  %v344_v13 = vld [vmem:[%s2218_s1 + $0x100] sm:$0xff]  ;;  %v179_v15 = vld [vmem:[%s1552_s7 + $0x10] sm:$0xff] }
  0x10   : > { %495 = vmatprep.subr.mxu0 %v1484_v1  ;;  %1325 = vmatpush3.msra.mxu1 %v346_v8  ;;  %v318_v16 = vld [vmem:[%s2218_s1 + $0x30] sm:$0xff]  ;;  %v317_v17 = vld [vmem:[%s2218_s1 + $0x28] sm:$0xff]  ;;  %v316_v19 = vld [vmem:[%s2218_s1 + $0x20] sm:$0xff] }
  0x11   : > { %496 = vmatpush1.msra.mxu0 %v325_v3  ;;  %1326 = vmatprep.subr.mxu1 %v1484_v1  ;;  %v182_v18 = vld [vmem:[%s1552_s7 + $0x28] sm:$0xff]  ;;  %v315_v20 = vld [vmem:[%s2218_s1 + $0x18] sm:$0xff]  ;;  %v185_v21 = vld [vmem:[%s1552_s7 + $0x40] sm:$0xff] }
  0x12   : > { %497 = vmatprep.subr.mxu0 %v1484_v1  ;;  %1327 = vmatpush3.msra.mxu1 %v345_v10  ;;  %v314_v22 = vld [vmem:[%s2218_s1 + $0x10] sm:$0xff]  ;;  %v313_v23 = vld [vmem:[%s2218_s1 + $0x8] sm:$0xff]  ;;  %v188_v24 = vld [vmem:[%s1552_s7 + $0x58] sm:$0xff] }
  0x13   : > { %498 = vmatpush1.msra.mxu0 %v324_v4  ;;  %1328 = vmatprep.subr.mxu1 %v1484_v1  ;;  %v312_v25 = vld [vmem:[%s2218_s1] sm:$0xff]  ;;  %v343_v26 = vld [vmem:[%s2218_s1 + $0xf8] sm:$0xff]  ;;  %v191_v27 = vld [vmem:[%s1552_s7 + $0x70] sm:$0xff] }
  0x14   : > { %499 = vmatprep.subr.mxu0 %v1484_v1  ;;  %555 = vmatprep.mubr.f32.mxu0 %v178_v12  ;;  %v342_v28 = vld [vmem:[%s2218_s1 + $0xf0] sm:$0xff]  ;;  %v341_v29 = vld [vmem:[%s2218_s1 + $0xe8] sm:$0xff]  ;;  %v340_v31 = vld [vmem:[%s2218_s1 + $0xe0] sm:$0xff] }
  0x15   : > { %500 = vmatpush1.msra.mxu0 %v323_v5  ;;  %1329 = vmatpush3.msra.mxu1 %v344_v13  ;;  %v194_v30 = vld [vmem:[%s1552_s7 + $0x88] sm:$0xff]  ;;  %v339_v32 = vld [vmem:[%s2218_s1 + $0xd8] sm:$0xff]  ;;  %v197_v33 = vld [vmem:[%s1552_s7 + $0xa0] sm:$0xff] }
  0x16   : > { %501 = vmatprep.subr.mxu0 %v1484_v1  ;;  %1331 = vmatmul.mubr.msk.f32.vlgmr.msra.gmra.mxu1 %vm355_vm1, %v179_v15  ;;  %v338_v34 = vld [vmem:[%s2218_s1 + $0xd0] sm:$0xff]  ;;  %v337_v35 = vld [vmem:[%s2218_s1 + $0xc8] sm:$0xff]  ;;  %v200_v36 = vld [vmem:[%s1552_s7 + $0xb8] sm:$0xff] }
  0x17   : > { %502 = vmatpush1.msra.mxu0 %v322_v6  ;;  %1333 = vmatprep.mubr.msk.f32.mxu1 %vm1485_vm0, %v1484_v1  ;;  %v336_v37 = vld [vmem:[%s2218_s1 + $0xc0] sm:$0xff]  ;;  %v335_v38 = vld [vmem:[%s2218_s1 + $0xb8] sm:$0xff]  ;;  %v203_v39 = vld [vmem:[%s1552_s7 + $0xd0] sm:$0xff] }
  0x18   : > { %503 = vmatprep.subr.mxu0 %v1484_v1  ;;  %v334_v40 = vld [vmem:[%s2218_s1 + $0xb0] sm:$0xff]  ;;  %v333_v41 = vld [vmem:[%s2218_s1 + $0xa8] sm:$0xff]  ;;  %v332_v43 = vld [vmem:[%s2218_s1 + $0xa0] sm:$0xff] }
  0x19   : > { %504 = vmatpush1.msra.mxu0 %v321_v9  ;;  %v206_v42 = vld [vmem:[%s1552_s7 + $0xe8] sm:$0xff]  ;;  %v331_v44 = vld [vmem:[%s2218_s1 + $0x98] sm:$0xff]  ;;  %v209_v45 = vld [vmem:[%s1552_s7 + $0x100] sm:$0xff] }
  0x1a   : > { %505 = vmatprep.subr.mxu0 %v1484_v1  ;;  %1334 = vmatmul.mubr.msk.f32.gmra.mxu1 %vm355_vm1, %v182_v18  ;;  %v330_v46 = vld [vmem:[%s2218_s1 + $0x90] sm:$0xff]  ;;  %v329_v47 = vld [vmem:[%s2218_s1 + $0x88] sm:$0xff]  ;;  %v212_v48 = vld [vmem:[%s1552_s7 + $0x118] sm:$0xff] }
  0x1b   : > { %506 = vmatpush1.msra.mxu0 %v320_v11  ;;  %1336 = vmatprep.mubr.msk.f32.mxu1 %vm1485_vm0, %v1484_v1  ;;  %v328_v49 = vld [vmem:[%s2218_s1 + $0x80] sm:$0xff]  ;;  %v215_v52 = vld [vmem:[%s1552_s7 + $0x130] sm:$0xff]  ;;  %v180_v53 = vld [vmem:[%s1552_s7 + $0x18] sm:$0xff] }
  0x1c   : > { %507 = vmatprep.subr.mxu0 %v1484_v1  ;;  %v177_v50 = vld [vmem:[%s1552_s7] sm:$0xff]  ;;  %v184_v54 = vld [vmem:[%s1552_s7 + $0x38] sm:$0xff]  ;;  %v218_v55 = vld [vmem:[%s1552_s7 + $0x148] sm:$0xff] }
  0x1d   : > { %508 = vmatpush1.msra.mxu0 %v319_v14  ;;  %v181_v51 = vld [vmem:[%s1552_s7 + $0x20] sm:$0xff]  ;;  %v183_v56 = vld [vmem:[%s1552_s7 + $0x30] sm:$0xff]  ;;  %v186_v59 = vld [vmem:[%s1552_s7 + $0x48] sm:$0xff] }
  0x1e   : > { %509 = vmatprep.subr.mxu0 %v1484_v1  ;;  %1337 = vmatmul.mubr.msk.f32.gmra.mxu1 %vm355_vm1, %v185_v21  ;;  %v187_v57 = vld [vmem:[%s1552_s7 + $0x50] sm:$0xff]  ;;  %v221_v58 = vld [vmem:[%s1552_s7 + $0x160] sm:$0xff]  ;;  %v190_v60 = vld [vmem:[%s1552_s7 + $0x68] sm:$0xff] }
  0x1f   : > { %510 = vmatpush1.msra.mxu0 %v318_v16  ;;  %1339 = vmatprep.mubr.msk.f32.mxu1 %vm1485_vm0, %v1484_v1  ;;  %v224_v61 = vld [vmem:[%s1552_s7 + $0x178] sm:$0xff]  ;;  %v189_v62 = vld [vmem:[%s1552_s7 + $0x60] sm:$0xff]  ;;  %v227_v0 = vld [vmem:[%s1552_s7 + $0x190] sm:$0xff] }
  0x20   : > { %511 = vmatprep.subr.mxu0 %v1484_v1  ;;  %v193_v63 = vld [vmem:[%s1552_s7 + $0x80] sm:$0xff]  ;;  %v192_v2 = vld [vmem:[%s1552_s7 + $0x78] sm:$0xff]  ;;  %v230_v4 = vld [vmem:[%s1552_s7 + $0x1a8] sm:$0xff] }
  0x21   : > { %512 = vmatpush1.msra.mxu0 %v317_v17  ;;  %v196_v3 = vld [vmem:[%s1552_s7 + $0x98] sm:$0xff]  ;;  %v195_v5 = vld [vmem:[%s1552_s7 + $0x90] sm:$0xff]  ;;  %v233_v7 = vld [vmem:[%s1552_s7 + $0x1c0] sm:$0xff] }
  0x22   : > { %513 = vmatprep.subr.mxu0 %v1484_v1  ;;  %1340 = vmatmul.mubr.msk.f32.gmra.mxu1 %vm355_vm1, %v188_v24  ;;  %v199_v6 = vld [vmem:[%s1552_s7 + $0xb0] sm:$0xff]  ;;  %v198_v8 = vld [vmem:[%s1552_s7 + $0xa8] sm:$0xff]  ;;  %v236_v10 = vld [vmem:[%s1552_s7 + $0x1d8] sm:$0xff] }
  0x23   : > { %514 = vmatpush1.msra.mxu0 %v316_v19  ;;  %1342 = vmatprep.mubr.msk.f32.mxu1 %vm1485_vm0, %v1484_v1  ;;  %v202_v9 = vld [vmem:[%s1552_s7 + $0xc8] sm:$0xff]  ;;  %v201_v11 = vld [vmem:[%s1552_s7 + $0xc0] sm:$0xff]  ;;  %v239_v13 = vld [vmem:[%s1552_s7 + $0x1f0] sm:$0xff] }
  0x24   : > { %515 = vmatprep.subr.mxu0 %v1484_v1  ;;  %v205_v12 = vld [vmem:[%s1552_s7 + $0xe0] sm:$0xff]  ;;  %v204_v14 = vld [vmem:[%s1552_s7 + $0xd8] sm:$0xff]  ;;  %v242_v16 = vld [vmem:[%s1552_s7 + $0x208] sm:$0xff] }
  0x25   : > { %516 = vmatpush1.msra.mxu0 %v315_v20  ;;  %v208_v15 = vld [vmem:[%s1552_s7 + $0xf8] sm:$0xff]  ;;  %v207_v17 = vld [vmem:[%s1552_s7 + $0xf0] sm:$0xff]  ;;  %v245_v19 = vld [vmem:[%s1552_s7 + $0x220] sm:$0xff] }
  0x26   : > { %517 = vmatprep.subr.mxu0 %v1484_v1  ;;  %1343 = vmatmul.mubr.msk.f32.gmra.mxu1 %vm355_vm1, %v191_v27  ;;  %v211_v18 = vld [vmem:[%s1552_s7 + $0x110] sm:$0xff]  ;;  %v210_v20 = vld [vmem:[%s1552_s7 + $0x108] sm:$0xff]  ;;  %v217_v24 = vld [vmem:[%s1552_s7 + $0x140] sm:$0xff] }
  0x27   : > { %518 = vmatpush1.msra.mxu0 %v314_v22  ;;  %1345 = vmatprep.mubr.msk.f32.mxu1 %vm1485_vm0, %v1484_v1  ;;  %v214_v21 = vld [vmem:[%s1552_s7 + $0x128] sm:$0xff]  ;;  %v248_v22 = vld [vmem:[%s1552_s7 + $0x238] sm:$0xff] }
  0x28   : > { %519 = vmatprep.subr.mxu0 %v1484_v1  ;;  %v220_v27 = vld [vmem:[%s1552_s7 + $0x158] sm:$0xff] }
  0x29   : > { %520 = vmatpush1.msra.mxu0 %v313_v23  ;;  %v213_v23 = vld [vmem:[%s1552_s7 + $0x120] sm:$0xff] }
  0x2a   : > { %521 = vmatprep.subr.mxu0 %v1484_v1  ;;  %1346 = vmatmul.mubr.msk.f32.gmra.mxu1 %vm355_vm1, %v194_v30  ;;  %v223_v30 = vld [vmem:[%s1552_s7 + $0x170] sm:$0xff] }
  0x2b   : > { %522 = vmatpush1.msra.mxu0 %v312_v25  ;;  %1348 = vmatprep.mubr.msk.f32.mxu1 %vm1485_vm0, %v1484_v1  ;;  %v251_v25 = vld [vmem:[%s1552_s7 + $0x250] sm:$0xff] }
  0x2c   : > { %523 = vmatprep.subr.mxu0 %v1484_v1 }
  0x2d   : > { %524 = vmatpush2.msra.mxu0 %v343_v26  ;;  %v216_v26 = vld [vmem:[%s1552_s7 + $0x138] sm:$0xff] }
  0x2e   : > { %525 = vmatprep.subr.mxu0 %v1484_v1  ;;  %1349 = vmatmul.mubr.msk.f32.gmra.mxu1 %vm355_vm1, %v197_v33  ;;  %v226_v33 = vld [vmem:[%s1552_s7 + $0x188] sm:$0xff] }
  0x2f   : > { %526 = vmatpush2.msra.mxu0 %v342_v28  ;;  %1351 = vmatprep.mubr.msk.f32.mxu1 %vm1485_vm0, %v1484_v1  ;;  %v254_v28 = vld [vmem:[%s1552_s7 + $0x268] sm:$0xff] }
  0x30   : > { %527 = vmatprep.subr.mxu0 %v1484_v1 }
  0x31   : > { %528 = vmatpush2.msra.mxu0 %v341_v29  ;;  %v219_v29 = vld [vmem:[%s1552_s7 + $0x150] sm:$0xff] }
  0x32   : > { %529 = vmatprep.subr.mxu0 %v1484_v1  ;;  %1352 = vmatmul.mubr.msk.f32.gmra.mxu1 %vm355_vm1, %v200_v36  ;;  %v229_v36 = vld [vmem:[%s1552_s7 + $0x1a0] sm:$0xff] }
  0x33   : > { %530 = vmatpush2.msra.mxu0 %v340_v31  ;;  %1354 = vmatprep.mubr.msk.f32.mxu1 %vm1485_vm0, %v1484_v1  ;;  %v257_v31 = vld [vmem:[%s1552_s7 + $0x280] sm:$0xff] }
  0x34   : > { %531 = vmatprep.subr.mxu0 %v1484_v1 }
  0x35   : > { %532 = vmatpush2.msra.mxu0 %v339_v32  ;;  %v222_v32 = vld [vmem:[%s1552_s7 + $0x168] sm:$0xff] }
  0x36   : > { %533 = vmatprep.subr.mxu0 %v1484_v1  ;;  %1355 = vmatmul.mubr.msk.f32.gmra.mxu1 %vm355_vm1, %v203_v39  ;;  %v232_v39 = vld [vmem:[%s1552_s7 + $0x1b8] sm:$0xff] }
  0x37   : > { %534 = vmatpush2.msra.mxu0 %v338_v34  ;;  %1357 = vmatprep.mubr.msk.f32.mxu1 %vm1485_vm0, %v1484_v1  ;;  %v260_v34 = vld [vmem:[%s1552_s7 + $0x298] sm:$0xff] }
  0x38   : > { %535 = vmatprep.subr.mxu0 %v1484_v1 }
  0x39   : > { %536 = vmatpush2.msra.mxu0 %v337_v35  ;;  %v225_v35 = vld [vmem:[%s1552_s7 + $0x180] sm:$0xff] }
  0x3a   : > { %537 = vmatprep.subr.mxu0 %v1484_v1  ;;  %1358 = vmatmul.mubr.msk.f32.gmra.mxu1 %vm355_vm1, %v206_v42  ;;  %v235_v42 = vld [vmem:[%s1552_s7 + $0x1d0] sm:$0xff] }
  0x3b   : > { %538 = vmatpush2.msra.mxu0 %v336_v37  ;;  %1360 = vmatprep.mubr.msk.f32.mxu1 %vm1485_vm0, %v1484_v1  ;;  %v263_v37 = vld [vmem:[%s1552_s7 + $0x2b0] sm:$0xff] }
  0x3c   : > { %539 = vmatprep.subr.mxu0 %v1484_v1 }
  0x3d   : > { %540 = vmatpush2.msra.mxu0 %v335_v38  ;;  %v228_v38 = vld [vmem:[%s1552_s7 + $0x198] sm:$0xff] }
  0x3e   : > { %541 = vmatprep.subr.mxu0 %v1484_v1  ;;  %1361 = vmatmul.mubr.msk.f32.gmra.mxu1 %vm355_vm1, %v209_v45  ;;  %v238_v45 = vld [vmem:[%s1552_s7 + $0x1e8] sm:$0xff] }
  0x3f   : > { %542 = vmatpush2.msra.mxu0 %v334_v40  ;;  %1363 = vmatprep.mubr.msk.f32.mxu1 %vm1485_vm0, %v1484_v1  ;;  %v266_v40 = vld [vmem:[%s1552_s7 + $0x2c8] sm:$0xff] }
  0x40   : > { %543 = vmatprep.subr.mxu0 %v1484_v1 }
  0x41   : > { %544 = vmatpush2.msra.mxu0 %v333_v41  ;;  %v231_v41 = vld [vmem:[%s1552_s7 + $0x1b0] sm:$0xff] }
  0x42   : > { %545 = vmatprep.subr.mxu0 %v1484_v1  ;;  %1364 = vmatmul.mubr.msk.f32.gmra.mxu1 %vm355_vm1, %v212_v48  ;;  %v241_v48 = vld [vmem:[%s1552_s7 + $0x200] sm:$0xff] }
  0x43   : > { %546 = vmatpush2.msra.mxu0 %v332_v43  ;;  %1366 = vmatprep.mubr.msk.f32.mxu1 %vm1485_vm0, %v1484_v1  ;;  %v269_v43 = vld [vmem:[%s1552_s7 + $0x2e0] sm:$0xff] }
  0x44   : > { %547 = vmatprep.subr.mxu0 %v1484_v1 }
  0x45   : > { %548 = vmatpush2.msra.mxu0 %v331_v44  ;;  %v234_v44 = vld [vmem:[%s1552_s7 + $0x1c8] sm:$0xff] }
  0x46   : > { %549 = vmatprep.subr.mxu0 %v1484_v1  ;;  %1367 = vmatmul.mubr.msk.f32.gmra.mxu1 %vm355_vm1, %v215_v52  ;;  %v278_v52 = vld [vmem:[%s1552_s7 + $0x328] sm:$0xff] }
  0x47   : > { %550 = vmatpush2.msra.mxu0 %v330_v46  ;;  %1369 = vmatprep.mubr.msk.f32.mxu1 %vm1485_vm0, %v1484_v1  ;;  %v272_v46 = vld [vmem:[%s1552_s7 + $0x2f8] sm:$0xff] }
  0x48   : > { %551 = vmatprep.subr.mxu0 %v1484_v1 }
  0x49   : > { %552 = vmatpush2.msra.mxu0 %v329_v47  ;;  %v237_v47 = vld [vmem:[%s1552_s7 + $0x1e0] sm:$0xff] }
  0x4a   : > { %553 = vmatprep.subr.mxu0 %v1484_v1  ;;  %1370 = vmatmul.mubr.msk.f32.gmra.mxu1 %vm355_vm1, %v218_v55  ;;  %v281_v55 = vld [vmem:[%s1552_s7 + $0x340] sm:$0xff] }
  0x4b   : > { %554 = vmatpush2.msra.mxu0 %v328_v49  ;;  %1372 = vmatprep.mubr.msk.f32.mxu1 %vm1485_vm0, %v1484_v1  ;;  %v275_v49 = vld [vmem:[%s1552_s7 + $0x310] sm:$0xff] }
  0x4c   : > { %556 = vmatmul.mubr.f32.vlgmr.msra.gmra.mxu0 %v177_v50  ;;  %v240_v50 = vld [vmem:[%s1552_s7 + $0x1f8] sm:$0xff] }
  0x4d   : > { %560 = vmatprep.mubr.f32.mxu0 %v181_v51  ;;  %v244_v51 = vld [vmem:[%s1552_s7 + $0x218] sm:$0xff] }
  0x4e   : > { %1373 = vmatmul.mubr.msk.f32.gmra.mxu1 %vm355_vm1, %v221_v58  ;;  %v284_v58 = vld [vmem:[%s1552_s7 + $0x358] sm:$0xff] }
  0x4f   : > { %1375 = vmatprep.mubr.msk.f32.mxu1 %vm1485_vm0, %v1484_v1 }
  0x50   : > { %561 = vmatmul.mubr.f32.gmra.mxu0 %v180_v53  ;;  %v243_v53 = vld [vmem:[%s1552_s7 + $0x210] sm:$0xff] }
  0x51   : > { %565 = vmatprep.mubr.f32.mxu0 %v184_v54  ;;  %v247_v54 = vld [vmem:[%s1552_s7 + $0x230] sm:$0xff] }
  0x52   : > { %1376 = vmatmul.mubr.msk.f32.gmra.mxu1 %vm355_vm1, %v224_v61  ;;  %v287_v61 = vld [vmem:[%s1552_s7 + $0x370] sm:$0xff] }
  0x53   : > { %1378 = vmatprep.mubr.msk.f32.mxu1 %vm1485_vm0, %v1484_v1 }
  0x54   : > { %566 = vmatmul.mubr.f32.gmra.mxu0 %v183_v56  ;;  %v246_v56 = vld [vmem:[%s1552_s7 + $0x228] sm:$0xff] }
  0x55   : > { %570 = vmatprep.mubr.f32.mxu0 %v187_v57  ;;  %v250_v57 = vld [vmem:[%s1552_s7 + $0x248] sm:$0xff] }
  0x56   : > { %1379 = vmatmul.mubr.msk.f32.gmra.mxu1 %vm355_vm1, %v227_v0  ;;  %v290_v0 = vld [vmem:[%s1552_s7 + $0x388] sm:$0xff] }
  0x57   : > { %1381 = vmatprep.mubr.msk.f32.mxu1 %vm1485_vm0, %v1484_v1 }
  0x58   : > { %571 = vmatmul.mubr.f32.gmra.mxu0 %v186_v59  ;;  %v249_v59 = vld [vmem:[%s1552_s7 + $0x240] sm:$0xff] }
  0x59   : > { %575 = vmatprep.mubr.f32.mxu0 %v190_v60  ;;  %v253_v60 = vld [vmem:[%s1552_s7 + $0x260] sm:$0xff] }
  0x5a   : > { %1382 = vmatmul.mubr.msk.f32.gmra.mxu1 %vm355_vm1, %v230_v4  ;;  %v293_v4 = vld [vmem:[%s1552_s7 + $0x3a0] sm:$0xff] }
  0x5b   : > { %1384 = vmatprep.mubr.msk.f32.mxu1 %vm1485_vm0, %v1484_v1 }
  0x5c   : > { %576 = vmatmul.mubr.f32.gmra.mxu0 %v189_v62  ;;  %v252_v62 = vld [vmem:[%s1552_s7 + $0x258] sm:$0xff] }
  0x5d   : > { %580 = vmatprep.mubr.f32.mxu0 %v193_v63  ;;  %v256_v63 = vld [vmem:[%s1552_s7 + $0x278] sm:$0xff] }
  0x5e   : > { %1385 = vmatmul.mubr.msk.f32.gmra.mxu1 %vm355_vm1, %v233_v7  ;;  %v296_v7 = vld [vmem:[%s1552_s7 + $0x3b8] sm:$0xff] }
  0x5f   : > { %1387 = vmatprep.mubr.msk.f32.mxu1 %vm1485_vm0, %v1484_v1 }
  0x60   : > { %581 = vmatmul.mubr.f32.gmra.mxu0 %v192_v2  ;;  %v255_v2 = vld [vmem:[%s1552_s7 + $0x270] sm:$0xff] }
  0x61   : > { %585 = vmatprep.mubr.f32.mxu0 %v196_v3  ;;  %v259_v3 = vld [vmem:[%s1552_s7 + $0x290] sm:$0xff] }
  0x62   : > { %1388 = vmatmul.mubr.msk.f32.gmra.mxu1 %vm355_vm1, %v236_v10  ;;  %v299_v10 = vld [vmem:[%s1552_s7 + $0x3d0] sm:$0xff] }
  0x63   : > { %1390 = vmatprep.mubr.msk.f32.mxu1 %vm1485_vm0, %v1484_v1 }
  0x64   : > { %586 = vmatmul.mubr.f32.gmra.mxu0 %v195_v5  ;;  %v258_v5 = vld [vmem:[%s1552_s7 + $0x288] sm:$0xff] }
  0x65   : > { %590 = vmatprep.mubr.f32.mxu0 %v199_v6  ;;  %v262_v6 = vld [vmem:[%s1552_s7 + $0x2a8] sm:$0xff] }
  0x66   : > { %1391 = vmatmul.mubr.msk.f32.gmra.mxu1 %vm355_vm1, %v239_v13  ;;  %v302_v13 = vld [vmem:[%s1552_s7 + $0x3e8] sm:$0xff] }
  0x67   : > { %1393 = vmatprep.mubr.msk.f32.mxu1 %vm1485_vm0, %v1484_v1 }
  0x68   : > { %591 = vmatmul.mubr.f32.gmra.mxu0 %v198_v8  ;;  %v261_v8 = vld [vmem:[%s1552_s7 + $0x2a0] sm:$0xff] }
  0x69   : > { %595 = vmatprep.mubr.f32.mxu0 %v202_v9  ;;  %v265_v9 = vld [vmem:[%s1552_s7 + $0x2c0] sm:$0xff] }
  0x6a   : > { %1394 = vmatmul.mubr.msk.f32.gmra.mxu1 %vm355_vm1, %v242_v16  ;;  %v305_v16 = vld [vmem:[%s1552_s7 + $0x400] sm:$0xff] }
  0x6b   : > { %1396 = vmatprep.mubr.msk.f32.mxu1 %vm1485_vm0, %v1484_v1 }
  0x6c   : > { %596 = vmatmul.mubr.f32.gmra.mxu0 %v201_v11  ;;  %v264_v11 = vld [vmem:[%s1552_s7 + $0x2b8] sm:$0xff] }
  0x6d   : > { %600 = vmatprep.mubr.f32.mxu0 %v205_v12  ;;  %v268_v12 = vld [vmem:[%s1552_s7 + $0x2d8] sm:$0xff] }
  0x6e   : > { %1397 = vmatmul.mubr.msk.f32.gmra.mxu1 %vm355_vm1, %v245_v19  ;;  %v308_v19 = vld [vmem:[%s1552_s7 + $0x418] sm:$0xff] }
  0x6f   : > { %1399 = vmatprep.mubr.msk.f32.mxu1 %vm1485_vm0, %v1484_v1 }
  0x70   : > { %601 = vmatmul.mubr.f32.gmra.mxu0 %v204_v14  ;;  %v267_v14 = vld [vmem:[%s1552_s7 + $0x2d0] sm:$0xff] }
  0x71   : > { %605 = vmatprep.mubr.f32.mxu0 %v208_v15  ;;  %v271_v15 = vld [vmem:[%s1552_s7 + $0x2f0] sm:$0xff] }
  0x72   : > { %1400 = vmatmul.mubr.msk.f32.gmra.mxu1 %vm355_vm1, %v248_v22  ;;  %v311_v22 = vld [vmem:[%s1552_s7 + $0x430] sm:$0xff] }
  0x73   : > { %1402 = vmatprep.mubr.msk.f32.mxu1 %vm1485_vm0, %v1484_v1 }
  0x74   : > { %606 = vmatmul.mubr.f32.gmra.mxu0 %v207_v17  ;;  %v270_v17 = vld [vmem:[%s1552_s7 + $0x2e8] sm:$0xff] }
  0x75   : > { %610 = vmatprep.mubr.f32.mxu0 %v211_v18  ;;  %v274_v18 = vld [vmem:[%s1552_s7 + $0x308] sm:$0xff] }
  0x76   : > { %1403 = vmatmul.mubr.msk.f32.gmra.mxu1 %vm355_vm1, %v251_v25  ;;  %v279_v25 = vld [vmem:[%s1552_s7 + $0x330] sm:$0xff] }
  0x77   : > { %1405 = vmatprep.mubr.msk.f32.mxu1 %vm1485_vm0, %v1484_v1 }
  0x78   : > { %611 = vmatmul.mubr.f32.gmra.mxu0 %v210_v20  ;;  %v273_v20 = vld [vmem:[%s1552_s7 + $0x300] sm:$0xff] }
  0x79   : > { %615 = vmatprep.mubr.f32.mxu0 %v214_v21  ;;  %v277_v21 = vld [vmem:[%s1552_s7 + $0x320] sm:$0xff] }
  0x7a   : > { %1406 = vmatmul.mubr.msk.f32.gmra.mxu1 %vm355_vm1, %v254_v28  ;;  %v285_v28 = vld [vmem:[%s1552_s7 + $0x360] sm:$0xff] }
  0x7b   : > { %1408 = vmatprep.mubr.msk.f32.mxu1 %vm1485_vm0, %v1484_v1 }
  0x7c   : > { %616 = vmatmul.mubr.f32.gmra.mxu0 %v213_v23  ;;  %v276_v23 = vld [vmem:[%s1552_s7 + $0x318] sm:$0xff] }
  0x7d   : > { %620 = vmatprep.mubr.f32.mxu0 %v217_v24  ;;  %v280_v24 = vld [vmem:[%s1552_s7 + $0x338] sm:$0xff] }
  0x7e   : > { %1409 = vmatmul.mubr.msk.f32.gmra.mxu1 %vm355_vm1, %v257_v31 }
  0x7f   : > { %1411 = vmatprep.mubr.msk.f32.mxu1 %vm1485_vm0, %v1484_v1 }
  0x80   : > { %621 = vmatmul.mubr.f32.gmra.mxu0 %v216_v26  ;;  %v283_v26 = vld [vmem:[%s1552_s7 + $0x350] sm:$0xff] }
  0x81   : > { %625 = vmatprep.mubr.f32.mxu0 %v220_v27  ;;  %v282_v27 = vld [vmem:[%s1552_s7 + $0x348] sm:$0xff] }
  0x82   : > { %1412 = vmatmul.mubr.msk.f32.gmra.mxu1 %vm355_vm1, %v260_v34  ;;  %v291_v34 = vld [vmem:[%s1552_s7 + $0x390] sm:$0xff] }
  0x83   : > { %1414 = vmatprep.mubr.msk.f32.mxu1 %vm1485_vm0, %v1484_v1 }
  0x84   : > { %626 = vmatmul.mubr.f32.gmra.mxu0 %v219_v29  ;;  %v289_v29 = vld [vmem:[%s1552_s7 + $0x380] sm:$0xff] }
  0x85   : > { %630 = vmatprep.mubr.f32.mxu0 %v223_v30  ;;  %v288_v30 = vld [vmem:[%s1552_s7 + $0x378] sm:$0xff] }
  0x86   : > { %1415 = vmatmul.mubr.msk.f32.gmra.mxu1 %vm355_vm1, %v263_v37 }
  0x87   : > { %1417 = vmatprep.mubr.msk.f32.mxu1 %vm1485_vm0, %v1484_v1 }
  0x88   : > { %631 = vmatmul.mubr.f32.gmra.mxu0 %v222_v32  ;;  %v292_v32 = vld [vmem:[%s1552_s7 + $0x398] sm:$0xff] }
  0x89   : > { %635 = vmatprep.mubr.f32.mxu0 %v226_v33 }
  0x8a   : > { %1418 = vmatmul.mubr.msk.f32.gmra.mxu1 %vm355_vm1, %v266_v40  ;;  %v298_v40 = vld [vmem:[%s1552_s7 + $0x3c8] sm:$0xff] }
  0x8b   : > { %1420 = vmatprep.mubr.msk.f32.mxu1 %vm1485_vm0, %v1484_v1 }
  0x8c   : > { %636 = vmatmul.mubr.f32.gmra.mxu0 %v225_v35 }
  0x8d   : > { %640 = vmatprep.mubr.f32.mxu0 %v229_v36  ;;  %v295_v36 = vld [vmem:[%s1552_s7 + $0x3b0] sm:$0xff] }
  0x8e   : > { %1421 = vmatmul.mubr.msk.f32.gmra.mxu1 %vm355_vm1, %v269_v43 }
  0x8f   : > { %1423 = vmatprep.mubr.msk.f32.mxu1 %vm1485_vm0, %v1484_v1 }
  0x90   : > { %641 = vmatmul.mubr.f32.gmra.mxu0 %v228_v38  ;;  %v294_v38 = vld [vmem:[%s1552_s7 + $0x3a8] sm:$0xff] }
  0x91   : > { %645 = vmatprep.mubr.f32.mxu0 %v232_v39 }
  0x92   : > { %1424 = vmatmul.mubr.msk.f32.gmra.mxu1 %vm355_vm1, %v272_v46  ;;  %v300_v46 = vld [vmem:[%s1552_s7 + $0x3d8] sm:$0xff] }
  0x93   : > { %1426 = vmatprep.mubr.msk.f32.mxu1 %vm1485_vm0, %v1484_v1 }
  0x94   : > { %646 = vmatmul.mubr.f32.gmra.mxu0 %v231_v41 }
  0x95   : > { %650 = vmatprep.mubr.f32.mxu0 %v235_v42  ;;  %v297_v42 = vld [vmem:[%s1552_s7 + $0x3c0] sm:$0xff] }
  0x96   : > { %1427 = vmatmul.mubr.msk.f32.gmra.mxu1 %vm355_vm1, %v275_v49 }
  0x97   : > { %1429 = vmatprep.mubr.msk.f32.mxu1 %vm1485_vm0, %v1484_v1 }
  0x98   : > { %651 = vmatmul.mubr.f32.gmra.mxu0 %v234_v44  ;;  %v301_v44 = vld [vmem:[%s1552_s7 + $0x3e0] sm:$0xff] }
  0x99   : > { %655 = vmatprep.mubr.f32.mxu0 %v238_v45 }
  0x9a   : > { %1430 = vmatmul.mubr.msk.f32.gmra.mxu1 %vm355_vm1, %v278_v52  ;;  %v307_v52 = vld [vmem:[%s1552_s7 + $0x410] sm:$0xff] }
  0x9b   : > { %1432 = vmatprep.mubr.msk.f32.mxu1 %vm1485_vm0, %v1484_v1 }
  0x9c   : > { %656 = vmatmul.mubr.f32.gmra.mxu0 %v237_v47 }
  0x9d   : > { %660 = vmatprep.mubr.f32.mxu0 %v241_v48  ;;  %v304_v48 = vld [vmem:[%s1552_s7 + $0x3f8] sm:$0xff] }
  0x9e   : > { %1433 = vmatmul.mubr.msk.f32.gmra.mxu1 %vm355_vm1, %v281_v55 }
  0x9f   : > { %1435 = vmatprep.mubr.msk.f32.mxu1 %vm1485_vm0, %v1484_v1 }
  0xa0   : > { %661 = vmatmul.mubr.f32.gmra.mxu0 %v240_v50  ;;  %v303_v50 = vld [vmem:[%s1552_s7 + $0x3f0] sm:$0xff] }
  0xa1   : > { %665 = vmatprep.mubr.f32.mxu0 %v244_v51 }
  0xa2   : > { %1436 = vmatmul.mubr.msk.f32.gmra.mxu1 %vm355_vm1, %v284_v58  ;;  %v309_v58 = vld [vmem:[%s1552_s7 + $0x420] sm:$0xff] }
  0xa3   : > { %1438 = vmatprep.mubr.msk.f32.mxu1 %vm1485_vm0, %v1484_v1 }
  0xa4   : > { %666 = vmatmul.mubr.f32.gmra.mxu0 %v243_v53 }
  0xa5   : > { %670 = vmatprep.mubr.f32.mxu0 %v247_v54  ;;  %v306_v54 = vld [vmem:[%s1552_s7 + $0x408] sm:$0xff] }
  0xa6   : > { %1439 = vmatmul.mubr.msk.f32.gmra.mxu1 %vm355_vm1, %v287_v61 }
  0xa7   : > { %1441 = vmatprep.mubr.msk.f32.mxu1 %vm1485_vm0, %v1484_v1 }
  0xa8   : > { %671 = vmatmul.mubr.f32.gmra.mxu0 %v246_v56  ;;  %v310_v56 = vld [vmem:[%s1552_s7 + $0x428] sm:$0xff] }
  0xa9   : > { %675 = vmatprep.mubr.f32.mxu0 %v250_v57 }
  0xaa   : > { %1442 = vmatmul.mubr.msk.f32.gmra.mxu1 %vm355_vm1, %v290_v0 }
  0xab   : > { %1444 = vmatprep.mubr.msk.f32.mxu1 %vm1485_vm0, %v1484_v1 }
  0xac   : > { %676 = vmatmul.mubr.f32.gmra.mxu0 %v249_v59 }
  0xad   : > { %680 = vmatprep.mubr.f32.mxu0 %v253_v60 }
  0xae   : > { %1445 = vmatmul.mubr.msk.f32.gmra.mxu1 %vm355_vm1, %v293_v4 }
  0xaf   : > { %1447 = vmatprep.mubr.msk.f32.mxu1 %vm1485_vm0, %v1484_v1 }
  0xb0   : > { %681 = vmatmul.mubr.f32.gmra.mxu0 %v252_v62 }
  0xb1   : > { %685 = vmatprep.mubr.f32.mxu0 %v256_v63 }
  0xb2   : > { %1448 = vmatmul.mubr.msk.f32.gmra.mxu1 %vm355_vm1, %v296_v7 }
  0xb3   : > { %1450 = vmatprep.mubr.msk.f32.mxu1 %vm1485_vm0, %v1484_v1 }
  0xb4   : > { %686 = vmatmul.mubr.f32.gmra.mxu0 %v255_v2 }
  0xb5   : > { %690 = vmatprep.mubr.f32.mxu0 %v259_v3 }
  0xb6   : > { %1451 = vmatmul.mubr.msk.f32.gmra.mxu1 %vm355_vm1, %v299_v10 }
  0xb7   : > { %1453 = vmatprep.mubr.msk.f32.mxu1 %vm1485_vm0, %v1484_v1 }
  0xb8   : > { %691 = vmatmul.mubr.f32.gmra.mxu0 %v258_v5  ;;  %v1961_v5 = vld [vmem:[%s2219_s2] ss:$0 sm:$0xff] }
  0xb9   : > { %695 = vmatprep.mubr.f32.mxu0 %v262_v6 }
  0xba   : > { %1454 = vmatmul.mubr.msk.f32.gmra.mxu1 %vm355_vm1, %v302_v13 }
  0xbb   : > { %1456 = vmatprep.mubr.msk.f32.mxu1 %vm1485_vm0, %v1484_v1 }
  0xbc   : > { %696 = vmatmul.mubr.f32.gmra.mxu0 %v261_v8 }
  0xbd   : > { %700 = vmatprep.mubr.f32.mxu0 %v265_v9 }
  0xbe   : > { %1457 = vmatmul.mubr.msk.f32.gmra.mxu1 %vm355_vm1, %v305_v16 }
  0xbf   : > { %1459 = vmatprep.mubr.msk.f32.mxu1 %vm1485_vm0, %v1484_v1 }
  0xc0   : > { %701 = vmatmul.mubr.f32.gmra.mxu0 %v264_v11 }
  0xc1   : > { %705 = vmatprep.mubr.f32.mxu0 %v268_v12 }
  0xc2   : > { %1460 = vmatmul.mubr.msk.f32.gmra.mxu1 %vm355_vm1, %v308_v19 }
  0xc3   : > { %1462 = vmatprep.mubr.msk.f32.mxu1 %vm1485_vm0, %v1484_v1  ;;  %v286_v1 = vld [vmem:[%s1552_s7 + $0x368] sm:$0xff]  ;;  %s1224_s7 = sshll.u32 %s2222_s16, 3 }
  0xc4   : > { %706 = vmatmul.mubr.f32.gmra.mxu0 %v267_v14  ;;  %s1970_s22 = scalar_lea.vmem %s2220_s3, %s1224_s7 }
  0xc5   : > { %710 = vmatprep.mubr.f32.mxu0 %v271_v15 }
  0xc6   : > { %1463 = vmatmul.mubr.msk.f32.gmra.mxu1 %vm355_vm1, %v311_v22 }
  0xc8   : > { %711 = vmatmul.mubr.f32.gmra.mxu0 %v270_v17 }
  0xc9   : > { %715 = vmatprep.mubr.f32.mxu0 %v274_v18 }
  0xcc   : > { %716 = vmatmul.mubr.f32.gmra.mxu0 %v273_v20 }
  0xcd   : > { %720 = vmatprep.mubr.f32.mxu0 %v277_v21 }
  0xd0   : > { %721 = vmatmul.mubr.f32.gmra.mxu0 %v276_v23 }
  0xd1   : > { %725 = vmatprep.mubr.f32.mxu0 %v280_v24 }
  0xd4   : > { %726 = vmatmul.mubr.f32.gmra.mxu0 %v279_v25 }
  0xd5   : > { %730 = vmatprep.mubr.f32.mxu0 %v283_v26 }
  0xd6   : > { %v847_v31 = vpop.f32.mrf.mxu1 }
  0xd8   : > { %731 = vmatmul.mubr.f32.gmra.mxu0 %v282_v27  ;;  %v1332_v33 = vpop.f32.mrf.mxu1 }
  0xd9   : > { %735 = vmatprep.mubr.f32.mxu0 %v286_v1 }
  0xda   : > { %v1924_v35 = vpop.f32.mrf.mxu1 }
  0xdc   : > { %736 = vmatmul.mubr.f32.gmra.mxu0 %v285_v28  ;;  %v1335_v37 = vpop.f32.mrf.mxu1 }
  0xdd   : > { %740 = vmatprep.mubr.f32.mxu0 %v289_v29 }
  0xde   : > { %v1928_v39 = vpop.f32.mrf.mxu1 }
  0xe0   : > { %741 = vmatmul.mubr.f32.gmra.mxu0 %v288_v30  ;;  %v1338_v41 = vpop.f32.mrf.mxu1 }
  0xe1   : > { %745 = vmatprep.mubr.f32.mxu0 %v292_v32 }
  0xe2   : > { %v1932_v43 = vpop.f32.mrf.mxu1 }
  0xe4   : > { %746 = vmatmul.mubr.f32.gmra.mxu0 %v291_v34  ;;  %v1341_v45 = vpop.f32.mrf.mxu1 }
  0xe5   : > { %750 = vmatprep.mubr.f32.mxu0 %v295_v36 }
  0xe6   : > { %v1936_v47 = vpop.f32.mrf.mxu1 }
  0xe8   : > { %751 = vmatmul.mubr.f32.gmra.mxu0 %v294_v38  ;;  %v1344_v49 = vpop.f32.mrf.mxu1 }
  0xe9   : > { %755 = vmatprep.mubr.f32.mxu0 %v298_v40 }
  0xea   : > { %v1940_v51 = vpop.f32.mrf.mxu1 }
  0xec   : > { %756 = vmatmul.mubr.f32.gmra.mxu0 %v297_v42  ;;  %v1347_v53 = vpop.f32.mrf.mxu1 }
  0xed   : > { %760 = vmatprep.mubr.f32.mxu0 %v301_v44 }
  0xee   : > { %v1944_v55 = vpop.f32.mrf.mxu1 }
  0xf0   : > { %761 = vmatmul.mubr.f32.gmra.mxu0 %v300_v46  ;;  %v1350_v57 = vpop.f32.mrf.mxu1 }
  0xf1   : > { %765 = vmatprep.mubr.f32.mxu0 %v304_v48 }
  0xf2   : > { %v1948_v59 = vpop.f32.mrf.mxu1 }
  0xf4   : > { %766 = vmatmul.mubr.f32.gmra.mxu0 %v303_v50  ;;  %v1353_v60 = vpop.f32.mrf.mxu1 }
  0xf5   : > { %770 = vmatprep.mubr.f32.mxu0 %v307_v52 }
  0xf6   : > { %v1950_v61 = vpop.f32.mrf.mxu1 }
  0xf8   : > { %771 = vmatmul.mubr.f32.gmra.mxu0 %v306_v54  ;;  %v1356_v62 = vpop.f32.mrf.mxu1 }
  0xf9   : > { %775 = vmatprep.mubr.f32.mxu0 %v310_v56 }
  0xfa   : > { %v1952_v63 = vpop.f32.mrf.mxu1 }
  0xfc   : > { %776 = vmatmul.mubr.f32.gmra.mxu0 %v309_v58  ;;  %v1359_v0 = vpop.f32.mrf.mxu1 }
  0xfe   : > { %v1954_v2 = vpop.f32.mrf.mxu1 }
 0x100   : > { %v1362_v3 = vpop.f32.mrf.mxu1 }
 0x102   : > { %v1956_v4 = vpop.f32.mrf.mxu1 }
 0x104   : > { %v1365_v6 = vpop.f32.mrf.mxu1 }
 0x106   : > { %v1965_v9 = vpop.f32.mrf.mxu1 }
 0x108   : > { %v1368_v12 = vpop.f32.mrf.mxu1 }
 0x10a   : > { %v1973_v16 = vpop.f32.mrf.mxu1 }
 0x10c   : > { %v557_v7 = vpop.f32.mrf.mxu0  ;;  %v1371_v19 = vpop.f32.mrf.mxu1 }
 0x10d   : > { %v558_v8 = vadd.f32 %v1961_v5, %v557_v7 }
 0x10e   : > { %v559_v10 = vpop.f32.mrf.mxu0  ;;  %v1979_v23 = vpop.f32.mrf.mxu1 }
 0x10f   : > { %v848_v11 = vadd.f32 %v847_v31, %v558_v8 }
 0x110   : > { %v562_v13 = vpop.f32.mrf.mxu0  ;;  %v1374_v26 = vpop.f32.mrf.mxu1 }
 0x111   : > { %v1071_v14 = vmax.f32 %v848_v11, 0.0  ;;  %v563_v15 = vadd.f32 %v1961_v5, %v562_v13 }
 0x112   : > { %v564_v17 = vpop.f32.mrf.mxu0  ;;  %v1985_v29 = vpop.f32.mrf.mxu1 }
 0x113   : > { %1117 = vst.msk [vmem:[%s1970_s22] sm:$0xff] %vm1116_vm2, %v1071_v14  ;;  %v853_v18 = vadd.f32 %v1924_v35, %v563_v15 }
 0x114   : > { %v567_v20 = vpop.f32.mrf.mxu0  ;;  %v1377_v32 = vpop.f32.mrf.mxu1 }
 0x115   : > { %v1072_v21 = vmax.f32 %v853_v18, 0.0  ;;  %v568_v22 = vadd.f32 %v1961_v5, %v567_v20 }
 0x116   : > { %v569_v24 = vpop.f32.mrf.mxu0  ;;  %v1991_v36 = vpop.f32.mrf.mxu1 }
 0x117   : > { %1118 = vst.msk [vmem:[%s1970_s22 + $0x8] sm:$0xff] %vm1116_vm2, %v1072_v21  ;;  %v858_v25 = vadd.f32 %v1928_v39, %v568_v22 }
 0x118   : > { %v572_v27 = vpop.f32.mrf.mxu0  ;;  %v1380_v39 = vpop.f32.mrf.mxu1 }
 0x119   : > { %v1073_v1 = vmax.f32 %v858_v25, 0.0  ;;  %v573_v28 = vadd.f32 %v1961_v5, %v572_v27 }
 0x11a   : > { %v574_v30 = vpop.f32.mrf.mxu0  ;;  %v1997_v44 = vpop.f32.mrf.mxu1 }
 0x11b   : > { %1119 = vst.msk [vmem:[%s1970_s22 + $0x10] sm:$0xff] %vm1116_vm2, %v1073_v1  ;;  %v863_v31 = vadd.f32 %v1932_v43, %v573_v28 }
 0x11c   : > { %v577_v33 = vpop.f32.mrf.mxu0  ;;  %v1383_v46 = vpop.f32.mrf.mxu1 }
 0x11d   : > { %v1074_v34 = vmax.f32 %v863_v31, 0.0  ;;  %v578_v35 = vadd.f32 %v1961_v5, %v577_v33 }
 0x11e   : > { %v579_v37 = vpop.f32.mrf.mxu0  ;;  %v2003_v52 = vpop.f32.mrf.mxu1 }
 0x11f   : > { %1120 = vst.msk [vmem:[%s1970_s22 + $0x18] sm:$0xff] %vm1116_vm2, %v1074_v34  ;;  %v868_v38 = vadd.f32 %v1936_v47, %v578_v35 }
 0x120   : > { %v582_v40 = vpop.f32.mrf.mxu0  ;;  %v1386_v54 = vpop.f32.mrf.mxu1 }
 0x121   : > { %v1075_v41 = vmax.f32 %v868_v38, 0.0  ;;  %v583_v42 = vadd.f32 %v1961_v5, %v582_v40 }
 0x122   : > { %v584_v43 = vpop.f32.mrf.mxu0  ;;  %v2009_v60 = vpop.f32.mrf.mxu1 }
 0x123   : > { %1121 = vst.msk [vmem:[%s1970_s22 + $0x20] sm:$0xff] %vm1116_vm2, %v1075_v41  ;;  %v873_v45 = vadd.f32 %v1940_v51, %v583_v42 }
 0x124   : > { %v587_v48 = vpop.f32.mrf.mxu0  ;;  %v1389_v0 = vpop.f32.mrf.mxu1 }
 0x125   : > { %v1076_v49 = vmax.f32 %v873_v45, 0.0  ;;  %v588_v50 = vadd.f32 %v1961_v5, %v587_v48 }
 0x126   : > { %v589_v47 = vpop.f32.mrf.mxu0  ;;  %v2015_v8 = vpop.f32.mrf.mxu1 }
 0x127   : > { %1122 = vst.msk [vmem:[%s1970_s22 + $0x28] sm:$0xff] %vm1116_vm2, %v1076_v49  ;;  %v878_v53 = vadd.f32 %v1944_v55, %v588_v50 }
 0x128   : > { %v592_v56 = vpop.f32.mrf.mxu0  ;;  %v1392_v11 = vpop.f32.mrf.mxu1 }
 0x129   : > { %v1077_v57 = vmax.f32 %v878_v53, 0.0  ;;  %v593_v58 = vadd.f32 %v1961_v5, %v592_v56 }
 0x12a   : > { %v594_v51 = vpop.f32.mrf.mxu0  ;;  %v2021_v15 = vpop.f32.mrf.mxu1 }
 0x12b   : > { %1123 = vst.msk [vmem:[%s1970_s22 + $0x30] sm:$0xff] %vm1116_vm2, %v1077_v57  ;;  %v883_v62 = vadd.f32 %v1948_v59, %v593_v58 }
 0x12c   : > { %v597_v3 = vpop.f32.mrf.mxu0  ;;  %v1395_v18 = vpop.f32.mrf.mxu1 }
 0x12d   : > { %v1078_v6 = vmax.f32 %v883_v62, 0.0  ;;  %v598_v7 = vadd.f32 %v1961_v5, %v597_v3 }
 0x12e   : > { %v599_v55 = vpop.f32.mrf.mxu0  ;;  %v2027_v22 = vpop.f32.mrf.mxu1 }
 0x12f   : > { %1124 = vst.msk [vmem:[%s1970_s22 + $0x38] sm:$0xff] %vm1116_vm2, %v1078_v6  ;;  %v888_v10 = vadd.f32 %v1950_v61, %v598_v7 }
 0x130   : > { %v602_v12 = vpop.f32.mrf.mxu0  ;;  %v1398_v25 = vpop.f32.mrf.mxu1 }
 0x131   : > { %v1079_v13 = vmax.f32 %v888_v10, 0.0  ;;  %v603_v14 = vadd.f32 %v1961_v5, %v602_v12 }
 0x132   : > { %v604_v59 = vpop.f32.mrf.mxu0  ;;  %v2033_v28 = vpop.f32.mrf.mxu1 }
 0x133   : > { %1125 = vst.msk [vmem:[%s1970_s22 + $0x40] sm:$0xff] %vm1116_vm2, %v1079_v13  ;;  %v893_v17 = vadd.f32 %v1952_v63, %v603_v14 }
 0x134   : > { %v607_v19 = vpop.f32.mrf.mxu0  ;;  %v1401_v31 = vpop.f32.mrf.mxu1 }
 0x135   : > { %v1080_v20 = vmax.f32 %v893_v17, 0.0  ;;  %v608_v21 = vadd.f32 %v1961_v5, %v607_v19 }
 0x136   : > { %v609_v61 = vpop.f32.mrf.mxu0  ;;  %v2039_v35 = vpop.f32.mrf.mxu1 }
 0x137   : > { %1126 = vst.msk [vmem:[%s1970_s22 + $0x48] sm:$0xff] %vm1116_vm2, %v1080_v20  ;;  %v898_v24 = vadd.f32 %v1954_v2, %v608_v21 }
 0x138   : > { %v612_v26 = vpop.f32.mrf.mxu0  ;;  %v1404_v38 = vpop.f32.mrf.mxu1 }
 0x139   : > { %v1081_v27 = vmax.f32 %v898_v24, 0.0  ;;  %v613_v1 = vadd.f32 %v1961_v5, %v612_v26 }
 0x13a   : > { %v614_v63 = vpop.f32.mrf.mxu0  ;;  %v2045_v42 = vpop.f32.mrf.mxu1 }
 0x13b   : > { %1127 = vst.msk [vmem:[%s1970_s22 + $0x50] sm:$0xff] %vm1116_vm2, %v1081_v27  ;;  %v903_v30 = vadd.f32 %v1956_v4, %v613_v1 }
 0x13c   : > { %v617_v32 = vpop.f32.mrf.mxu0  ;;  %v1407_v45 = vpop.f32.mrf.mxu1 }
 0x13d   : > { %v1082_v33 = vmax.f32 %v903_v30, 0.0  ;;  %v618_v34 = vadd.f32 %v1961_v5, %v617_v32 }
 0x13e   : > { %v619_v2 = vpop.f32.mrf.mxu0  ;;  %v2051_v50 = vpop.f32.mrf.mxu1 }
 0x13f   : > { %1128 = vst.msk [vmem:[%s1970_s22 + $0x58] sm:$0xff] %vm1116_vm2, %v1082_v33  ;;  %v908_v37 = vadd.f32 %v1965_v9, %v618_v34 }
 0x140   : > { %v622_v39 = vpop.f32.mrf.mxu0  ;;  %v1410_v53 = vpop.f32.mrf.mxu1 }
 0x141   : > { %v1083_v40 = vmax.f32 %v908_v37, 0.0  ;;  %v623_v41 = vadd.f32 %v1961_v5, %v622_v39 }
 0x142   : > { %v624_v4 = vpop.f32.mrf.mxu0  ;;  %v2057_v58 = vpop.f32.mrf.mxu1 }
 0x143   : > { %1129 = vst.msk [vmem:[%s1970_s22 + $0x60] sm:$0xff] %vm1116_vm2, %v1083_v40  ;;  %v913_v43 = vadd.f32 %v1973_v16, %v623_v41 }
 0x144   : > { %v627_v46 = vpop.f32.mrf.mxu0  ;;  %v1413_v62 = vpop.f32.mrf.mxu1 }
 0x145   : > { %v1084_v48 = vmax.f32 %v913_v43, 0.0  ;;  %v628_v49 = vadd.f32 %v1961_v5, %v627_v46 }
 0x146   : > { %v629_v9 = vpop.f32.mrf.mxu0  ;;  %v2063_v7 = vpop.f32.mrf.mxu1 }
 0x147   : > { %1130 = vst.msk [vmem:[%s1970_s22 + $0x68] sm:$0xff] %vm1116_vm2, %v1084_v48  ;;  %v918_v47 = vadd.f32 %v1979_v23, %v628_v49 }
 0x148   : > { %v632_v54 = vpop.f32.mrf.mxu0  ;;  %v1416_v10 = vpop.f32.mrf.mxu1 }
 0x149   : > { %v1085_v56 = vmax.f32 %v918_v47, 0.0  ;;  %v633_v57 = vadd.f32 %v1961_v5, %v632_v54 }
 0x14a   : > { %v634_v16 = vpop.f32.mrf.mxu0  ;;  %v2069_v14 = vpop.f32.mrf.mxu1 }
 0x14b   : > { %1131 = vst.msk [vmem:[%s1970_s22 + $0x70] sm:$0xff] %vm1116_vm2, %v1085_v56  ;;  %v923_v51 = vadd.f32 %v1985_v29, %v633_v57 }
 0x14c   : > { %v637_v0 = vpop.f32.mrf.mxu0  ;;  %v1419_v17 = vpop.f32.mrf.mxu1 }
 0x14d   : > { %v1086_v3 = vmax.f32 %v923_v51, 0.0  ;;  %v638_v6 = vadd.f32 %v1961_v5, %v637_v0 }
 0x14e   : > { %v639_v23 = vpop.f32.mrf.mxu0  ;;  %v2075_v21 = vpop.f32.mrf.mxu1 }
 0x14f   : > { %1132 = vst.msk [vmem:[%s1970_s22 + $0x78] sm:$0xff] %vm1116_vm2, %v1086_v3  ;;  %v928_v55 = vadd.f32 %v1991_v36, %v638_v6 }
 0x150   : > { %v642_v11 = vpop.f32.mrf.mxu0  ;;  %v1422_v24 = vpop.f32.mrf.mxu1 }
 0x151   : > { %v1087_v12 = vmax.f32 %v928_v55, 0.0  ;;  %v643_v13 = vadd.f32 %v1961_v5, %v642_v11 }
 0x152   : > { %v644_v29 = vpop.f32.mrf.mxu0  ;;  %v2081_v1 = vpop.f32.mrf.mxu1 }
 0x153   : > { %1133 = vst.msk [vmem:[%s1970_s22 + $0x80] sm:$0xff] %vm1116_vm2, %v1087_v12  ;;  %v933_v59 = vadd.f32 %v1997_v44, %v643_v13 }
 0x154   : > { %v647_v18 = vpop.f32.mrf.mxu0  ;;  %v1425_v30 = vpop.f32.mrf.mxu1 }
 0x155   : > { %v1088_v19 = vmax.f32 %v933_v59, 0.0  ;;  %v648_v20 = vadd.f32 %v1961_v5, %v647_v18 }
 0x156   : > { %v649_v36 = vpop.f32.mrf.mxu0  ;;  %v2087_v34 = vpop.f32.mrf.mxu1 }
 0x157   : > { %1134 = vst.msk [vmem:[%s1970_s22 + $0x88] sm:$0xff] %vm1116_vm2, %v1088_v19  ;;  %v938_v61 = vadd.f32 %v2003_v52, %v648_v20 }
 0x158   : > { %v652_v25 = vpop.f32.mrf.mxu0  ;;  %v1428_v37 = vpop.f32.mrf.mxu1 }
 0x159   : > { %v1089_v26 = vmax.f32 %v938_v61, 0.0  ;;  %v653_v27 = vadd.f32 %v1961_v5, %v652_v25 }
 0x15a   : > { %v654_v44 = vpop.f32.mrf.mxu0  ;;  %v2093_v41 = vpop.f32.mrf.mxu1 }
 0x15b   : > { %1135 = vst.msk [vmem:[%s1970_s22 + $0x90] sm:$0xff] %vm1116_vm2, %v1089_v26  ;;  %v943_v63 = vadd.f32 %v2009_v60, %v653_v27 }
 0x15c   : > { %v657_v31 = vpop.f32.mrf.mxu0  ;;  %v1431_v43 = vpop.f32.mrf.mxu1 }
 0x15d   : > { %v1090_v32 = vmax.f32 %v943_v63, 0.0  ;;  %v658_v33 = vadd.f32 %v1961_v5, %v657_v31 }
 0x15e   : > { %v659_v52 = vpop.f32.mrf.mxu0  ;;  %v2099_v49 = vpop.f32.mrf.mxu1 }
 0x15f   : > { %1136 = vst.msk [vmem:[%s1970_s22 + $0x98] sm:$0xff] %vm1116_vm2, %v1090_v32  ;;  %v948_v2 = vadd.f32 %v2015_v8, %v658_v33 }
 0x160   : > { %v662_v38 = vpop.f32.mrf.mxu0  ;;  %v1434_v47 = vpop.f32.mrf.mxu1 }
 0x161   : > { %v1091_v39 = vmax.f32 %v948_v2, 0.0  ;;  %v663_v40 = vadd.f32 %v1961_v5, %v662_v38 }
 0x162   : > { %v664_v60 = vpop.f32.mrf.mxu0  ;;  %v2105_v57 = vpop.f32.mrf.mxu1 }
 0x163   : > { %1137 = vst.msk [vmem:[%s1970_s22 + $0xa0] sm:$0xff] %vm1116_vm2, %v1091_v39  ;;  %v953_v4 = vadd.f32 %v2021_v15, %v663_v40 }
 0x164   : > { %v667_v45 = vpop.f32.mrf.mxu0  ;;  %v1437_v51 = vpop.f32.mrf.mxu1 }
 0x165   : > { %v1092_v46 = vmax.f32 %v953_v4, 0.0  ;;  %v668_v48 = vadd.f32 %v1961_v5, %v667_v45 }
 0x166   : > { %v669_v8 = vpop.f32.mrf.mxu0  ;;  %v2111_v6 = vpop.f32.mrf.mxu1 }
 0x167   : > { %1138 = vst.msk [vmem:[%s1970_s22 + $0xa8] sm:$0xff] %vm1116_vm2, %v1092_v46  ;;  %v958_v9 = vadd.f32 %v2027_v22, %v668_v48 }
 0x168   : > { %v672_v53 = vpop.f32.mrf.mxu0  ;;  %v1440_v55 = vpop.f32.mrf.mxu1 }
 0x169   : > { %v1093_v54 = vmax.f32 %v958_v9, 0.0  ;;  %v673_v56 = vadd.f32 %v1961_v5, %v672_v53 }
 0x16a   : > { %v674_v15 = vpop.f32.mrf.mxu0  ;;  %v2117_v13 = vpop.f32.mrf.mxu1 }
 0x16b   : > { %1139 = vst.msk [vmem:[%s1970_s22 + $0xb0] sm:$0xff] %vm1116_vm2, %v1093_v54  ;;  %v963_v16 = vadd.f32 %v2033_v28, %v673_v56 }
 0x16c   : > { %v677_v62 = vpop.f32.mrf.mxu0  ;;  %v1443_v59 = vpop.f32.mrf.mxu1 }
 0x16d   : > { %v1094_v0 = vmax.f32 %v963_v16, 0.0  ;;  %v678_v3 = vadd.f32 %v1961_v5, %v677_v62 }
 0x16e   : > { %v679_v22 = vpop.f32.mrf.mxu0  ;;  %v2123_v20 = vpop.f32.mrf.mxu1 }
 0x16f   : > { %1140 = vst.msk [vmem:[%s1970_s22 + $0xb8] sm:$0xff] %vm1116_vm2, %v1094_v0  ;;  %v968_v23 = vadd.f32 %v2039_v35, %v678_v3 }
 0x170   : > { %v682_v10 = vpop.f32.mrf.mxu0  ;;  %v1446_v61 = vpop.f32.mrf.mxu1 }
 0x171   : > { %v1095_v11 = vmax.f32 %v968_v23, 0.0  ;;  %v683_v12 = vadd.f32 %v1961_v5, %v682_v10 }
 0x172   : > { %v684_v28 = vpop.f32.mrf.mxu0  ;;  %v2129_v27 = vpop.f32.mrf.mxu1 }
 0x173   : > { %1141 = vst.msk [vmem:[%s1970_s22 + $0xc0] sm:$0xff] %vm1116_vm2, %v1095_v11  ;;  %v973_v29 = vadd.f32 %v2045_v42, %v683_v12 }
 0x174   : > { %v687_v17 = vpop.f32.mrf.mxu0  ;;  %v1449_v63 = vpop.f32.mrf.mxu1 }
 0x175   : > { %v1096_v18 = vmax.f32 %v973_v29, 0.0  ;;  %v688_v19 = vadd.f32 %v1961_v5, %v687_v17 }
 0x176   : > { %v689_v35 = vpop.f32.mrf.mxu0  ;;  %v2135_v33 = vpop.f32.mrf.mxu1 }
 0x177   : > { %1142 = vst.msk [vmem:[%s1970_s22 + $0xc8] sm:$0xff] %vm1116_vm2, %v1096_v18  ;;  %v978_v36 = vadd.f32 %v2051_v50, %v688_v19 }
 0x178   : > { %v692_v24 = vpop.f32.mrf.mxu0  ;;  %v1452_v2 = vpop.f32.mrf.mxu1 }
 0x179   : > { %v1097_v25 = vmax.f32 %v978_v36, 0.0  ;;  %v693_v26 = vadd.f32 %v1961_v5, %v692_v24 }
 0x17a   : > { %v694_v42 = vpop.f32.mrf.mxu0  ;;  %v2141_v40 = vpop.f32.mrf.mxu1 }
 0x17b   : > { %1143 = vst.msk [vmem:[%s1970_s22 + $0xd0] sm:$0xff] %vm1116_vm2, %v1097_v25  ;;  %v983_v44 = vadd.f32 %v2057_v58, %v693_v26 }
 0x17c   : > { %v697_v30 = vpop.f32.mrf.mxu0  ;;  %v1455_v4 = vpop.f32.mrf.mxu1 }
 0x17d   : > { %v1098_v31 = vmax.f32 %v983_v44, 0.0  ;;  %v698_v32 = vadd.f32 %v1961_v5, %v697_v30 }
 0x17e   : > { %v699_v50 = vpop.f32.mrf.mxu0  ;;  %v2147_v48 = vpop.f32.mrf.mxu1 }
 0x17f   : > { %1144 = vst.msk [vmem:[%s1970_s22 + $0xd8] sm:$0xff] %vm1116_vm2, %v1098_v31  ;;  %v988_v52 = vadd.f32 %v2063_v7, %v698_v32 }
 0x180   : > { %v702_v37 = vpop.f32.mrf.mxu0  ;;  %v1458_v9 = vpop.f32.mrf.mxu1 }
 0x181   : > { %v1099_v38 = vmax.f32 %v988_v52, 0.0  ;;  %v703_v39 = vadd.f32 %v1961_v5, %v702_v37 }
 0x182   : > { %v704_v58 = vpop.f32.mrf.mxu0  ;;  %v2153_v56 = vpop.f32.mrf.mxu1 }
 0x183   : > { %1145 = vst.msk [vmem:[%s1970_s22 + $0xe0] sm:$0xff] %vm1116_vm2, %v1099_v38  ;;  %v993_v60 = vadd.f32 %v2069_v14, %v703_v39 }
 0x184   : > { %v707_v43 = vpop.f32.mrf.mxu0  ;;  %v1461_v16 = vpop.f32.mrf.mxu1 }
 0x185   : > { %v1100_v45 = vmax.f32 %v993_v60, 0.0  ;;  %v708_v46 = vadd.f32 %v1961_v5, %v707_v43 }
 0x186   : > { %v709_v7 = vpop.f32.mrf.mxu0 }
 0x187   : > { %1146 = vst.msk [vmem:[%s1970_s22 + $0xe8] sm:$0xff] %vm1116_vm2, %v1100_v45  ;;  %v998_v8 = vadd.f32 %v2075_v21, %v708_v46  ;;  %v2159_v21 = vpop.f32.mrf.mxu1 }
 0x188   : > { %v712_v47 = vpop.f32.mrf.mxu0 }
 0x189   : > { %v1101_v53 = vmax.f32 %v998_v8, 0.0  ;;  %v713_v54 = vadd.f32 %v1961_v5, %v712_v47  ;;  %v1464_v23 = vpop.f32.mrf.mxu1 }
 0x18a   : > { %v714_v14 = vpop.f32.mrf.mxu0 }
 0x18b   : > { %1147 = vst.msk [vmem:[%s1970_s22 + $0xf0] sm:$0xff] %vm1116_vm2, %v1101_v53  ;;  %v1003_v15 = vadd.f32 %v2081_v1, %v713_v54 }
 0x18c   : > { %v717_v51 = vpop.f32.mrf.mxu0 }
 0x18d   : > { %v1102_v62 = vmax.f32 %v1003_v15, 0.0  ;;  %v718_v0 = vadd.f32 %v1961_v5, %v717_v51 }
 0x18e   : > { %v719_v3 = vpop.f32.mrf.mxu0 }
 0x18f   : > { %1148 = vst.msk [vmem:[%s1970_s22 + $0xf8] sm:$0xff] %vm1116_vm2, %v1102_v62  ;;  %v1008_v22 = vadd.f32 %v2087_v34, %v718_v0 }
 0x190   : > { %v722_v55 = vpop.f32.mrf.mxu0 }
 0x191   : > { %v1103_v10 = vmax.f32 %v1008_v22, 0.0  ;;  %v723_v11 = vadd.f32 %v1961_v5, %v722_v55 }
 0x192   : > { %v724_v1 = vpop.f32.mrf.mxu0 }
 0x193   : > { %1149 = vst.msk [vmem:[%s1970_s22 + $0x100] sm:$0xff] %vm1116_vm2, %v1103_v10  ;;  %v1013_v12 = vadd.f32 %v2093_v41, %v723_v11 }
 0x194   : > { %v727_v28 = vpop.f32.mrf.mxu0 }
 0x195   : > { %v1104_v29 = vmax.f32 %v1013_v12, 0.0  ;;  %v728_v59 = vadd.f32 %v1961_v5, %v727_v28 }
 0x196   : > { %v729_v17 = vpop.f32.mrf.mxu0 }
 0x197   : > { %1150 = vst.msk [vmem:[%s1970_s22 + $0x108] sm:$0xff] %vm1116_vm2, %v1104_v29  ;;  %v1018_v34 = vadd.f32 %v2099_v49, %v728_v59 }
 0x198   : > { %v732_v18 = vpop.f32.mrf.mxu0 }
 0x199   : > { %v1105_v19 = vmax.f32 %v1018_v34, 0.0  ;;  %v733_v35 = vadd.f32 %v1961_v5, %v732_v18 }
 0x19a   : > { %v734_v36 = vpop.f32.mrf.mxu0 }
 0x19b   : > { %1151 = vst.msk [vmem:[%s1970_s22 + $0x110] sm:$0xff] %vm1116_vm2, %v1105_v19  ;;  %v1023_v41 = vadd.f32 %v2105_v57, %v733_v35 }
 0x19c   : > { %v737_v61 = vpop.f32.mrf.mxu0 }
 0x19d   : > { %v1106_v24 = vmax.f32 %v1023_v41, 0.0  ;;  %v738_v25 = vadd.f32 %v1961_v5, %v737_v61 }
 0x19e   : > { %v739_v26 = vpop.f32.mrf.mxu0 }
 0x19f   : > { %1152 = vst.msk [vmem:[%s1970_s22 + $0x118] sm:$0xff] %vm1116_vm2, %v1106_v24  ;;  %v1028_v49 = vadd.f32 %v2111_v6, %v738_v25 }
 0x1a0   : > { %v742_v42 = vpop.f32.mrf.mxu0 }
 0x1a1   : > { %v1107_v44 = vmax.f32 %v1028_v49, 0.0  ;;  %v743_v63 = vadd.f32 %v1961_v5, %v742_v42 }
 0x1a2   : > { %v744_v30 = vpop.f32.mrf.mxu0 }
 0x1a3   : > { %1153 = vst.msk [vmem:[%s1970_s22 + $0x120] sm:$0xff] %vm1116_vm2, %v1107_v44  ;;  %v1033_v57 = vadd.f32 %v2117_v13, %v743_v63 }
 0x1a4   : > { %v747_v31 = vpop.f32.mrf.mxu0 }
 0x1a5   : > { %v1108_v32 = vmax.f32 %v1033_v57, 0.0  ;;  %v748_v50 = vadd.f32 %v1961_v5, %v747_v31 }
 0x1a6   : > { %v749_v52 = vpop.f32.mrf.mxu0 }
 0x1a7   : > { %1154 = vst.msk [vmem:[%s1970_s22 + $0x128] sm:$0xff] %vm1116_vm2, %v1108_v32  ;;  %v1038_v6 = vadd.f32 %v2123_v20, %v748_v50 }
 0x1a8   : > { %v752_v2 = vpop.f32.mrf.mxu0 }
 0x1a9   : > { %v1109_v37 = vmax.f32 %v1038_v6, 0.0  ;;  %v753_v38 = vadd.f32 %v1961_v5, %v752_v2 }
 0x1aa   : > { %v754_v39 = vpop.f32.mrf.mxu0 }
 0x1ab   : > { %1155 = vst.msk [vmem:[%s1970_s22 + $0x130] sm:$0xff] %vm1116_vm2, %v1109_v37  ;;  %v1043_v13 = vadd.f32 %v2129_v27, %v753_v38 }
 0x1ac   : > { %v757_v58 = vpop.f32.mrf.mxu0 }
 0x1ad   : > { %v1110_v60 = vmax.f32 %v1043_v13, 0.0  ;;  %v758_v4 = vadd.f32 %v1961_v5, %v757_v58 }
 0x1ae   : > { %v759_v43 = vpop.f32.mrf.mxu0 }
 0x1af   : > { %1156 = vst.msk [vmem:[%s1970_s22 + $0x138] sm:$0xff] %vm1116_vm2, %v1110_v60  ;;  %v1048_v20 = vadd.f32 %v2135_v33, %v758_v4 }
 0x1b0   : > { %v762_v45 = vpop.f32.mrf.mxu0 }
 0x1b1   : > { %v1111_v46 = vmax.f32 %v1048_v20, 0.0  ;;  %v763_v7 = vadd.f32 %v1961_v5, %v762_v45 }
 0x1b2   : > { %v764_v8 = vpop.f32.mrf.mxu0 }
 0x1b3   : > { %1157 = vst.msk [vmem:[%s1970_s22 + $0x140] sm:$0xff] %vm1116_vm2, %v1111_v46  ;;  %v1053_v27 = vadd.f32 %v2141_v40, %v763_v7 }
 0x1b4   : > { %v767_v9 = vpop.f32.mrf.mxu0 }
 0x1b5   : > { %v1112_v47 = vmax.f32 %v1053_v27, 0.0  ;;  %v768_v53 = vadd.f32 %v1961_v5, %v767_v9 }
 0x1b6   : > { %v769_v54 = vpop.f32.mrf.mxu0 }
 0x1b7   : > { %1158 = vst.msk [vmem:[%s1970_s22 + $0x148] sm:$0xff] %vm1116_vm2, %v1112_v47  ;;  %v1058_v33 = vadd.f32 %v2147_v48, %v768_v53 }
 0x1b8   : > { %v772_v14 = vpop.f32.mrf.mxu0 }
 0x1b9   : > { %v1113_v15 = vmax.f32 %v1058_v33, 0.0  ;;  %v773_v16 = vadd.f32 %v1961_v5, %v772_v14 }
 0x1ba   : > { %v774_v51 = vpop.f32.mrf.mxu0 }
 0x1bb   : > { %1159 = vst.msk [vmem:[%s1970_s22 + $0x150] sm:$0xff] %vm1116_vm2, %v1113_v15  ;;  %v1063_v40 = vadd.f32 %v2153_v56, %v773_v16 }
 0x1bc   : > { %v777_v62 = vpop.f32.mrf.mxu0 }
 0x1bd   : > { %v1114_v0 = vmax.f32 %v1063_v40, 0.0  ;;  %v778_v3 = vadd.f32 %v1961_v5, %v777_v62 }
 0x1be   : > { %v779_v22 = vpop.f32.mrf.mxu0 }
 0x1bf   : > { %1160 = vst.msk [vmem:[%s1970_s22 + $0x158] sm:$0xff] %vm1116_vm2, %v1114_v0  ;;  %v1068_v23 = vadd.f32 %v2159_v21, %v778_v3 }
 0x1c1   : > { %v1115_v55 = vmax.f32 %v1068_v23, 0.0 }
 0x1c3   : > { %1161 = vst.msk [vmem:[%s1970_s22 + $0x160] sm:$0xff] %vm1116_vm2, %v1115_v55 }
 0x1c4 PF: > { %s13_s12 = sadd.s32 1, %s1482_s12  }
 0x1c5   : > { %p10_p4 = scmp.ge.s32.totalorder %s13_s12, 5  }
 0x1c7   :  { %12 = sbr.rel (!%p10_p4) target bundleno = 1 (0x1), region = 62 }

// kernel: japaness_discriminator_forward.9
= control target key start
LH: loop header
LB: loop body
LE: loop exit
PB: predicated region body
PF: predicated region fallthrough
CT: control target
= control target key end

     0   :  { %v8237_v0 = vmov 0.0   ;;  %vm4454_vm0 = vmmov 0   ;;  %vm715_vm1 = vcmask 523264   ;;  %vm3218_vm2 = vcmask 588800   ;;  %s8228_s2 = inlined_call_operand.vmem [shape: f32[576,64], index: 2, kind: input, shape index: {}]   ;;  %s8229_s0 = inlined_call_operand.vmem [shape: f32[968,576], index: 0, kind: input, shape index: {}]   ;;  %s8230_s3 = inlined_call_operand.vmem [shape: f32[1,64], index: 3, kind: input, shape index: {}]   ;;  %s8231_s1 = inlined_call_operand.vmem [shape: f32[8,968], index: 1, kind: input, shape index: {}]   ;;  %s8232_s4 = inlined_call_operand.vmem [shape: f32[64,64], index: 4, kind: input, shape index: {}]   ;;  %s8233_s7 = inlined_call_operand.<no memory space> [shape: f32[1,1], index: 7, kind: input, shape index: {}]   ;;  %s8234_s5 = inlined_call_operand.vmem [shape: f32[1,64], index: 5, kind: input, shape index: {}]   ;;  %s8235_s6 = inlined_call_operand.vmem [shape: f32[1,64], index: 6, kind: input, shape index: {}]   ;;  %s8236_s8 = inlined_call_operand.vmem [shape: f32[8,1], index: 8, kind: output, shape index: {}]  }
   0x1   :  { %1079 = vmatprep.subr.mxu0 %v8237_v0  ;;  %4384 = vmatprep.subr.mxu1 %v8237_v0  ;;  %v651_v1 = vld [vmem:[%s8228_s2 + $0x78] sm:$0xff]  ;;  %v650_v2 = vld [vmem:[%s8228_s2 + $0x70] sm:$0xff]  ;;  %v649_v3 = vld [vmem:[%s8228_s2 + $0x68] sm:$0xff]  ;;  %vm3610_vm3 = vcmask 7168  }
   0x2   :  { %1080 = vmatpush1.msra.mxu0 %v651_v1  ;;  %4416 = vmatpush1.msra.mxu1 %v651_v1  ;;  %v648_v4 = vld [vmem:[%s8228_s2 + $0x60] sm:$0xff]  ;;  %v647_v5 = vld [vmem:[%s8228_s2 + $0x58] sm:$0xff]  ;;  %v646_v6 = vld [vmem:[%s8228_s2 + $0x50] sm:$0xff] }
   0x3   :  { %1081 = vmatprep.subr.mxu0 %v8237_v0  ;;  %4385 = vmatprep.subr.mxu1 %v8237_v0  ;;  %v645_v7 = vld [vmem:[%s8228_s2 + $0x48] sm:$0xff]  ;;  %v644_v8 = vld [vmem:[%s8228_s2 + $0x40] sm:$0xff]  ;;  %v643_v9 = vld [vmem:[%s8228_s2 + $0x38] sm:$0xff] }
   0x4   :  { %1082 = vmatpush1.msra.mxu0 %v650_v2  ;;  %4417 = vmatpush1.msra.mxu1 %v650_v2  ;;  %v642_v10 = vld [vmem:[%s8228_s2 + $0x30] sm:$0xff]  ;;  %v641_v11 = vld [vmem:[%s8228_s2 + $0x28] sm:$0xff]  ;;  %v640_v12 = vld [vmem:[%s8228_s2 + $0x20] sm:$0xff] }
   0x5   :  { %1083 = vmatprep.subr.mxu0 %v8237_v0  ;;  %4386 = vmatprep.subr.mxu1 %v8237_v0  ;;  %v639_v13 = vld [vmem:[%s8228_s2 + $0x18] sm:$0xff]  ;;  %v638_v14 = vld [vmem:[%s8228_s2 + $0x10] sm:$0xff]  ;;  %v637_v15 = vld [vmem:[%s8228_s2 + $0x8] sm:$0xff] }
   0x6   :  { %1084 = vmatpush1.msra.mxu0 %v649_v3  ;;  %4418 = vmatpush1.msra.mxu1 %v649_v3  ;;  %v636_v16 = vld [vmem:[%s8228_s2] sm:$0xff]  ;;  %v667_v17 = vld [vmem:[%s8228_s2 + $0xf8] sm:$0xff]  ;;  %v666_v18 = vld [vmem:[%s8228_s2 + $0xf0] sm:$0xff] }
   0x7   :  { %1085 = vmatprep.subr.mxu0 %v8237_v0  ;;  %4387 = vmatprep.subr.mxu1 %v8237_v0  ;;  %v665_v19 = vld [vmem:[%s8228_s2 + $0xe8] sm:$0xff]  ;;  %v664_v20 = vld [vmem:[%s8228_s2 + $0xe0] sm:$0xff]  ;;  %v663_v21 = vld [vmem:[%s8228_s2 + $0xd8] sm:$0xff] }
   0x8   :  { %1086 = vmatpush1.msra.mxu0 %v648_v4  ;;  %4419 = vmatpush1.msra.mxu1 %v648_v4  ;;  %v662_v22 = vld [vmem:[%s8228_s2 + $0xd0] sm:$0xff]  ;;  %v661_v23 = vld [vmem:[%s8228_s2 + $0xc8] sm:$0xff]  ;;  %v660_v24 = vld [vmem:[%s8228_s2 + $0xc0] sm:$0xff] }
   0x9   :  { %1087 = vmatprep.subr.mxu0 %v8237_v0  ;;  %4388 = vmatprep.subr.mxu1 %v8237_v0  ;;  %v659_v25 = vld [vmem:[%s8228_s2 + $0xb8] sm:$0xff]  ;;  %v658_v26 = vld [vmem:[%s8228_s2 + $0xb0] sm:$0xff]  ;;  %v657_v27 = vld [vmem:[%s8228_s2 + $0xa8] sm:$0xff] }
   0xa   :  { %1088 = vmatpush1.msra.mxu0 %v647_v5  ;;  %4420 = vmatpush1.msra.mxu1 %v647_v5  ;;  %v656_v28 = vld [vmem:[%s8228_s2 + $0xa0] sm:$0xff]  ;;  %v655_v29 = vld [vmem:[%s8228_s2 + $0x98] sm:$0xff]  ;;  %v654_v30 = vld [vmem:[%s8228_s2 + $0x90] sm:$0xff] }
   0xb   :  { %1089 = vmatprep.subr.mxu0 %v8237_v0  ;;  %4389 = vmatprep.subr.mxu1 %v8237_v0  ;;  %v653_v31 = vld [vmem:[%s8228_s2 + $0x88] sm:$0xff]  ;;  %v652_v32 = vld [vmem:[%s8228_s2 + $0x80] sm:$0xff]  ;;  %v422_v34 = vld [vmem:[%s8229_s0 + $0xc38] sm:$0xff] }
   0xc   :  { %1090 = vmatpush1.msra.mxu0 %v646_v6  ;;  %4421 = vmatpush1.msra.mxu1 %v646_v6  ;;  %v32_v33 = vld [vmem:[%s8229_s0 + $0x8] sm:$0xff]  ;;  %v31_v35 = vld [vmem:[%s8229_s0] sm:$0xff]  ;;  %v421_v36 = vld [vmem:[%s8229_s0 + $0xc30] sm:$0xff] }
   0xd   :  { %1091 = vmatprep.subr.mxu0 %v8237_v0  ;;  %4390 = vmatprep.subr.mxu1 %v8237_v0  ;;  %v37_v37 = vld [vmem:[%s8229_s0 + $0x30] sm:$0xff]  ;;  %v427_v38 = vld [vmem:[%s8229_s0 + $0xc60] sm:$0xff]  ;;  %v683_v39 = vld [vmem:[%s8228_s2 + $0x178] sm:$0xff] }
   0xe   :  { %1092 = vmatpush1.msra.mxu0 %v645_v7  ;;  %4422 = vmatpush1.msra.mxu1 %v645_v7  ;;  %v36_v40 = vld [vmem:[%s8229_s0 + $0x28] sm:$0xff]  ;;  %v426_v41 = vld [vmem:[%s8229_s0 + $0xc58] sm:$0xff]  ;;  %v682_v44 = vld [vmem:[%s8228_s2 + $0x170] sm:$0xff] }
   0xf   :  { %1093 = vmatprep.subr.mxu0 %v8237_v0  ;;  %4391 = vmatprep.subr.mxu1 %v8237_v0  ;;  %v42_v42 = vld [vmem:[%s8229_s0 + $0x58] sm:$0xff]  ;;  %v432_v43 = vld [vmem:[%s8229_s0 + $0xc88] sm:$0xff]  ;;  %v41_v45 = vld [vmem:[%s8229_s0 + $0x50] sm:$0xff] }
  0x10   :  { %1094 = vmatpush1.msra.mxu0 %v644_v8  ;;  %4423 = vmatpush1.msra.mxu1 %v644_v8  ;;  %v431_v46 = vld [vmem:[%s8229_s0 + $0xc80] sm:$0xff]  ;;  %v437_v48 = vld [vmem:[%s8229_s0 + $0xcb0] sm:$0xff]  ;;  %v681_v49 = vld [vmem:[%s8228_s2 + $0x168] sm:$0xff] }
  0x11   :  { %1095 = vmatprep.subr.mxu0 %v8237_v0  ;;  %4392 = vmatprep.subr.mxu1 %v8237_v0  ;;  %v47_v47 = vld [vmem:[%s8229_s0 + $0x80] sm:$0xff]  ;;  %v46_v50 = vld [vmem:[%s8229_s0 + $0x78] sm:$0xff]  ;;  %v436_v51 = vld [vmem:[%s8229_s0 + $0xca8] sm:$0xff] }
  0x12   :  { %1096 = vmatpush1.msra.mxu0 %v643_v9  ;;  %4424 = vmatpush1.msra.mxu1 %v643_v9  ;;  %v52_v52 = vld [vmem:[%s8229_s0 + $0xa8] sm:$0xff]  ;;  %v442_v53 = vld [vmem:[%s8229_s0 + $0xcd8] sm:$0xff]  ;;  %v680_v54 = vld [vmem:[%s8228_s2 + $0x160] sm:$0xff] }
  0x13   :  { %1097 = vmatprep.subr.mxu0 %v8237_v0  ;;  %4393 = vmatprep.subr.mxu1 %v8237_v0  ;;  %v51_v55 = vld [vmem:[%s8229_s0 + $0xa0] sm:$0xff]  ;;  %v441_v56 = vld [vmem:[%s8229_s0 + $0xcd0] sm:$0xff]  ;;  %v679_v59 = vld [vmem:[%s8228_s2 + $0x158] sm:$0xff] }
  0x14   :  { %1098 = vmatpush1.msra.mxu0 %v642_v10  ;;  %4425 = vmatpush1.msra.mxu1 %v642_v10  ;;  %v57_v57 = vld [vmem:[%s8229_s0 + $0xd0] sm:$0xff]  ;;  %v447_v58 = vld [vmem:[%s8229_s0 + $0xd00] sm:$0xff]  ;;  %v56_v60 = vld [vmem:[%s8229_s0 + $0xc8] sm:$0xff] }
  0x15   :  { %1099 = vmatprep.subr.mxu0 %v8237_v0  ;;  %4394 = vmatprep.subr.mxu1 %v8237_v0  ;;  %v446_v61 = vld [vmem:[%s8229_s0 + $0xcf8] sm:$0xff]  ;;  %v452_v63 = vld [vmem:[%s8229_s0 + $0xd28] sm:$0xff]  ;;  %v678_v1 = vld [vmem:[%s8228_s2 + $0x150] sm:$0xff] }
  0x16   :  { %1100 = vmatpush1.msra.mxu0 %v641_v11  ;;  %4426 = vmatpush1.msra.mxu1 %v641_v11  ;;  %v62_v62 = vld [vmem:[%s8229_s0 + $0xf8] sm:$0xff]  ;;  %v61_v2 = vld [vmem:[%s8229_s0 + $0xf0] sm:$0xff]  ;;  %v451_v3 = vld [vmem:[%s8229_s0 + $0xd20] sm:$0xff] }
  0x17   :  { %1101 = vmatprep.subr.mxu0 %v8237_v0  ;;  %4395 = vmatprep.subr.mxu1 %v8237_v0  ;;  %v67_v4 = vld [vmem:[%s8229_s0 + $0x120] sm:$0xff]  ;;  %v457_v5 = vld [vmem:[%s8229_s0 + $0xd50] sm:$0xff]  ;;  %v677_v6 = vld [vmem:[%s8228_s2 + $0x148] sm:$0xff] }
  0x18   :  { %1102 = vmatpush1.msra.mxu0 %v640_v12  ;;  %4427 = vmatpush1.msra.mxu1 %v640_v12  ;;  %v66_v7 = vld [vmem:[%s8229_s0 + $0x118] sm:$0xff]  ;;  %v456_v8 = vld [vmem:[%s8229_s0 + $0xd48] sm:$0xff]  ;;  %v676_v11 = vld [vmem:[%s8228_s2 + $0x140] sm:$0xff] }
  0x19   :  { %1103 = vmatprep.subr.mxu0 %v8237_v0  ;;  %4396 = vmatprep.subr.mxu1 %v8237_v0  ;;  %v72_v9 = vld [vmem:[%s8229_s0 + $0x148] sm:$0xff]  ;;  %v462_v10 = vld [vmem:[%s8229_s0 + $0xd78] sm:$0xff]  ;;  %v71_v12 = vld [vmem:[%s8229_s0 + $0x140] sm:$0xff] }
  0x1a   :  { %1104 = vmatpush1.msra.mxu0 %v639_v13  ;;  %4428 = vmatpush1.msra.mxu1 %v639_v13  ;;  %v461_v13 = vld [vmem:[%s8229_s0 + $0xd70] sm:$0xff] }
  0x1b   :  { %1105 = vmatprep.subr.mxu0 %v8237_v0  ;;  %4397 = vmatprep.subr.mxu1 %v8237_v0 }
  0x1c   :  { %1106 = vmatpush1.msra.mxu0 %v638_v14  ;;  %4429 = vmatpush1.msra.mxu1 %v638_v14  ;;  %v77_v14 = vld [vmem:[%s8229_s0 + $0x170] sm:$0xff] }
  0x1d   :  { %1107 = vmatprep.subr.mxu0 %v8237_v0  ;;  %4398 = vmatprep.subr.mxu1 %v8237_v0 }
  0x1e   :  { %1108 = vmatpush1.msra.mxu0 %v637_v15  ;;  %4430 = vmatpush1.msra.mxu1 %v637_v15  ;;  %v467_v15 = vld [vmem:[%s8229_s0 + $0xda0] sm:$0xff] }
  0x1f   :  { %1109 = vmatprep.subr.mxu0 %v8237_v0  ;;  %4399 = vmatprep.subr.mxu1 %v8237_v0 }
  0x20   :  { %1110 = vmatpush1.msra.mxu0 %v636_v16  ;;  %4431 = vmatpush1.msra.mxu1 %v636_v16  ;;  %v675_v16 = vld [vmem:[%s8228_s2 + $0x138] sm:$0xff] }
  0x21   :  { %1111 = vmatprep.subr.mxu0 %v8237_v0  ;;  %4400 = vmatprep.subr.mxu1 %v8237_v0 }
  0x22   :  { %1112 = vmatpush2.msra.mxu0 %v667_v17  ;;  %4432 = vmatpush2.msra.mxu1 %v667_v17  ;;  %v76_v17 = vld [vmem:[%s8229_s0 + $0x168] sm:$0xff] }
  0x23   :  { %1113 = vmatprep.subr.mxu0 %v8237_v0  ;;  %4401 = vmatprep.subr.mxu1 %v8237_v0 }
  0x24   :  { %1114 = vmatpush2.msra.mxu0 %v666_v18  ;;  %4433 = vmatpush2.msra.mxu1 %v666_v18  ;;  %v466_v18 = vld [vmem:[%s8229_s0 + $0xd98] sm:$0xff] }
  0x25   :  { %1115 = vmatprep.subr.mxu0 %v8237_v0  ;;  %4402 = vmatprep.subr.mxu1 %v8237_v0 }
  0x26   :  { %1116 = vmatpush2.msra.mxu0 %v665_v19  ;;  %4434 = vmatpush2.msra.mxu1 %v665_v19  ;;  %v82_v19 = vld [vmem:[%s8229_s0 + $0x198] sm:$0xff] }
  0x27   :  { %1117 = vmatprep.subr.mxu0 %v8237_v0  ;;  %4403 = vmatprep.subr.mxu1 %v8237_v0 }
  0x28   :  { %1118 = vmatpush2.msra.mxu0 %v664_v20  ;;  %4435 = vmatpush2.msra.mxu1 %v664_v20  ;;  %v472_v20 = vld [vmem:[%s8229_s0 + $0xdc8] sm:$0xff] }
  0x29   :  { %1119 = vmatprep.subr.mxu0 %v8237_v0  ;;  %4404 = vmatprep.subr.mxu1 %v8237_v0 }
  0x2a   :  { %1120 = vmatpush2.msra.mxu0 %v663_v21  ;;  %4436 = vmatpush2.msra.mxu1 %v663_v21  ;;  %v674_v21 = vld [vmem:[%s8228_s2 + $0x130] sm:$0xff] }
  0x2b   :  { %1121 = vmatprep.subr.mxu0 %v8237_v0  ;;  %4405 = vmatprep.subr.mxu1 %v8237_v0 }
  0x2c   :  { %1122 = vmatpush2.msra.mxu0 %v662_v22  ;;  %4437 = vmatpush2.msra.mxu1 %v662_v22  ;;  %v81_v22 = vld [vmem:[%s8229_s0 + $0x190] sm:$0xff] }
  0x2d   :  { %1123 = vmatprep.subr.mxu0 %v8237_v0  ;;  %4406 = vmatprep.subr.mxu1 %v8237_v0 }
  0x2e   :  { %1124 = vmatpush2.msra.mxu0 %v661_v23  ;;  %4438 = vmatpush2.msra.mxu1 %v661_v23  ;;  %v471_v23 = vld [vmem:[%s8229_s0 + $0xdc0] sm:$0xff] }
  0x2f   :  { %1125 = vmatprep.subr.mxu0 %v8237_v0  ;;  %4407 = vmatprep.subr.mxu1 %v8237_v0 }
  0x30   :  { %1126 = vmatpush2.msra.mxu0 %v660_v24  ;;  %4439 = vmatpush2.msra.mxu1 %v660_v24  ;;  %v87_v24 = vld [vmem:[%s8229_s0 + $0x1c0] sm:$0xff] }
  0x31   :  { %1127 = vmatprep.subr.mxu0 %v8237_v0  ;;  %4408 = vmatprep.subr.mxu1 %v8237_v0 }
  0x32   :  { %1128 = vmatpush2.msra.mxu0 %v659_v25  ;;  %4440 = vmatpush2.msra.mxu1 %v659_v25  ;;  %v477_v25 = vld [vmem:[%s8229_s0 + $0xdf0] sm:$0xff] }
  0x33   :  { %1129 = vmatprep.subr.mxu0 %v8237_v0  ;;  %4409 = vmatprep.subr.mxu1 %v8237_v0 }
  0x34   :  { %1130 = vmatpush2.msra.mxu0 %v658_v26  ;;  %4441 = vmatpush2.msra.mxu1 %v658_v26  ;;  %v673_v26 = vld [vmem:[%s8228_s2 + $0x128] sm:$0xff] }
  0x35   :  { %1131 = vmatprep.subr.mxu0 %v8237_v0  ;;  %4410 = vmatprep.subr.mxu1 %v8237_v0 }
  0x36   :  { %1132 = vmatpush2.msra.mxu0 %v657_v27  ;;  %4442 = vmatpush2.msra.mxu1 %v657_v27  ;;  %v86_v27 = vld [vmem:[%s8229_s0 + $0x1b8] sm:$0xff] }
  0x37   :  { %1133 = vmatprep.subr.mxu0 %v8237_v0  ;;  %4411 = vmatprep.subr.mxu1 %v8237_v0 }
  0x38   :  { %1134 = vmatpush2.msra.mxu0 %v656_v28  ;;  %4443 = vmatpush2.msra.mxu1 %v656_v28  ;;  %v476_v28 = vld [vmem:[%s8229_s0 + $0xde8] sm:$0xff] }
  0x39   :  { %1135 = vmatprep.subr.mxu0 %v8237_v0  ;;  %4412 = vmatprep.subr.mxu1 %v8237_v0 }
  0x3a   :  { %1136 = vmatpush2.msra.mxu0 %v655_v29  ;;  %4444 = vmatpush2.msra.mxu1 %v655_v29  ;;  %v92_v29 = vld [vmem:[%s8229_s0 + $0x1e8] sm:$0xff] }
  0x3b   :  { %1137 = vmatprep.subr.mxu0 %v8237_v0  ;;  %4413 = vmatprep.subr.mxu1 %v8237_v0 }
  0x3c   :  { %1138 = vmatpush2.msra.mxu0 %v654_v30  ;;  %4445 = vmatpush2.msra.mxu1 %v654_v30  ;;  %v482_v30 = vld [vmem:[%s8229_s0 + $0xe18] sm:$0xff] }
  0x3d   :  { %1139 = vmatprep.subr.mxu0 %v8237_v0  ;;  %4414 = vmatprep.subr.mxu1 %v8237_v0 }
  0x3e   :  { %1140 = vmatpush2.msra.mxu0 %v653_v31  ;;  %4446 = vmatpush2.msra.mxu1 %v653_v31  ;;  %v672_v31 = vld [vmem:[%s8228_s2 + $0x120] sm:$0xff] }
  0x3f   :  { %1141 = vmatprep.subr.mxu0 %v8237_v0  ;;  %4415 = vmatprep.subr.mxu1 %v8237_v0 }
  0x40   :  { %1142 = vmatpush2.msra.mxu0 %v652_v32  ;;  %4447 = vmatpush2.msra.mxu1 %v652_v32  ;;  %v91_v32 = vld [vmem:[%s8229_s0 + $0x1e0] sm:$0xff] }
  0x41   :  { %1143 = vmatprep.mubr.f32.mxu0 %v32_v33  ;;  %1533 = vmatprep.mubr.f32.mxu1 %v422_v34  ;;  %v481_v33 = vld [vmem:[%s8229_s0 + $0xe10] sm:$0xff] }
  0x42   :  { %1144 = vmatmul.mubr.f32.vlgmr.msra.gmra.mxu0 %v31_v35  ;;  %1534 = vmatmul.mubr.f32.vlgmr.msra.gmra.mxu1 %v421_v36  ;;  %v97_v34 = vld [vmem:[%s8229_s0 + $0x210] sm:$0xff]  ;;  %v487_v35 = vld [vmem:[%s8229_s0 + $0xe40] sm:$0xff]  ;;  %v671_v36 = vld [vmem:[%s8228_s2 + $0x118] sm:$0xff] }
  0x43   :  { %1148 = vmatprep.mubr.f32.mxu0 %v37_v37  ;;  %1538 = vmatprep.mubr.f32.mxu1 %v427_v38  ;;  %v96_v37 = vld [vmem:[%s8229_s0 + $0x208] sm:$0xff]  ;;  %v486_v38 = vld [vmem:[%s8229_s0 + $0xe38] sm:$0xff] }
  0x44   :  { %1749 = vmatprep.subr.mxu1 %v8237_v0  ;;  %3986 = vmatprep.subr.mxu0 %v8237_v0 }
  0x45   :  { %1750 = vmatpush1.msra.mxu1 %v683_v39  ;;  %v102_v39 = vld [vmem:[%s8229_s0 + $0x238] sm:$0xff] }
  0x46   :  { %1149 = vmatmul.mubr.f32.gmra.mxu0 %v36_v40  ;;  %1539 = vmatmul.mubr.f32.gmra.mxu1 %v426_v41  ;;  %v492_v40 = vld [vmem:[%s8229_s0 + $0xe68] sm:$0xff]  ;;  %v670_v41 = vld [vmem:[%s8228_s2 + $0x110] sm:$0xff] }
  0x47   :  { %1153 = vmatprep.mubr.f32.mxu0 %v42_v42  ;;  %1543 = vmatprep.mubr.f32.mxu1 %v432_v43  ;;  %v101_v42 = vld [vmem:[%s8229_s0 + $0x230] sm:$0xff]  ;;  %v491_v43 = vld [vmem:[%s8229_s0 + $0xe60] sm:$0xff] }
  0x48   :  { %1751 = vmatprep.subr.mxu1 %v8237_v0 }
  0x49   :  { %1752 = vmatpush1.msra.mxu1 %v682_v44  ;;  %v107_v44 = vld [vmem:[%s8229_s0 + $0x260] sm:$0xff] }
  0x4a   :  { %1154 = vmatmul.mubr.f32.gmra.mxu0 %v41_v45  ;;  %1544 = vmatmul.mubr.f32.gmra.mxu1 %v431_v46  ;;  %v497_v45 = vld [vmem:[%s8229_s0 + $0xe90] sm:$0xff]  ;;  %v669_v46 = vld [vmem:[%s8228_s2 + $0x108] sm:$0xff] }
  0x4b   :  { %1158 = vmatprep.mubr.f32.mxu0 %v47_v47  ;;  %1548 = vmatprep.mubr.f32.mxu1 %v437_v48  ;;  %v106_v47 = vld [vmem:[%s8229_s0 + $0x258] sm:$0xff]  ;;  %v496_v48 = vld [vmem:[%s8229_s0 + $0xe88] sm:$0xff] }
  0x4c   :  { %1753 = vmatprep.subr.mxu1 %v8237_v0 }
  0x4d   :  { %1754 = vmatpush1.msra.mxu1 %v681_v49  ;;  %v112_v49 = vld [vmem:[%s8229_s0 + $0x288] sm:$0xff] }
  0x4e   :  { %1159 = vmatmul.mubr.f32.gmra.mxu0 %v46_v50  ;;  %1549 = vmatmul.mubr.f32.gmra.mxu1 %v436_v51  ;;  %v502_v50 = vld [vmem:[%s8229_s0 + $0xeb8] sm:$0xff]  ;;  %v668_v51 = vld [vmem:[%s8228_s2 + $0x100] sm:$0xff] }
  0x4f   :  { %1163 = vmatprep.mubr.f32.mxu0 %v52_v52  ;;  %1553 = vmatprep.mubr.f32.mxu1 %v442_v53  ;;  %v111_v52 = vld [vmem:[%s8229_s0 + $0x280] sm:$0xff]  ;;  %v501_v53 = vld [vmem:[%s8229_s0 + $0xeb0] sm:$0xff] }
  0x50   :  { %1755 = vmatprep.subr.mxu1 %v8237_v0 }
  0x51   :  { %1756 = vmatpush1.msra.mxu1 %v680_v54  ;;  %v117_v54 = vld [vmem:[%s8229_s0 + $0x2b0] sm:$0xff] }
  0x52   :  { %1164 = vmatmul.mubr.f32.gmra.mxu0 %v51_v55  ;;  %1554 = vmatmul.mubr.f32.gmra.mxu1 %v441_v56  ;;  %v507_v55 = vld [vmem:[%s8229_s0 + $0xee0] sm:$0xff]  ;;  %v699_v56 = vld [vmem:[%s8228_s2 + $0x1f8] sm:$0xff] }
  0x53   :  { %1168 = vmatprep.mubr.f32.mxu0 %v57_v57  ;;  %1558 = vmatprep.mubr.f32.mxu1 %v447_v58  ;;  %v116_v57 = vld [vmem:[%s8229_s0 + $0x2a8] sm:$0xff]  ;;  %v506_v58 = vld [vmem:[%s8229_s0 + $0xed8] sm:$0xff] }
  0x54   :  { %1757 = vmatprep.subr.mxu1 %v8237_v0 }
  0x55   :  { %1758 = vmatpush1.msra.mxu1 %v679_v59  ;;  %v122_v59 = vld [vmem:[%s8229_s0 + $0x2d8] sm:$0xff] }
  0x56   :  { %1169 = vmatmul.mubr.f32.gmra.mxu0 %v56_v60  ;;  %1559 = vmatmul.mubr.f32.gmra.mxu1 %v446_v61  ;;  %v512_v60 = vld [vmem:[%s8229_s0 + $0xf08] sm:$0xff]  ;;  %v698_v61 = vld [vmem:[%s8228_s2 + $0x1f0] sm:$0xff] }
  0x57   :  { %1173 = vmatprep.mubr.f32.mxu0 %v62_v62  ;;  %1563 = vmatprep.mubr.f32.mxu1 %v452_v63  ;;  %v121_v62 = vld [vmem:[%s8229_s0 + $0x2d0] sm:$0xff]  ;;  %v511_v63 = vld [vmem:[%s8229_s0 + $0xf00] sm:$0xff] }
  0x58   :  { %1759 = vmatprep.subr.mxu1 %v8237_v0 }
  0x59   :  { %1760 = vmatpush1.msra.mxu1 %v678_v1  ;;  %v127_v1 = vld [vmem:[%s8229_s0 + $0x300] sm:$0xff] }
  0x5a   :  { %1174 = vmatmul.mubr.f32.gmra.mxu0 %v61_v2  ;;  %1564 = vmatmul.mubr.f32.gmra.mxu1 %v451_v3  ;;  %v517_v2 = vld [vmem:[%s8229_s0 + $0xf30] sm:$0xff]  ;;  %v697_v3 = vld [vmem:[%s8228_s2 + $0x1e8] sm:$0xff] }
  0x5b   :  { %1178 = vmatprep.mubr.f32.mxu0 %v67_v4  ;;  %1568 = vmatprep.mubr.f32.mxu1 %v457_v5  ;;  %v126_v4 = vld [vmem:[%s8229_s0 + $0x2f8] sm:$0xff]  ;;  %v516_v5 = vld [vmem:[%s8229_s0 + $0xf28] sm:$0xff] }
  0x5c   :  { %1761 = vmatprep.subr.mxu1 %v8237_v0 }
  0x5d   :  { %1762 = vmatpush1.msra.mxu1 %v677_v6  ;;  %v132_v6 = vld [vmem:[%s8229_s0 + $0x328] sm:$0xff] }
  0x5e   :  { %1179 = vmatmul.mubr.f32.gmra.mxu0 %v66_v7  ;;  %1569 = vmatmul.mubr.f32.gmra.mxu1 %v456_v8  ;;  %v522_v7 = vld [vmem:[%s8229_s0 + $0xf58] sm:$0xff]  ;;  %v696_v8 = vld [vmem:[%s8228_s2 + $0x1e0] sm:$0xff] }
  0x5f   :  { %1183 = vmatprep.mubr.f32.mxu0 %v72_v9  ;;  %1573 = vmatprep.mubr.f32.mxu1 %v462_v10  ;;  %v131_v9 = vld [vmem:[%s8229_s0 + $0x320] sm:$0xff]  ;;  %v521_v10 = vld [vmem:[%s8229_s0 + $0xf50] sm:$0xff] }
  0x60   :  { %1763 = vmatprep.subr.mxu1 %v8237_v0 }
  0x61   :  { %1764 = vmatpush1.msra.mxu1 %v676_v11  ;;  %v137_v11 = vld [vmem:[%s8229_s0 + $0x350] sm:$0xff] }
  0x62   :  { %1184 = vmatmul.mubr.f32.gmra.mxu0 %v71_v12  ;;  %1574 = vmatmul.mubr.f32.gmra.mxu1 %v461_v13  ;;  %v527_v12 = vld [vmem:[%s8229_s0 + $0xf80] sm:$0xff]  ;;  %v695_v13 = vld [vmem:[%s8228_s2 + $0x1d8] sm:$0xff] }
  0x63   :  { %1188 = vmatprep.mubr.f32.mxu0 %v77_v14  ;;  %1578 = vmatprep.mubr.f32.mxu1 %v467_v15  ;;  %v136_v14 = vld [vmem:[%s8229_s0 + $0x348] sm:$0xff]  ;;  %v526_v15 = vld [vmem:[%s8229_s0 + $0xf78] sm:$0xff] }
  0x64   :  { %1765 = vmatprep.subr.mxu1 %v8237_v0 }
  0x65   :  { %1766 = vmatpush1.msra.mxu1 %v675_v16  ;;  %v142_v16 = vld [vmem:[%s8229_s0 + $0x378] sm:$0xff] }
  0x66   :  { %1189 = vmatmul.mubr.f32.gmra.mxu0 %v76_v17  ;;  %1579 = vmatmul.mubr.f32.gmra.mxu1 %v466_v18  ;;  %v532_v17 = vld [vmem:[%s8229_s0 + $0xfa8] sm:$0xff]  ;;  %v694_v18 = vld [vmem:[%s8228_s2 + $0x1d0] sm:$0xff] }
  0x67   :  { %1193 = vmatprep.mubr.f32.mxu0 %v82_v19  ;;  %1583 = vmatprep.mubr.f32.mxu1 %v472_v20  ;;  %v141_v19 = vld [vmem:[%s8229_s0 + $0x370] sm:$0xff]  ;;  %v531_v20 = vld [vmem:[%s8229_s0 + $0xfa0] sm:$0xff] }
  0x68   :  { %1767 = vmatprep.subr.mxu1 %v8237_v0 }
  0x69   :  { %1768 = vmatpush1.msra.mxu1 %v674_v21  ;;  %v147_v21 = vld [vmem:[%s8229_s0 + $0x3a0] sm:$0xff] }
  0x6a   :  { %1194 = vmatmul.mubr.f32.gmra.mxu0 %v81_v22  ;;  %1584 = vmatmul.mubr.f32.gmra.mxu1 %v471_v23  ;;  %v537_v22 = vld [vmem:[%s8229_s0 + $0xfd0] sm:$0xff]  ;;  %v693_v23 = vld [vmem:[%s8228_s2 + $0x1c8] sm:$0xff] }
  0x6b   :  { %1198 = vmatprep.mubr.f32.mxu0 %v87_v24  ;;  %1588 = vmatprep.mubr.f32.mxu1 %v477_v25  ;;  %v146_v24 = vld [vmem:[%s8229_s0 + $0x398] sm:$0xff]  ;;  %v536_v25 = vld [vmem:[%s8229_s0 + $0xfc8] sm:$0xff] }
  0x6c   :  { %1769 = vmatprep.subr.mxu1 %v8237_v0 }
  0x6d   :  { %1770 = vmatpush1.msra.mxu1 %v673_v26  ;;  %v152_v26 = vld [vmem:[%s8229_s0 + $0x3c8] sm:$0xff] }
  0x6e   :  { %1199 = vmatmul.mubr.f32.gmra.mxu0 %v86_v27  ;;  %1589 = vmatmul.mubr.f32.gmra.mxu1 %v476_v28  ;;  %v542_v27 = vld [vmem:[%s8229_s0 + $0xff8] sm:$0xff]  ;;  %v692_v28 = vld [vmem:[%s8228_s2 + $0x1c0] sm:$0xff] }
  0x6f   :  { %1203 = vmatprep.mubr.f32.mxu0 %v92_v29  ;;  %1593 = vmatprep.mubr.f32.mxu1 %v482_v30  ;;  %v151_v29 = vld [vmem:[%s8229_s0 + $0x3c0] sm:$0xff]  ;;  %v541_v30 = vld [vmem:[%s8229_s0 + $0xff0] sm:$0xff] }
  0x70   :  { %1771 = vmatprep.subr.mxu1 %v8237_v0 }
  0x71   :  { %1772 = vmatpush1.msra.mxu1 %v672_v31  ;;  %v157_v31 = vld [vmem:[%s8229_s0 + $0x3f0] sm:$0xff] }
  0x72   :  { %1204 = vmatmul.mubr.f32.gmra.mxu0 %v91_v32  ;;  %1594 = vmatmul.mubr.f32.gmra.mxu1 %v481_v33  ;;  %v547_v32 = vld [vmem:[%s8229_s0 + $0x1020] sm:$0xff]  ;;  %v691_v33 = vld [vmem:[%s8228_s2 + $0x1b8] sm:$0xff] }
  0x73   :  { %1208 = vmatprep.mubr.f32.mxu0 %v97_v34  ;;  %1598 = vmatprep.mubr.f32.mxu1 %v487_v35  ;;  %v156_v34 = vld [vmem:[%s8229_s0 + $0x3e8] sm:$0xff]  ;;  %v546_v35 = vld [vmem:[%s8229_s0 + $0x1018] sm:$0xff] }
  0x74   :  { %1773 = vmatprep.subr.mxu1 %v8237_v0 }
  0x75   :  { %1774 = vmatpush1.msra.mxu1 %v671_v36  ;;  %v707_v36 = vld [vmem:[%s8228_s2 + $0x238] sm:$0xff] }
  0x76   :  { %1209 = vmatmul.mubr.f32.gmra.mxu0 %v96_v37  ;;  %1599 = vmatmul.mubr.f32.gmra.mxu1 %v486_v38  ;;  %v162_v37 = vld [vmem:[%s8229_s0 + $0x418] sm:$0xff]  ;;  %v552_v38 = vld [vmem:[%s8229_s0 + $0x1048] sm:$0xff] }
  0x77   :  { %1213 = vmatprep.mubr.f32.mxu0 %v102_v39  ;;  %1603 = vmatprep.mubr.f32.mxu1 %v492_v40  ;;  %v690_v39 = vld [vmem:[%s8228_s2 + $0x1b0] sm:$0xff] }
  0x78   :  { %1775 = vmatprep.subr.mxu1 %v8237_v0  ;;  %3987 = vmatpush3.msra.mxu0 %v707_v36  ;;  %v161_v40 = vld [vmem:[%s8229_s0 + $0x410] sm:$0xff]  ;;  %v226_v36 = vld [vmem:[%s8229_s0 + $0x618] sm:$0xff] }
  0x79   :  { %1776 = vmatpush1.msra.mxu1 %v670_v41  ;;  %3988 = vmatprep.subr.mxu0 %v8237_v0  ;;  %v551_v41 = vld [vmem:[%s8229_s0 + $0x1040] sm:$0xff] }
  0x7a   :  { %1214 = vmatmul.mubr.f32.gmra.mxu0 %v101_v42  ;;  %1604 = vmatmul.mubr.f32.gmra.mxu1 %v491_v43  ;;  %v167_v42 = vld [vmem:[%s8229_s0 + $0x440] sm:$0xff]  ;;  %v557_v43 = vld [vmem:[%s8229_s0 + $0x1070] sm:$0xff] }
  0x7b   :  { %1218 = vmatprep.mubr.f32.mxu0 %v107_v44  ;;  %1608 = vmatprep.mubr.f32.mxu1 %v497_v45  ;;  %v689_v44 = vld [vmem:[%s8228_s2 + $0x1a8] sm:$0xff]  ;;  %v166_v45 = vld [vmem:[%s8229_s0 + $0x438] sm:$0xff] }
  0x7c   :  { %1777 = vmatprep.subr.mxu1 %v8237_v0 }
  0x7d   :  { %1778 = vmatpush1.msra.mxu1 %v669_v46  ;;  %v556_v46 = vld [vmem:[%s8229_s0 + $0x1068] sm:$0xff] }
  0x7e   :  { %1219 = vmatmul.mubr.f32.gmra.mxu0 %v106_v47  ;;  %1609 = vmatmul.mubr.f32.gmra.mxu1 %v496_v48  ;;  %v172_v47 = vld [vmem:[%s8229_s0 + $0x468] sm:$0xff]  ;;  %v562_v48 = vld [vmem:[%s8229_s0 + $0x1098] sm:$0xff] }
  0x7f   :  { %1223 = vmatprep.mubr.f32.mxu0 %v112_v49  ;;  %1613 = vmatprep.mubr.f32.mxu1 %v502_v50  ;;  %v688_v49 = vld [vmem:[%s8228_s2 + $0x1a0] sm:$0xff] }
  0x80   :  { %1779 = vmatprep.subr.mxu1 %v8237_v0  ;;  %v171_v50 = vld [vmem:[%s8229_s0 + $0x460] sm:$0xff] }
  0x81   :  { %1780 = vmatpush1.msra.mxu1 %v668_v51  ;;  %v561_v51 = vld [vmem:[%s8229_s0 + $0x1090] sm:$0xff] }
  0x82   :  { %1224 = vmatmul.mubr.f32.gmra.mxu0 %v111_v52  ;;  %1614 = vmatmul.mubr.f32.gmra.mxu1 %v501_v53  ;;  %v177_v52 = vld [vmem:[%s8229_s0 + $0x490] sm:$0xff]  ;;  %v567_v53 = vld [vmem:[%s8229_s0 + $0x10c0] sm:$0xff] }
  0x83   :  { %1228 = vmatprep.mubr.f32.mxu0 %v117_v54  ;;  %1618 = vmatprep.mubr.f32.mxu1 %v507_v55  ;;  %v687_v54 = vld [vmem:[%s8228_s2 + $0x198] sm:$0xff]  ;;  %v176_v55 = vld [vmem:[%s8229_s0 + $0x488] sm:$0xff] }
  0x84   :  { %1781 = vmatprep.subr.mxu1 %v8237_v0 }
  0x85   :  { %1782 = vmatpush2.msra.mxu1 %v699_v56  ;;  %v566_v56 = vld [vmem:[%s8229_s0 + $0x10b8] sm:$0xff] }
  0x86   :  { %1229 = vmatmul.mubr.f32.gmra.mxu0 %v116_v57  ;;  %1619 = vmatmul.mubr.f32.gmra.mxu1 %v506_v58  ;;  %v182_v57 = vld [vmem:[%s8229_s0 + $0x4b8] sm:$0xff]  ;;  %v572_v58 = vld [vmem:[%s8229_s0 + $0x10e8] sm:$0xff] }
  0x87   :  { %1233 = vmatprep.mubr.f32.mxu0 %v122_v59  ;;  %1623 = vmatprep.mubr.f32.mxu1 %v512_v60  ;;  %v686_v59 = vld [vmem:[%s8228_s2 + $0x190] sm:$0xff] }
  0x88   :  { %1783 = vmatprep.subr.mxu1 %v8237_v0  ;;  %v181_v60 = vld [vmem:[%s8229_s0 + $0x4b0] sm:$0xff] }
  0x89   :  { %1784 = vmatpush2.msra.mxu1 %v698_v61  ;;  %v571_v61 = vld [vmem:[%s8229_s0 + $0x10e0] sm:$0xff] }
  0x8a   :  { %1234 = vmatmul.mubr.f32.gmra.mxu0 %v121_v62  ;;  %1624 = vmatmul.mubr.f32.gmra.mxu1 %v511_v63  ;;  %v187_v62 = vld [vmem:[%s8229_s0 + $0x4e0] sm:$0xff]  ;;  %v577_v63 = vld [vmem:[%s8229_s0 + $0x1110] sm:$0xff] }
  0x8b   :  { %1238 = vmatprep.mubr.f32.mxu0 %v127_v1  ;;  %1628 = vmatprep.mubr.f32.mxu1 %v517_v2  ;;  %v685_v1 = vld [vmem:[%s8228_s2 + $0x188] sm:$0xff]  ;;  %v186_v2 = vld [vmem:[%s8229_s0 + $0x4d8] sm:$0xff] }
  0x8c   :  { %1785 = vmatprep.subr.mxu1 %v8237_v0 }
  0x8d   :  { %1786 = vmatpush2.msra.mxu1 %v697_v3  ;;  %v576_v3 = vld [vmem:[%s8229_s0 + $0x1108] sm:$0xff] }
  0x8e   :  { %1239 = vmatmul.mubr.f32.gmra.mxu0 %v126_v4  ;;  %1629 = vmatmul.mubr.f32.gmra.mxu1 %v516_v5  ;;  %v192_v4 = vld [vmem:[%s8229_s0 + $0x508] sm:$0xff]  ;;  %v582_v5 = vld [vmem:[%s8229_s0 + $0x1138] sm:$0xff] }
  0x8f   :  { %1243 = vmatprep.mubr.f32.mxu0 %v132_v6  ;;  %1633 = vmatprep.mubr.f32.mxu1 %v522_v7  ;;  %v684_v6 = vld [vmem:[%s8228_s2 + $0x180] sm:$0xff] }
  0x90   :  { %1787 = vmatprep.subr.mxu1 %v8237_v0  ;;  %v191_v7 = vld [vmem:[%s8229_s0 + $0x500] sm:$0xff] }
  0x91   :  { %1788 = vmatpush2.msra.mxu1 %v696_v8  ;;  %v581_v8 = vld [vmem:[%s8229_s0 + $0x1130] sm:$0xff] }
  0x92   :  { %1244 = vmatmul.mubr.f32.gmra.mxu0 %v131_v9  ;;  %1634 = vmatmul.mubr.f32.gmra.mxu1 %v521_v10  ;;  %v197_v9 = vld [vmem:[%s8229_s0 + $0x530] sm:$0xff]  ;;  %v587_v10 = vld [vmem:[%s8229_s0 + $0x1160] sm:$0xff] }
  0x93   :  { %1248 = vmatprep.mubr.f32.mxu0 %v137_v11  ;;  %1638 = vmatprep.mubr.f32.mxu1 %v527_v12  ;;  %v196_v11 = vld [vmem:[%s8229_s0 + $0x528] sm:$0xff]  ;;  %v586_v12 = vld [vmem:[%s8229_s0 + $0x1158] sm:$0xff] }
  0x94   :  { %1789 = vmatprep.subr.mxu1 %v8237_v0 }
  0x95   :  { %1790 = vmatpush2.msra.mxu1 %v695_v13  ;;  %v202_v13 = vld [vmem:[%s8229_s0 + $0x558] sm:$0xff] }
  0x96   :  { %1249 = vmatmul.mubr.f32.gmra.mxu0 %v136_v14  ;;  %1639 = vmatmul.mubr.f32.gmra.mxu1 %v526_v15  ;;  %v592_v14 = vld [vmem:[%s8229_s0 + $0x1188] sm:$0xff]  ;;  %v201_v15 = vld [vmem:[%s8229_s0 + $0x550] sm:$0xff] }
  0x97   :  { %1253 = vmatprep.mubr.f32.mxu0 %v142_v16  ;;  %1643 = vmatprep.mubr.f32.mxu1 %v532_v17  ;;  %v591_v16 = vld [vmem:[%s8229_s0 + $0x1180] sm:$0xff] }
  0x98   :  { %1791 = vmatprep.subr.mxu1 %v8237_v0  ;;  %v207_v17 = vld [vmem:[%s8229_s0 + $0x580] sm:$0xff] }
  0x99   :  { %1792 = vmatpush2.msra.mxu1 %v694_v18  ;;  %v597_v18 = vld [vmem:[%s8229_s0 + $0x11b0] sm:$0xff] }
  0x9a   :  { %1254 = vmatmul.mubr.f32.gmra.mxu0 %v141_v19  ;;  %1644 = vmatmul.mubr.f32.gmra.mxu1 %v531_v20  ;;  %v206_v19 = vld [vmem:[%s8229_s0 + $0x578] sm:$0xff]  ;;  %v596_v20 = vld [vmem:[%s8229_s0 + $0x11a8] sm:$0xff] }
  0x9b   :  { %1258 = vmatprep.mubr.f32.mxu0 %v147_v21  ;;  %1648 = vmatprep.mubr.f32.mxu1 %v537_v22  ;;  %v706_v21 = vld [vmem:[%s8228_s2 + $0x230] sm:$0xff]  ;;  %v212_v22 = vld [vmem:[%s8229_s0 + $0x5a8] sm:$0xff] }
  0x9c   :  { %1793 = vmatprep.subr.mxu1 %v8237_v0  ;;  %3989 = vmatpush3.msra.mxu0 %v706_v21  ;;  %v276_v21 = vld [vmem:[%s8229_s0 + $0x7a8] sm:$0xff] }
  0x9d   :  { %1794 = vmatpush2.msra.mxu1 %v693_v23  ;;  %v602_v23 = vld [vmem:[%s8229_s0 + $0x11d8] sm:$0xff]  ;;  %3990 = vmatprep.subr.mxu0 %v8237_v0 }
  0x9e   :  { %1259 = vmatmul.mubr.f32.gmra.mxu0 %v146_v24  ;;  %1649 = vmatmul.mubr.f32.gmra.mxu1 %v536_v25  ;;  %v211_v24 = vld [vmem:[%s8229_s0 + $0x5a0] sm:$0xff]  ;;  %v601_v25 = vld [vmem:[%s8229_s0 + $0x11d0] sm:$0xff] }
  0x9f   :  { %1263 = vmatprep.mubr.f32.mxu0 %v152_v26  ;;  %1653 = vmatprep.mubr.f32.mxu1 %v542_v27  ;;  %v217_v26 = vld [vmem:[%s8229_s0 + $0x5d0] sm:$0xff]  ;;  %v607_v27 = vld [vmem:[%s8229_s0 + $0x1200] sm:$0xff] }
  0xa0   :  { %1795 = vmatprep.subr.mxu1 %v8237_v0 }
  0xa1   :  { %1796 = vmatpush2.msra.mxu1 %v692_v28  ;;  %v216_v28 = vld [vmem:[%s8229_s0 + $0x5c8] sm:$0xff] }
  0xa2   :  { %1264 = vmatmul.mubr.f32.gmra.mxu0 %v151_v29  ;;  %1654 = vmatmul.mubr.f32.gmra.mxu1 %v541_v30  ;;  %v606_v29 = vld [vmem:[%s8229_s0 + $0x11f8] sm:$0xff] }
  0xa3   :  { %1268 = vmatprep.mubr.f32.mxu0 %v157_v31  ;;  %1658 = vmatprep.mubr.f32.mxu1 %v547_v32  ;;  %v222_v30 = vld [vmem:[%s8229_s0 + $0x5f8] sm:$0xff]  ;;  %v612_v31 = vld [vmem:[%s8229_s0 + $0x1228] sm:$0xff]  ;;  %v221_v32 = vld [vmem:[%s8229_s0 + $0x5f0] sm:$0xff] }
  0xa4   :  { %1797 = vmatprep.subr.mxu1 %v8237_v0 }
  0xa5   :  { %1798 = vmatpush2.msra.mxu1 %v691_v33  ;;  %v611_v33 = vld [vmem:[%s8229_s0 + $0x1220] sm:$0xff] }
  0xa6   :  { %1269 = vmatmul.mubr.f32.gmra.mxu0 %v156_v34  ;;  %1659 = vmatmul.mubr.f32.gmra.mxu1 %v546_v35  ;;  %v227_v34 = vld [vmem:[%s8229_s0 + $0x620] sm:$0xff]  ;;  %v617_v35 = vld [vmem:[%s8229_s0 + $0x1250] sm:$0xff] }
  0xa7   :  { %1273 = vmatprep.mubr.f32.mxu0 %v162_v37  ;;  %1663 = vmatprep.mubr.f32.mxu1 %v552_v38  ;;  %v616_v37 = vld [vmem:[%s8229_s0 + $0x1248] sm:$0xff] }
  0xa8   :  { %1799 = vmatprep.subr.mxu1 %v8237_v0  ;;  %v232_v38 = vld [vmem:[%s8229_s0 + $0x648] sm:$0xff] }
  0xa9   :  { %1800 = vmatpush2.msra.mxu1 %v690_v39  ;;  %v622_v39 = vld [vmem:[%s8229_s0 + $0x1278] sm:$0xff] }
  0xaa   :  { %1274 = vmatmul.mubr.f32.gmra.mxu0 %v161_v40  ;;  %1664 = vmatmul.mubr.f32.gmra.mxu1 %v551_v41  ;;  %v231_v40 = vld [vmem:[%s8229_s0 + $0x640] sm:$0xff]  ;;  %v621_v41 = vld [vmem:[%s8229_s0 + $0x1270] sm:$0xff] }
  0xab   :  { %1278 = vmatprep.mubr.f32.mxu0 %v167_v42  ;;  %1668 = vmatprep.mubr.f32.mxu1 %v557_v43  ;;  %v237_v42 = vld [vmem:[%s8229_s0 + $0x670] sm:$0xff]  ;;  %v627_v43 = vld [vmem:[%s8229_s0 + $0x12a0] sm:$0xff] }
  0xac   :  { %1801 = vmatprep.subr.mxu1 %v8237_v0 }
  0xad   :  { %1802 = vmatpush2.msra.mxu1 %v689_v44  ;;  %v236_v44 = vld [vmem:[%s8229_s0 + $0x668] sm:$0xff] }
  0xae   :  { %1279 = vmatmul.mubr.f32.gmra.mxu0 %v166_v45  ;;  %1669 = vmatmul.mubr.f32.gmra.mxu1 %v556_v46  ;;  %v626_v45 = vld [vmem:[%s8229_s0 + $0x1298] sm:$0xff] }
  0xaf   :  { %1283 = vmatprep.mubr.f32.mxu0 %v172_v47  ;;  %1673 = vmatprep.mubr.f32.mxu1 %v562_v48  ;;  %v242_v46 = vld [vmem:[%s8229_s0 + $0x698] sm:$0xff]  ;;  %v632_v47 = vld [vmem:[%s8229_s0 + $0x12c8] sm:$0xff]  ;;  %v241_v48 = vld [vmem:[%s8229_s0 + $0x690] sm:$0xff] }
  0xb0   :  { %1803 = vmatprep.subr.mxu1 %v8237_v0 }
  0xb1   :  { %1804 = vmatpush2.msra.mxu1 %v688_v49  ;;  %v631_v49 = vld [vmem:[%s8229_s0 + $0x12c0] sm:$0xff] }
  0xb2   :  { %1284 = vmatmul.mubr.f32.gmra.mxu0 %v171_v50  ;;  %1674 = vmatmul.mubr.f32.gmra.mxu1 %v561_v51  ;;  %v247_v50 = vld [vmem:[%s8229_s0 + $0x6c0] sm:$0xff]  ;;  %v34_v51 = vld [vmem:[%s8229_s0 + $0x18] sm:$0xff] }
  0xb3   :  { %1288 = vmatprep.mubr.f32.mxu0 %v177_v52  ;;  %1678 = vmatprep.mubr.f32.mxu1 %v567_v53  ;;  %v246_v52 = vld [vmem:[%s8229_s0 + $0x6b8] sm:$0xff]  ;;  %v33_v53 = vld [vmem:[%s8229_s0 + $0x10] sm:$0xff] }
  0xb4   :  { %1805 = vmatprep.subr.mxu1 %v8237_v0 }
  0xb5   :  { %1806 = vmatpush2.msra.mxu1 %v687_v54  ;;  %v252_v54 = vld [vmem:[%s8229_s0 + $0x6e8] sm:$0xff] }
  0xb6   :  { %1289 = vmatmul.mubr.f32.gmra.mxu0 %v176_v55  ;;  %1679 = vmatmul.mubr.f32.gmra.mxu1 %v566_v56  ;;  %v39_v55 = vld [vmem:[%s8229_s0 + $0x40] sm:$0xff]  ;;  %v705_v56 = vld [vmem:[%s8228_s2 + $0x228] sm:$0xff] }
  0xb7   :  { %1293 = vmatprep.mubr.f32.mxu0 %v182_v57  ;;  %1683 = vmatprep.mubr.f32.mxu1 %v572_v58  ;;  %v251_v57 = vld [vmem:[%s8229_s0 + $0x6e0] sm:$0xff]  ;;  %v38_v58 = vld [vmem:[%s8229_s0 + $0x38] sm:$0xff] }
  0xb8   :  { %1807 = vmatprep.subr.mxu1 %v8237_v0  ;;  %3991 = vmatpush3.msra.mxu0 %v705_v56 }
  0xb9   :  { %1808 = vmatpush2.msra.mxu1 %v686_v59  ;;  %v257_v59 = vld [vmem:[%s8229_s0 + $0x710] sm:$0xff]  ;;  %3992 = vmatprep.subr.mxu0 %v8237_v0 }
  0xba   :  { %1294 = vmatmul.mubr.f32.gmra.mxu0 %v181_v60  ;;  %1684 = vmatmul.mubr.f32.gmra.mxu1 %v571_v61  ;;  %v44_v60 = vld [vmem:[%s8229_s0 + $0x68] sm:$0xff]  ;;  %v704_v61 = vld [vmem:[%s8228_s2 + $0x220] sm:$0xff] }
  0xbb   :  { %1298 = vmatprep.mubr.f32.mxu0 %v187_v62  ;;  %1688 = vmatprep.mubr.f32.mxu1 %v577_v63  ;;  %v256_v62 = vld [vmem:[%s8229_s0 + $0x708] sm:$0xff]  ;;  %v43_v63 = vld [vmem:[%s8229_s0 + $0x60] sm:$0xff] }
  0xbc   :  { %1809 = vmatprep.subr.mxu1 %v8237_v0  ;;  %3993 = vmatpush3.msra.mxu0 %v704_v61  ;;  %v301_v61 = vld [vmem:[%s8229_s0 + $0x870] sm:$0xff] }
  0xbd   :  { %1810 = vmatpush2.msra.mxu1 %v685_v1  ;;  %v262_v1 = vld [vmem:[%s8229_s0 + $0x738] sm:$0xff]  ;;  %3994 = vmatprep.subr.mxu0 %v8237_v0 }
  0xbe   :  { %1299 = vmatmul.mubr.f32.gmra.mxu0 %v186_v2  ;;  %1689 = vmatmul.mubr.f32.gmra.mxu1 %v576_v3  ;;  %v49_v2 = vld [vmem:[%s8229_s0 + $0x90] sm:$0xff]  ;;  %v703_v3 = vld [vmem:[%s8228_s2 + $0x218] sm:$0xff] }
  0xbf   :  { %1303 = vmatprep.mubr.f32.mxu0 %v192_v4  ;;  %1693 = vmatprep.mubr.f32.mxu1 %v582_v5  ;;  %v261_v4 = vld [vmem:[%s8229_s0 + $0x730] sm:$0xff]  ;;  %v48_v5 = vld [vmem:[%s8229_s0 + $0x88] sm:$0xff] }
  0xc0   :  { %1811 = vmatprep.subr.mxu1 %v8237_v0  ;;  %3995 = vmatpush3.msra.mxu0 %v703_v3  ;;  %v94_v3 = vld [vmem:[%s8229_s0 + $0x1f8] sm:$0xff] }
  0xc1   :  { %1812 = vmatpush2.msra.mxu1 %v684_v6  ;;  %v267_v6 = vld [vmem:[%s8229_s0 + $0x760] sm:$0xff]  ;;  %3996 = vmatprep.subr.mxu0 %v8237_v0 }
  0xc2   :  { %1304 = vmatmul.mubr.f32.gmra.mxu0 %v191_v7  ;;  %1694 = vmatmul.mubr.f32.gmra.mxu1 %v581_v8  ;;  %v54_v7 = vld [vmem:[%s8229_s0 + $0xb8] sm:$0xff]  ;;  %v702_v8 = vld [vmem:[%s8228_s2 + $0x210] sm:$0xff] }
  0xc3   :  { %1308 = vmatprep.mubr.f32.mxu0 %v197_v9  ;;  %1698 = vmatprep.mubr.f32.mxu1 %v587_v10  ;;  %v266_v9 = vld [vmem:[%s8229_s0 + $0x758] sm:$0xff]  ;;  %v53_v10 = vld [vmem:[%s8229_s0 + $0xb0] sm:$0xff] }
  0xc4   :  { %3997 = vmatpush3.msra.mxu0 %v702_v8 }
  0xc5   :  { %3998 = vmatprep.subr.mxu0 %v8237_v0 }
  0xc6   :  { %1309 = vmatmul.mubr.f32.gmra.mxu0 %v196_v11  ;;  %1699 = vmatmul.mubr.f32.gmra.mxu1 %v586_v12  ;;  %v272_v11 = vld [vmem:[%s8229_s0 + $0x788] sm:$0xff]  ;;  %v59_v12 = vld [vmem:[%s8229_s0 + $0xe0] sm:$0xff] }
  0xc7   :  { %1313 = vmatprep.mubr.f32.mxu0 %v202_v13  ;;  %1703 = vmatprep.mubr.f32.mxu1 %v592_v14  ;;  %v701_v13 = vld [vmem:[%s8228_s2 + $0x208] sm:$0xff]  ;;  %v271_v14 = vld [vmem:[%s8229_s0 + $0x780] sm:$0xff] }
  0xc8   :  { %3999 = vmatpush3.msra.mxu0 %v701_v13 }
  0xc9   :  { %4000 = vmatprep.subr.mxu0 %v8237_v0 }
  0xca   :  { %1314 = vmatmul.mubr.f32.gmra.mxu0 %v201_v15  ;;  %1704 = vmatmul.mubr.f32.gmra.mxu1 %v591_v16  ;;  %v58_v15 = vld [vmem:[%s8229_s0 + $0xd8] sm:$0xff]  ;;  %v277_v16 = vld [vmem:[%s8229_s0 + $0x7b0] sm:$0xff] }
  0xcb   :  { %1318 = vmatprep.mubr.f32.mxu0 %v207_v17  ;;  %1708 = vmatprep.mubr.f32.mxu1 %v597_v18  ;;  %v64_v17 = vld [vmem:[%s8229_s0 + $0x108] sm:$0xff]  ;;  %v700_v18 = vld [vmem:[%s8228_s2 + $0x200] sm:$0xff] }
  0xcc   :  { %4001 = vmatpush3.msra.mxu0 %v700_v18  ;;  %v317_v18 = vld [vmem:[%s8229_s0 + $0x8f0] sm:$0xff] }
  0xce   :  { %1319 = vmatmul.mubr.f32.gmra.mxu0 %v206_v19  ;;  %1709 = vmatmul.mubr.f32.gmra.mxu1 %v596_v20 }
  0xcf   :  { %1323 = vmatprep.mubr.f32.mxu0 %v212_v22  ;;  %1713 = vmatprep.mubr.f32.mxu1 %v602_v23  ;;  %v63_v22 = vld [vmem:[%s8229_s0 + $0x100] sm:$0xff] }
  0xd2   :  { %1324 = vmatmul.mubr.f32.gmra.mxu0 %v211_v24  ;;  %1714 = vmatmul.mubr.f32.gmra.mxu1 %v601_v25  ;;  %v282_v25 = vld [vmem:[%s8229_s0 + $0x7d8] sm:$0xff] }
  0xd3   :  { %1328 = vmatprep.mubr.f32.mxu0 %v217_v26  ;;  %1718 = vmatprep.mubr.f32.mxu1 %v607_v27  ;;  %v69_v26 = vld [vmem:[%s8229_s0 + $0x130] sm:$0xff] }
  0xd6   :  { %1329 = vmatmul.mubr.f32.gmra.mxu0 %v216_v28  ;;  %1719 = vmatmul.mubr.f32.gmra.mxu1 %v606_v29  ;;  %v281_v29 = vld [vmem:[%s8229_s0 + $0x7d0] sm:$0xff] }
  0xd7   :  { %1333 = vmatprep.mubr.f32.mxu0 %v222_v30  ;;  %1723 = vmatprep.mubr.f32.mxu1 %v612_v31  ;;  %v68_v30 = vld [vmem:[%s8229_s0 + $0x128] sm:$0xff] }
  0xda   :  { %1334 = vmatmul.mubr.f32.gmra.mxu0 %v221_v32  ;;  %1724 = vmatmul.mubr.f32.gmra.mxu1 %v611_v33  ;;  %v287_v33 = vld [vmem:[%s8229_s0 + $0x800] sm:$0xff] }
  0xdb   :  { %1338 = vmatprep.mubr.f32.mxu0 %v227_v34  ;;  %1728 = vmatprep.mubr.f32.mxu1 %v617_v35  ;;  %v74_v34 = vld [vmem:[%s8229_s0 + $0x158] sm:$0xff] }
  0xde   :  { %1339 = vmatmul.mubr.f32.gmra.mxu0 %v226_v36  ;;  %1729 = vmatmul.mubr.f32.gmra.mxu1 %v616_v37  ;;  %v286_v37 = vld [vmem:[%s8229_s0 + $0x7f8] sm:$0xff] }
  0xdf   :  { %1343 = vmatprep.mubr.f32.mxu0 %v232_v38  ;;  %1733 = vmatprep.mubr.f32.mxu1 %v622_v39  ;;  %v73_v38 = vld [vmem:[%s8229_s0 + $0x150] sm:$0xff] }
  0xe2   :  { %1344 = vmatmul.mubr.f32.gmra.mxu0 %v231_v40  ;;  %1734 = vmatmul.mubr.f32.gmra.mxu1 %v621_v41  ;;  %v292_v41 = vld [vmem:[%s8229_s0 + $0x828] sm:$0xff] }
  0xe3   :  { %1348 = vmatprep.mubr.f32.mxu0 %v237_v42  ;;  %1738 = vmatprep.mubr.f32.mxu1 %v627_v43  ;;  %v79_v42 = vld [vmem:[%s8229_s0 + $0x180] sm:$0xff] }
  0xe6   :  { %1349 = vmatmul.mubr.f32.gmra.mxu0 %v236_v44  ;;  %1739 = vmatmul.mubr.f32.gmra.mxu1 %v626_v45  ;;  %v291_v45 = vld [vmem:[%s8229_s0 + $0x820] sm:$0xff] }
  0xe7   :  { %1353 = vmatprep.mubr.f32.mxu0 %v242_v46  ;;  %1743 = vmatprep.mubr.f32.mxu1 %v632_v47  ;;  %v78_v46 = vld [vmem:[%s8229_s0 + $0x178] sm:$0xff] }
  0xea   :  { %1354 = vmatmul.mubr.f32.gmra.mxu0 %v241_v48  ;;  %1744 = vmatmul.mubr.f32.gmra.mxu1 %v631_v49  ;;  %v297_v49 = vld [vmem:[%s8229_s0 + $0x850] sm:$0xff] }
  0xeb   :  { %1358 = vmatprep.mubr.f32.mxu0 %v247_v50  ;;  %1813 = vmatprep.mubr.f32.mxu1 %v34_v51  ;;  %v84_v50 = vld [vmem:[%s8229_s0 + $0x1a8] sm:$0xff] }
  0xee   :  { %1359 = vmatmul.mubr.f32.gmra.mxu0 %v246_v52  ;;  %1814 = vmatmul.mubr.f32.vlgmr.msra.gmra.mxu1 %v33_v53  ;;  %v296_v53 = vld [vmem:[%s8229_s0 + $0x848] sm:$0xff] }
  0xef   :  { %1363 = vmatprep.mubr.f32.mxu0 %v252_v54  ;;  %1818 = vmatprep.mubr.f32.mxu1 %v39_v55  ;;  %v83_v54 = vld [vmem:[%s8229_s0 + $0x1a0] sm:$0xff] }
  0xf2   :  { %1364 = vmatmul.mubr.f32.gmra.mxu0 %v251_v57  ;;  %1819 = vmatmul.mubr.f32.gmra.mxu1 %v38_v58  ;;  %v302_v57 = vld [vmem:[%s8229_s0 + $0x878] sm:$0xff]  ;;  %v89_v58 = vld [vmem:[%s8229_s0 + $0x1d0] sm:$0xff] }
  0xf3   :  { %1368 = vmatprep.mubr.f32.mxu0 %v257_v59  ;;  %1823 = vmatprep.mubr.f32.mxu1 %v44_v60 }
  0xf6   :  { %1369 = vmatmul.mubr.f32.gmra.mxu0 %v256_v62  ;;  %1824 = vmatmul.mubr.f32.gmra.mxu1 %v43_v63  ;;  %v88_v62 = vld [vmem:[%s8229_s0 + $0x1c8] sm:$0xff] }
  0xf7   :  { %1373 = vmatprep.mubr.f32.mxu0 %v262_v1  ;;  %1828 = vmatprep.mubr.f32.mxu1 %v49_v2  ;;  %v307_v2 = vld [vmem:[%s8229_s0 + $0x8a0] sm:$0xff] }
  0xfa   :  { %1374 = vmatmul.mubr.f32.gmra.mxu0 %v261_v4  ;;  %1829 = vmatmul.mubr.f32.gmra.mxu1 %v48_v5 }
  0xfb   :  { %1378 = vmatprep.mubr.f32.mxu0 %v267_v6  ;;  %1833 = vmatprep.mubr.f32.mxu1 %v54_v7  ;;  %v306_v6 = vld [vmem:[%s8229_s0 + $0x898] sm:$0xff]  ;;  %v93_v7 = vld [vmem:[%s8229_s0 + $0x1f0] sm:$0xff] }
  0xfe   :  { %1379 = vmatmul.mubr.f32.gmra.mxu0 %v266_v9  ;;  %1834 = vmatmul.mubr.f32.gmra.mxu1 %v53_v10  ;;  %v312_v10 = vld [vmem:[%s8229_s0 + $0x8c8] sm:$0xff] }
  0xff   :  { %1383 = vmatprep.mubr.f32.mxu0 %v272_v11  ;;  %1838 = vmatprep.mubr.f32.mxu1 %v59_v12  ;;  %v99_v11 = vld [vmem:[%s8229_s0 + $0x220] sm:$0xff] }
 0x102   :  { %v5414_v19 = vpop.f32.mrf.mxu0  ;;  %1384 = vmatmul.mubr.f32.gmra.mxu0 %v271_v14  ;;  %v5416_v20 = vpop.f32.mrf.mxu1  ;;  %1839 = vmatmul.mubr.f32.gmra.mxu1 %v58_v15  ;;  %v311_v14 = vld [vmem:[%s8229_s0 + $0x8c0] sm:$0xff]  ;;  %v98_v15 = vld [vmem:[%s8229_s0 + $0x218] sm:$0xff] }
 0x103   :  { %8239 = vst [vmem:[#allocation3_spill] sm:$0xff] %v5416_v20  ;;  %1388 = vmatprep.mubr.f32.mxu0 %v277_v16  ;;  %1843 = vmatprep.mubr.f32.mxu1 %v64_v17 }
 0x104   :  { %v1147_v23 = vpop.f32.mrf.mxu0  ;;  %v1537_v24 = vpop.f32.mrf.mxu1 }
 0x105   :  { %v316_v24 = vld [vmem:[%s8229_s0 + $0x8e8] sm:$0xff] }
 0x106   :  { %v5430_v27 = vpop.f32.mrf.mxu0  ;;  %1389 = vmatmul.mubr.f32.gmra.mxu0 %v276_v21  ;;  %v5432_v28 = vpop.f32.mrf.mxu1  ;;  %1844 = vmatmul.mubr.f32.gmra.mxu1 %v63_v22  ;;  %v104_v21 = vld [vmem:[%s8229_s0 + $0x248] sm:$0xff] }
 0x107   :  { %8240 = vst [vmem:[#allocation4_spill] sm:$0xff] %v5432_v28  ;;  %1393 = vmatprep.mubr.f32.mxu0 %v282_v25  ;;  %1848 = vmatprep.mubr.f32.mxu1 %v69_v26  ;;  %v103_v25 = vld [vmem:[%s8229_s0 + $0x240] sm:$0xff] }
 0x108   :  { %v1152_v31 = vpop.f32.mrf.mxu0  ;;  %v1542_v32 = vpop.f32.mrf.mxu1 }
 0x109   :  { %v109_v31 = vld [vmem:[%s8229_s0 + $0x270] sm:$0xff] }
 0x10a   :  { %v5446_v35 = vpop.f32.mrf.mxu0  ;;  %1394 = vmatmul.mubr.f32.gmra.mxu0 %v281_v29  ;;  %v5448_v36 = vpop.f32.mrf.mxu1  ;;  %1849 = vmatmul.mubr.f32.gmra.mxu1 %v68_v30  ;;  %v322_v30 = vld [vmem:[%s8229_s0 + $0x918] sm:$0xff] }
 0x10b   :  { %8241 = vst [vmem:[#allocation5_spill] sm:$0xff] %v5448_v36  ;;  %1398 = vmatprep.mubr.f32.mxu0 %v287_v33  ;;  %1853 = vmatprep.mubr.f32.mxu1 %v74_v34  ;;  %v321_v34 = vld [vmem:[%s8229_s0 + $0x910] sm:$0xff] }
 0x10c   :  { %v1157_v39 = vpop.f32.mrf.mxu0  ;;  %v1547_v40 = vpop.f32.mrf.mxu1 }
 0x10d   :  { %v327_v40 = vld [vmem:[%s8229_s0 + $0x940] sm:$0xff] }
 0x10e   :  { %v5462_v43 = vpop.f32.mrf.mxu0  ;;  %1399 = vmatmul.mubr.f32.gmra.mxu0 %v286_v37  ;;  %v5464_v44 = vpop.f32.mrf.mxu1  ;;  %1854 = vmatmul.mubr.f32.gmra.mxu1 %v73_v38  ;;  %v108_v37 = vld [vmem:[%s8229_s0 + $0x268] sm:$0xff] }
 0x10f   :  { %8242 = vst [vmem:[#allocation6_spill] sm:$0xff] %v5464_v44  ;;  %1403 = vmatprep.mubr.f32.mxu0 %v292_v41  ;;  %1858 = vmatprep.mubr.f32.mxu1 %v79_v42  ;;  %v114_v41 = vld [vmem:[%s8229_s0 + $0x298] sm:$0xff] }
 0x110   :  { %v1162_v47 = vpop.f32.mrf.mxu0  ;;  %v1552_v48 = vpop.f32.mrf.mxu1 }
 0x111   :  { %v113_v47 = vld [vmem:[%s8229_s0 + $0x290] sm:$0xff] }
 0x112   :  { %v5478_v51 = vpop.f32.mrf.mxu0  ;;  %1404 = vmatmul.mubr.f32.gmra.mxu0 %v291_v45  ;;  %v5480_v52 = vpop.f32.mrf.mxu1  ;;  %1859 = vmatmul.mubr.f32.gmra.mxu1 %v78_v46  ;;  %v326_v46 = vld [vmem:[%s8229_s0 + $0x938] sm:$0xff] }
 0x113   :  { %8243 = vst [vmem:[#allocation7_spill] sm:$0xff] %v5480_v52  ;;  %1408 = vmatprep.mubr.f32.mxu0 %v297_v49  ;;  %1863 = vmatprep.mubr.f32.mxu1 %v84_v50  ;;  %v332_v50 = vld [vmem:[%s8229_s0 + $0x968] sm:$0xff] }
 0x114   :  { %v1167_v55 = vpop.f32.mrf.mxu0  ;;  %v1557_v56 = vpop.f32.mrf.mxu1 }
 0x115   :  { %v331_v56 = vld [vmem:[%s8229_s0 + $0x960] sm:$0xff] }
 0x116   :  { %v5494_v59 = vpop.f32.mrf.mxu0  ;;  %1409 = vmatmul.mubr.f32.gmra.mxu0 %v296_v53  ;;  %v5496_v60 = vpop.f32.mrf.mxu1  ;;  %1864 = vmatmul.mubr.f32.gmra.mxu1 %v83_v54  ;;  %v119_v53 = vld [vmem:[%s8229_s0 + $0x2c0] sm:$0xff] }
 0x117   :  { %8244 = vst [vmem:[#allocation8_spill] sm:$0xff] %v5496_v60  ;;  %1413 = vmatprep.mubr.f32.mxu0 %v302_v57  ;;  %1868 = vmatprep.mubr.f32.mxu1 %v89_v58  ;;  %v118_v57 = vld [vmem:[%s8229_s0 + $0x2b8] sm:$0xff] }
 0x118   :  { %v1172_v63 = vpop.f32.mrf.mxu0  ;;  %v1562_v1 = vpop.f32.mrf.mxu1 }
 0x119   :  { %v124_v63 = vld [vmem:[%s8229_s0 + $0x2e8] sm:$0xff] }
 0x11a   :  { %v5510_v4 = vpop.f32.mrf.mxu0  ;;  %1414 = vmatmul.mubr.f32.gmra.mxu0 %v301_v61  ;;  %v5512_v5 = vpop.f32.mrf.mxu1  ;;  %1869 = vmatmul.mubr.f32.gmra.mxu1 %v88_v62  ;;  %v337_v62 = vld [vmem:[%s8229_s0 + $0x990] sm:$0xff] }
 0x11b   :  { %8245 = vst [vmem:[#allocation9_spill] sm:$0xff] %v5512_v5  ;;  %1418 = vmatprep.mubr.f32.mxu0 %v307_v2  ;;  %1873 = vmatprep.mubr.f32.mxu1 %v94_v3  ;;  %v336_v3 = vld [vmem:[%s8229_s0 + $0x988] sm:$0xff] }
 0x11c   :  { %v1177_v8 = vpop.f32.mrf.mxu0  ;;  %v1567_v9 = vpop.f32.mrf.mxu1 }
 0x11d   :  { %v342_v9 = vld [vmem:[%s8229_s0 + $0x9b8] sm:$0xff] }
 0x11e   :  { %v5526_v12 = vpop.f32.mrf.mxu0  ;;  %1419 = vmatmul.mubr.f32.gmra.mxu0 %v306_v6  ;;  %v5528_v13 = vpop.f32.mrf.mxu1  ;;  %1874 = vmatmul.mubr.f32.gmra.mxu1 %v93_v7  ;;  %v123_v6 = vld [vmem:[%s8229_s0 + $0x2e0] sm:$0xff] }
 0x11f   :  { %8246 = vst [vmem:[#allocation10_spill] sm:$0xff] %v5528_v13  ;;  %1423 = vmatprep.mubr.f32.mxu0 %v312_v10  ;;  %1878 = vmatprep.mubr.f32.mxu1 %v99_v11  ;;  %v129_v10 = vld [vmem:[%s8229_s0 + $0x310] sm:$0xff] }
 0x120   :  { %v1182_v16 = vpop.f32.mrf.mxu0  ;;  %v1572_v17 = vpop.f32.mrf.mxu1 }
 0x121   :  { %v128_v16 = vld [vmem:[%s8229_s0 + $0x308] sm:$0xff] }
 0x122   :  { %v5542_v22 = vpop.f32.mrf.mxu0  ;;  %1424 = vmatmul.mubr.f32.gmra.mxu0 %v311_v14  ;;  %v5544_v23 = vpop.f32.mrf.mxu1  ;;  %1879 = vmatmul.mubr.f32.gmra.mxu1 %v98_v15  ;;  %v341_v15 = vld [vmem:[%s8229_s0 + $0x9b0] sm:$0xff] }
 0x123   :  { %8247 = vst [vmem:[#allocation11_spill] sm:$0xff] %v5544_v23  ;;  %1428 = vmatprep.mubr.f32.mxu0 %v317_v18  ;;  %1883 = vmatprep.mubr.f32.mxu1 %v104_v21  ;;  %v347_v21 = vld [vmem:[%s8229_s0 + $0x9e0] sm:$0xff] }
 0x124   :  { %v1187_v26 = vpop.f32.mrf.mxu0  ;;  %v1577_v29 = vpop.f32.mrf.mxu1 }
 0x125   :  { %v346_v29 = vld [vmem:[%s8229_s0 + $0x9d8] sm:$0xff] }
 0x126   :  { %v5558_v32 = vpop.f32.mrf.mxu0  ;;  %1429 = vmatmul.mubr.f32.gmra.mxu0 %v316_v24  ;;  %v5560_v33 = vpop.f32.mrf.mxu1  ;;  %1884 = vmatmul.mubr.f32.gmra.mxu1 %v103_v25  ;;  %v134_v24 = vld [vmem:[%s8229_s0 + $0x338] sm:$0xff] }
 0x127   :  { %8248 = vst [vmem:[#allocation12_spill] sm:$0xff] %v5560_v33  ;;  %1433 = vmatprep.mubr.f32.mxu0 %v322_v30  ;;  %1888 = vmatprep.mubr.f32.mxu1 %v109_v31  ;;  %v133_v30 = vld [vmem:[%s8229_s0 + $0x330] sm:$0xff] }
 0x128   :  { %v1192_v38 = vpop.f32.mrf.mxu0  ;;  %v1582_v39 = vpop.f32.mrf.mxu1 }
 0x129   :  { %v139_v38 = vld [vmem:[%s8229_s0 + $0x360] sm:$0xff] }
 0x12a   :  { %v5574_v42 = vpop.f32.mrf.mxu0  ;;  %1434 = vmatmul.mubr.f32.gmra.mxu0 %v321_v34  ;;  %v5576_v45 = vpop.f32.mrf.mxu1  ;;  %1889 = vmatmul.mubr.f32.gmra.mxu1 %v108_v37  ;;  %v352_v37 = vld [vmem:[%s8229_s0 + $0xa08] sm:$0xff] }
 0x12b   :  { %8249 = vst [vmem:[#allocation13_spill] sm:$0xff] %v5576_v45  ;;  %1438 = vmatprep.mubr.f32.mxu0 %v327_v40  ;;  %1893 = vmatprep.mubr.f32.mxu1 %v114_v41  ;;  %v351_v41 = vld [vmem:[%s8229_s0 + $0xa00] sm:$0xff] }
 0x12c   :  { %v1197_v48 = vpop.f32.mrf.mxu0  ;;  %v1587_v49 = vpop.f32.mrf.mxu1 }
 0x12d   :  { %v357_v49 = vld [vmem:[%s8229_s0 + $0xa30] sm:$0xff] }
 0x12e   :  { %v5590_v54 = vpop.f32.mrf.mxu0  ;;  %1439 = vmatmul.mubr.f32.gmra.mxu0 %v326_v46  ;;  %v5592_v55 = vpop.f32.mrf.mxu1  ;;  %1894 = vmatmul.mubr.f32.gmra.mxu1 %v113_v47  ;;  %v138_v46 = vld [vmem:[%s8229_s0 + $0x358] sm:$0xff] }
 0x12f   :  { %8250 = vst [vmem:[#allocation14_spill] sm:$0xff] %v5592_v55  ;;  %1443 = vmatprep.mubr.f32.mxu0 %v332_v50  ;;  %1898 = vmatprep.mubr.f32.mxu1 %v119_v53  ;;  %v144_v50 = vld [vmem:[%s8229_s0 + $0x388] sm:$0xff] }
 0x130   :  { %v1202_v58 = vpop.f32.mrf.mxu0  ;;  %v1592_v61 = vpop.f32.mrf.mxu1 }
 0x131   :  { %v143_v58 = vld [vmem:[%s8229_s0 + $0x380] sm:$0xff] }
 0x132   :  { %v5606_v1 = vpop.f32.mrf.mxu0  ;;  %1444 = vmatmul.mubr.f32.gmra.mxu0 %v331_v56  ;;  %v5608_v2 = vpop.f32.mrf.mxu1  ;;  %1899 = vmatmul.mubr.f32.gmra.mxu1 %v118_v57  ;;  %v356_v57 = vld [vmem:[%s8229_s0 + $0xa28] sm:$0xff] }
 0x133   :  { %8251 = vst [vmem:[#allocation15_spill] sm:$0xff] %v5608_v2  ;;  %1448 = vmatprep.mubr.f32.mxu0 %v337_v62  ;;  %1903 = vmatprep.mubr.f32.mxu1 %v124_v63  ;;  %v362_v63 = vld [vmem:[%s8229_s0 + $0xa58] sm:$0xff] }
 0x134   :  { %v1207_v7 = vpop.f32.mrf.mxu0  ;;  %v1597_v8 = vpop.f32.mrf.mxu1 }
 0x135   :  { %v361_v8 = vld [vmem:[%s8229_s0 + $0xa50] sm:$0xff] }
 0x136   :  { %v5622_v11 = vpop.f32.mrf.mxu0  ;;  %1449 = vmatmul.mubr.f32.gmra.mxu0 %v336_v3  ;;  %v5624_v14 = vpop.f32.mrf.mxu1  ;;  %1904 = vmatmul.mubr.f32.gmra.mxu1 %v123_v6  ;;  %v149_v3 = vld [vmem:[%s8229_s0 + $0x3b0] sm:$0xff] }
 0x137   :  { %8252 = vst [vmem:[#allocation16_spill] sm:$0xff] %v5624_v14  ;;  %1453 = vmatprep.mubr.f32.mxu0 %v342_v9  ;;  %1908 = vmatprep.mubr.f32.mxu1 %v129_v10  ;;  %v148_v9 = vld [vmem:[%s8229_s0 + $0x3a8] sm:$0xff] }
 0x138   :  { %v1212_v17 = vpop.f32.mrf.mxu0  ;;  %v1602_v18 = vpop.f32.mrf.mxu1 }
 0x139   :  { %v154_v17 = vld [vmem:[%s8229_s0 + $0x3d8] sm:$0xff] }
 0x13a   :  { %v5638_v25 = vpop.f32.mrf.mxu0  ;;  %1454 = vmatmul.mubr.f32.gmra.mxu0 %v341_v15  ;;  %v5640_v26 = vpop.f32.mrf.mxu1  ;;  %1909 = vmatmul.mubr.f32.gmra.mxu1 %v128_v16  ;;  %v367_v16 = vld [vmem:[%s8229_s0 + $0xa80] sm:$0xff] }
 0x13b   :  { %8253 = vst [vmem:[#allocation17_spill] sm:$0xff] %v5640_v26  ;;  %1458 = vmatprep.mubr.f32.mxu0 %v347_v21  ;;  %1913 = vmatprep.mubr.f32.mxu1 %v134_v24  ;;  %v366_v24 = vld [vmem:[%s8229_s0 + $0xa78] sm:$0xff] }
 0x13c   :  { %v1217_v31 = vpop.f32.mrf.mxu0  ;;  %v1607_v34 = vpop.f32.mrf.mxu1 }
 0x13d   :  { %v372_v34 = vld [vmem:[%s8229_s0 + $0xaa8] sm:$0xff] }
 0x13e   :  { %v5654_v39 = vpop.f32.mrf.mxu0  ;;  %1459 = vmatmul.mubr.f32.gmra.mxu0 %v346_v29  ;;  %v5656_v40 = vpop.f32.mrf.mxu1  ;;  %1914 = vmatmul.mubr.f32.gmra.mxu1 %v133_v30  ;;  %v153_v29 = vld [vmem:[%s8229_s0 + $0x3d0] sm:$0xff] }
 0x13f   :  { %8254 = vst [vmem:[#allocation18_spill] sm:$0xff] %v5656_v40  ;;  %1463 = vmatprep.mubr.f32.mxu0 %v352_v37  ;;  %1918 = vmatprep.mubr.f32.mxu1 %v139_v38  ;;  %v159_v37 = vld [vmem:[%s8229_s0 + $0x400] sm:$0xff] }
 0x140   :  { %v1222_v47 = vpop.f32.mrf.mxu0  ;;  %v1612_v48 = vpop.f32.mrf.mxu1 }
 0x141   :  { %v158_v47 = vld [vmem:[%s8229_s0 + $0x3f8] sm:$0xff] }
 0x142   :  { %v5670_v53 = vpop.f32.mrf.mxu0  ;;  %1464 = vmatmul.mubr.f32.gmra.mxu0 %v351_v41  ;;  %v5672_v56 = vpop.f32.mrf.mxu1  ;;  %1919 = vmatmul.mubr.f32.gmra.mxu1 %v138_v46  ;;  %v371_v46 = vld [vmem:[%s8229_s0 + $0xaa0] sm:$0xff] }
 0x143   :  { %8255 = vst [vmem:[#allocation19_spill] sm:$0xff] %v5672_v56  ;;  %1468 = vmatprep.mubr.f32.mxu0 %v357_v49  ;;  %1923 = vmatprep.mubr.f32.mxu1 %v144_v50  ;;  %v377_v50 = vld [vmem:[%s8229_s0 + $0xad0] sm:$0xff] }
 0x144   :  { %v1227_v61 = vpop.f32.mrf.mxu0  ;;  %v1617_v62 = vpop.f32.mrf.mxu1 }
 0x145   :  { %v376_v62 = vld [vmem:[%s8229_s0 + $0xac8] sm:$0xff] }
 0x146   :  { %v5686_v6 = vpop.f32.mrf.mxu0  ;;  %1469 = vmatmul.mubr.f32.gmra.mxu0 %v356_v57  ;;  %v5688_v7 = vpop.f32.mrf.mxu1  ;;  %1924 = vmatmul.mubr.f32.gmra.mxu1 %v143_v58  ;;  %v164_v57 = vld [vmem:[%s8229_s0 + $0x428] sm:$0xff] }
 0x147   :  { %8256 = vst [vmem:[#allocation20_spill] sm:$0xff] %v5688_v7  ;;  %1473 = vmatprep.mubr.f32.mxu0 %v362_v63  ;;  %1928 = vmatprep.mubr.f32.mxu1 %v149_v3  ;;  %v163_v63 = vld [vmem:[%s8229_s0 + $0x420] sm:$0xff] }
 0x148   :  { %v1232_v10 = vpop.f32.mrf.mxu0  ;;  %v1622_v15 = vpop.f32.mrf.mxu1 }
 0x149   :  { %v169_v10 = vld [vmem:[%s8229_s0 + $0x450] sm:$0xff] }
 0x14a   :  { %v5702_v18 = vpop.f32.mrf.mxu0  ;;  %1474 = vmatmul.mubr.f32.gmra.mxu0 %v361_v8  ;;  %v5704_v21 = vpop.f32.mrf.mxu1  ;;  %1929 = vmatmul.mubr.f32.gmra.mxu1 %v148_v9  ;;  %v382_v9 = vld [vmem:[%s8229_s0 + $0xaf8] sm:$0xff] }
 0x14b   :  { %8257 = vst [vmem:[#allocation21_spill] sm:$0xff] %v5704_v21  ;;  %1478 = vmatprep.mubr.f32.mxu0 %v367_v16  ;;  %1933 = vmatprep.mubr.f32.mxu1 %v154_v17  ;;  %v381_v17 = vld [vmem:[%s8229_s0 + $0xaf0] sm:$0xff] }
 0x14c   :  { %v1237_v30 = vpop.f32.mrf.mxu0  ;;  %v1627_v31 = vpop.f32.mrf.mxu1 }
 0x14d   :  { %v387_v31 = vld [vmem:[%s8229_s0 + $0xb20] sm:$0xff] }
 0x14e   :  { %v5718_v38 = vpop.f32.mrf.mxu0  ;;  %1479 = vmatmul.mubr.f32.gmra.mxu0 %v366_v24  ;;  %v5720_v41 = vpop.f32.mrf.mxu1  ;;  %1934 = vmatmul.mubr.f32.gmra.mxu1 %v153_v29  ;;  %v168_v24 = vld [vmem:[%s8229_s0 + $0x448] sm:$0xff] }
 0x14f   :  { %8258 = vst [vmem:[#allocation22_spill] sm:$0xff] %v5720_v41  ;;  %1483 = vmatprep.mubr.f32.mxu0 %v372_v34  ;;  %1938 = vmatprep.mubr.f32.mxu1 %v159_v37  ;;  %v174_v34 = vld [vmem:[%s8229_s0 + $0x478] sm:$0xff] }
 0x150   :  { %v1242_v48 = vpop.f32.mrf.mxu0  ;;  %v1632_v49 = vpop.f32.mrf.mxu1 }
 0x151   :  { %v173_v48 = vld [vmem:[%s8229_s0 + $0x470] sm:$0xff] }
 0x152   :  { %v5734_v58 = vpop.f32.mrf.mxu0  ;;  %1484 = vmatmul.mubr.f32.gmra.mxu0 %v371_v46  ;;  %v5736_v61 = vpop.f32.mrf.mxu1  ;;  %1939 = vmatmul.mubr.f32.gmra.mxu1 %v158_v47  ;;  %v386_v47 = vld [vmem:[%s8229_s0 + $0xb18] sm:$0xff] }
 0x153   :  { %8259 = vst [vmem:[#allocation23_spill] sm:$0xff] %v5736_v61  ;;  %1488 = vmatprep.mubr.f32.mxu0 %v377_v50  ;;  %1943 = vmatprep.mubr.f32.mxu1 %v164_v57  ;;  %v392_v57 = vld [vmem:[%s8229_s0 + $0xb48] sm:$0xff] }
 0x154   :  { %v1247_v3 = vpop.f32.mrf.mxu0  ;;  %v1637_v8 = vpop.f32.mrf.mxu1 }
 0x155   :  { %v391_v8 = vld [vmem:[%s8229_s0 + $0xb40] sm:$0xff] }
 0x156   :  { %v5750_v15 = vpop.f32.mrf.mxu0  ;;  %1489 = vmatmul.mubr.f32.gmra.mxu0 %v376_v62  ;;  %v5752_v16 = vpop.f32.mrf.mxu1  ;;  %1944 = vmatmul.mubr.f32.gmra.mxu1 %v163_v63  ;;  %v179_v62 = vld [vmem:[%s8229_s0 + $0x4a0] sm:$0xff] }
 0x157   :  { %8260 = vst [vmem:[#allocation24_spill] sm:$0xff] %v5752_v16  ;;  %1493 = vmatprep.mubr.f32.mxu0 %v382_v9  ;;  %1948 = vmatprep.mubr.f32.mxu1 %v169_v10  ;;  %v178_v9 = vld [vmem:[%s8229_s0 + $0x498] sm:$0xff] }
 0x158   :  { %v1252_v29 = vpop.f32.mrf.mxu0  ;;  %v1642_v30 = vpop.f32.mrf.mxu1 }
 0x159   :  { %v184_v29 = vld [vmem:[%s8229_s0 + $0x4c8] sm:$0xff] }
 0x15a   :  { %v5766_v37 = vpop.f32.mrf.mxu0  ;;  %1494 = vmatmul.mubr.f32.gmra.mxu0 %v381_v17  ;;  %v5768_v46 = vpop.f32.mrf.mxu1  ;;  %1949 = vmatmul.mubr.f32.gmra.mxu1 %v168_v24  ;;  %v397_v24 = vld [vmem:[%s8229_s0 + $0xb70] sm:$0xff] }
 0x15b   :  { %8261 = vst [vmem:[#allocation25_spill] sm:$0xff] %v5768_v46  ;;  %1498 = vmatprep.mubr.f32.mxu0 %v387_v31  ;;  %1953 = vmatprep.mubr.f32.mxu1 %v174_v34  ;;  %v396_v34 = vld [vmem:[%s8229_s0 + $0xb68] sm:$0xff] }
 0x15c   :  { %v1257_v49 = vpop.f32.mrf.mxu0  ;;  %v1647_v50 = vpop.f32.mrf.mxu1 }
 0x15d   :  { %v402_v50 = vld [vmem:[%s8229_s0 + $0xb98] sm:$0xff] }
 0x15e   :  { %v5782_v63 = vpop.f32.mrf.mxu0  ;;  %1499 = vmatmul.mubr.f32.gmra.mxu0 %v386_v47  ;;  %v5784_v3 = vpop.f32.mrf.mxu1  ;;  %1954 = vmatmul.mubr.f32.gmra.mxu1 %v173_v48  ;;  %v183_v47 = vld [vmem:[%s8229_s0 + $0x4c0] sm:$0xff] }
 0x15f   :  { %8262 = vst [vmem:[#allocation26_spill] sm:$0xff] %v5784_v3  ;;  %1503 = vmatprep.mubr.f32.mxu0 %v392_v57  ;;  %1958 = vmatprep.mubr.f32.mxu1 %v179_v62  ;;  %v189_v57 = vld [vmem:[%s8229_s0 + $0x4f0] sm:$0xff] }
 0x160   :  { %v1262_v10 = vpop.f32.mrf.mxu0  ;;  %v1652_v17 = vpop.f32.mrf.mxu1 }
 0x161   :  { %v188_v10 = vld [vmem:[%s8229_s0 + $0x4e8] sm:$0xff] }
 0x162   :  { %v5798_v30 = vpop.f32.mrf.mxu0  ;;  %1504 = vmatmul.mubr.f32.gmra.mxu0 %v391_v8  ;;  %v5800_v31 = vpop.f32.mrf.mxu1  ;;  %1959 = vmatmul.mubr.f32.gmra.mxu1 %v178_v9  ;;  %v401_v9 = vld [vmem:[%s8229_s0 + $0xb90] sm:$0xff] }
 0x163   :  { %8263 = vst [vmem:[#allocation27_spill] sm:$0xff] %v5800_v31  ;;  %1508 = vmatprep.mubr.f32.mxu0 %v397_v24  ;;  %1963 = vmatprep.mubr.f32.mxu1 %v184_v29  ;;  %v407_v29 = vld [vmem:[%s8229_s0 + $0xbc0] sm:$0xff] }
 0x164   :  { %v1267_v48 = vpop.f32.mrf.mxu0  ;;  %v1657_v49 = vpop.f32.mrf.mxu1 }
 0x165   :  { %v406_v49 = vld [vmem:[%s8229_s0 + $0xbb8] sm:$0xff] }
 0x166   :  { %v5814_v62 = vpop.f32.mrf.mxu0  ;;  %1509 = vmatmul.mubr.f32.gmra.mxu0 %v396_v34  ;;  %v5816_v8 = vpop.f32.mrf.mxu1  ;;  %1964 = vmatmul.mubr.f32.gmra.mxu1 %v183_v47  ;;  %v194_v34 = vld [vmem:[%s8229_s0 + $0x518] sm:$0xff] }
 0x167   :  { %8264 = vst [vmem:[#allocation28_spill] sm:$0xff] %v5816_v8  ;;  %1513 = vmatprep.mubr.f32.mxu0 %v402_v50  ;;  %1968 = vmatprep.mubr.f32.mxu1 %v189_v57  ;;  %v193_v50 = vld [vmem:[%s8229_s0 + $0x510] sm:$0xff] }
 0x168   :  { %v1272_v17 = vpop.f32.mrf.mxu0  ;;  %v1662_v24 = vpop.f32.mrf.mxu1  ;;  %v209_v8 = vld [vmem:[%s8229_s0 + $0x590] sm:$0xff] }
 0x169   :  { %v412_v24 = vld [vmem:[%s8229_s0 + $0xbe8] sm:$0xff] }
 0x16a   :  { %v5830_v47 = vpop.f32.mrf.mxu0  ;;  %1514 = vmatmul.mubr.f32.gmra.mxu0 %v401_v9  ;;  %v5832_v48 = vpop.f32.mrf.mxu1  ;;  %1969 = vmatmul.mubr.f32.gmra.mxu1 %v188_v10  ;;  %v199_v9 = vld [vmem:[%s8229_s0 + $0x540] sm:$0xff] }
 0x16b   :  { %8265 = vst [vmem:[#allocation29_spill] sm:$0xff] %v5832_v48  ;;  %1518 = vmatprep.mubr.f32.mxu0 %v407_v29  ;;  %1973 = vmatprep.mubr.f32.mxu1 %v194_v34  ;;  %v411_v34 = vld [vmem:[%s8229_s0 + $0xbe0] sm:$0xff]  ;;  %v417_v48 = vld [vmem:[%s8229_s0 + $0xc10] sm:$0xff] }
 0x16c   :  { %v1277_v57 = vpop.f32.mrf.mxu0  ;;  %v1667_v17 = vpop.f32.mrf.mxu1 }
 0x16d   :  { %v198_v57 = vld [vmem:[%s8229_s0 + $0x538] sm:$0xff] }
 0x16e   :  { %v5846_v10 = vpop.f32.mrf.mxu0  ;;  %1519 = vmatmul.mubr.f32.gmra.mxu0 %v406_v49  ;;  %v5848_v29 = vpop.f32.mrf.mxu1  ;;  %1974 = vmatmul.mubr.f32.gmra.mxu1 %v193_v50  ;;  %v204_v49 = vld [vmem:[%s8229_s0 + $0x568] sm:$0xff] }
 0x16f   :  { %8266 = vst [vmem:[#allocation30_spill] sm:$0xff] %v5848_v29  ;;  %1523 = vmatprep.mubr.f32.mxu0 %v412_v24  ;;  %1978 = vmatprep.mubr.f32.mxu1 %v199_v9  ;;  %v203_v9 = vld [vmem:[%s8229_s0 + $0x560] sm:$0xff] }
 0x170   :  { %v1282_v17 = vpop.f32.mrf.mxu0  ;;  %v1672_v0 = vpop.f32.mrf.mxu1 }
 0x171   :  { %v416_v0 = vld [vmem:[%s8229_s0 + $0xc08] sm:$0xff] }
 0x172   :  { %v5862_v50 = vpop.f32.mrf.mxu0  ;;  %1524 = vmatmul.mubr.f32.gmra.mxu0 %v411_v34  ;;  %v5864_v24 = vpop.f32.mrf.mxu1  ;;  %1979 = vmatmul.mubr.f32.gmra.mxu1 %v198_v57 }
 0x173   :  { %8267 = vst [vmem:[#allocation31_spill] sm:$0xff] %v5864_v24  ;;  %1528 = vmatprep.mubr.f32.mxu0 %v417_v48  ;;  %1983 = vmatprep.mubr.f32.mxu1 %v204_v49  ;;  %v8269_v48 = vmov 0.0   ;;  %v208_v49 = vld [vmem:[%s8229_s0 + $0x588] sm:$0xff] }
 0x174   :  { %v1287_v17 = vpop.f32.mrf.mxu0  ;;  %v1677_v29 = vpop.f32.mrf.mxu1 }
 0x175   :  { %v35_v29 = vld [vmem:[%s8229_s0 + $0x20] sm:$0xff] }
 0x176   :  { %v5875_v34 = vpop.f32.mrf.mxu0  ;;  %1529 = vmatmul.mubr.f32.gmra.mxu0 %v416_v0  ;;  %v5877_v57 = vpop.f32.mrf.mxu1  ;;  %1984 = vmatmul.mubr.f32.gmra.mxu1 %v203_v9  ;;  %v214_v0 = vld [vmem:[%s8229_s0 + $0x5b8] sm:$0xff] }
 0x177   :  { %8268 = vst [vmem:[#allocation32_spill] sm:$0xff] %v5877_v57  ;;  %1988 = vmatprep.mubr.f32.mxu1 %v209_v8  ;;  %4002 = vmatprep.mubr.msk.f32.mxu0 %vm4454_vm0, %v8269_v48 }
 0x178   :  { %v1292_v17 = vpop.f32.mrf.mxu0  ;;  %v1682_v24 = vpop.f32.mrf.mxu1 }
 0x179   :  { %v213_v17 = vld [vmem:[%s8229_s0 + $0x5b0] sm:$0xff]  ;;  %v40_v24 = vld [vmem:[%s8229_s0 + $0x48] sm:$0xff] }
 0x17a   :  { %v5890_v8 = vpop.f32.mrf.mxu0  ;;  %v5892_v9 = vpop.f32.mrf.mxu1  ;;  %1989 = vmatmul.mubr.f32.gmra.mxu1 %v208_v49  ;;  %4003 = vmatmul.mubr.msk.f32.vlgmr.msra.gmra.mxu0 %vm715_vm1, %v35_v29  ;;  %v219_v49 = vld [vmem:[%s8229_s0 + $0x5e0] sm:$0xff] }
 0x17b   :  { %8270 = vst [vmem:[#allocation33_spill] sm:$0xff] %v5892_v9  ;;  %1993 = vmatprep.mubr.f32.mxu1 %v214_v0  ;;  %4005 = vmatprep.mubr.msk.f32.mxu0 %vm4454_vm0, %v8269_v48 }
 0x17c   :  { %v1297_v57 = vpop.f32.mrf.mxu0  ;;  %v1687_v31 = vpop.f32.mrf.mxu1 }
 0x17d   :  { %v218_v57 = vld [vmem:[%s8229_s0 + $0x5d8] sm:$0xff]  ;;  %v45_v31 = vld [vmem:[%s8229_s0 + $0x70] sm:$0xff] }
 0x17e   :  { %v5906_v9 = vpop.f32.mrf.mxu0  ;;  %v5908_v29 = vpop.f32.mrf.mxu1  ;;  %1994 = vmatmul.mubr.f32.gmra.mxu1 %v213_v17  ;;  %4006 = vmatmul.mubr.msk.f32.gmra.mxu0 %vm715_vm1, %v40_v24  ;;  %v224_v17 = vld [vmem:[%s8229_s0 + $0x608] sm:$0xff] }
 0x17f   :  { %8271 = vst [vmem:[#allocation34_spill] sm:$0xff] %v5908_v29  ;;  %1998 = vmatprep.mubr.f32.mxu1 %v219_v49  ;;  %4008 = vmatprep.mubr.msk.f32.mxu0 %vm4454_vm0, %v8269_v48  ;;  %v223_v49 = vld [vmem:[%s8229_s0 + $0x600] sm:$0xff] }
 0x180   :  { %v1302_v0 = vpop.f32.mrf.mxu0  ;;  %v1692_v3 = vpop.f32.mrf.mxu1 }
 0x181   :  { %v50_v3 = vld [vmem:[%s8229_s0 + $0x98] sm:$0xff] }
 0x182   :  { %v5922_v29 = vpop.f32.mrf.mxu0  ;;  %v5924_v24 = vpop.f32.mrf.mxu1  ;;  %1999 = vmatmul.mubr.f32.gmra.mxu1 %v218_v57  ;;  %4009 = vmatmul.mubr.msk.f32.gmra.mxu0 %vm715_vm1, %v45_v31  ;;  %v229_v57 = vld [vmem:[%s8229_s0 + $0x630] sm:$0xff] }
 0x183   :  { %8272 = vst [vmem:[#allocation35_spill] sm:$0xff] %v5924_v24  ;;  %2003 = vmatprep.mubr.f32.mxu1 %v224_v17  ;;  %4011 = vmatprep.mubr.msk.f32.mxu0 %vm4454_vm0, %v8269_v48  ;;  %v228_v17 = vld [vmem:[%s8229_s0 + $0x628] sm:$0xff] }
 0x184   :  { %v1307_v0 = vpop.f32.mrf.mxu0  ;;  %v1697_v46 = vpop.f32.mrf.mxu1 }
 0x185   :  { %v55_v46 = vld [vmem:[%s8229_s0 + $0xc0] sm:$0xff] }
 0x186   :  { %v5938_v24 = vpop.f32.mrf.mxu0  ;;  %v5940_v31 = vpop.f32.mrf.mxu1  ;;  %2004 = vmatmul.mubr.f32.gmra.mxu1 %v223_v49  ;;  %4012 = vmatmul.mubr.msk.f32.gmra.mxu0 %vm715_vm1, %v50_v3  ;;  %v234_v49 = vld [vmem:[%s8229_s0 + $0x658] sm:$0xff] }
 0x187   :  { %8273 = vst [vmem:[#allocation36_spill] sm:$0xff] %v5940_v31  ;;  %2008 = vmatprep.mubr.f32.mxu1 %v229_v57  ;;  %4014 = vmatprep.mubr.msk.f32.mxu0 %vm4454_vm0, %v8269_v48  ;;  %v233_v57 = vld [vmem:[%s8229_s0 + $0x650] sm:$0xff] }
 0x188   :  { %v1312_v0 = vpop.f32.mrf.mxu0  ;;  %v1702_v16 = vpop.f32.mrf.mxu1 }
 0x189   :  { %v60_v16 = vld [vmem:[%s8229_s0 + $0xe8] sm:$0xff] }
 0x18a   :  { %v5954_v31 = vpop.f32.mrf.mxu0  ;;  %v5956_v3 = vpop.f32.mrf.mxu1  ;;  %2009 = vmatmul.mubr.f32.gmra.mxu1 %v228_v17  ;;  %4015 = vmatmul.mubr.msk.f32.gmra.mxu0 %vm715_vm1, %v55_v46  ;;  %v239_v17 = vld [vmem:[%s8229_s0 + $0x680] sm:$0xff] }
 0x18b   :  { %8274 = vst [vmem:[#allocation37_spill] sm:$0xff] %v5956_v3  ;;  %2013 = vmatprep.mubr.f32.mxu1 %v234_v49  ;;  %4017 = vmatprep.mubr.msk.f32.mxu0 %vm4454_vm0, %v8269_v48  ;;  %v238_v49 = vld [vmem:[%s8229_s0 + $0x678] sm:$0xff] }
 0x18c   :  { %v1317_v0 = vpop.f32.mrf.mxu0  ;;  %v1707_v61 = vpop.f32.mrf.mxu1 }
 0x18d   :  { %v65_v61 = vld [vmem:[%s8229_s0 + $0x110] sm:$0xff] }
 0x18e   :  { %v5970_v3 = vpop.f32.mrf.mxu0  ;;  %v5972_v46 = vpop.f32.mrf.mxu1  ;;  %2014 = vmatmul.mubr.f32.gmra.mxu1 %v233_v57  ;;  %4018 = vmatmul.mubr.msk.f32.gmra.mxu0 %vm715_vm1, %v60_v16  ;;  %v244_v57 = vld [vmem:[%s8229_s0 + $0x6a8] sm:$0xff] }
 0x18f   :  { %8275 = vst [vmem:[#allocation38_spill] sm:$0xff] %v5972_v46  ;;  %2018 = vmatprep.mubr.f32.mxu1 %v239_v17  ;;  %4020 = vmatprep.mubr.msk.f32.mxu0 %vm4454_vm0, %v8269_v48  ;;  %v243_v17 = vld [vmem:[%s8229_s0 + $0x6a0] sm:$0xff] }
 0x190   :  { %v1322_v0 = vpop.f32.mrf.mxu0  ;;  %v1712_v41 = vpop.f32.mrf.mxu1 }
 0x191   :  { %v70_v41 = vld [vmem:[%s8229_s0 + $0x138] sm:$0xff] }
 0x192   :  { %v5986_v46 = vpop.f32.mrf.mxu0  ;;  %v5988_v16 = vpop.f32.mrf.mxu1  ;;  %2019 = vmatmul.mubr.f32.gmra.mxu1 %v238_v49  ;;  %4021 = vmatmul.mubr.msk.f32.gmra.mxu0 %vm715_vm1, %v65_v61  ;;  %v249_v49 = vld [vmem:[%s8229_s0 + $0x6d0] sm:$0xff] }
 0x193   :  { %8276 = vst [vmem:[#allocation39_spill] sm:$0xff] %v5988_v16  ;;  %2023 = vmatprep.mubr.f32.mxu1 %v244_v57  ;;  %4023 = vmatprep.mubr.msk.f32.mxu0 %vm4454_vm0, %v8269_v48  ;;  %v248_v57 = vld [vmem:[%s8229_s0 + $0x6c8] sm:$0xff] }
 0x194   :  { %v1327_v0 = vpop.f32.mrf.mxu0  ;;  %v1717_v21 = vpop.f32.mrf.mxu1 }
 0x195   :  { %v75_v21 = vld [vmem:[%s8229_s0 + $0x160] sm:$0xff] }
 0x196   :  { %v6002_v16 = vpop.f32.mrf.mxu0  ;;  %v6004_v61 = vpop.f32.mrf.mxu1  ;;  %2024 = vmatmul.mubr.f32.gmra.mxu1 %v243_v17  ;;  %4024 = vmatmul.mubr.msk.f32.gmra.mxu0 %vm715_vm1, %v70_v41  ;;  %v254_v17 = vld [vmem:[%s8229_s0 + $0x6f8] sm:$0xff] }
 0x197   :  { %8277 = vst [vmem:[#allocation40_spill] sm:$0xff] %v6004_v61  ;;  %2028 = vmatprep.mubr.f32.mxu1 %v249_v49  ;;  %4026 = vmatprep.mubr.msk.f32.mxu0 %vm4454_vm0, %v8269_v48  ;;  %v253_v49 = vld [vmem:[%s8229_s0 + $0x6f0] sm:$0xff] }
 0x198   :  { %v1332_v0 = vpop.f32.mrf.mxu0  ;;  %v1722_v7 = vpop.f32.mrf.mxu1 }
 0x199   :  { %v80_v7 = vld [vmem:[%s8229_s0 + $0x188] sm:$0xff] }
 0x19a   :  { %v6018_v61 = vpop.f32.mrf.mxu0  ;;  %v6020_v41 = vpop.f32.mrf.mxu1  ;;  %2029 = vmatmul.mubr.f32.gmra.mxu1 %v248_v57  ;;  %4027 = vmatmul.mubr.msk.f32.gmra.mxu0 %vm715_vm1, %v75_v21  ;;  %v259_v57 = vld [vmem:[%s8229_s0 + $0x720] sm:$0xff] }
 0x19b   :  { %8278 = vst [vmem:[#allocation41_spill] sm:$0xff] %v6020_v41  ;;  %2033 = vmatprep.mubr.f32.mxu1 %v254_v17  ;;  %4029 = vmatprep.mubr.msk.f32.mxu0 %vm4454_vm0, %v8269_v48  ;;  %v258_v17 = vld [vmem:[%s8229_s0 + $0x718] sm:$0xff] }
 0x19c   :  { %v1337_v0 = vpop.f32.mrf.mxu0  ;;  %v1727_v56 = vpop.f32.mrf.mxu1 }
 0x19d   :  { %v85_v56 = vld [vmem:[%s8229_s0 + $0x1b0] sm:$0xff] }
 0x19e   :  { %v6034_v41 = vpop.f32.mrf.mxu0  ;;  %v6036_v21 = vpop.f32.mrf.mxu1  ;;  %2034 = vmatmul.mubr.f32.gmra.mxu1 %v253_v49  ;;  %4030 = vmatmul.mubr.msk.f32.gmra.mxu0 %vm715_vm1, %v80_v7  ;;  %v264_v49 = vld [vmem:[%s8229_s0 + $0x748] sm:$0xff] }
 0x19f   :  { %8279 = vst [vmem:[#allocation42_spill] sm:$0xff] %v6036_v21  ;;  %2038 = vmatprep.mubr.f32.mxu1 %v259_v57  ;;  %4032 = vmatprep.mubr.msk.f32.mxu0 %vm4454_vm0, %v8269_v48  ;;  %v263_v57 = vld [vmem:[%s8229_s0 + $0x740] sm:$0xff] }
 0x1a0   :  { %v1342_v0 = vpop.f32.mrf.mxu0  ;;  %v1732_v40 = vpop.f32.mrf.mxu1 }
 0x1a1   :  { %v90_v40 = vld [vmem:[%s8229_s0 + $0x1d8] sm:$0xff] }
 0x1a2   :  { %v6050_v21 = vpop.f32.mrf.mxu0  ;;  %v6052_v7 = vpop.f32.mrf.mxu1  ;;  %2039 = vmatmul.mubr.f32.gmra.mxu1 %v258_v17  ;;  %4033 = vmatmul.mubr.msk.f32.gmra.mxu0 %vm715_vm1, %v85_v56  ;;  %v269_v17 = vld [vmem:[%s8229_s0 + $0x770] sm:$0xff] }
 0x1a3   :  { %8280 = vst [vmem:[#allocation43_spill] sm:$0xff] %v6052_v7  ;;  %2043 = vmatprep.mubr.f32.mxu1 %v264_v49  ;;  %4035 = vmatprep.mubr.msk.f32.mxu0 %vm4454_vm0, %v8269_v48  ;;  %v268_v49 = vld [vmem:[%s8229_s0 + $0x768] sm:$0xff] }
 0x1a4   :  { %v1347_v0 = vpop.f32.mrf.mxu0  ;;  %v1737_v26 = vpop.f32.mrf.mxu1 }
 0x1a5   :  { %v95_v26 = vld [vmem:[%s8229_s0 + $0x200] sm:$0xff] }
 0x1a6   :  { %v6066_v7 = vpop.f32.mrf.mxu0  ;;  %v6068_v56 = vpop.f32.mrf.mxu1  ;;  %2044 = vmatmul.mubr.f32.gmra.mxu1 %v263_v57  ;;  %4036 = vmatmul.mubr.msk.f32.gmra.mxu0 %vm715_vm1, %v90_v40  ;;  %v274_v57 = vld [vmem:[%s8229_s0 + $0x798] sm:$0xff]  ;;  %v6085_v40 = vld [vmem:[%s8230_s3] ss:$0 sm:$0xff] }
 0x1a7   :  { %8281 = vst [vmem:[#allocation44_spill] sm:$0xff] %v6068_v56  ;;  %2048 = vmatprep.mubr.f32.mxu1 %v269_v17  ;;  %4038 = vmatprep.mubr.msk.f32.mxu0 %vm4454_vm0, %v8269_v48 }
 0x1a8   :  { %v1352_v0 = vpop.f32.mrf.mxu0  ;;  %v1742_v14 = vpop.f32.mrf.mxu1 }
 0x1a9   :  { %v273_v14 = vld [vmem:[%s8229_s0 + $0x790] sm:$0xff]  ;;  %v100_v0 = vld [vmem:[%s8229_s0 + $0x228] sm:$0xff] }
 0x1aa   :  { %v6087_v17 = vpop.f32.mrf.mxu0  ;;  %v6089_v56 = vpop.f32.mrf.mxu1  ;;  %2049 = vmatmul.mubr.f32.gmra.mxu1 %v268_v49  ;;  %4039 = vmatmul.mubr.msk.f32.gmra.mxu0 %vm715_vm1, %v95_v26  ;;  %v279_v49 = vld [vmem:[%s8229_s0 + $0x7c0] sm:$0xff]  ;;  %v1146_v26 = vadd.f32 %v6085_v40, %v5414_v19  ;;  %v105_v19 = vld [vmem:[%s8229_s0 + $0x250] sm:$0xff] }
 0x1ab   :  { %8282 = vst [vmem:[#allocation45_spill] sm:$0xff] %v6089_v56  ;;  %2053 = vmatprep.mubr.f32.mxu1 %v274_v57  ;;  %4041 = vmatprep.mubr.msk.f32.mxu0 %vm4454_vm0, %v8269_v48 }
 0x1ac   :  { %v1357_v2 = vpop.f32.mrf.mxu0  ;;  %v1747_v55 = vpop.f32.mrf.mxu1 }
 0x1ad   :  { %v278_v55 = vld [vmem:[%s8229_s0 + $0x7b8] sm:$0xff] }
 0x1ae   :  { %v6105_v57 = vpop.f32.mrf.mxu0  ;;  %v1815_v56 = vpop.f32.mrf.mxu1  ;;  %2054 = vmatmul.mubr.f32.gmra.mxu1 %v273_v14  ;;  %4042 = vmatmul.mubr.msk.f32.gmra.mxu0 %vm715_vm1, %v100_v0  ;;  %v284_v14 = vld [vmem:[%s8229_s0 + $0x7e8] sm:$0xff] }
 0x1af   :  { %v6108_v45 = vadd.f32 %v1815_v56, %v1146_v26  ;;  %2058 = vmatprep.mubr.f32.mxu1 %v279_v49  ;;  %4044 = vmatprep.mubr.msk.f32.mxu0 %vm4454_vm0, %v8269_v48  ;;  %v1151_v56 = vadd.f32 %v6085_v40, %v5430_v27  ;;  %v110_v27 = vld [vmem:[%s8229_s0 + $0x278] sm:$0xff] }
 0x1b0   :  { %v1362_v2 = vpop.f32.mrf.mxu0  ;;  %v1817_v33 = vpop.f32.mrf.mxu1 }
 0x1b1   :  { %v283_v33 = vld [vmem:[%s8229_s0 + $0x7e0] sm:$0xff] }
 0x1b2   :  { %v6123_v0 = vpop.f32.mrf.mxu0  ;;  %v1820_v49 = vpop.f32.mrf.mxu1  ;;  %2059 = vmatmul.mubr.f32.gmra.mxu1 %v278_v55  ;;  %4045 = vmatmul.mubr.msk.f32.gmra.mxu0 %vm715_vm1, %v105_v19  ;;  %v289_v55 = vld [vmem:[%s8229_s0 + $0x810] sm:$0xff]  ;;  %v1156_v19 = vadd.f32 %v6085_v40, %v5446_v35  ;;  %v115_v35 = vld [vmem:[%s8229_s0 + $0x2a0] sm:$0xff] }
 0x1b3   :  { %v6126_v26 = vadd.f32 %v1820_v49, %v1151_v56  ;;  %2063 = vmatprep.mubr.f32.mxu1 %v284_v14  ;;  %4047 = vmatprep.mubr.msk.f32.mxu0 %vm4454_vm0, %v8269_v48 }
 0x1b4   :  { %v1367_v2 = vpop.f32.mrf.mxu0  ;;  %v1822_v23 = vpop.f32.mrf.mxu1 }
 0x1b5   :  { %v288_v23 = vld [vmem:[%s8229_s0 + $0x808] sm:$0xff] }
 0x1b6   :  { %v6141_v14 = vpop.f32.mrf.mxu0  ;;  %v1825_v56 = vpop.f32.mrf.mxu1  ;;  %2064 = vmatmul.mubr.f32.gmra.mxu1 %v283_v33  ;;  %4048 = vmatmul.mubr.msk.f32.gmra.mxu0 %vm715_vm1, %v110_v27  ;;  %v294_v33 = vld [vmem:[%s8229_s0 + $0x838] sm:$0xff]  ;;  %v1161_v27 = vadd.f32 %v6085_v40, %v5462_v43  ;;  %v120_v43 = vld [vmem:[%s8229_s0 + $0x2c8] sm:$0xff] }
 0x1b7   :  { %v6144_v49 = vadd.f32 %v1825_v56, %v1156_v19  ;;  %2068 = vmatprep.mubr.f32.mxu1 %v289_v55  ;;  %4050 = vmatprep.mubr.msk.f32.mxu0 %vm4454_vm0, %v8269_v48 }
 0x1b8   :  { %v1372_v2 = vpop.f32.mrf.mxu0  ;;  %v1827_v13 = vpop.f32.mrf.mxu1 }
 0x1b9   :  { %v293_v13 = vld [vmem:[%s8229_s0 + $0x830] sm:$0xff] }
 0x1ba   :  { %v6159_v55 = vpop.f32.mrf.mxu0  ;;  %v1830_v19 = vpop.f32.mrf.mxu1  ;;  %2069 = vmatmul.mubr.f32.gmra.mxu1 %v288_v23  ;;  %4051 = vmatmul.mubr.msk.f32.gmra.mxu0 %vm715_vm1, %v115_v35  ;;  %v299_v23 = vld [vmem:[%s8229_s0 + $0x860] sm:$0xff]  ;;  %v1166_v35 = vadd.f32 %v6085_v40, %v5478_v51  ;;  %v125_v51 = vld [vmem:[%s8229_s0 + $0x2f0] sm:$0xff] }
 0x1bb   :  { %v6162_v56 = vadd.f32 %v1830_v19, %v1161_v27  ;;  %2073 = vmatprep.mubr.f32.mxu1 %v294_v33  ;;  %4053 = vmatprep.mubr.msk.f32.mxu0 %vm4454_vm0, %v8269_v48 }
 0x1bc   :  { %v1377_v2 = vpop.f32.mrf.mxu0  ;;  %v1832_v5 = vpop.f32.mrf.mxu1 }
 0x1bd   :  { %v298_v5 = vld [vmem:[%s8229_s0 + $0x858] sm:$0xff] }
 0x1be   :  { %v6177_v33 = vpop.f32.mrf.mxu0  ;;  %v1835_v27 = vpop.f32.mrf.mxu1  ;;  %2074 = vmatmul.mubr.f32.gmra.mxu1 %v293_v13  ;;  %4054 = vmatmul.mubr.msk.f32.gmra.mxu0 %vm715_vm1, %v120_v43  ;;  %v304_v13 = vld [vmem:[%s8229_s0 + $0x888] sm:$0xff]  ;;  %v1171_v43 = vadd.f32 %v6085_v40, %v5494_v59  ;;  %v130_v59 = vld [vmem:[%s8229_s0 + $0x318] sm:$0xff] }
 0x1bf   :  { %v6180_v19 = vadd.f32 %v1835_v27, %v1166_v35  ;;  %2078 = vmatprep.mubr.f32.mxu1 %v299_v23  ;;  %4056 = vmatprep.mubr.msk.f32.mxu0 %vm4454_vm0, %v8269_v48 }
 0x1c0   :  { %v1382_v2 = vpop.f32.mrf.mxu0  ;;  %v1837_v60 = vpop.f32.mrf.mxu1 }
 0x1c1   :  { %v303_v60 = vld [vmem:[%s8229_s0 + $0x880] sm:$0xff] }
 0x1c2   :  { %v6195_v23 = vpop.f32.mrf.mxu0  ;;  %v1840_v35 = vpop.f32.mrf.mxu1  ;;  %2079 = vmatmul.mubr.f32.gmra.mxu1 %v298_v5  ;;  %4057 = vmatmul.mubr.msk.f32.gmra.mxu0 %vm715_vm1, %v125_v51  ;;  %v309_v5 = vld [vmem:[%s8229_s0 + $0x8b0] sm:$0xff]  ;;  %v1176_v51 = vadd.f32 %v6085_v40, %v5510_v4  ;;  %v135_v4 = vld [vmem:[%s8229_s0 + $0x340] sm:$0xff] }
 0x1c3   :  { %v6198_v27 = vadd.f32 %v1840_v35, %v1171_v43  ;;  %2083 = vmatprep.mubr.f32.mxu1 %v304_v13  ;;  %4059 = vmatprep.mubr.msk.f32.mxu0 %vm4454_vm0, %v8269_v48 }
 0x1c4   :  { %v1387_v2 = vpop.f32.mrf.mxu0  ;;  %v1842_v52 = vpop.f32.mrf.mxu1 }
 0x1c5   :  { %v308_v52 = vld [vmem:[%s8229_s0 + $0x8a8] sm:$0xff] }
 0x1c6   :  { %v6213_v13 = vpop.f32.mrf.mxu0  ;;  %v1845_v43 = vpop.f32.mrf.mxu1  ;;  %2084 = vmatmul.mubr.f32.gmra.mxu1 %v303_v60  ;;  %4060 = vmatmul.mubr.msk.f32.gmra.mxu0 %vm715_vm1, %v130_v59  ;;  %v314_v60 = vld [vmem:[%s8229_s0 + $0x8d8] sm:$0xff]  ;;  %v1181_v59 = vadd.f32 %v6085_v40, %v5526_v12  ;;  %v140_v12 = vld [vmem:[%s8229_s0 + $0x368] sm:$0xff] }
 0x1c7   :  { %v6216_v35 = vadd.f32 %v1845_v43, %v1176_v51  ;;  %2088 = vmatprep.mubr.f32.mxu1 %v309_v5  ;;  %4062 = vmatprep.mubr.msk.f32.mxu0 %vm4454_vm0, %v8269_v48 }
 0x1c8   :  { %v1392_v2 = vpop.f32.mrf.mxu0  ;;  %v1847_v44 = vpop.f32.mrf.mxu1 }
 0x1c9   :  { %v313_v44 = vld [vmem:[%s8229_s0 + $0x8d0] sm:$0xff] }
 0x1ca   :  { %v6231_v5 = vpop.f32.mrf.mxu0  ;;  %v1850_v51 = vpop.f32.mrf.mxu1  ;;  %2089 = vmatmul.mubr.f32.gmra.mxu1 %v308_v52  ;;  %4063 = vmatmul.mubr.msk.f32.gmra.mxu0 %vm715_vm1, %v135_v4  ;;  %v319_v52 = vld [vmem:[%s8229_s0 + $0x900] sm:$0xff]  ;;  %v1186_v4 = vadd.f32 %v6085_v40, %v5542_v22  ;;  %v145_v22 = vld [vmem:[%s8229_s0 + $0x390] sm:$0xff] }
 0x1cb   :  { %v6234_v43 = vadd.f32 %v1850_v51, %v1181_v59  ;;  %2093 = vmatprep.mubr.f32.mxu1 %v314_v60  ;;  %4065 = vmatprep.mubr.msk.f32.mxu0 %vm4454_vm0, %v8269_v48 }
 0x1cc   :  { %v1397_v2 = vpop.f32.mrf.mxu0  ;;  %v1852_v36 = vpop.f32.mrf.mxu1 }
 0x1cd   :  { %v318_v36 = vld [vmem:[%s8229_s0 + $0x8f8] sm:$0xff] }
 0x1ce   :  { %v6249_v60 = vpop.f32.mrf.mxu0  ;;  %v1855_v59 = vpop.f32.mrf.mxu1  ;;  %2094 = vmatmul.mubr.f32.gmra.mxu1 %v313_v44  ;;  %4066 = vmatmul.mubr.msk.f32.gmra.mxu0 %vm715_vm1, %v140_v12  ;;  %v324_v44 = vld [vmem:[%s8229_s0 + $0x928] sm:$0xff]  ;;  %v1191_v12 = vadd.f32 %v6085_v40, %v5558_v32  ;;  %v150_v32 = vld [vmem:[%s8229_s0 + $0x3b8] sm:$0xff] }
 0x1cf   :  { %v6252_v51 = vadd.f32 %v1855_v59, %v1186_v4  ;;  %2098 = vmatprep.mubr.f32.mxu1 %v319_v52  ;;  %4068 = vmatprep.mubr.msk.f32.mxu0 %vm4454_vm0, %v8269_v48 }
 0x1d0   :  { %v1402_v2 = vpop.f32.mrf.mxu0  ;;  %v1857_v28 = vpop.f32.mrf.mxu1 }
 0x1d1   :  { %v323_v28 = vld [vmem:[%s8229_s0 + $0x920] sm:$0xff] }
 0x1d2   :  { %v6267_v52 = vpop.f32.mrf.mxu0  ;;  %v1860_v4 = vpop.f32.mrf.mxu1  ;;  %2099 = vmatmul.mubr.f32.gmra.mxu1 %v318_v36  ;;  %4069 = vmatmul.mubr.msk.f32.gmra.mxu0 %vm715_vm1, %v145_v22  ;;  %v329_v36 = vld [vmem:[%s8229_s0 + $0x950] sm:$0xff]  ;;  %v1196_v22 = vadd.f32 %v6085_v40, %v5574_v42  ;;  %v155_v42 = vld [vmem:[%s8229_s0 + $0x3e0] sm:$0xff] }
 0x1d3   :  { %v6270_v59 = vadd.f32 %v1860_v4, %v1191_v12  ;;  %2103 = vmatprep.mubr.f32.mxu1 %v324_v44  ;;  %4071 = vmatprep.mubr.msk.f32.mxu0 %vm4454_vm0, %v8269_v48 }
 0x1d4   :  { %v1407_v2 = vpop.f32.mrf.mxu0  ;;  %v1862_v20 = vpop.f32.mrf.mxu1 }
 0x1d5   :  { %v328_v20 = vld [vmem:[%s8229_s0 + $0x948] sm:$0xff] }
 0x1d6   :  { %v6285_v44 = vpop.f32.mrf.mxu0  ;;  %v1865_v12 = vpop.f32.mrf.mxu1  ;;  %2104 = vmatmul.mubr.f32.gmra.mxu1 %v323_v28  ;;  %4072 = vmatmul.mubr.msk.f32.gmra.mxu0 %vm715_vm1, %v150_v32  ;;  %v334_v28 = vld [vmem:[%s8229_s0 + $0x978] sm:$0xff]  ;;  %v1201_v32 = vadd.f32 %v6085_v40, %v5590_v54  ;;  %v160_v54 = vld [vmem:[%s8229_s0 + $0x408] sm:$0xff] }
 0x1d7   :  { %8283 = vst [vmem:[#allocation46_spill] sm:$0xff] %v6285_v44  ;;  %v6288_v4 = vadd.f32 %v1865_v12, %v1196_v22  ;;  %2108 = vmatprep.mubr.f32.mxu1 %v329_v36  ;;  %4074 = vmatprep.mubr.msk.f32.mxu0 %vm4454_vm0, %v8269_v48 }
 0x1d8   :  { %v1412_v2 = vpop.f32.mrf.mxu0  ;;  %v1867_v44 = vpop.f32.mrf.mxu1 }
 0x1d9   :  { %v333_v44 = vld [vmem:[%s8229_s0 + $0x970] sm:$0xff] }
 0x1da   :  { %v6303_v36 = vpop.f32.mrf.mxu0  ;;  %v1870_v22 = vpop.f32.mrf.mxu1  ;;  %2109 = vmatmul.mubr.f32.gmra.mxu1 %v328_v20  ;;  %4075 = vmatmul.mubr.msk.f32.gmra.mxu0 %vm715_vm1, %v155_v42  ;;  %v339_v20 = vld [vmem:[%s8229_s0 + $0x9a0] sm:$0xff]  ;;  %v1206_v42 = vadd.f32 %v6085_v40, %v5606_v1  ;;  %v165_v1 = vld [vmem:[%s8229_s0 + $0x430] sm:$0xff] }
 0x1db   :  { %8284 = vst [vmem:[#allocation47_spill] sm:$0xff] %v6303_v36  ;;  %v6306_v12 = vadd.f32 %v1870_v22, %v1201_v32  ;;  %2113 = vmatprep.mubr.f32.mxu1 %v334_v28  ;;  %4077 = vmatprep.mubr.msk.f32.mxu0 %vm4454_vm0, %v8269_v48 }
 0x1dc   :  { %v1417_v2 = vpop.f32.mrf.mxu0  ;;  %v1872_v36 = vpop.f32.mrf.mxu1 }
 0x1dd   :  { %v338_v36 = vld [vmem:[%s8229_s0 + $0x998] sm:$0xff] }
 0x1de   :  { %v6321_v28 = vpop.f32.mrf.mxu0  ;;  %v1875_v32 = vpop.f32.mrf.mxu1  ;;  %2114 = vmatmul.mubr.f32.gmra.mxu1 %v333_v44  ;;  %4078 = vmatmul.mubr.msk.f32.gmra.mxu0 %vm715_vm1, %v160_v54  ;;  %v344_v44 = vld [vmem:[%s8229_s0 + $0x9c8] sm:$0xff]  ;;  %v1211_v54 = vadd.f32 %v6085_v40, %v5622_v11  ;;  %v170_v11 = vld [vmem:[%s8229_s0 + $0x458] sm:$0xff] }
 0x1df   :  { %8285 = vst [vmem:[#allocation48_spill] sm:$0xff] %v6321_v28  ;;  %v6324_v22 = vadd.f32 %v1875_v32, %v1206_v42  ;;  %2118 = vmatprep.mubr.f32.mxu1 %v339_v20  ;;  %4080 = vmatprep.mubr.msk.f32.mxu0 %vm4454_vm0, %v8269_v48 }
 0x1e0   :  { %v1422_v2 = vpop.f32.mrf.mxu0  ;;  %v1877_v28 = vpop.f32.mrf.mxu1 }
 0x1e1   :  { %v343_v28 = vld [vmem:[%s8229_s0 + $0x9c0] sm:$0xff] }
 0x1e2   :  { %v6339_v20 = vpop.f32.mrf.mxu0  ;;  %v1880_v42 = vpop.f32.mrf.mxu1  ;;  %2119 = vmatmul.mubr.f32.gmra.mxu1 %v338_v36  ;;  %4081 = vmatmul.mubr.msk.f32.gmra.mxu0 %vm715_vm1, %v165_v1  ;;  %v349_v36 = vld [vmem:[%s8229_s0 + $0x9f0] sm:$0xff]  ;;  %v1216_v1 = vadd.f32 %v6085_v40, %v5638_v25  ;;  %v175_v25 = vld [vmem:[%s8229_s0 + $0x480] sm:$0xff] }
 0x1e3   :  { %8286 = vst [vmem:[#allocation49_spill] sm:$0xff] %v6339_v20  ;;  %v6342_v32 = vadd.f32 %v1880_v42, %v1211_v54  ;;  %2123 = vmatprep.mubr.f32.mxu1 %v344_v44  ;;  %4083 = vmatprep.mubr.msk.f32.mxu0 %vm4454_vm0, %v8269_v48 }
 0x1e4   :  { %v1427_v2 = vpop.f32.mrf.mxu0  ;;  %v1882_v20 = vpop.f32.mrf.mxu1 }
 0x1e5   :  { %v348_v20 = vld [vmem:[%s8229_s0 + $0x9e8] sm:$0xff] }
 0x1e6   :  { %v6357_v44 = vpop.f32.mrf.mxu0  ;;  %v1885_v54 = vpop.f32.mrf.mxu1  ;;  %2124 = vmatmul.mubr.f32.gmra.mxu1 %v343_v28  ;;  %4084 = vmatmul.mubr.msk.f32.gmra.mxu0 %vm715_vm1, %v170_v11  ;;  %v354_v28 = vld [vmem:[%s8229_s0 + $0xa18] sm:$0xff]  ;;  %v1221_v11 = vadd.f32 %v6085_v40, %v5654_v39  ;;  %v180_v39 = vld [vmem:[%s8229_s0 + $0x4a8] sm:$0xff] }
 0x1e7   :  { %8287 = vst [vmem:[#allocation50_spill] sm:$0xff] %v6357_v44  ;;  %v6360_v42 = vadd.f32 %v1885_v54, %v1216_v1  ;;  %2128 = vmatprep.mubr.f32.mxu1 %v349_v36  ;;  %4086 = vmatprep.mubr.msk.f32.mxu0 %vm4454_vm0, %v8269_v48 }
 0x1e8   :  { %v1432_v2 = vpop.f32.mrf.mxu0  ;;  %v1887_v44 = vpop.f32.mrf.mxu1 }
 0x1e9   :  { %v353_v44 = vld [vmem:[%s8229_s0 + $0xa10] sm:$0xff] }
 0x1ea   :  { %v6375_v36 = vpop.f32.mrf.mxu0  ;;  %v1890_v1 = vpop.f32.mrf.mxu1  ;;  %2129 = vmatmul.mubr.f32.gmra.mxu1 %v348_v20  ;;  %4087 = vmatmul.mubr.msk.f32.gmra.mxu0 %vm715_vm1, %v175_v25  ;;  %v359_v20 = vld [vmem:[%s8229_s0 + $0xa40] sm:$0xff]  ;;  %v1226_v25 = vadd.f32 %v6085_v40, %v5670_v53  ;;  %v185_v53 = vld [vmem:[%s8229_s0 + $0x4d0] sm:$0xff] }
 0x1eb   :  { %8288 = vst [vmem:[#allocation51_spill] sm:$0xff] %v6375_v36  ;;  %v6378_v54 = vadd.f32 %v1890_v1, %v1221_v11  ;;  %2133 = vmatprep.mubr.f32.mxu1 %v354_v28  ;;  %4089 = vmatprep.mubr.msk.f32.mxu0 %vm4454_vm0, %v8269_v48 }
 0x1ec   :  { %v1437_v2 = vpop.f32.mrf.mxu0  ;;  %v1892_v36 = vpop.f32.mrf.mxu1 }
 0x1ed   :  { %v358_v36 = vld [vmem:[%s8229_s0 + $0xa38] sm:$0xff] }
 0x1ee   :  { %v6393_v28 = vpop.f32.mrf.mxu0  ;;  %v1895_v11 = vpop.f32.mrf.mxu1  ;;  %2134 = vmatmul.mubr.f32.gmra.mxu1 %v353_v44  ;;  %4090 = vmatmul.mubr.msk.f32.gmra.mxu0 %vm715_vm1, %v180_v39  ;;  %v364_v44 = vld [vmem:[%s8229_s0 + $0xa68] sm:$0xff]  ;;  %v1231_v39 = vadd.f32 %v6085_v40, %v5686_v6  ;;  %v190_v6 = vld [vmem:[%s8229_s0 + $0x4f8] sm:$0xff] }
 0x1ef   :  { %8289 = vst [vmem:[#allocation52_spill] sm:$0xff] %v6393_v28  ;;  %v6396_v1 = vadd.f32 %v1895_v11, %v1226_v25  ;;  %2138 = vmatprep.mubr.f32.mxu1 %v359_v20  ;;  %4092 = vmatprep.mubr.msk.f32.mxu0 %vm4454_vm0, %v8269_v48 }
 0x1f0   :  { %v1442_v2 = vpop.f32.mrf.mxu0  ;;  %v1897_v28 = vpop.f32.mrf.mxu1 }
 0x1f1   :  { %v363_v28 = vld [vmem:[%s8229_s0 + $0xa60] sm:$0xff] }
 0x1f2   :  { %v6411_v20 = vpop.f32.mrf.mxu0  ;;  %v1900_v25 = vpop.f32.mrf.mxu1  ;;  %2139 = vmatmul.mubr.f32.gmra.mxu1 %v358_v36  ;;  %4093 = vmatmul.mubr.msk.f32.gmra.mxu0 %vm715_vm1, %v185_v53  ;;  %v369_v36 = vld [vmem:[%s8229_s0 + $0xa90] sm:$0xff]  ;;  %v1236_v53 = vadd.f32 %v6085_v40, %v5702_v18  ;;  %v195_v18 = vld [vmem:[%s8229_s0 + $0x520] sm:$0xff] }
 0x1f3   :  { %8290 = vst [vmem:[#allocation53_spill] sm:$0xff] %v6411_v20  ;;  %v6414_v11 = vadd.f32 %v1900_v25, %v1231_v39  ;;  %2143 = vmatprep.mubr.f32.mxu1 %v364_v44  ;;  %4095 = vmatprep.mubr.msk.f32.mxu0 %vm4454_vm0, %v8269_v48 }
 0x1f4   :  { %v1447_v2 = vpop.f32.mrf.mxu0  ;;  %v1902_v20 = vpop.f32.mrf.mxu1 }
 0x1f5   :  { %v368_v20 = vld [vmem:[%s8229_s0 + $0xa88] sm:$0xff] }
 0x1f6   :  { %v6429_v44 = vpop.f32.mrf.mxu0  ;;  %v1905_v39 = vpop.f32.mrf.mxu1  ;;  %2144 = vmatmul.mubr.f32.gmra.mxu1 %v363_v28  ;;  %4096 = vmatmul.mubr.msk.f32.gmra.mxu0 %vm715_vm1, %v190_v6  ;;  %v374_v28 = vld [vmem:[%s8229_s0 + $0xab8] sm:$0xff]  ;;  %v1241_v6 = vadd.f32 %v6085_v40, %v5718_v38  ;;  %v200_v38 = vld [vmem:[%s8229_s0 + $0x548] sm:$0xff] }
 0x1f7   :  { %8291 = vst [vmem:[#allocation54_spill] sm:$0xff] %v6429_v44  ;;  %v6432_v25 = vadd.f32 %v1905_v39, %v1236_v53  ;;  %2148 = vmatprep.mubr.f32.mxu1 %v369_v36  ;;  %4098 = vmatprep.mubr.msk.f32.mxu0 %vm4454_vm0, %v8269_v48 }
 0x1f8   :  { %v1452_v2 = vpop.f32.mrf.mxu0  ;;  %v1907_v44 = vpop.f32.mrf.mxu1 }
 0x1f9   :  { %v373_v44 = vld [vmem:[%s8229_s0 + $0xab0] sm:$0xff] }
 0x1fa   :  { %v6447_v36 = vpop.f32.mrf.mxu0  ;;  %v1910_v53 = vpop.f32.mrf.mxu1  ;;  %2149 = vmatmul.mubr.f32.gmra.mxu1 %v368_v20  ;;  %4099 = vmatmul.mubr.msk.f32.gmra.mxu0 %vm715_vm1, %v195_v18  ;;  %v379_v20 = vld [vmem:[%s8229_s0 + $0xae0] sm:$0xff]  ;;  %v1246_v18 = vadd.f32 %v6085_v40, %v5734_v58  ;;  %v205_v58 = vld [vmem:[%s8229_s0 + $0x570] sm:$0xff] }
 0x1fb   :  { %8292 = vst [vmem:[#allocation55_spill] sm:$0xff] %v6447_v36  ;;  %v6450_v39 = vadd.f32 %v1910_v53, %v1241_v6  ;;  %2153 = vmatprep.mubr.f32.mxu1 %v374_v28  ;;  %4101 = vmatprep.mubr.msk.f32.mxu0 %vm4454_vm0, %v8269_v48 }
 0x1fc   :  { %v1457_v2 = vpop.f32.mrf.mxu0  ;;  %v1912_v36 = vpop.f32.mrf.mxu1 }
 0x1fd   :  { %v378_v36 = vld [vmem:[%s8229_s0 + $0xad8] sm:$0xff] }
 0x1fe   :  { %v6465_v28 = vpop.f32.mrf.mxu0  ;;  %v1915_v6 = vpop.f32.mrf.mxu1  ;;  %2154 = vmatmul.mubr.f32.gmra.mxu1 %v373_v44  ;;  %4102 = vmatmul.mubr.msk.f32.gmra.mxu0 %vm715_vm1, %v200_v38  ;;  %v384_v44 = vld [vmem:[%s8229_s0 + $0xb08] sm:$0xff]  ;;  %v1251_v38 = vadd.f32 %v6085_v40, %v5750_v15  ;;  %v210_v15 = vld [vmem:[%s8229_s0 + $0x598] sm:$0xff] }
 0x1ff   :  { %8293 = vst [vmem:[#allocation56_spill] sm:$0xff] %v6465_v28  ;;  %v6468_v53 = vadd.f32 %v1915_v6, %v1246_v18  ;;  %2158 = vmatprep.mubr.f32.mxu1 %v379_v20  ;;  %4104 = vmatprep.mubr.msk.f32.mxu0 %vm4454_vm0, %v8269_v48 }
 0x200   :  { %v1462_v2 = vpop.f32.mrf.mxu0  ;;  %v1917_v28 = vpop.f32.mrf.mxu1 }
 0x201   :  { %v383_v28 = vld [vmem:[%s8229_s0 + $0xb00] sm:$0xff] }
 0x202   :  { %v6483_v20 = vpop.f32.mrf.mxu0  ;;  %v1920_v18 = vpop.f32.mrf.mxu1  ;;  %2159 = vmatmul.mubr.f32.gmra.mxu1 %v378_v36  ;;  %4105 = vmatmul.mubr.msk.f32.gmra.mxu0 %vm715_vm1, %v205_v58  ;;  %v389_v36 = vld [vmem:[%s8229_s0 + $0xb30] sm:$0xff]  ;;  %v1256_v58 = vadd.f32 %v6085_v40, %v5766_v37  ;;  %v215_v37 = vld [vmem:[%s8229_s0 + $0x5c0] sm:$0xff] }
 0x203   :  { %8294 = vst [vmem:[#allocation57_spill] sm:$0xff] %v6483_v20  ;;  %v6486_v6 = vadd.f32 %v1920_v18, %v1251_v38  ;;  %2163 = vmatprep.mubr.f32.mxu1 %v384_v44  ;;  %4107 = vmatprep.mubr.msk.f32.mxu0 %vm4454_vm0, %v8269_v48 }
 0x204   :  { %v1467_v2 = vpop.f32.mrf.mxu0  ;;  %v1922_v20 = vpop.f32.mrf.mxu1 }
 0x205   :  { %8295 = vst [vmem:[#allocation58_spill] sm:$0xff] %v6486_v6  ;;  %v388_v20 = vld [vmem:[%s8229_s0 + $0xb28] sm:$0xff] }
 0x206   :  { %v6501_v44 = vpop.f32.mrf.mxu0  ;;  %v1925_v38 = vpop.f32.mrf.mxu1  ;;  %2164 = vmatmul.mubr.f32.gmra.mxu1 %v383_v28  ;;  %4108 = vmatmul.mubr.msk.f32.gmra.mxu0 %vm715_vm1, %v210_v15  ;;  %v394_v28 = vld [vmem:[%s8229_s0 + $0xb58] sm:$0xff]  ;;  %v1261_v15 = vadd.f32 %v6085_v40, %v5782_v63  ;;  %v220_v63 = vld [vmem:[%s8229_s0 + $0x5e8] sm:$0xff] }
 0x207   :  { %v6504_v18 = vadd.f32 %v1925_v38, %v1256_v58  ;;  %2168 = vmatprep.mubr.f32.mxu1 %v389_v36  ;;  %4110 = vmatprep.mubr.msk.f32.mxu0 %vm4454_vm0, %v8269_v48 }
 0x208   :  { %v1472_v2 = vpop.f32.mrf.mxu0  ;;  %v1927_v6 = vpop.f32.mrf.mxu1 }
 0x209   :  { %8296 = vst [vmem:[#allocation59_spill] sm:$0xff] %v6504_v18  ;;  %v393_v6 = vld [vmem:[%s8229_s0 + $0xb50] sm:$0xff] }
 0x20a   :  { %v6519_v36 = vpop.f32.mrf.mxu0  ;;  %v1930_v58 = vpop.f32.mrf.mxu1  ;;  %2169 = vmatmul.mubr.f32.gmra.mxu1 %v388_v20  ;;  %4111 = vmatmul.mubr.msk.f32.gmra.mxu0 %vm715_vm1, %v215_v37  ;;  %v399_v20 = vld [vmem:[%s8229_s0 + $0xb80] sm:$0xff]  ;;  %v1266_v37 = vadd.f32 %v6085_v40, %v5798_v30  ;;  %v225_v30 = vld [vmem:[%s8229_s0 + $0x610] sm:$0xff] }
 0x20b   :  { %v6522_v38 = vadd.f32 %v1930_v58, %v1261_v15  ;;  %2173 = vmatprep.mubr.f32.mxu1 %v394_v28  ;;  %4113 = vmatprep.mubr.msk.f32.mxu0 %vm4454_vm0, %v8269_v48 }
 0x20c   :  { %v1477_v2 = vpop.f32.mrf.mxu0  ;;  %v1932_v18 = vpop.f32.mrf.mxu1 }
 0x20d   :  { %8297 = vst [vmem:[#allocation60_spill] sm:$0xff] %v6522_v38  ;;  %v398_v18 = vld [vmem:[%s8229_s0 + $0xb78] sm:$0xff] }
 0x20e   :  { %v6537_v28 = vpop.f32.mrf.mxu0  ;;  %v1935_v15 = vpop.f32.mrf.mxu1  ;;  %2174 = vmatmul.mubr.f32.gmra.mxu1 %v393_v6  ;;  %4114 = vmatmul.mubr.msk.f32.gmra.mxu0 %vm715_vm1, %v220_v63  ;;  %v404_v6 = vld [vmem:[%s8229_s0 + $0xba8] sm:$0xff]  ;;  %v1271_v63 = vadd.f32 %v6085_v40, %v5814_v62  ;;  %v230_v62 = vld [vmem:[%s8229_s0 + $0x638] sm:$0xff] }
 0x20f   :  { %v6540_v58 = vadd.f32 %v1935_v15, %v1266_v37  ;;  %2178 = vmatprep.mubr.f32.mxu1 %v399_v20  ;;  %4116 = vmatprep.mubr.msk.f32.mxu0 %vm4454_vm0, %v8269_v48 }
 0x210   :  { %v1482_v2 = vpop.f32.mrf.mxu0  ;;  %v1937_v38 = vpop.f32.mrf.mxu1 }
 0x211   :  { %8298 = vst [vmem:[#allocation61_spill] sm:$0xff] %v6540_v58  ;;  %v403_v38 = vld [vmem:[%s8229_s0 + $0xba0] sm:$0xff] }
 0x212   :  { %v6555_v20 = vpop.f32.mrf.mxu0  ;;  %v1940_v37 = vpop.f32.mrf.mxu1  ;;  %2179 = vmatmul.mubr.f32.gmra.mxu1 %v398_v18  ;;  %4117 = vmatmul.mubr.msk.f32.gmra.mxu0 %vm715_vm1, %v225_v30  ;;  %v409_v18 = vld [vmem:[%s8229_s0 + $0xbd0] sm:$0xff]  ;;  %v1276_v30 = vadd.f32 %v6085_v40, %v5830_v47  ;;  %v235_v47 = vld [vmem:[%s8229_s0 + $0x660] sm:$0xff] }
 0x213   :  { %v6558_v15 = vadd.f32 %v1940_v37, %v1271_v63  ;;  %2183 = vmatprep.mubr.f32.mxu1 %v404_v6  ;;  %4119 = vmatprep.mubr.msk.f32.mxu0 %vm4454_vm0, %v8269_v48 }
 0x214   :  { %v1487_v2 = vpop.f32.mrf.mxu0  ;;  %v1942_v58 = vpop.f32.mrf.mxu1 }
 0x215   :  { %8299 = vst [vmem:[#allocation62_spill] sm:$0xff] %v6558_v15  ;;  %v408_v58 = vld [vmem:[%s8229_s0 + $0xbc8] sm:$0xff] }
 0x216   :  { %v6573_v6 = vpop.f32.mrf.mxu0  ;;  %v1945_v63 = vpop.f32.mrf.mxu1  ;;  %2184 = vmatmul.mubr.f32.gmra.mxu1 %v403_v38  ;;  %4120 = vmatmul.mubr.msk.f32.gmra.mxu0 %vm715_vm1, %v230_v62  ;;  %v414_v38 = vld [vmem:[%s8229_s0 + $0xbf8] sm:$0xff]  ;;  %v1281_v62 = vadd.f32 %v6085_v40, %v5846_v10  ;;  %v240_v10 = vld [vmem:[%s8229_s0 + $0x688] sm:$0xff] }
 0x217   :  { %v6576_v37 = vadd.f32 %v1945_v63, %v1276_v30  ;;  %2188 = vmatprep.mubr.f32.mxu1 %v409_v18  ;;  %4122 = vmatprep.mubr.msk.f32.mxu0 %vm4454_vm0, %v8269_v48 }
 0x218   :  { %v1492_v2 = vpop.f32.mrf.mxu0  ;;  %v1947_v15 = vpop.f32.mrf.mxu1 }
 0x219   :  { %v413_v15 = vld [vmem:[%s8229_s0 + $0xbf0] sm:$0xff] }
 0x21a   :  { %v6591_v18 = vpop.f32.mrf.mxu0  ;;  %v1950_v30 = vpop.f32.mrf.mxu1  ;;  %2189 = vmatmul.mubr.f32.gmra.mxu1 %v408_v58  ;;  %4123 = vmatmul.mubr.msk.f32.gmra.mxu0 %vm715_vm1, %v235_v47  ;;  %v419_v58 = vld [vmem:[%s8229_s0 + $0xc20] sm:$0xff]  ;;  %v1286_v47 = vadd.f32 %v6085_v40, %v5862_v50  ;;  %v245_v50 = vld [vmem:[%s8229_s0 + $0x6b0] sm:$0xff] }
 0x21b   :  { %8300 = vst [vmem:[#allocation63_spill] sm:$0xff] %v6591_v18  ;;  %v6594_v63 = vadd.f32 %v1950_v30, %v1281_v62  ;;  %2193 = vmatprep.mubr.f32.mxu1 %v414_v38  ;;  %4125 = vmatprep.mubr.msk.f32.mxu0 %vm4454_vm0, %v8269_v48 }
 0x21c   :  { %v1497_v2 = vpop.f32.mrf.mxu0  ;;  %v1952_v18 = vpop.f32.mrf.mxu1 }
 0x21d   :  { %v418_v18 = vld [vmem:[%s8229_s0 + $0xc18] sm:$0xff] }
 0x21e   :  { %v6609_v38 = vpop.f32.mrf.mxu0  ;;  %v1955_v62 = vpop.f32.mrf.mxu1  ;;  %2194 = vmatmul.mubr.f32.gmra.mxu1 %v413_v15  ;;  %4126 = vmatmul.mubr.msk.f32.gmra.mxu0 %vm715_vm1, %v240_v10  ;;  %v424_v15 = vld [vmem:[%s8229_s0 + $0xc48] sm:$0xff]  ;;  %v1291_v10 = vadd.f32 %v6085_v40, %v5875_v34  ;;  %v250_v34 = vld [vmem:[%s8229_s0 + $0x6d8] sm:$0xff] }
 0x21f   :  { %8301 = vst [vmem:[#allocation64_spill] sm:$0xff] %v6609_v38  ;;  %v6612_v30 = vadd.f32 %v1955_v62, %v1286_v47  ;;  %2198 = vmatprep.mubr.f32.mxu1 %v419_v58  ;;  %4128 = vmatprep.mubr.msk.f32.mxu0 %vm4454_vm0, %v8269_v48 }
 0x220   :  { %v1502_v2 = vpop.f32.mrf.mxu0  ;;  %v1957_v38 = vpop.f32.mrf.mxu1 }
 0x221   :  { %v423_v38 = vld [vmem:[%s8229_s0 + $0xc40] sm:$0xff] }
 0x222   :  { %v6627_v58 = vpop.f32.mrf.mxu0  ;;  %v1960_v47 = vpop.f32.mrf.mxu1  ;;  %2199 = vmatmul.mubr.f32.gmra.mxu1 %v418_v18  ;;  %4129 = vmatmul.mubr.msk.f32.gmra.mxu0 %vm715_vm1, %v245_v50  ;;  %v429_v18 = vld [vmem:[%s8229_s0 + $0xc70] sm:$0xff]  ;;  %v1296_v50 = vadd.f32 %v6085_v40, %v5890_v8  ;;  %v255_v8 = vld [vmem:[%s8229_s0 + $0x700] sm:$0xff] }
 0x223   :  { %8302 = vst [vmem:[#allocation65_spill] sm:$0xff] %v6627_v58  ;;  %v6630_v62 = vadd.f32 %v1960_v47, %v1291_v10  ;;  %2203 = vmatprep.mubr.f32.mxu1 %v424_v15  ;;  %4131 = vmatprep.mubr.msk.f32.mxu0 %vm4454_vm0, %v8269_v48 }
 0x224   :  { %v1507_v2 = vpop.f32.mrf.mxu0  ;;  %v1962_v58 = vpop.f32.mrf.mxu1 }
 0x225   :  { %v428_v58 = vld [vmem:[%s8229_s0 + $0xc68] sm:$0xff] }
 0x226   :  { %v6645_v15 = vpop.f32.mrf.mxu0  ;;  %v1965_v10 = vpop.f32.mrf.mxu1  ;;  %2204 = vmatmul.mubr.f32.gmra.mxu1 %v423_v38  ;;  %4132 = vmatmul.mubr.msk.f32.gmra.mxu0 %vm715_vm1, %v250_v34  ;;  %v434_v38 = vld [vmem:[%s8229_s0 + $0xc98] sm:$0xff]  ;;  %v1301_v34 = vadd.f32 %v6085_v40, %v5906_v9  ;;  %v260_v9 = vld [vmem:[%s8229_s0 + $0x728] sm:$0xff] }
 0x227   :  { %8303 = vst [vmem:[#allocation66_spill] sm:$0xff] %v6645_v15  ;;  %v6648_v47 = vadd.f32 %v1965_v10, %v1296_v50  ;;  %2208 = vmatprep.mubr.f32.mxu1 %v429_v18  ;;  %4134 = vmatprep.mubr.msk.f32.mxu0 %vm4454_vm0, %v8269_v48 }
 0x228   :  { %v1512_v2 = vpop.f32.mrf.mxu0  ;;  %v1967_v15 = vpop.f32.mrf.mxu1 }
 0x229   :  { %v433_v15 = vld [vmem:[%s8229_s0 + $0xc90] sm:$0xff] }
 0x22a   :  { %v6663_v18 = vpop.f32.mrf.mxu0  ;;  %v1970_v50 = vpop.f32.mrf.mxu1  ;;  %2209 = vmatmul.mubr.f32.gmra.mxu1 %v428_v58  ;;  %4135 = vmatmul.mubr.msk.f32.gmra.mxu0 %vm715_vm1, %v255_v8  ;;  %v439_v58 = vld [vmem:[%s8229_s0 + $0xcc0] sm:$0xff]  ;;  %v1306_v8 = vadd.f32 %v6085_v40, %v5922_v29  ;;  %v265_v29 = vld [vmem:[%s8229_s0 + $0x750] sm:$0xff] }
 0x22b   :  { %8304 = vst [vmem:[#allocation67_spill] sm:$0xff] %v6663_v18  ;;  %v6666_v10 = vadd.f32 %v1970_v50, %v1301_v34  ;;  %2213 = vmatprep.mubr.f32.mxu1 %v434_v38  ;;  %4137 = vmatprep.mubr.msk.f32.mxu0 %vm4454_vm0, %v8269_v48 }
 0x22c   :  { %v1517_v2 = vpop.f32.mrf.mxu0  ;;  %v1972_v18 = vpop.f32.mrf.mxu1 }
 0x22d   :  { %v438_v18 = vld [vmem:[%s8229_s0 + $0xcb8] sm:$0xff] }
 0x22e   :  { %v6681_v38 = vpop.f32.mrf.mxu0  ;;  %v1975_v34 = vpop.f32.mrf.mxu1  ;;  %2214 = vmatmul.mubr.f32.gmra.mxu1 %v433_v15  ;;  %4138 = vmatmul.mubr.msk.f32.gmra.mxu0 %vm715_vm1, %v260_v9  ;;  %v444_v15 = vld [vmem:[%s8229_s0 + $0xce8] sm:$0xff]  ;;  %v1311_v9 = vadd.f32 %v6085_v40, %v5938_v24  ;;  %v270_v24 = vld [vmem:[%s8229_s0 + $0x778] sm:$0xff] }
 0x22f   :  { %8305 = vst [vmem:[#allocation68_spill] sm:$0xff] %v6681_v38  ;;  %v6684_v50 = vadd.f32 %v1975_v34, %v1306_v8  ;;  %2218 = vmatprep.mubr.f32.mxu1 %v439_v58  ;;  %4140 = vmatprep.mubr.msk.f32.mxu0 %vm4454_vm0, %v8269_v48 }
 0x230   :  { %v1522_v2 = vpop.f32.mrf.mxu0  ;;  %v1977_v38 = vpop.f32.mrf.mxu1 }
 0x231   :  { %v443_v38 = vld [vmem:[%s8229_s0 + $0xce0] sm:$0xff] }
 0x232   :  { %v6699_v58 = vpop.f32.mrf.mxu0  ;;  %v1980_v8 = vpop.f32.mrf.mxu1  ;;  %2219 = vmatmul.mubr.f32.gmra.mxu1 %v438_v18  ;;  %4141 = vmatmul.mubr.msk.f32.gmra.mxu0 %vm715_vm1, %v265_v29  ;;  %v449_v18 = vld [vmem:[%s8229_s0 + $0xd10] sm:$0xff]  ;;  %v1316_v29 = vadd.f32 %v6085_v40, %v5954_v31  ;;  %v275_v31 = vld [vmem:[%s8229_s0 + $0x7a0] sm:$0xff] }
 0x233   :  { %8306 = vst [vmem:[#allocation69_spill] sm:$0xff] %v6699_v58  ;;  %v6702_v34 = vadd.f32 %v1980_v8, %v1311_v9  ;;  %2223 = vmatprep.mubr.f32.mxu1 %v444_v15  ;;  %4143 = vmatprep.mubr.msk.f32.mxu0 %vm4454_vm0, %v8269_v48 }
 0x234   :  { %v1527_v2 = vpop.f32.mrf.mxu0  ;;  %v1982_v58 = vpop.f32.mrf.mxu1 }
 0x235   :  { %v448_v58 = vld [vmem:[%s8229_s0 + $0xd08] sm:$0xff] }
 0x236   :  { %v6717_v15 = vpop.f32.mrf.mxu0  ;;  %v1985_v9 = vpop.f32.mrf.mxu1  ;;  %2224 = vmatmul.mubr.f32.gmra.mxu1 %v443_v38  ;;  %4144 = vmatmul.mubr.msk.f32.gmra.mxu0 %vm715_vm1, %v270_v24  ;;  %v454_v38 = vld [vmem:[%s8229_s0 + $0xd38] sm:$0xff]  ;;  %v1321_v24 = vadd.f32 %v6085_v40, %v5970_v3  ;;  %v280_v3 = vld [vmem:[%s8229_s0 + $0x7c8] sm:$0xff] }
 0x237   :  { %8307 = vst [vmem:[#allocation70_spill] sm:$0xff] %v6717_v15  ;;  %v6720_v8 = vadd.f32 %v1985_v9, %v1316_v29  ;;  %2228 = vmatprep.mubr.f32.mxu1 %v449_v18  ;;  %4146 = vmatprep.mubr.msk.f32.mxu0 %vm4454_vm0, %v8269_v48 }
 0x238   :  { %v1532_v2 = vpop.f32.mrf.mxu0  ;;  %v1987_v15 = vpop.f32.mrf.mxu1 }
 0x239   :  { %8308 = vst [vmem:[#allocation71_spill] sm:$0xff] %v6720_v8  ;;  %v453_v15 = vld [vmem:[%s8229_s0 + $0xd30] sm:$0xff] }
 0x23a   :  { %v1990_v18 = vpop.f32.mrf.mxu1  ;;  %2229 = vmatmul.mubr.f32.gmra.mxu1 %v448_v58  ;;  %v2485_v29 = vpop.f32.mrf.mxu0  ;;  %4147 = vmatmul.mubr.msk.f32.gmra.mxu0 %vm715_vm1, %v275_v31  ;;  %v459_v31 = vld [vmem:[%s8229_s0 + $0xd60] sm:$0xff] }
 0x23b   :  { %v6736_v9 = vadd.f32 %v1990_v18, %v1321_v24  ;;  %v6739_v8 = vadd.f32 %v2485_v29, %v6108_v45  ;;  %2233 = vmatprep.mubr.f32.mxu1 %v454_v38  ;;  %4149 = vmatprep.mubr.msk.f32.mxu0 %vm4454_vm0, %v8269_v48  ;;  %v1326_v45 = vadd.f32 %v6085_v40, %v5986_v46  ;;  %v285_v46 = vld [vmem:[%s8229_s0 + $0x7f0] sm:$0xff] }
 0x23c   :  { %v1992_v58 = vpop.f32.mrf.mxu1  ;;  %v4004_v2 = vpop.f32.mrf.mxu0 }
 0x23d   :  { %v458_v58 = vld [vmem:[%s8229_s0 + $0xd58] sm:$0xff] }
 0x23e   :  { %v1995_v38 = vpop.f32.mrf.mxu1  ;;  %2234 = vmatmul.mubr.f32.gmra.mxu1 %v453_v15  ;;  %v2490_v24 = vpop.f32.mrf.mxu0  ;;  %4150 = vmatmul.mubr.msk.f32.gmra.mxu0 %vm715_vm1, %v280_v3  ;;  %v464_v3 = vld [vmem:[%s8229_s0 + $0xd88] sm:$0xff] }
 0x23f   :  { %v6755_v18 = vadd.f32 %v1995_v38, %v1326_v45  ;;  %v6758_v29 = vadd.f32 %v2490_v24, %v6126_v26  ;;  %2238 = vmatprep.mubr.f32.mxu1 %v459_v31  ;;  %4152 = vmatprep.mubr.msk.f32.mxu0 %vm4454_vm0, %v8269_v48  ;;  %v1331_v26 = vadd.f32 %v6085_v40, %v6002_v16  ;;  %v290_v16 = vld [vmem:[%s8229_s0 + $0x818] sm:$0xff] }
 0x240   :  { %v1997_v15 = vpop.f32.mrf.mxu1  ;;  %v4007_v2 = vpop.f32.mrf.mxu0 }
 0x241   :  { %v463_v15 = vld [vmem:[%s8229_s0 + $0xd80] sm:$0xff] }
 0x242   :  { %v2000_v31 = vpop.f32.mrf.mxu1  ;;  %2239 = vmatmul.mubr.f32.gmra.mxu1 %v458_v58  ;;  %v2495_v45 = vpop.f32.mrf.mxu0  ;;  %4153 = vmatmul.mubr.msk.f32.gmra.mxu0 %vm715_vm1, %v285_v46  ;;  %v469_v46 = vld [vmem:[%s8229_s0 + $0xdb0] sm:$0xff] }
 0x243   :  { %v6774_v38 = vadd.f32 %v2000_v31, %v1331_v26  ;;  %v6777_v24 = vadd.f32 %v2495_v45, %v6144_v49  ;;  %2243 = vmatprep.mubr.f32.mxu1 %v464_v3  ;;  %4155 = vmatprep.mubr.msk.f32.mxu0 %vm4454_vm0, %v8269_v48  ;;  %v1336_v49 = vadd.f32 %v6085_v40, %v6018_v61  ;;  %v295_v61 = vld [vmem:[%s8229_s0 + $0x840] sm:$0xff] }
 0x244   :  { %v2002_v58 = vpop.f32.mrf.mxu1  ;;  %v4010_v2 = vpop.f32.mrf.mxu0 }
 0x245   :  { %v468_v58 = vld [vmem:[%s8229_s0 + $0xda8] sm:$0xff] }
 0x246   :  { %v2005_v3 = vpop.f32.mrf.mxu1  ;;  %2244 = vmatmul.mubr.f32.gmra.mxu1 %v463_v15  ;;  %v2500_v26 = vpop.f32.mrf.mxu0  ;;  %4156 = vmatmul.mubr.msk.f32.gmra.mxu0 %vm715_vm1, %v290_v16  ;;  %v474_v16 = vld [vmem:[%s8229_s0 + $0xdd8] sm:$0xff] }
 0x247   :  { %v6793_v31 = vadd.f32 %v2005_v3, %v1336_v49  ;;  %v6796_v45 = vadd.f32 %v2500_v26, %v6162_v56  ;;  %2248 = vmatprep.mubr.f32.mxu1 %v469_v46  ;;  %4158 = vmatprep.mubr.msk.f32.mxu0 %vm4454_vm0, %v8269_v48  ;;  %v6812_v56 = vld [vmem:[%s8230_s3] ss:$0 sm:$0xff] }
 0x248   :  { %v2007_v40 = vpop.f32.mrf.mxu1  ;;  %v4013_v15 = vpop.f32.mrf.mxu0  ;;  %v1341_v2 = vadd.f32 %v6812_v56, %v6034_v41  ;;  %v300_v41 = vld [vmem:[%s8229_s0 + $0x868] sm:$0xff] }
 0x249   :  { %v473_v40 = vld [vmem:[%s8229_s0 + $0xdd0] sm:$0xff] }
 0x24a   :  { %v2010_v46 = vpop.f32.mrf.mxu1  ;;  %2249 = vmatmul.mubr.f32.gmra.mxu1 %v468_v58  ;;  %v2505_v49 = vpop.f32.mrf.mxu0  ;;  %4159 = vmatmul.mubr.msk.f32.gmra.mxu0 %vm715_vm1, %v295_v61  ;;  %v479_v61 = vld [vmem:[%s8229_s0 + $0xe00] sm:$0xff] }
 0x24b   :  { %v6817_v3 = vadd.f32 %v2010_v46, %v1341_v2  ;;  %v6820_v26 = vadd.f32 %v2505_v49, %v6180_v19  ;;  %2253 = vmatprep.mubr.f32.mxu1 %v474_v16  ;;  %4161 = vmatprep.mubr.msk.f32.mxu0 %vm4454_vm0, %v8269_v48  ;;  %v1346_v19 = vadd.f32 %v6812_v56, %v6050_v21  ;;  %v305_v21 = vld [vmem:[%s8229_s0 + $0x890] sm:$0xff] }
 0x24c   :  { %v2012_v58 = vpop.f32.mrf.mxu1  ;;  %v4016_v15 = vpop.f32.mrf.mxu0 }
 0x24d   :  { %v478_v58 = vld [vmem:[%s8229_s0 + $0xdf8] sm:$0xff] }
 0x24e   :  { %v2015_v16 = vpop.f32.mrf.mxu1  ;;  %2254 = vmatmul.mubr.f32.gmra.mxu1 %v473_v40  ;;  %v2510_v2 = vpop.f32.mrf.mxu0  ;;  %4162 = vmatmul.mubr.msk.f32.gmra.mxu0 %vm715_vm1, %v300_v41  ;;  %v484_v41 = vld [vmem:[%s8229_s0 + $0xe28] sm:$0xff] }
 0x24f   :  { %v6836_v46 = vadd.f32 %v2015_v16, %v1346_v19  ;;  %v6839_v49 = vadd.f32 %v2510_v2, %v6198_v27  ;;  %2258 = vmatprep.mubr.f32.mxu1 %v479_v61  ;;  %4164 = vmatprep.mubr.msk.f32.mxu0 %vm4454_vm0, %v8269_v48  ;;  %v1351_v27 = vadd.f32 %v6812_v56, %v6066_v7  ;;  %v310_v7 = vld [vmem:[%s8229_s0 + $0x8b8] sm:$0xff] }
 0x250   :  { %v2017_v40 = vpop.f32.mrf.mxu1  ;;  %v4019_v15 = vpop.f32.mrf.mxu0 }
 0x251   :  { %v483_v40 = vld [vmem:[%s8229_s0 + $0xe20] sm:$0xff] }
 0x252   :  { %v2020_v61 = vpop.f32.mrf.mxu1  ;;  %2259 = vmatmul.mubr.f32.gmra.mxu1 %v478_v58  ;;  %v2515_v19 = vpop.f32.mrf.mxu0  ;;  %4165 = vmatmul.mubr.msk.f32.gmra.mxu0 %vm715_vm1, %v305_v21  ;;  %v489_v21 = vld [vmem:[%s8229_s0 + $0xe50] sm:$0xff] }
 0x253   :  { %v6855_v16 = vadd.f32 %v2020_v61, %v1351_v27  ;;  %v6858_v2 = vadd.f32 %v2515_v19, %v6216_v35  ;;  %2263 = vmatprep.mubr.f32.mxu1 %v484_v41  ;;  %4167 = vmatprep.mubr.msk.f32.mxu0 %vm4454_vm0, %v8269_v48  ;;  %v1356_v35 = vadd.f32 %v6812_v56, %v6087_v17  ;;  %v315_v17 = vld [vmem:[%s8229_s0 + $0x8e0] sm:$0xff] }
 0x254   :  { %v2022_v58 = vpop.f32.mrf.mxu1  ;;  %v4022_v15 = vpop.f32.mrf.mxu0 }
 0x255   :  { %v488_v58 = vld [vmem:[%s8229_s0 + $0xe48] sm:$0xff] }
 0x256   :  { %v2025_v41 = vpop.f32.mrf.mxu1  ;;  %2264 = vmatmul.mubr.f32.gmra.mxu1 %v483_v40  ;;  %v2520_v27 = vpop.f32.mrf.mxu0  ;;  %4168 = vmatmul.mubr.msk.f32.gmra.mxu0 %vm715_vm1, %v310_v7  ;;  %v494_v7 = vld [vmem:[%s8229_s0 + $0xe78] sm:$0xff] }
 0x257   :  { %v6874_v61 = vadd.f32 %v2025_v41, %v1356_v35  ;;  %v6877_v19 = vadd.f32 %v2520_v27, %v6234_v43  ;;  %2268 = vmatprep.mubr.f32.mxu1 %v489_v21  ;;  %4170 = vmatprep.mubr.msk.f32.mxu0 %vm4454_vm0, %v8269_v48  ;;  %v1361_v43 = vadd.f32 %v6812_v56, %v6105_v57  ;;  %v320_v57 = vld [vmem:[%s8229_s0 + $0x908] sm:$0xff] }
 0x258   :  { %v2027_v40 = vpop.f32.mrf.mxu1  ;;  %v4025_v15 = vpop.f32.mrf.mxu0 }
 0x259   :  { %v493_v40 = vld [vmem:[%s8229_s0 + $0xe70] sm:$0xff] }
 0x25a   :  { %v2030_v21 = vpop.f32.mrf.mxu1  ;;  %2269 = vmatmul.mubr.f32.gmra.mxu1 %v488_v58  ;;  %v2525_v35 = vpop.f32.mrf.mxu0  ;;  %4171 = vmatmul.mubr.msk.f32.gmra.mxu0 %vm715_vm1, %v315_v17  ;;  %v499_v17 = vld [vmem:[%s8229_s0 + $0xea0] sm:$0xff] }
 0x25b   :  { %v6893_v41 = vadd.f32 %v2030_v21, %v1361_v43  ;;  %v6896_v27 = vadd.f32 %v2525_v35, %v6252_v51  ;;  %2273 = vmatprep.mubr.f32.mxu1 %v494_v7  ;;  %4173 = vmatprep.mubr.msk.f32.mxu0 %vm4454_vm0, %v8269_v48  ;;  %v1366_v51 = vadd.f32 %v6812_v56, %v6123_v0  ;;  %v325_v0 = vld [vmem:[%s8229_s0 + $0x930] sm:$0xff] }
 0x25c   :  { %v2032_v58 = vpop.f32.mrf.mxu1  ;;  %v4028_v15 = vpop.f32.mrf.mxu0 }
 0x25d   :  { %8309 = vst [vmem:[#allocation72_spill] sm:$0xff] %v6893_v41  ;;  %v498_v58 = vld [vmem:[%s8229_s0 + $0xe98] sm:$0xff] }
 0x25e   :  { %v2035_v7 = vpop.f32.mrf.mxu1  ;;  %2274 = vmatmul.mubr.f32.gmra.mxu1 %v493_v40  ;;  %v2530_v43 = vpop.f32.mrf.mxu0  ;;  %4174 = vmatmul.mubr.msk.f32.gmra.mxu0 %vm715_vm1, %v320_v57  ;;  %v504_v57 = vld [vmem:[%s8229_s0 + $0xec8] sm:$0xff] }
 0x25f   :  { %v6912_v21 = vadd.f32 %v2035_v7, %v1366_v51  ;;  %v6915_v35 = vadd.f32 %v2530_v43, %v6270_v59  ;;  %2278 = vmatprep.mubr.f32.mxu1 %v499_v17  ;;  %4176 = vmatprep.mubr.msk.f32.mxu0 %vm4454_vm0, %v8269_v48  ;;  %v1371_v59 = vadd.f32 %v6812_v56, %v6141_v14  ;;  %v330_v14 = vld [vmem:[%s8229_s0 + $0x958] sm:$0xff] }
 0x260   :  { %v2037_v40 = vpop.f32.mrf.mxu1  ;;  %v4031_v15 = vpop.f32.mrf.mxu0 }
 0x261   :  { %8310 = vst [vmem:[#allocation73_spill] sm:$0xff] %v6912_v21  ;;  %v503_v40 = vld [vmem:[%s8229_s0 + $0xec0] sm:$0xff] }
 0x262   :  { %v2040_v17 = vpop.f32.mrf.mxu1  ;;  %2279 = vmatmul.mubr.f32.gmra.mxu1 %v498_v58  ;;  %v2535_v51 = vpop.f32.mrf.mxu0  ;;  %4177 = vmatmul.mubr.msk.f32.gmra.mxu0 %vm715_vm1, %v325_v0  ;;  %v509_v0 = vld [vmem:[%s8229_s0 + $0xef0] sm:$0xff] }
 0x263   :  { %v6931_v7 = vadd.f32 %v2040_v17, %v1371_v59  ;;  %v6934_v43 = vadd.f32 %v2535_v51, %v6288_v4  ;;  %2283 = vmatprep.mubr.f32.mxu1 %v504_v57  ;;  %4179 = vmatprep.mubr.msk.f32.mxu0 %vm4454_vm0, %v8269_v48  ;;  %v1376_v4 = vadd.f32 %v6812_v56, %v6159_v55  ;;  %v335_v55 = vld [vmem:[%s8229_s0 + $0x980] sm:$0xff] }
 0x264   :  { %v2042_v58 = vpop.f32.mrf.mxu1  ;;  %v4034_v15 = vpop.f32.mrf.mxu0 }
 0x265   :  { %8311 = vst [vmem:[#allocation74_spill] sm:$0xff] %v6931_v7  ;;  %v508_v58 = vld [vmem:[%s8229_s0 + $0xee8] sm:$0xff] }
 0x266   :  { %v2045_v57 = vpop.f32.mrf.mxu1  ;;  %2284 = vmatmul.mubr.f32.gmra.mxu1 %v503_v40  ;;  %v2540_v59 = vpop.f32.mrf.mxu0  ;;  %4180 = vmatmul.mubr.msk.f32.gmra.mxu0 %vm715_vm1, %v330_v14  ;;  %v514_v14 = vld [vmem:[%s8229_s0 + $0xf18] sm:$0xff] }
 0x267   :  { %v6950_v17 = vadd.f32 %v2045_v57, %v1376_v4  ;;  %v6953_v51 = vadd.f32 %v2540_v59, %v6306_v12  ;;  %2288 = vmatprep.mubr.f32.mxu1 %v509_v0  ;;  %4182 = vmatprep.mubr.msk.f32.mxu0 %vm4454_vm0, %v8269_v48  ;;  %v1381_v12 = vadd.f32 %v6812_v56, %v6177_v33  ;;  %v340_v33 = vld [vmem:[%s8229_s0 + $0x9a8] sm:$0xff] }
 0x268   :  { %v2047_v40 = vpop.f32.mrf.mxu1  ;;  %v4037_v15 = vpop.f32.mrf.mxu0 }
 0x269   :  { %8312 = vst [vmem:[#allocation75_spill] sm:$0xff] %v6950_v17  ;;  %v513_v40 = vld [vmem:[%s8229_s0 + $0xf10] sm:$0xff] }
 0x26a   :  { %v2050_v0 = vpop.f32.mrf.mxu1  ;;  %2289 = vmatmul.mubr.f32.gmra.mxu1 %v508_v58  ;;  %v2545_v4 = vpop.f32.mrf.mxu0  ;;  %4183 = vmatmul.mubr.msk.f32.gmra.mxu0 %vm715_vm1, %v335_v55  ;;  %v519_v55 = vld [vmem:[%s8229_s0 + $0xf40] sm:$0xff] }
 0x26b   :  { %v6969_v57 = vadd.f32 %v2050_v0, %v1381_v12  ;;  %v6972_v59 = vadd.f32 %v2545_v4, %v6324_v22  ;;  %2293 = vmatprep.mubr.f32.mxu1 %v514_v14  ;;  %4185 = vmatprep.mubr.msk.f32.mxu0 %vm4454_vm0, %v8269_v48  ;;  %v1386_v22 = vadd.f32 %v6812_v56, %v6195_v23  ;;  %v345_v23 = vld [vmem:[%s8229_s0 + $0x9d0] sm:$0xff] }
 0x26c   :  { %v2052_v58 = vpop.f32.mrf.mxu1  ;;  %v4040_v15 = vpop.f32.mrf.mxu0 }
 0x26d   :  { %8313 = vst [vmem:[#allocation76_spill] sm:$0xff] %v6969_v57  ;;  %v518_v58 = vld [vmem:[%s8229_s0 + $0xf38] sm:$0xff] }
 0x26e   :  { %v2055_v14 = vpop.f32.mrf.mxu1  ;;  %2294 = vmatmul.mubr.f32.gmra.mxu1 %v513_v40  ;;  %v2550_v12 = vpop.f32.mrf.mxu0  ;;  %4186 = vmatmul.mubr.msk.f32.gmra.mxu0 %vm715_vm1, %v340_v33  ;;  %v524_v33 = vld [vmem:[%s8229_s0 + $0xf68] sm:$0xff] }
 0x26f   :  { %v6988_v0 = vadd.f32 %v2055_v14, %v1386_v22  ;;  %v6991_v4 = vadd.f32 %v2550_v12, %v6342_v32  ;;  %2298 = vmatprep.mubr.f32.mxu1 %v519_v55  ;;  %4188 = vmatprep.mubr.msk.f32.mxu0 %vm4454_vm0, %v8269_v48  ;;  %v1391_v32 = vadd.f32 %v6812_v56, %v6213_v13  ;;  %v350_v13 = vld [vmem:[%s8229_s0 + $0x9f8] sm:$0xff] }
 0x270   :  { %v2057_v40 = vpop.f32.mrf.mxu1  ;;  %v4043_v15 = vpop.f32.mrf.mxu0 }
 0x271   :  { %8314 = vst [vmem:[#allocation77_spill] sm:$0xff] %v6988_v0  ;;  %v523_v40 = vld [vmem:[%s8229_s0 + $0xf60] sm:$0xff] }
 0x272   :  { %v2060_v55 = vpop.f32.mrf.mxu1  ;;  %2299 = vmatmul.mubr.f32.gmra.mxu1 %v518_v58  ;;  %v2555_v22 = vpop.f32.mrf.mxu0  ;;  %4189 = vmatmul.mubr.msk.f32.gmra.mxu0 %vm715_vm1, %v345_v23  ;;  %v529_v23 = vld [vmem:[%s8229_s0 + $0xf90] sm:$0xff] }
 0x273   :  { %v7007_v14 = vadd.f32 %v2060_v55, %v1391_v32  ;;  %v7010_v12 = vadd.f32 %v2555_v22, %v6360_v42  ;;  %2303 = vmatprep.mubr.f32.mxu1 %v524_v33  ;;  %4191 = vmatprep.mubr.msk.f32.mxu0 %vm4454_vm0, %v8269_v48  ;;  %v1396_v42 = vadd.f32 %v6812_v56, %v6231_v5  ;;  %v355_v5 = vld [vmem:[%s8229_s0 + $0xa20] sm:$0xff] }
 0x274   :  { %v2062_v58 = vpop.f32.mrf.mxu1  ;;  %v4046_v15 = vpop.f32.mrf.mxu0 }
 0x275   :  { %8315 = vst [vmem:[#allocation78_spill] sm:$0xff] %v7007_v14  ;;  %v528_v58 = vld [vmem:[%s8229_s0 + $0xf88] sm:$0xff] }
 0x276   :  { %v2065_v33 = vpop.f32.mrf.mxu1  ;;  %2304 = vmatmul.mubr.f32.gmra.mxu1 %v523_v40  ;;  %v2560_v32 = vpop.f32.mrf.mxu0  ;;  %4192 = vmatmul.mubr.msk.f32.gmra.mxu0 %vm715_vm1, %v350_v13  ;;  %v534_v13 = vld [vmem:[%s8229_s0 + $0xfb8] sm:$0xff] }
 0x277   :  { %v7026_v55 = vadd.f32 %v2065_v33, %v1396_v42  ;;  %v7029_v22 = vadd.f32 %v2560_v32, %v6378_v54  ;;  %2308 = vmatprep.mubr.f32.mxu1 %v529_v23  ;;  %4194 = vmatprep.mubr.msk.f32.mxu0 %vm4454_vm0, %v8269_v48  ;;  %v1401_v54 = vadd.f32 %v6812_v56, %v6249_v60  ;;  %v360_v60 = vld [vmem:[%s8229_s0 + $0xa48] sm:$0xff] }
 0x278   :  { %v2067_v40 = vpop.f32.mrf.mxu1  ;;  %v4049_v15 = vpop.f32.mrf.mxu0 }
 0x279   :  { %8316 = vst [vmem:[#allocation79_spill] sm:$0xff] %v7026_v55  ;;  %v533_v40 = vld [vmem:[%s8229_s0 + $0xfb0] sm:$0xff] }
 0x27a   :  { %v2070_v23 = vpop.f32.mrf.mxu1  ;;  %2309 = vmatmul.mubr.f32.gmra.mxu1 %v528_v58  ;;  %v2565_v42 = vpop.f32.mrf.mxu0  ;;  %4195 = vmatmul.mubr.msk.f32.gmra.mxu0 %vm715_vm1, %v355_v5  ;;  %v539_v5 = vld [vmem:[%s8229_s0 + $0xfe0] sm:$0xff] }
 0x27b   :  { %v7045_v33 = vadd.f32 %v2070_v23, %v1401_v54  ;;  %v7048_v32 = vadd.f32 %v2565_v42, %v6396_v1  ;;  %2313 = vmatprep.mubr.f32.mxu1 %v534_v13  ;;  %4197 = vmatprep.mubr.msk.f32.mxu0 %vm4454_vm0, %v8269_v48  ;;  %v1406_v1 = vadd.f32 %v6812_v56, %v6267_v52  ;;  %v365_v52 = vld [vmem:[%s8229_s0 + $0xa70] sm:$0xff] }
 0x27c   :  { %v2072_v58 = vpop.f32.mrf.mxu1  ;;  %v4052_v15 = vpop.f32.mrf.mxu0 }
 0x27d   :  { %8317 = vst [vmem:[#allocation80_spill] sm:$0xff] %v7045_v33  ;;  %v538_v58 = vld [vmem:[%s8229_s0 + $0xfd8] sm:$0xff] }
 0x27e   :  { %v2075_v13 = vpop.f32.mrf.mxu1  ;;  %2314 = vmatmul.mubr.f32.gmra.mxu1 %v533_v40  ;;  %v2570_v54 = vpop.f32.mrf.mxu0  ;;  %4198 = vmatmul.mubr.msk.f32.gmra.mxu0 %vm715_vm1, %v360_v60  ;;  %v544_v60 = vld [vmem:[%s8229_s0 + $0x1008] sm:$0xff] }
 0x27f   :  { %v7064_v23 = vadd.f32 %v2075_v13, %v1406_v1  ;;  %v7067_v42 = vadd.f32 %v2570_v54, %v6414_v11  ;;  %2318 = vmatprep.mubr.f32.mxu1 %v539_v5  ;;  %4200 = vmatprep.mubr.msk.f32.mxu0 %vm4454_vm0, %v8269_v48  ;;  %v8319_v11 = vld [vmem:[#allocation46_spill] sm:$0xff] }
 0x280   :  { %v2077_v40 = vpop.f32.mrf.mxu1  ;;  %v4055_v15 = vpop.f32.mrf.mxu0  ;;  %v1411_v5 = vadd.f32 %v6812_v56, %v8319_v11 }
 0x281   :  { %8318 = vst [vmem:[#allocation81_spill] sm:$0xff] %v7064_v23  ;;  %v543_v40 = vld [vmem:[%s8229_s0 + $0x1000] sm:$0xff] }
 0x282   :  { %v2080_v1 = vpop.f32.mrf.mxu1  ;;  %2319 = vmatmul.mubr.f32.gmra.mxu1 %v538_v58  ;;  %v2575_v13 = vpop.f32.mrf.mxu0  ;;  %4201 = vmatmul.mubr.msk.f32.gmra.mxu0 %vm715_vm1, %v365_v52  ;;  %v370_v58 = vld [vmem:[%s8229_s0 + $0xa98] sm:$0xff]  ;;  %v549_v52 = vld [vmem:[%s8229_s0 + $0x1030] sm:$0xff] }
 0x283   :  { %v7083_v54 = vadd.f32 %v2080_v1, %v1411_v5  ;;  %v7086_v23 = vadd.f32 %v2575_v13, %v6432_v25  ;;  %2323 = vmatprep.mubr.f32.mxu1 %v544_v60  ;;  %4203 = vmatprep.mubr.msk.f32.mxu0 %vm4454_vm0, %v8269_v48  ;;  %v8321_v25 = vld [vmem:[#allocation47_spill] sm:$0xff] }
 0x284   :  { %v2082_v15 = vpop.f32.mrf.mxu1  ;;  %v4058_v11 = vpop.f32.mrf.mxu0  ;;  %v1416_v60 = vadd.f32 %v6812_v56, %v8321_v25 }
 0x285   :  { %8320 = vst [vmem:[#allocation46_spill] sm:$0xff] %v7083_v54  ;;  %v548_v15 = vld [vmem:[%s8229_s0 + $0x1028] sm:$0xff] }
 0x286   :  { %v2085_v5 = vpop.f32.mrf.mxu1  ;;  %2324 = vmatmul.mubr.f32.gmra.mxu1 %v543_v40  ;;  %v2580_v1 = vpop.f32.mrf.mxu0  ;;  %4204 = vmatmul.mubr.msk.f32.gmra.mxu0 %vm715_vm1, %v370_v58  ;;  %v375_v40 = vld [vmem:[%s8229_s0 + $0xac0] sm:$0xff]  ;;  %v554_v58 = vld [vmem:[%s8229_s0 + $0x1058] sm:$0xff] }
 0x287   :  { %v7102_v13 = vadd.f32 %v2085_v5, %v1416_v60  ;;  %v7105_v54 = vadd.f32 %v2580_v1, %v6450_v39  ;;  %2328 = vmatprep.mubr.f32.mxu1 %v549_v52  ;;  %4206 = vmatprep.mubr.msk.f32.mxu0 %vm4454_vm0, %v8269_v48  ;;  %v8323_v39 = vld [vmem:[#allocation48_spill] sm:$0xff] }
 0x288   :  { %v2087_v11 = vpop.f32.mrf.mxu1  ;;  %v4061_v25 = vpop.f32.mrf.mxu0  ;;  %v1421_v52 = vadd.f32 %v6812_v56, %v8323_v39 }
 0x289   :  { %8322 = vst [vmem:[#allocation47_spill] sm:$0xff] %v7102_v13  ;;  %v553_v11 = vld [vmem:[%s8229_s0 + $0x1050] sm:$0xff] }
 0x28a   :  { %v2090_v60 = vpop.f32.mrf.mxu1  ;;  %2329 = vmatmul.mubr.f32.gmra.mxu1 %v548_v15  ;;  %v2585_v5 = vpop.f32.mrf.mxu0  ;;  %4207 = vmatmul.mubr.msk.f32.gmra.mxu0 %vm715_vm1, %v375_v40  ;;  %v380_v15 = vld [vmem:[%s8229_s0 + $0xae8] sm:$0xff]  ;;  %v559_v40 = vld [vmem:[%s8229_s0 + $0x1080] sm:$0xff] }
 0x28b   :  { %v7121_v1 = vadd.f32 %v2090_v60, %v1421_v52  ;;  %v7124_v13 = vadd.f32 %v2585_v5, %v6468_v53  ;;  %2333 = vmatprep.mubr.f32.mxu1 %v554_v58  ;;  %4209 = vmatprep.mubr.msk.f32.mxu0 %vm4454_vm0, %v8269_v48  ;;  %v8325_v53 = vld [vmem:[#allocation49_spill] sm:$0xff] }
 0x28c   :  { %v2092_v25 = vpop.f32.mrf.mxu1  ;;  %v4064_v39 = vpop.f32.mrf.mxu0  ;;  %v1426_v58 = vadd.f32 %v6812_v56, %v8325_v53 }
 0x28d   :  { %8324 = vst [vmem:[#allocation48_spill] sm:$0xff] %v7121_v1  ;;  %v558_v25 = vld [vmem:[%s8229_s0 + $0x1078] sm:$0xff]  ;;  %v385_v39 = vld [vmem:[%s8229_s0 + $0xb10] sm:$0xff] }
 0x28e   :  { %v2095_v52 = vpop.f32.mrf.mxu1  ;;  %2334 = vmatmul.mubr.f32.gmra.mxu1 %v553_v11  ;;  %v7139_v60 = vpop.f32.mrf.mxu0  ;;  %4210 = vmatmul.mubr.msk.f32.gmra.mxu0 %vm715_vm1, %v380_v15  ;;  %v564_v15 = vld [vmem:[%s8229_s0 + $0x10a8] sm:$0xff] }
 0x28f   :  { %v7142_v5 = vadd.f32 %v2095_v52, %v1426_v58  ;;  %2338 = vmatprep.mubr.f32.mxu1 %v559_v40  ;;  %4212 = vmatprep.mubr.msk.f32.mxu0 %vm4454_vm0, %v8269_v48  ;;  %v8327_v58 = vld [vmem:[#allocation50_spill] sm:$0xff] }
 0x290   :  { %v2097_v53 = vpop.f32.mrf.mxu1  ;;  %v4067_v11 = vpop.f32.mrf.mxu0  ;;  %v1431_v40 = vadd.f32 %v6812_v56, %v8327_v58 }
 0x291   :  { %8326 = vst [vmem:[#allocation49_spill] sm:$0xff] %v7142_v5  ;;  %v563_v53 = vld [vmem:[%s8229_s0 + $0x10a0] sm:$0xff]  ;;  %v390_v11 = vld [vmem:[%s8229_s0 + $0xb38] sm:$0xff] }
 0x292   :  { %v2100_v52 = vpop.f32.mrf.mxu1  ;;  %2339 = vmatmul.mubr.f32.gmra.mxu1 %v558_v25  ;;  %v7157_v1 = vpop.f32.mrf.mxu0  ;;  %4213 = vmatmul.mubr.msk.f32.gmra.mxu0 %vm715_vm1, %v385_v39  ;;  %v569_v39 = vld [vmem:[%s8229_s0 + $0x10d0] sm:$0xff] }
 0x293   :  { %v7160_v5 = vadd.f32 %v2100_v52, %v1431_v40  ;;  %2343 = vmatprep.mubr.f32.mxu1 %v564_v15  ;;  %4215 = vmatprep.mubr.msk.f32.mxu0 %vm4454_vm0, %v8269_v48  ;;  %v8329_v40 = vld [vmem:[#allocation51_spill] sm:$0xff] }
 0x294   :  { %v2102_v58 = vpop.f32.mrf.mxu1  ;;  %v4070_v25 = vpop.f32.mrf.mxu0  ;;  %v1436_v15 = vadd.f32 %v6812_v56, %v8329_v40 }
 0x295   :  { %8328 = vst [vmem:[#allocation50_spill] sm:$0xff] %v7160_v5  ;;  %v568_v58 = vld [vmem:[%s8229_s0 + $0x10c8] sm:$0xff]  ;;  %v395_v25 = vld [vmem:[%s8229_s0 + $0xb60] sm:$0xff] }
 0x296   :  { %v2105_v52 = vpop.f32.mrf.mxu1  ;;  %2344 = vmatmul.mubr.f32.gmra.mxu1 %v563_v53  ;;  %v7175_v5 = vpop.f32.mrf.mxu0  ;;  %4216 = vmatmul.mubr.msk.f32.gmra.mxu0 %vm715_vm1, %v390_v11  ;;  %v574_v11 = vld [vmem:[%s8229_s0 + $0x10f8] sm:$0xff] }
 0x297   :  { %v7178_v33 = vadd.f32 %v2105_v52, %v1436_v15  ;;  %2348 = vmatprep.mubr.f32.mxu1 %v569_v39  ;;  %4218 = vmatprep.mubr.msk.f32.mxu0 %vm4454_vm0, %v8269_v48  ;;  %v8331_v15 = vld [vmem:[#allocation52_spill] sm:$0xff] }
 0x298   :  { %v2107_v40 = vpop.f32.mrf.mxu1  ;;  %v4073_v53 = vpop.f32.mrf.mxu0  ;;  %v1441_v39 = vadd.f32 %v6812_v56, %v8331_v15 }
 0x299   :  { %8330 = vst [vmem:[#allocation51_spill] sm:$0xff] %v7178_v33  ;;  %v573_v40 = vld [vmem:[%s8229_s0 + $0x10f0] sm:$0xff]  ;;  %v400_v53 = vld [vmem:[%s8229_s0 + $0xb88] sm:$0xff] }
 0x29a   :  { %v2110_v52 = vpop.f32.mrf.mxu1  ;;  %2349 = vmatmul.mubr.f32.gmra.mxu1 %v568_v58  ;;  %v7193_v33 = vpop.f32.mrf.mxu0  ;;  %4219 = vmatmul.mubr.msk.f32.gmra.mxu0 %vm715_vm1, %v395_v25  ;;  %v579_v25 = vld [vmem:[%s8229_s0 + $0x1120] sm:$0xff] }
 0x29b   :  { %v7196_v55 = vadd.f32 %v2110_v52, %v1441_v39  ;;  %2353 = vmatprep.mubr.f32.mxu1 %v574_v11  ;;  %4221 = vmatprep.mubr.msk.f32.mxu0 %vm4454_vm0, %v8269_v48  ;;  %v8333_v39 = vld [vmem:[#allocation53_spill] sm:$0xff] }
 0x29c   :  { %v2112_v15 = vpop.f32.mrf.mxu1  ;;  %v4076_v58 = vpop.f32.mrf.mxu0  ;;  %v1446_v11 = vadd.f32 %v6812_v56, %v8333_v39 }
 0x29d   :  { %8332 = vst [vmem:[#allocation52_spill] sm:$0xff] %v7196_v55  ;;  %v578_v15 = vld [vmem:[%s8229_s0 + $0x1118] sm:$0xff]  ;;  %v405_v58 = vld [vmem:[%s8229_s0 + $0xbb0] sm:$0xff] }
 0x29e   :  { %v2115_v52 = vpop.f32.mrf.mxu1  ;;  %2354 = vmatmul.mubr.f32.gmra.mxu1 %v573_v40  ;;  %v7211_v55 = vpop.f32.mrf.mxu0  ;;  %4222 = vmatmul.mubr.msk.f32.gmra.mxu0 %vm715_vm1, %v400_v53  ;;  %v584_v53 = vld [vmem:[%s8229_s0 + $0x1148] sm:$0xff] }
 0x29f   :  { %v7214_v14 = vadd.f32 %v2115_v52, %v1446_v11  ;;  %2358 = vmatprep.mubr.f32.mxu1 %v579_v25  ;;  %4224 = vmatprep.mubr.msk.f32.mxu0 %vm4454_vm0, %v8269_v48  ;;  %v8335_v11 = vld [vmem:[#allocation54_spill] sm:$0xff] }
 0x2a0   :  { %v2117_v39 = vpop.f32.mrf.mxu1  ;;  %v4079_v40 = vpop.f32.mrf.mxu0  ;;  %v1451_v25 = vadd.f32 %v6812_v56, %v8335_v11 }
 0x2a1   :  { %8334 = vst [vmem:[#allocation53_spill] sm:$0xff] %v7214_v14  ;;  %v583_v39 = vld [vmem:[%s8229_s0 + $0x1140] sm:$0xff]  ;;  %v410_v40 = vld [vmem:[%s8229_s0 + $0xbd8] sm:$0xff] }
 0x2a2   :  { %v2120_v52 = vpop.f32.mrf.mxu1  ;;  %2359 = vmatmul.mubr.f32.gmra.mxu1 %v578_v15  ;;  %v7229_v14 = vpop.f32.mrf.mxu0  ;;  %4225 = vmatmul.mubr.msk.f32.gmra.mxu0 %vm715_vm1, %v405_v58  ;;  %v589_v58 = vld [vmem:[%s8229_s0 + $0x1170] sm:$0xff] }
 0x2a3   :  { %v7232_v0 = vadd.f32 %v2120_v52, %v1451_v25  ;;  %2363 = vmatprep.mubr.f32.mxu1 %v584_v53  ;;  %4227 = vmatprep.mubr.msk.f32.mxu0 %vm4454_vm0, %v8269_v48  ;;  %v8337_v25 = vld [vmem:[#allocation55_spill] sm:$0xff] }
 0x2a4   :  { %v2122_v11 = vpop.f32.mrf.mxu1  ;;  %v4082_v15 = vpop.f32.mrf.mxu0  ;;  %v1456_v53 = vadd.f32 %v6812_v56, %v8337_v25 }
 0x2a5   :  { %8336 = vst [vmem:[#allocation54_spill] sm:$0xff] %v7232_v0  ;;  %v588_v11 = vld [vmem:[%s8229_s0 + $0x1168] sm:$0xff]  ;;  %v415_v15 = vld [vmem:[%s8229_s0 + $0xc00] sm:$0xff] }
 0x2a6   :  { %v2125_v52 = vpop.f32.mrf.mxu1  ;;  %2364 = vmatmul.mubr.f32.gmra.mxu1 %v583_v39  ;;  %v7247_v0 = vpop.f32.mrf.mxu0  ;;  %4228 = vmatmul.mubr.msk.f32.gmra.mxu0 %vm715_vm1, %v410_v40  ;;  %v594_v40 = vld [vmem:[%s8229_s0 + $0x1198] sm:$0xff] }
 0x2a7   :  { %v7250_v57 = vadd.f32 %v2125_v52, %v1456_v53  ;;  %2368 = vmatprep.mubr.f32.mxu1 %v589_v58  ;;  %4230 = vmatprep.mubr.msk.f32.mxu0 %vm4454_vm0, %v8269_v48  ;;  %v8339_v53 = vld [vmem:[#allocation56_spill] sm:$0xff] }
 0x2a8   :  { %v2127_v25 = vpop.f32.mrf.mxu1  ;;  %v4085_v39 = vpop.f32.mrf.mxu0  ;;  %v1461_v58 = vadd.f32 %v6812_v56, %v8339_v53 }
 0x2a9   :  { %8338 = vst [vmem:[#allocation55_spill] sm:$0xff] %v7250_v57  ;;  %v593_v25 = vld [vmem:[%s8229_s0 + $0x1190] sm:$0xff]  ;;  %v420_v39 = vld [vmem:[%s8229_s0 + $0xc28] sm:$0xff] }
 0x2aa   :  { %v2130_v52 = vpop.f32.mrf.mxu1  ;;  %2369 = vmatmul.mubr.f32.gmra.mxu1 %v588_v11  ;;  %v7265_v57 = vpop.f32.mrf.mxu0  ;;  %4231 = vmatmul.mubr.msk.f32.gmra.mxu0 %vm715_vm1, %v415_v15  ;;  %v599_v15 = vld [vmem:[%s8229_s0 + $0x11c0] sm:$0xff] }
 0x2ab   :  { %v7268_v17 = vadd.f32 %v2130_v52, %v1461_v58  ;;  %2373 = vmatprep.mubr.f32.mxu1 %v594_v40  ;;  %4233 = vmatprep.mubr.msk.f32.mxu0 %vm4454_vm0, %v8269_v48  ;;  %v8341_v58 = vld [vmem:[#allocation57_spill] sm:$0xff] }
 0x2ac   :  { %v2132_v53 = vpop.f32.mrf.mxu1  ;;  %v4088_v11 = vpop.f32.mrf.mxu0  ;;  %v1466_v40 = vadd.f32 %v6812_v56, %v8341_v58 }
 0x2ad   :  { %8340 = vst [vmem:[#allocation56_spill] sm:$0xff] %v7268_v17  ;;  %v598_v53 = vld [vmem:[%s8229_s0 + $0x11b8] sm:$0xff]  ;;  %v425_v11 = vld [vmem:[%s8229_s0 + $0xc50] sm:$0xff] }
 0x2ae   :  { %v2135_v52 = vpop.f32.mrf.mxu1  ;;  %2374 = vmatmul.mubr.f32.gmra.mxu1 %v593_v25  ;;  %v2630_v17 = vpop.f32.mrf.mxu0  ;;  %4234 = vmatmul.mubr.msk.f32.gmra.mxu0 %vm715_vm1, %v420_v39  ;;  %v604_v25 = vld [vmem:[%s8229_s0 + $0x11e8] sm:$0xff]  ;;  %v1471_v39 = vadd.f32 %v6812_v56, %v6501_v44 }
 0x2af   :  { %v7284_v7 = vadd.f32 %v2135_v52, %v1466_v40  ;;  %2378 = vmatprep.mubr.f32.mxu1 %v599_v15  ;;  %4236 = vmatprep.mubr.msk.f32.mxu0 %vm4454_vm0, %v8269_v48 }
 0x2b0   :  { %v2137_v58 = vpop.f32.mrf.mxu1  ;;  %v4091_v21 = vpop.f32.mrf.mxu0 }
 0x2b1   :  { %8342 = vst [vmem:[#allocation57_spill] sm:$0xff] %v7284_v7  ;;  %v603_v21 = vld [vmem:[%s8229_s0 + $0x11e0] sm:$0xff]  ;;  %v430_v58 = vld [vmem:[%s8229_s0 + $0xc78] sm:$0xff] }
 0x2b2   :  { %v2140_v15 = vpop.f32.mrf.mxu1  ;;  %2379 = vmatmul.mubr.f32.gmra.mxu1 %v598_v53  ;;  %v2635_v40 = vpop.f32.mrf.mxu0  ;;  %4237 = vmatmul.mubr.msk.f32.gmra.mxu0 %vm715_vm1, %v425_v11  ;;  %v609_v53 = vld [vmem:[%s8229_s0 + $0x1210] sm:$0xff]  ;;  %v1476_v11 = vadd.f32 %v6812_v56, %v6519_v36  ;;  %v435_v36 = vld [vmem:[%s8229_s0 + $0xca0] sm:$0xff] }
 0x2b3   :  { %v7300_v52 = vadd.f32 %v2140_v15, %v1471_v39  ;;  %2383 = vmatprep.mubr.f32.mxu1 %v604_v25  ;;  %4239 = vmatprep.mubr.msk.f32.mxu0 %vm4454_vm0, %v8269_v48  ;;  %v2636_v15 = vadd.f32 %v2635_v40, %v6648_v47  ;;  %v614_v47 = vld [vmem:[%s8229_s0 + $0x1238] sm:$0xff] }
 0x2b4   :  { %v2142_v44 = vpop.f32.mrf.mxu1  ;;  %v4094_v7 = vpop.f32.mrf.mxu0 }
 0x2b5   :  { %8343 = vst [vmem:[#allocation82_spill] sm:$0xff] %v7300_v52  ;;  %v608_v7 = vld [vmem:[%s8229_s0 + $0x1208] sm:$0xff]  ;;  %v3104_v44 = vmax.f32 %v7029_v22, 0.0 }
 0x2b6   :  { %v2145_v25 = vpop.f32.mrf.mxu1  ;;  %2384 = vmatmul.mubr.f32.gmra.mxu1 %v603_v21  ;;  %v2640_v39 = vpop.f32.mrf.mxu0  ;;  %4240 = vmatmul.mubr.msk.f32.gmra.mxu0 %vm715_vm1, %v430_v58 }
 0x2b7   :  { %v7317_v52 = vadd.f32 %v2145_v25, %v1476_v11  ;;  %v2641_v41 = vadd.f32 %v2640_v39, %v6666_v10  ;;  %2388 = vmatprep.mubr.f32.mxu1 %v609_v53  ;;  %4242 = vmatprep.mubr.msk.f32.mxu0 %vm4454_vm0, %v8269_v48  ;;  %v1481_v10 = vadd.f32 %v6812_v56, %v6537_v28  ;;  %v3119_v39 = vmax.f32 %v2636_v15, 0.0  ;;  %v613_v28 = vld [vmem:[%s8229_s0 + $0x1230] sm:$0xff] }
 0x2b8   :  { %v2147_v21 = vpop.f32.mrf.mxu1  ;;  %v4097_v58 = vpop.f32.mrf.mxu0  ;;  %v2631_v53 = vadd.f32 %v2630_v17, %v6630_v62  ;;  %v440_v62 = vld [vmem:[%s8229_s0 + $0xcc8] sm:$0xff]  ;;  %v1486_v15 = vadd.f32 %v6812_v56, %v6555_v20  ;;  %v618_v20 = vld [vmem:[%s8229_s0 + $0x1258] sm:$0xff] }
 0x2b9   :  { %v3120_v40 = vmax.f32 %v2641_v41, 0.0  ;;  %v2626_v41 = vadd.f32 %v7265_v57, %v6612_v30 }
 0x2ba   :  { %v2150_v11 = vpop.f32.mrf.mxu1  ;;  %2389 = vmatmul.mubr.f32.gmra.mxu1 %v608_v7  ;;  %v2645_v25 = vpop.f32.mrf.mxu0  ;;  %4243 = vmatmul.mubr.msk.f32.gmra.mxu0 %vm715_vm1, %v435_v36  ;;  %v3103_v7 = vmax.f32 %v7010_v12, 0.0  ;;  %v2621_v36 = vadd.f32 %v7247_v0, %v6594_v63  ;;  %v3118_v30 = vmax.f32 %v2631_v53, 0.0  ;;  %v2616_v63 = vadd.f32 %v7229_v14, %v6576_v37  ;;  %v624_v37 = vld [vmem:[%s8229_s0 + $0x1288] sm:$0xff]  ;;  %v8344_v14 = vld [vmem:[#allocation62_spill] sm:$0xff] }
 0x2bb   :  { %v7336_v21 = vadd.f32 %v2150_v11, %v1481_v10  ;;  %v7339_v58 = vadd.f32 %v2645_v25, %v6684_v50  ;;  %3872 = vmatprep.subr.mxu1 %v3120_v40  ;;  %2393 = vmatprep.mubr.f32.mxu1 %v614_v47  ;;  %v619_v50 = vld [vmem:[%s8229_s0 + $0x1260] sm:$0xff]  ;;  %v3102_v10 = vmax.f32 %v6991_v4, 0.0  ;;  %v3117_v0 = vmax.f32 %v2626_v41, 0.0 }
 0x2bc   :  { %v2152_v17 = vpop.f32.mrf.mxu1  ;;  %v4100_v22 = vpop.f32.mrf.mxu0  ;;  %3873 = vmatpush3.msra.mxu1 %v3104_v44  ;;  %4245 = vmatprep.mubr.msk.f32.mxu0 %vm4454_vm0, %v8269_v48  ;;  %v1491_v4 = vadd.f32 %v6812_v56, %v6573_v6  ;;  %v3101_v11 = vmax.f32 %v6972_v59, 0.0  ;;  %v2611_v25 = vadd.f32 %v7211_v55, %v8344_v14  ;;  %v3100_v41 = vmax.f32 %v6953_v51, 0.0  ;;  %v8345_v6 = vld [vmem:[#allocation71_spill] sm:$0xff]  ;;  %v8346_v55 = vld [vmem:[#allocation61_spill] sm:$0xff] }
 0x2bd   :  { %3874 = vmatprep.subr.mxu1 %v3119_v39  ;;  %v3116_v39 = vmax.f32 %v2621_v36, 0.0  ;;  %v623_v59 = vld [vmem:[%s8229_s0 + $0x1280] sm:$0xff]  ;;  %v450_v51 = vld [vmem:[%s8229_s0 + $0xd18] sm:$0xff] }
 0x2be   :  { %v2155_v57 = vpop.f32.mrf.mxu1  ;;  %2394 = vmatmul.mubr.f32.gmra.mxu1 %v613_v28  ;;  %v2650_v47 = vpop.f32.mrf.mxu0  ;;  %4246 = vmatmul.mubr.msk.f32.gmra.mxu0 %vm715_vm1, %v440_v62 }
 0x2bf   :  { %v7361_v40 = vadd.f32 %v2155_v57, %v1486_v15  ;;  %v7364_v44 = vadd.f32 %v2650_v47, %v6702_v34  ;;  %3875 = vmatpush3.msra.mxu1 %v3103_v7  ;;  %2398 = vmatprep.mubr.f32.mxu1 %v619_v50  ;;  %v445_v34 = vld [vmem:[%s8229_s0 + $0xcf0] sm:$0xff]  ;;  %v2606_v50 = vadd.f32 %v7193_v33, %v8346_v55  ;;  %v3115_v15 = vmax.f32 %v2616_v63, 0.0 }
 0x2c0   :  { %3876 = vmatprep.subr.mxu1 %v3118_v30  ;;  %v2157_v12 = vpop.f32.mrf.mxu1  ;;  %v4103_v53 = vpop.f32.mrf.mxu0  ;;  %4248 = vmatprep.mubr.msk.f32.mxu0 %vm4454_vm0, %v8269_v48  ;;  %v8347_v30 = vld [vmem:[#allocation63_spill] sm:$0xff]  ;;  %v3099_v47 = vmax.f32 %v6934_v43, 0.0  ;;  %v629_v33 = vld [vmem:[%s8229_s0 + $0x12b0] sm:$0xff]  ;;  %v3114_v63 = vmax.f32 %v2611_v25, 0.0 }
 0x2c1   :  { %3877 = vmatpush3.msra.mxu1 %v3102_v10  ;;  %v1496_v57 = vadd.f32 %v6812_v56, %v8347_v30  ;;  %v8348_v10 = vld [vmem:[#allocation60_spill] sm:$0xff]  ;;  %v3098_v53 = vmax.f32 %v6915_v35, 0.0  ;;  %v8352_v30 = vld [vmem:[#allocation65_spill] sm:$0xff] }
 0x2c2   :  { %3878 = vmatprep.subr.mxu1 %v3117_v0  ;;  %v2160_v28 = vpop.f32.mrf.mxu1  ;;  %2399 = vmatmul.mubr.f32.gmra.mxu1 %v618_v20  ;;  %v2655_v62 = vpop.f32.mrf.mxu0  ;;  %v2601_v20 = vadd.f32 %v7175_v5, %v8348_v10  ;;  %v8349_v5 = vld [vmem:[#allocation59_spill] sm:$0xff]  ;;  %v8350_v35 = vld [vmem:[#allocation64_spill] sm:$0xff] }
 0x2c3   :  { %v7385_v17 = vadd.f32 %v2160_v28, %v1491_v4  ;;  %v7388_v22 = vadd.f32 %v2655_v62, %v8345_v6  ;;  %4249 = vmatmul.mubr.msk.f32.gmra.mxu0 %vm715_vm1, %v445_v34  ;;  %3879 = vmatpush3.msra.mxu1 %v3101_v11  ;;  %v628_v4 = vld [vmem:[%s8229_s0 + $0x12a8] sm:$0xff]  ;;  %v2596_v11 = vadd.f32 %v7157_v1, %v8349_v5  ;;  %v3097_v28 = vmax.f32 %v6896_v27, 0.0  ;;  %v634_v1 = vld [vmem:[%s8229_s0 + $0x12d8] sm:$0xff] }
 0x2c4   :  { %3880 = vmatprep.subr.mxu1 %v3116_v39  ;;  %v2162_v7 = vpop.f32.mrf.mxu1  ;;  %v4106_v36 = vpop.f32.mrf.mxu0  ;;  %2403 = vmatprep.mubr.f32.mxu1 %v624_v37  ;;  %v3113_v37 = vmax.f32 %v2606_v50, 0.0  ;;  %v1501_v39 = vadd.f32 %v6812_v56, %v8350_v35  ;;  %v8351_v62 = vld [vmem:[#allocation58_spill] sm:$0xff]  ;;  %v3112_v6 = vmax.f32 %v2601_v20, 0.0  ;;  %v3096_v50 = vmax.f32 %v6877_v19, 0.0  ;;  %v460_v19 = vld [vmem:[%s8229_s0 + $0xd68] sm:$0xff] }
 0x2c5   :  { %3881 = vmatpush3.msra.mxu1 %v3100_v41  ;;  %4251 = vmatprep.mubr.msk.f32.mxu0 %vm4454_vm0, %v8269_v48  ;;  %v2591_v41 = vadd.f32 %v7139_v60, %v8351_v62  ;;  %v633_v7 = vld [vmem:[%s8229_s0 + $0x12d0] sm:$0xff]  ;;  %v3111_v60 = vmax.f32 %v2596_v11, 0.0  ;;  %v3211_v20 = vld [vmem:[%s8231_s1 + $0x8] sm:$0xff]  ;;  %v3108_v11 = vmax.f32 %v7105_v54, 0.0  ;;  %v3106_v62 = vmax.f32 %v7067_v42, 0.0 }
 0x2c6   :  { %3882 = vmatprep.subr.mxu1 %v3115_v15  ;;  %v2165_v0 = vpop.f32.mrf.mxu1  ;;  %2404 = vmatmul.mubr.f32.gmra.mxu1 %v623_v59  ;;  %v2660_v12 = vpop.f32.mrf.mxu0  ;;  %v8354_v54 = vld [vmem:[#allocation67_spill] sm:$0xff]  ;;  %v8355_v42 = vld [vmem:[#allocation68_spill] sm:$0xff] }
 0x2c7   :  { %v7410_v34 = vadd.f32 %v2165_v0, %v1496_v57  ;;  %v7413_v43 = vadd.f32 %v2660_v12, %v6736_v9  ;;  %4252 = vmatmul.mubr.msk.f32.gmra.mxu0 %vm715_vm1, %v450_v51  ;;  %3883 = vmatpush3.msra.mxu1 %v3099_v47  ;;  %v455_v9 = vld [vmem:[%s8229_s0 + $0xd40] sm:$0xff]  ;;  %v3095_v57 = vmax.f32 %v6858_v2, 0.0  ;;  %v3110_v47 = vmax.f32 %v2591_v41, 0.0 }
 0x2c8   :  { %3884 = vmatprep.subr.mxu1 %v3114_v63  ;;  %v2167_v14 = vpop.f32.mrf.mxu1  ;;  %v4109_v25 = vpop.f32.mrf.mxu0  ;;  %2408 = vmatprep.mubr.f32.mxu1 %v629_v33  ;;  %v3094_v63 = vmax.f32 %v6839_v49, 0.0  ;;  %v3109_v2 = vmax.f32 %v7124_v13, 0.0  ;;  %v465_v49 = vld [vmem:[%s8229_s0 + $0xd90] sm:$0xff]  ;;  %v3093_v13 = vmax.f32 %v6820_v26, 0.0 }
 0x2c9   :  { %3885 = vmatpush3.msra.mxu1 %v3098_v53  ;;  %4254 = vmatprep.mubr.msk.f32.mxu0 %vm4454_vm0, %v8269_v48  ;;  %v3092_v25 = vmax.f32 %v6796_v45, 0.0  ;;  %v470_v45 = vld [vmem:[%s8229_s0 + $0xdb8] sm:$0xff] }
 0x2ca   :  { %3886 = vmatprep.subr.mxu1 %v3113_v37  ;;  %v2170_v59 = vpop.f32.mrf.mxu1  ;;  %2409 = vmatmul.mubr.f32.gmra.mxu1 %v628_v4  ;;  %v2665_v55 = vpop.f32.mrf.mxu0  ;;  %v8353_v4 = vld [vmem:[#allocation66_spill] sm:$0xff] }
 0x2cb   :  { %v7435_v15 = vadd.f32 %v2170_v59, %v1501_v39  ;;  %v7438_v27 = vadd.f32 %v2665_v55, %v6755_v18  ;;  %4255 = vmatmul.mubr.msk.f32.gmra.mxu0 %vm715_vm1, %v455_v9  ;;  %3887 = vmatpush3.msra.mxu1 %v3097_v28  ;;  %v1506_v18 = vadd.f32 %v6812_v56, %v8352_v30  ;;  %v3107_v39 = vmax.f32 %v7086_v23, 0.0 }
 0x2cc   :  { %3888 = vmatprep.subr.mxu1 %v3112_v6  ;;  %v2172_v36 = vpop.f32.mrf.mxu1  ;;  %v4112_v51 = vpop.f32.mrf.mxu0  ;;  %2413 = vmatprep.mubr.f32.mxu1 %v634_v1  ;;  %v3090_v6 = vmax.f32 %v6758_v29, 0.0  ;;  %v475_v29 = vld [vmem:[%s8229_s0 + $0xde0] sm:$0xff] }
 0x2cd   :  { %3889 = vmatpush3.msra.mxu1 %v3096_v50  ;;  %4257 = vmatprep.mubr.msk.f32.mxu0 %vm4454_vm0, %v8269_v48  ;;  %v3105_v50 = vmax.f32 %v7048_v32, 0.0  ;;  %v3210_v32 = vld [vmem:[%s8231_s1] sm:$0xff] }
 0x2ce   :  { %3890 = vmatprep.subr.mxu1 %v3111_v60  ;;  %v2175_v33 = vpop.f32.mrf.mxu1  ;;  %2414 = vmatmul.mubr.f32.gmra.mxu1 %v633_v7  ;;  %v2670_v10 = vpop.f32.mrf.mxu0 }
 0x2cf   :  { %v7456_v0 = vadd.f32 %v2175_v33, %v1506_v18  ;;  %v7459_v56 = vadd.f32 %v2670_v10, %v6774_v38  ;;  %4258 = vmatmul.mubr.msk.f32.gmra.mxu0 %vm715_vm1, %v460_v19  ;;  %3891 = vmatpush3.msra.mxu1 %v3095_v57  ;;  %v7471_v38 = vld [vmem:[%s8230_s3] ss:$0 sm:$0xff] }
 0x2d0   :  { %3892 = vmatprep.subr.mxu1 %v3110_v47  ;;  %v2177_v12 = vpop.f32.mrf.mxu1  ;;  %v4115_v53 = vpop.f32.mrf.mxu0  ;;  %4260 = vmatprep.mubr.msk.f32.mxu0 %vm4454_vm0, %v8269_v48  ;;  %v1511_v5 = vadd.f32 %v7471_v38, %v8353_v4  ;;  %v1516_v1 = vadd.f32 %v7471_v38, %v8354_v54  ;;  %v1521_v60 = vadd.f32 %v7471_v38, %v8355_v42  ;;  %v8356_v47 = vld [vmem:[#allocation69_spill] sm:$0xff] }
 0x2d1   :  { %3893 = vmatpush3.msra.mxu1 %v3094_v63  ;;  %3286 = vmatprep.mubr.f32.mxu1 %v3211_v20  ;;  %v1526_v33 = vadd.f32 %v7471_v38, %v8356_v47  ;;  %v485_v53 = vld [vmem:[%s8229_s0 + $0xe30] sm:$0xff]  ;;  %v8363_v47 = vld [vmem:[#allocation74_spill] sm:$0xff] }
 0x2d2   :  { %3894 = vmatprep.subr.mxu1 %v3109_v2  ;;  %v2180_v37 = vpop.f32.mrf.mxu1  ;;  %v2675_v14 = vpop.f32.mrf.mxu0 }
 0x2d3   :  { %v7478_v9 = vadd.f32 %v2180_v37, %v1511_v5  ;;  %v7481_v35 = vadd.f32 %v2675_v14, %v6793_v31  ;;  %4261 = vmatmul.mubr.msk.f32.gmra.mxu0 %vm715_vm1, %v465_v49  ;;  %3895 = vmatpush3.msra.mxu1 %v3093_v13  ;;  %v3091_v31 = vmax.f32 %v6777_v24, 0.0  ;;  %v8357_v49 = vld [vmem:[#allocation70_spill] sm:$0xff] }
 0x2d4   :  { %3896 = vmatprep.subr.mxu1 %v3108_v11  ;;  %v2182_v26 = vpop.f32.mrf.mxu1  ;;  %v4118_v28 = vpop.f32.mrf.mxu0  ;;  %4263 = vmatprep.mubr.msk.f32.mxu0 %vm4454_vm0, %v8269_v48  ;;  %v1531_v4 = vadd.f32 %v7471_v38, %v8357_v49 }
 0x2d5   :  { %3897 = vmatpush3.msra.mxu1 %v3092_v25  ;;  %v490_v25 = vld [vmem:[%s8229_s0 + $0xe58] sm:$0xff] }
 0x2d6   :  { %3898 = vmatprep.subr.mxu1 %v3107_v39  ;;  %v2185_v23 = vpop.f32.mrf.mxu1  ;;  %v2680_v41 = vpop.f32.mrf.mxu0  ;;  %v8358_v39 = vld [vmem:[#allocation3_spill] sm:$0xff] }
 0x2d7   :  { %v7495_v59 = vadd.f32 %v2185_v23, %v1516_v1  ;;  %v7498_v55 = vadd.f32 %v2680_v41, %v6817_v3  ;;  %4264 = vmatmul.mubr.msk.f32.gmra.mxu0 %vm715_vm1, %v470_v45  ;;  %3899 = vmatpush3.msra.mxu1 %v3091_v31  ;;  %v3089_v3 = vmax.f32 %v6739_v8, 0.0  ;;  %v480_v8 = vld [vmem:[%s8229_s0 + $0xe08] sm:$0xff]  ;;  %v1536_v26 = vadd.f32 %v7471_v38, %v8358_v39  ;;  %v495_v23 = vld [vmem:[%s8229_s0 + $0xe80] sm:$0xff]  ;;  %v510_v39 = vld [vmem:[%s8229_s0 + $0xef8] sm:$0xff] }
 0x2d8   :  { %3900 = vmatprep.subr.mxu1 %v3106_v62  ;;  %v2187_v24 = vpop.f32.mrf.mxu1  ;;  %v4121_v7 = vpop.f32.mrf.mxu0  ;;  %4266 = vmatprep.mubr.msk.f32.mxu0 %vm4454_vm0, %v8269_v48  ;;  %v8360_v41 = vld [vmem:[#allocation4_spill] sm:$0xff] }
 0x2d9   :  { %3901 = vmatpush3.msra.mxu1 %v3090_v6  ;;  %v1541_v6 = vadd.f32 %v7471_v38, %v8360_v41 }
 0x2da   :  { %3902 = vmatprep.subr.mxu1 %v3105_v50  ;;  %v2190_v36 = vpop.f32.mrf.mxu1  ;;  %v2685_v51 = vpop.f32.mrf.mxu0 }
 0x2db   :  { %v7513_v19 = vadd.f32 %v2190_v36, %v1521_v60  ;;  %v7516_v30 = vadd.f32 %v2685_v51, %v6836_v46  ;;  %4267 = vmatmul.mubr.msk.f32.gmra.mxu0 %vm715_vm1, %v475_v29  ;;  %3903 = vmatpush3.msra.mxu1 %v3089_v3  ;;  %v8361_v29 = vld [vmem:[#allocation73_spill] sm:$0xff] }
 0x2dc   :  { %v2192_v18 = vpop.f32.mrf.mxu1  ;;  %v4124_v57 = vpop.f32.mrf.mxu0  ;;  %4269 = vmatprep.mubr.msk.f32.mxu0 %vm4454_vm0, %v8269_v48  ;;  %3287 = vmatmul.mubr.f32.vlgmr.msra.gmra.mxu1 %v3210_v32  ;;  %v500_v32 = vld [vmem:[%s8229_s0 + $0xea8] sm:$0xff]  ;;  %v8362_v36 = vld [vmem:[#allocation5_spill] sm:$0xff] }
 0x2dd   :  { %v1546_v51 = vadd.f32 %v7471_v38, %v8362_v36  ;;  %v8372_v36 = vld [vmem:[#allocation77_spill] sm:$0xff] }
 0x2de   :  { %v2195_v10 = vpop.f32.mrf.mxu1  ;;  %v2690_v20 = vpop.f32.mrf.mxu0 }
 0x2df   :  { %v7526_v46 = vadd.f32 %v2195_v10, %v1526_v33  ;;  %v7529_v63 = vadd.f32 %v2690_v20, %v6855_v16  ;;  %4270 = vmatmul.mubr.msk.f32.gmra.mxu0 %vm715_vm1, %v480_v8 }
 0x2e0   :  { %v2197_v2 = vpop.f32.mrf.mxu1  ;;  %v4127_v12 = vpop.f32.mrf.mxu0  ;;  %4272 = vmatprep.mubr.msk.f32.mxu0 %vm4454_vm0, %v8269_v48 }
 0x2e1   :  { %v505_v2 = vld [vmem:[%s8229_s0 + $0xed0] sm:$0xff]  ;;  %v8364_v12 = vld [vmem:[#allocation6_spill] sm:$0xff] }
 0x2e2   :  { %v2200_v5 = vpop.f32.mrf.mxu1  ;;  %v2695_v13 = vpop.f32.mrf.mxu0 }
 0x2e3   :  { %v7539_v11 = vadd.f32 %v2200_v5, %v1531_v4  ;;  %v7542_v16 = vadd.f32 %v2695_v13, %v6874_v61  ;;  %4273 = vmatmul.mubr.msk.f32.gmra.mxu0 %vm715_vm1, %v485_v53  ;;  %v8359_v61 = vld [vmem:[#allocation72_spill] sm:$0xff]  ;;  %v1551_v53 = vadd.f32 %v7471_v38, %v8364_v12  ;;  %v8366_v13 = vld [vmem:[#allocation75_spill] sm:$0xff] }
 0x2e4   :  { %v2202_v37 = vpop.f32.mrf.mxu1  ;;  %v4130_v14 = vpop.f32.mrf.mxu0  ;;  %4275 = vmatprep.mubr.msk.f32.mxu0 %vm4454_vm0, %v8269_v48 }
 0x2e6   :  { %v2205_v28 = vpop.f32.mrf.mxu1  ;;  %v2700_v45 = vpop.f32.mrf.mxu0 }
 0x2e7   :  { %v7552_v54 = vadd.f32 %v2205_v28, %v1536_v26  ;;  %v7555_v1 = vadd.f32 %v2700_v45, %v8359_v61  ;;  %4276 = vmatmul.mubr.msk.f32.gmra.mxu0 %vm715_vm1, %v490_v25  ;;  %v8367_v26 = vld [vmem:[#allocation7_spill] sm:$0xff] }
 0x2e8   :  { %v2207_v31 = vpop.f32.mrf.mxu1  ;;  %v4133_v62 = vpop.f32.mrf.mxu0  ;;  %4278 = vmatprep.mubr.msk.f32.mxu0 %vm4454_vm0, %v8269_v48  ;;  %v1556_v28 = vadd.f32 %v7471_v38, %v8367_v26 }
 0x2e9   :  { %v8369_v62 = vld [vmem:[#allocation76_spill] sm:$0xff] }
 0x2ea   :  { %v2210_v50 = vpop.f32.mrf.mxu1  ;;  %v2705_v24 = vpop.f32.mrf.mxu0 }
 0x2eb   :  { %v7565_v7 = vadd.f32 %v2210_v50, %v1541_v6  ;;  %v7568_v42 = vadd.f32 %v2705_v24, %v8361_v29  ;;  %4279 = vmatmul.mubr.msk.f32.gmra.mxu0 %vm715_vm1, %v495_v23  ;;  %v515_v50 = vld [vmem:[%s8229_s0 + $0xf20] sm:$0xff]  ;;  %v8370_v24 = vld [vmem:[#allocation8_spill] sm:$0xff] }
 0x2ec   :  { %v2212_v60 = vpop.f32.mrf.mxu1  ;;  %v4136_v3 = vpop.f32.mrf.mxu0  ;;  %4281 = vmatprep.mubr.msk.f32.mxu0 %vm4454_vm0, %v8269_v48  ;;  %v1561_v29 = vadd.f32 %v7471_v38, %v8370_v24  ;;  %v530_v24 = vld [vmem:[%s8229_s0 + $0xf98] sm:$0xff] }
 0x2ee   :  { %v2215_v18 = vpop.f32.mrf.mxu1  ;;  %v2710_v57 = vpop.f32.mrf.mxu0 }
 0x2ef   :  { %v7578_v8 = vadd.f32 %v2215_v18, %v1546_v51  ;;  %v7581_v33 = vadd.f32 %v2710_v57, %v8363_v47  ;;  %4282 = vmatmul.mubr.msk.f32.gmra.mxu0 %vm715_vm1, %v500_v32  ;;  %v520_v47 = vld [vmem:[%s8229_s0 + $0xf48] sm:$0xff] }
 0x2f0   :  { %v2217_v10 = vpop.f32.mrf.mxu1  ;;  %v4139_v20 = vpop.f32.mrf.mxu0  ;;  %4284 = vmatprep.mubr.msk.f32.mxu0 %vm4454_vm0, %v8269_v48 }
 0x2f1   :  { %v8373_v10 = vld [vmem:[#allocation9_spill] sm:$0xff] }
 0x2f2   :  { %v2220_v49 = vpop.f32.mrf.mxu1  ;;  %v2715_v4 = vpop.f32.mrf.mxu0  ;;  %v1566_v20 = vadd.f32 %v7471_v38, %v8373_v10 }
 0x2f3   :  { %v7591_v5 = vadd.f32 %v2220_v49, %v1551_v53  ;;  %v7594_v37 = vadd.f32 %v2715_v4, %v8366_v13  ;;  %4285 = vmatmul.mubr.msk.f32.gmra.mxu0 %vm715_vm1, %v505_v2  ;;  %v8375_v49 = vld [vmem:[#allocation78_spill] sm:$0xff] }
 0x2f4   :  { %v2222_v14 = vpop.f32.mrf.mxu1  ;;  %v4142_v25 = vpop.f32.mrf.mxu0  ;;  %4287 = vmatprep.mubr.msk.f32.mxu0 %vm4454_vm0, %v8269_v48 }
 0x2f5   :  { %8365 = vst [vmem:[#allocation62_spill] sm:$0xff] %v7591_v5  ;;  %v525_v25 = vld [vmem:[%s8229_s0 + $0xf70] sm:$0xff] }
 0x2f6   :  { %v2225_v45 = vpop.f32.mrf.mxu1  ;;  %v2720_v61 = vpop.f32.mrf.mxu0 }
 0x2f7   :  { %v7604_v31 = vadd.f32 %v2225_v45, %v1556_v28  ;;  %v7607_v23 = vadd.f32 %v2720_v61, %v8369_v62  ;;  %4288 = vmatmul.mubr.msk.f32.gmra.mxu0 %vm715_vm1, %v510_v39  ;;  %v8376_v39 = vld [vmem:[#allocation10_spill] sm:$0xff]  ;;  %v8378_v62 = vld [vmem:[#allocation79_spill] sm:$0xff] }
 0x2f8   :  { %v2227_v41 = vpop.f32.mrf.mxu1  ;;  %v4145_v6 = vpop.f32.mrf.mxu0  ;;  %4290 = vmatprep.mubr.msk.f32.mxu0 %vm4454_vm0, %v8269_v48  ;;  %v1571_v26 = vadd.f32 %v7471_v38, %v8376_v39  ;;  %v8384_v39 = vld [vmem:[#allocation81_spill] sm:$0xff] }
 0x2f9   :  { %8368 = vst [vmem:[#allocation71_spill] sm:$0xff] %v7604_v31  ;;  %v8410_v31 = vld [vmem:[#allocation54_spill] sm:$0xff] }
 0x2fa   :  { %v2230_v60 = vpop.f32.mrf.mxu1  ;;  %v2725_v3 = vpop.f32.mrf.mxu0 }
 0x2fb   :  { %v7617_v32 = vadd.f32 %v2230_v60, %v1561_v29  ;;  %v7620_v51 = vadd.f32 %v2725_v3, %v8372_v36  ;;  %4291 = vmatmul.mubr.msk.f32.gmra.mxu0 %vm715_vm1, %v515_v50  ;;  %v8379_v29 = vld [vmem:[#allocation11_spill] sm:$0xff] }
 0x2fc   :  { %v2232_v18 = vpop.f32.mrf.mxu1  ;;  %v4148_v57 = vpop.f32.mrf.mxu0  ;;  %4293 = vmatprep.mubr.msk.f32.mxu0 %vm4454_vm0, %v8269_v48  ;;  %v1576_v60 = vadd.f32 %v7471_v38, %v8379_v29 }
 0x2fd   :  { %8371 = vst [vmem:[#allocation61_spill] sm:$0xff] %v7617_v32  ;;  %v8381_v57 = vld [vmem:[#allocation80_spill] sm:$0xff] }
 0x2fe   :  { %v2235_v2 = vpop.f32.mrf.mxu1  ;;  %v2730_v12 = vpop.f32.mrf.mxu0 }
 0x2ff   :  { %v7630_v53 = vadd.f32 %v2235_v2, %v1566_v20  ;;  %v7633_v4 = vadd.f32 %v2730_v12, %v8375_v49  ;;  %4294 = vmatmul.mubr.msk.f32.gmra.mxu0 %vm715_vm1, %v520_v47  ;;  %v535_v2 = vld [vmem:[%s8229_s0 + $0xfc0] sm:$0xff]  ;;  %v8382_v12 = vld [vmem:[#allocation12_spill] sm:$0xff] }
 0x300   :  { %v2237_v13 = vpop.f32.mrf.mxu1  ;;  %v4151_v14 = vpop.f32.mrf.mxu0  ;;  %4296 = vmatprep.mubr.msk.f32.mxu0 %vm4454_vm0, %v8269_v48  ;;  %v1581_v49 = vadd.f32 %v7471_v38, %v8382_v12 }
 0x301   :  { %8374 = vst [vmem:[#allocation63_spill] sm:$0xff] %v7630_v53 }
 0x302   :  { %v2240_v28 = vpop.f32.mrf.mxu1  ;;  %v2735_v45 = vpop.f32.mrf.mxu0 }
 0x303   :  { %v7643_v61 = vadd.f32 %v2240_v28, %v1571_v26  ;;  %v7646_v41 = vadd.f32 %v2735_v45, %v8378_v62  ;;  %4297 = vmatmul.mubr.msk.f32.gmra.mxu0 %vm715_vm1, %v525_v25  ;;  %v540_v62 = vld [vmem:[%s8229_s0 + $0xfe8] sm:$0xff] }
 0x304   :  { %v2242_v6 = vpop.f32.mrf.mxu1  ;;  %v4154_v50 = vpop.f32.mrf.mxu0  ;;  %4299 = vmatprep.mubr.msk.f32.mxu0 %vm4454_vm0, %v8269_v48 }
 0x305   :  { %8377 = vst [vmem:[#allocation60_spill] sm:$0xff] %v7643_v61  ;;  %v8385_v6 = vld [vmem:[#allocation13_spill] sm:$0xff] }
 0x306   :  { %v2245_v3 = vpop.f32.mrf.mxu1  ;;  %v2740_v36 = vpop.f32.mrf.mxu0  ;;  %v1586_v50 = vadd.f32 %v7471_v38, %v8385_v6 }
 0x307   :  { %v7656_v18 = vadd.f32 %v2245_v3, %v1576_v60  ;;  %v7659_v47 = vadd.f32 %v2740_v36, %v8381_v57  ;;  %4300 = vmatmul.mubr.msk.f32.gmra.mxu0 %vm715_vm1, %v530_v24  ;;  %v545_v57 = vld [vmem:[%s8229_s0 + $0x1010] sm:$0xff] }
 0x308   :  { %v2247_v10 = vpop.f32.mrf.mxu1  ;;  %v4157_v20 = vpop.f32.mrf.mxu0  ;;  %4302 = vmatprep.mubr.msk.f32.mxu0 %vm4454_vm0, %v8269_v48 }
 0x309   :  { %8380 = vst [vmem:[#allocation59_spill] sm:$0xff] %v7656_v18  ;;  %v8387_v10 = vld [vmem:[#allocation14_spill] sm:$0xff] }
 0x30a   :  { %v2250_v13 = vpop.f32.mrf.mxu1  ;;  %v2745_v14 = vpop.f32.mrf.mxu0  ;;  %v1591_v20 = vadd.f32 %v7471_v38, %v8387_v10 }
 0x30b   :  { %v7669_v25 = vadd.f32 %v2250_v13, %v1581_v49  ;;  %v7672_v26 = vadd.f32 %v2745_v14, %v8384_v39  ;;  %4303 = vmatmul.mubr.msk.f32.gmra.mxu0 %vm715_vm1, %v535_v2  ;;  %v550_v39 = vld [vmem:[%s8229_s0 + $0x1038] sm:$0xff] }
 0x30c   :  { %v2252_v28 = vpop.f32.mrf.mxu1  ;;  %v4160_v45 = vpop.f32.mrf.mxu0  ;;  %4305 = vmatprep.mubr.msk.f32.mxu0 %vm4454_vm0, %v8269_v48 }
 0x30d   :  { %8383 = vst [vmem:[#allocation64_spill] sm:$0xff] %v7669_v25  ;;  %v8389_v28 = vld [vmem:[#allocation15_spill] sm:$0xff] }
 0x30e   :  { %v2255_v24 = vpop.f32.mrf.mxu1  ;;  %v7682_v29 = vpop.f32.mrf.mxu0  ;;  %v1596_v45 = vadd.f32 %v7471_v38, %v8389_v28  ;;  %v560_v28 = vld [vmem:[%s8229_s0 + $0x1088] sm:$0xff] }
 0x30f   :  { %v7684_v60 = vadd.f32 %v2255_v24, %v1586_v50  ;;  %4306 = vmatmul.mubr.msk.f32.gmra.mxu0 %vm715_vm1, %v540_v62 }
 0x310   :  { %v2257_v3 = vpop.f32.mrf.mxu1  ;;  %v4163_v36 = vpop.f32.mrf.mxu0  ;;  %4308 = vmatprep.mubr.msk.f32.mxu0 %vm4454_vm0, %v8269_v48 }
 0x311   :  { %8386 = vst [vmem:[#allocation58_spill] sm:$0xff] %v7684_v60  ;;  %v555_v36 = vld [vmem:[%s8229_s0 + $0x1060] sm:$0xff] }
 0x312   :  { %v2260_v2 = vpop.f32.mrf.mxu1  ;;  %v7694_v12 = vpop.f32.mrf.mxu0 }
 0x313   :  { %v7696_v49 = vadd.f32 %v2260_v2, %v1591_v20  ;;  %4309 = vmatmul.mubr.msk.f32.gmra.mxu0 %vm715_vm1, %v545_v57  ;;  %v8391_v57 = vld [vmem:[#allocation16_spill] sm:$0xff] }
 0x314   :  { %v2262_v13 = vpop.f32.mrf.mxu1  ;;  %v4166_v14 = vpop.f32.mrf.mxu0  ;;  %4311 = vmatprep.mubr.msk.f32.mxu0 %vm4454_vm0, %v8269_v48  ;;  %v1601_v10 = vadd.f32 %v7471_v38, %v8391_v57 }
 0x315   :  { %8388 = vst [vmem:[#allocation65_spill] sm:$0xff] %v7696_v49 }
 0x316   :  { %v2265_v62 = vpop.f32.mrf.mxu1  ;;  %v7706_v6 = vpop.f32.mrf.mxu0 }
 0x317   :  { %v7708_v50 = vadd.f32 %v2265_v62, %v1596_v45  ;;  %4312 = vmatmul.mubr.msk.f32.gmra.mxu0 %vm715_vm1, %v550_v39  ;;  %v8393_v45 = vld [vmem:[#allocation17_spill] sm:$0xff] }
 0x318   :  { %v2267_v24 = vpop.f32.mrf.mxu1  ;;  %v4169_v3 = vpop.f32.mrf.mxu0  ;;  %4314 = vmatprep.mubr.msk.f32.mxu0 %vm4454_vm0, %v8269_v48  ;;  %v1606_v62 = vadd.f32 %v7471_v38, %v8393_v45 }
 0x319   :  { %8390 = vst [vmem:[#allocation66_spill] sm:$0xff] %v7708_v50 }
 0x31a   :  { %v2270_v20 = vpop.f32.mrf.mxu1  ;;  %v7718_v2 = vpop.f32.mrf.mxu0 }
 0x31b   :  { %v7720_v13 = vadd.f32 %v2270_v20, %v1601_v10  ;;  %4315 = vmatmul.mubr.msk.f32.gmra.mxu0 %vm715_vm1, %v555_v36  ;;  %v565_v20 = vld [vmem:[%s8229_s0 + $0x10b0] sm:$0xff] }
 0x31c   :  { %v2272_v14 = vpop.f32.mrf.mxu1  ;;  %v4172_v39 = vpop.f32.mrf.mxu0  ;;  %4317 = vmatprep.mubr.msk.f32.mxu0 %vm4454_vm0, %v8269_v48 }
 0x31d   :  { %8392 = vst [vmem:[#allocation67_spill] sm:$0xff] %v7720_v13  ;;  %v8395_v14 = vld [vmem:[#allocation18_spill] sm:$0xff] }
 0x31e   :  { %v2275_v24 = vpop.f32.mrf.mxu1  ;;  %v7730_v3 = vpop.f32.mrf.mxu0  ;;  %v1611_v39 = vadd.f32 %v7471_v38, %v8395_v14 }
 0x31f   :  { %v7732_v57 = vadd.f32 %v2275_v24, %v1606_v62  ;;  %4318 = vmatmul.mubr.msk.f32.gmra.mxu0 %vm715_vm1, %v560_v28  ;;  %v570_v24 = vld [vmem:[%s8229_s0 + $0x10d8] sm:$0xff] }
 0x320   :  { %v2277_v36 = vpop.f32.mrf.mxu1  ;;  %v4175_v10 = vpop.f32.mrf.mxu0  ;;  %4320 = vmatprep.mubr.msk.f32.mxu0 %vm4454_vm0, %v8269_v48 }
 0x321   :  { %8394 = vst [vmem:[#allocation68_spill] sm:$0xff] %v7732_v57  ;;  %v8397_v36 = vld [vmem:[#allocation19_spill] sm:$0xff] }
 0x322   :  { %v2280_v45 = vpop.f32.mrf.mxu1  ;;  %v7742_v61 = vpop.f32.mrf.mxu0  ;;  %v1616_v10 = vadd.f32 %v7471_v38, %v8397_v36 }
 0x323   :  { %v7744_v18 = vadd.f32 %v2280_v45, %v1611_v39  ;;  %4321 = vmatmul.mubr.msk.f32.gmra.mxu0 %vm715_vm1, %v565_v20  ;;  %v575_v45 = vld [vmem:[%s8229_s0 + $0x1100] sm:$0xff] }
 0x324   :  { %v2282_v28 = vpop.f32.mrf.mxu1  ;;  %v4178_v62 = vpop.f32.mrf.mxu0  ;;  %4323 = vmatprep.mubr.msk.f32.mxu0 %vm4454_vm0, %v8269_v48 }
 0x325   :  { %8396 = vst [vmem:[#allocation69_spill] sm:$0xff] %v7744_v18  ;;  %v8399_v28 = vld [vmem:[#allocation20_spill] sm:$0xff] }
 0x326   :  { %v2285_v14 = vpop.f32.mrf.mxu1  ;;  %v7754_v25 = vpop.f32.mrf.mxu0  ;;  %v1621_v62 = vadd.f32 %v7471_v38, %v8399_v28 }
 0x327   :  { %v7756_v60 = vadd.f32 %v2285_v14, %v1616_v10  ;;  %4324 = vmatmul.mubr.msk.f32.gmra.mxu0 %vm715_vm1, %v570_v24  ;;  %v580_v14 = vld [vmem:[%s8229_s0 + $0x1128] sm:$0xff] }
 0x328   :  { %v2287_v20 = vpop.f32.mrf.mxu1  ;;  %v4181_v39 = vpop.f32.mrf.mxu0  ;;  %4326 = vmatprep.mubr.msk.f32.mxu0 %vm4454_vm0, %v8269_v48 }
 0x329   :  { %8398 = vst [vmem:[#allocation70_spill] sm:$0xff] %v7756_v60  ;;  %v8401_v20 = vld [vmem:[#allocation21_spill] sm:$0xff]  ;;  %v8406_v60 = vld [vmem:[#allocation55_spill] sm:$0xff] }
 0x32a   :  { %v2290_v36 = vpop.f32.mrf.mxu1  ;;  %v2785_v49 = vpop.f32.mrf.mxu0  ;;  %v1626_v39 = vadd.f32 %v7471_v38, %v8401_v20 }
 0x32b   :  { %v7766_v50 = vadd.f32 %v2290_v36, %v1621_v62  ;;  %4327 = vmatmul.mubr.msk.f32.gmra.mxu0 %vm715_vm1, %v575_v45  ;;  %v585_v36 = vld [vmem:[%s8229_s0 + $0x1150] sm:$0xff] }
 0x32c   :  { %v2292_v10 = vpop.f32.mrf.mxu1  ;;  %v4184_v24 = vpop.f32.mrf.mxu0  ;;  %4329 = vmatprep.mubr.msk.f32.mxu0 %vm4454_vm0, %v8269_v48 }
 0x32d   :  { %8400 = vst [vmem:[#allocation3_spill] sm:$0xff] %v7766_v50  ;;  %v8403_v10 = vld [vmem:[#allocation22_spill] sm:$0xff] }
 0x32e   :  { %v2295_v13 = vpop.f32.mrf.mxu1  ;;  %v2790_v28 = vpop.f32.mrf.mxu0  ;;  %v1631_v24 = vadd.f32 %v7471_v38, %v8403_v10 }
 0x32f   :  { %v7776_v57 = vadd.f32 %v2295_v13, %v1626_v39  ;;  %4330 = vmatmul.mubr.msk.f32.gmra.mxu0 %vm715_vm1, %v580_v14  ;;  %v590_v39 = vld [vmem:[%s8229_s0 + $0x1178] sm:$0xff] }
 0x330   :  { %v2297_v62 = vpop.f32.mrf.mxu1  ;;  %v4187_v45 = vpop.f32.mrf.mxu0  ;;  %4332 = vmatprep.mubr.msk.f32.mxu0 %vm4454_vm0, %v8269_v48 }
 0x331   :  { %8402 = vst [vmem:[#allocation72_spill] sm:$0xff] %v7776_v57  ;;  %v8405_v62 = vld [vmem:[#allocation23_spill] sm:$0xff] }
 0x332   :  { %v2300_v18 = vpop.f32.mrf.mxu1  ;;  %v2795_v20 = vpop.f32.mrf.mxu0  ;;  %v1636_v45 = vadd.f32 %v7471_v38, %v8405_v62  ;;  %v8409_v62 = vld [vmem:[#allocation24_spill] sm:$0xff] }
 0x333   :  { %v7786_v50 = vadd.f32 %v2300_v18, %v1631_v24  ;;  %4333 = vmatmul.mubr.msk.f32.gmra.mxu0 %vm715_vm1, %v585_v36  ;;  %v2796_v53 = vadd.f32 %v2795_v20, %v8406_v60  ;;  %v8408_v24 = vld [vmem:[#allocation56_spill] sm:$0xff]  ;;  %v1641_v32 = vadd.f32 %v7471_v38, %v8409_v62  ;;  %v2791_v60 = vadd.f32 %v2790_v28, %v8410_v31  ;;  %v3213_v31 = vld [vmem:[%s8231_s1 + $0x18] sm:$0xff] }
 0x334   :  { %v2302_v13 = vpop.f32.mrf.mxu1  ;;  %v4190_v14 = vpop.f32.mrf.mxu0  ;;  %4335 = vmatprep.mubr.msk.f32.mxu0 %vm4454_vm0, %v8269_v48  ;;  %v3136_v20 = vmax.f32 %v7607_v23, 0.0  ;;  %v3135_v28 = vmax.f32 %v7594_v37, 0.0  ;;  %3356 = vmatprep.mubr.f32.mxu1 %v3213_v31  ;;  %v3134_v37 = vmax.f32 %v7581_v33, 0.0  ;;  %v605_v33 = vld [vmem:[%s8229_s0 + $0x11f0] sm:$0xff]  ;;  %v8419_v31 = vld [vmem:[#allocation50_spill] sm:$0xff] }
 0x335   :  { %8404 = vst [vmem:[#allocation4_spill] sm:$0xff] %v7786_v50  ;;  %v595_v50 = vld [vmem:[%s8229_s0 + $0x11a0] sm:$0xff]  ;;  %v3150_v62 = vmax.f32 %v2791_v60, 0.0 }
 0x336   :  { %v2305_v57 = vpop.f32.mrf.mxu1  ;;  %v2800_v10 = vpop.f32.mrf.mxu0 }
 0x337   :  { %v7797_v18 = vadd.f32 %v2305_v57, %v1636_v45  ;;  %v2801_v36 = vadd.f32 %v2800_v10, %v8408_v24  ;;  %4336 = vmatmul.mubr.msk.f32.gmra.mxu0 %vm715_vm1, %v590_v39  ;;  %v8411_v39 = vld [vmem:[#allocation53_spill] sm:$0xff] }
 0x338   :  { %v2307_v13 = vpop.f32.mrf.mxu1  ;;  %v4193_v14 = vpop.f32.mrf.mxu0  ;;  %4338 = vmatprep.mubr.msk.f32.mxu0 %vm4454_vm0, %v8269_v48  ;;  %v2786_v24 = vadd.f32 %v2785_v49, %v8411_v39 }
 0x339   :  { %8407 = vst [vmem:[#allocation73_spill] sm:$0xff] %v7797_v18  ;;  %v3152_v57 = vmax.f32 %v2801_v36, 0.0  ;;  %v3151_v13 = vmax.f32 %v2796_v53, 0.0  ;;  %v8412_v18 = vld [vmem:[#allocation57_spill] sm:$0xff] }
 0x33a   :  { %v2310_v45 = vpop.f32.mrf.mxu1  ;;  %v2805_v10 = vpop.f32.mrf.mxu0  ;;  %v8414_v53 = vld [vmem:[#allocation25_spill] sm:$0xff]  ;;  %v3149_v39 = vmax.f32 %v2786_v24, 0.0 }
 0x33b   :  { %v7811_v14 = vadd.f32 %v2310_v45, %v1641_v32  ;;  %v7814_v5 = vadd.f32 %v2805_v10, %v8412_v18  ;;  %4339 = vmatmul.mubr.msk.f32.gmra.mxu0 %vm715_vm1, %v595_v50  ;;  %3907 = vmatprep.subr.mxu1 %v3152_v57  ;;  %v600_v32 = vld [vmem:[%s8229_s0 + $0x11c8] sm:$0xff]  ;;  %v1646_v49 = vadd.f32 %v7471_v38, %v8414_v53 }
 0x33c   :  { %v2312_v23 = vpop.f32.mrf.mxu1  ;;  %v4196_v36 = vpop.f32.mrf.mxu0  ;;  %3908 = vmatpush3.msra.mxu1 %v3136_v20  ;;  %4341 = vmatprep.mubr.msk.f32.mxu0 %vm4454_vm0, %v8269_v48  ;;  %v8415_v50 = vld [vmem:[#allocation52_spill] sm:$0xff]  ;;  %v8416_v45 = vld [vmem:[#allocation51_spill] sm:$0xff] }
 0x33d   :  { %8413 = vst [vmem:[#allocation5_spill] sm:$0xff] %v7814_v5  ;;  %v2781_v18 = vadd.f32 %v7754_v25, %v8415_v50  ;;  %3909 = vmatprep.subr.mxu1 %v3151_v13  ;;  %v2776_v10 = vadd.f32 %v7742_v61, %v8416_v45  ;;  %v8417_v36 = vld [vmem:[#allocation82_spill] sm:$0xff]  ;;  %v3133_v25 = vmax.f32 %v7568_v42, 0.0  ;;  %v3132_v42 = vmax.f32 %v7555_v1, 0.0  ;;  %v8420_v50 = vld [vmem:[#allocation49_spill] sm:$0xff] }
 0x33e   :  { %v2315_v57 = vpop.f32.mrf.mxu1  ;;  %v2810_v20 = vpop.f32.mrf.mxu0  ;;  %3910 = vmatpush3.msra.mxu1 %v3135_v28  ;;  %v8418_v61 = vld [vmem:[#allocation26_spill] sm:$0xff]  ;;  %v2771_v28 = vadd.f32 %v7730_v3, %v8419_v31  ;;  %v3131_v3 = vmax.f32 %v7542_v16, 0.0  ;;  %v3130_v16 = vmax.f32 %v7529_v63, 0.0 }
 0x33f   :  { %v7833_v23 = vadd.f32 %v2315_v57, %v1646_v49  ;;  %v7836_v5 = vadd.f32 %v2810_v20, %v8417_v36  ;;  %4342 = vmatmul.mubr.msk.f32.gmra.mxu0 %vm715_vm1, %v600_v32  ;;  %3911 = vmatprep.subr.mxu1 %v3150_v62  ;;  %v1651_v24 = vadd.f32 %v7471_v38, %v8418_v61  ;;  %v3148_v32 = vmax.f32 %v2781_v18, 0.0  ;;  %v610_v1 = vld [vmem:[%s8229_s0 + $0x1218] sm:$0xff]  ;;  %v615_v63 = vld [vmem:[%s8229_s0 + $0x1240] sm:$0xff] }
 0x340   :  { %v2317_v60 = vpop.f32.mrf.mxu1  ;;  %v4199_v13 = vpop.f32.mrf.mxu0  ;;  %3912 = vmatpush3.msra.mxu1 %v3134_v37  ;;  %4344 = vmatprep.mubr.msk.f32.mxu0 %vm4454_vm0, %v8269_v48  ;;  %v2766_v62 = vadd.f32 %v7718_v2, %v8420_v50  ;;  %v3147_v37 = vmax.f32 %v2776_v10, 0.0  ;;  %v8421_v2 = vld [vmem:[#allocation27_spill] sm:$0xff]  ;;  %v3146_v36 = vmax.f32 %v2771_v28, 0.0 }
 0x341   :  { %3913 = vmatprep.subr.mxu1 %v3149_v39  ;;  %v1656_v10 = vadd.f32 %v7471_v38, %v8421_v2  ;;  %v8423_v13 = vld [vmem:[#allocation47_spill] sm:$0xff]  ;;  %v8426_v2 = vld [vmem:[#allocation29_spill] sm:$0xff] }
 0x342   :  { %v2320_v53 = vpop.f32.mrf.mxu1  ;;  %v2815_v49 = vpop.f32.mrf.mxu0  ;;  %3914 = vmatpush3.msra.mxu1 %v3133_v25  ;;  %v3145_v61 = vmax.f32 %v2766_v62, 0.0 }
 0x343   :  { %v7852_v57 = vadd.f32 %v2320_v53, %v1651_v24  ;;  %v7855_v20 = vadd.f32 %v2815_v49, %v7317_v52  ;;  %4345 = vmatmul.mubr.msk.f32.gmra.mxu0 %vm715_vm1, %v605_v33  ;;  %3915 = vmatprep.subr.mxu1 %v3148_v32  ;;  %v8422_v52 = vld [vmem:[#allocation48_spill] sm:$0xff]  ;;  %v2756_v33 = vadd.f32 %v7694_v12, %v8423_v13 }
 0x344   :  { %v2322_v18 = vpop.f32.mrf.mxu1  ;;  %v4202_v45 = vpop.f32.mrf.mxu0  ;;  %3916 = vmatpush3.msra.mxu1 %v3132_v42  ;;  %4347 = vmatprep.mubr.msk.f32.mxu0 %vm4454_vm0, %v8269_v48  ;;  %v2761_v39 = vadd.f32 %v7706_v6, %v8422_v52  ;;  %v3129_v6 = vmax.f32 %v7516_v30, 0.0  ;;  %v8424_v12 = vld [vmem:[#allocation28_spill] sm:$0xff]  ;;  %v3128_v30 = vmax.f32 %v7498_v55, 0.0  ;;  %v3126_v52 = vmax.f32 %v7459_v56, 0.0 }
 0x345   :  { %3917 = vmatprep.subr.mxu1 %v3147_v37  ;;  %v1661_v42 = vadd.f32 %v7471_v38, %v8424_v12  ;;  %v3143_v37 = vmax.f32 %v2756_v33, 0.0  ;;  %v3127_v45 = vmax.f32 %v7481_v35, 0.0  ;;  %v620_v55 = vld [vmem:[%s8229_s0 + $0x1268] sm:$0xff]  ;;  %v3141_v35 = vmax.f32 %v7672_v26, 0.0  ;;  %v625_v56 = vld [vmem:[%s8229_s0 + $0x1290] sm:$0xff]  ;;  %v8427_v26 = vld [vmem:[#allocation30_spill] sm:$0xff] }
 0x346   :  { %v2325_v25 = vpop.f32.mrf.mxu1  ;;  %v2820_v60 = vpop.f32.mrf.mxu0  ;;  %3918 = vmatpush3.msra.mxu1 %v3131_v3  ;;  %v3144_v49 = vmax.f32 %v2761_v39, 0.0 }
 0x347   :  { %v7871_v24 = vadd.f32 %v2325_v25, %v1656_v10  ;;  %v7874_v31 = vadd.f32 %v2820_v60, %v7336_v21  ;;  %4348 = vmatmul.mubr.msk.f32.gmra.mxu0 %vm715_vm1, %v610_v1  ;;  %3919 = vmatprep.subr.mxu1 %v3146_v36  ;;  %v8425_v21 = vld [vmem:[#allocation46_spill] sm:$0xff]  ;;  %v1666_v10 = vadd.f32 %v7471_v38, %v8426_v2  ;;  %v3125_v60 = vmax.f32 %v7438_v27, 0.0  ;;  %v3215_v2 = vld [vmem:[%s8231_s1 + $0x28] sm:$0xff] }
 0x348   :  { %v2327_v28 = vpop.f32.mrf.mxu1  ;;  %v4205_v32 = vpop.f32.mrf.mxu0  ;;  %3920 = vmatpush3.msra.mxu1 %v3130_v16  ;;  %4350 = vmatprep.mubr.msk.f32.mxu0 %vm4454_vm0, %v8269_v48  ;;  %v2751_v53 = vadd.f32 %v7682_v29, %v8425_v21 }
 0x349   :  { %3921 = vmatprep.subr.mxu1 %v3145_v61  ;;  %v1671_v61 = vadd.f32 %v7471_v38, %v8427_v26  ;;  %v3139_v32 = vmax.f32 %v7646_v41, 0.0  ;;  %v8428_v41 = vld [vmem:[#allocation31_spill] sm:$0xff] }
 0x34a   :  { %v2330_v50 = vpop.f32.mrf.mxu1  ;;  %v2825_v62 = vpop.f32.mrf.mxu0  ;;  %3922 = vmatpush3.msra.mxu1 %v3129_v6  ;;  %v3124_v6 = vmax.f32 %v7413_v43, 0.0  ;;  %v630_v43 = vld [vmem:[%s8229_s0 + $0x12b8] sm:$0xff] }
 0x34b   :  { %v7888_v3 = vadd.f32 %v2330_v50, %v1661_v42  ;;  %v7891_v18 = vadd.f32 %v2825_v62, %v7361_v40  ;;  %4351 = vmatmul.mubr.msk.f32.gmra.mxu0 %vm715_vm1, %v615_v63  ;;  %3923 = vmatprep.subr.mxu1 %v3144_v49  ;;  %v3142_v40 = vmax.f32 %v2751_v53, 0.0  ;;  %v3123_v42 = vmax.f32 %v7388_v22, 0.0 }
 0x34c   :  { %v2332_v1 = vpop.f32.mrf.mxu1  ;;  %v4208_v29 = vpop.f32.mrf.mxu0  ;;  %3924 = vmatpush3.msra.mxu1 %v3128_v30  ;;  %4353 = vmatprep.mubr.msk.f32.mxu0 %vm4454_vm0, %v8269_v48  ;;  %v1676_v53 = vadd.f32 %v7471_v38, %v8428_v41  ;;  %v3122_v49 = vmax.f32 %v7364_v44, 0.0  ;;  %v3137_v50 = vmax.f32 %v7620_v51, 0.0  ;;  %v635_v44 = vld [vmem:[%s8229_s0 + $0x12e0] sm:$0xff]  ;;  %v8429_v51 = vld [vmem:[#allocation32_spill] sm:$0xff] }
 0x34d   :  { %3925 = vmatprep.subr.mxu1 %v3143_v37  ;;  %v1681_v29 = vadd.f32 %v7471_v38, %v8429_v51  ;;  %v8434_v51 = vld [vmem:[#allocation37_spill] sm:$0xff] }
 0x34e   :  { %v2335_v39 = vpop.f32.mrf.mxu1  ;;  %v2830_v36 = vpop.f32.mrf.mxu0  ;;  %3926 = vmatpush3.msra.mxu1 %v3127_v45  ;;  %v3121_v45 = vmax.f32 %v7339_v58, 0.0 }
 0x34f   :  { %v7904_v16 = vadd.f32 %v2335_v39, %v1666_v10  ;;  %v7907_v25 = vadd.f32 %v2830_v36, %v7385_v17  ;;  %4354 = vmatmul.mubr.msk.f32.gmra.mxu0 %vm715_vm1, %v620_v55  ;;  %3927 = vmatprep.subr.mxu1 %v3142_v40  ;;  %v3140_v17 = vmax.f32 %v7659_v47, 0.0  ;;  %v8430_v36 = vld [vmem:[#allocation33_spill] sm:$0xff] }
 0x350   :  { %v2337_v13 = vpop.f32.mrf.mxu1  ;;  %v4211_v33 = vpop.f32.mrf.mxu0  ;;  %3928 = vmatpush3.msra.mxu1 %v3126_v52  ;;  %4356 = vmatprep.mubr.msk.f32.mxu0 %vm4454_vm0, %v8269_v48 }
 0x351   :  { %3929 = vmatprep.subr.mxu1 %v3141_v35  ;;  %v1686_v35 = vadd.f32 %v7471_v38, %v8430_v36  ;;  %v8436_v36 = vld [vmem:[#allocation38_spill] sm:$0xff] }
 0x352   :  { %v2340_v28 = vpop.f32.mrf.mxu1  ;;  %v2835_v27 = vpop.f32.mrf.mxu0  ;;  %3930 = vmatpush3.msra.mxu1 %v3125_v60 }
 0x353   :  { %v7921_v63 = vadd.f32 %v2340_v28, %v1671_v61  ;;  %v7924_v12 = vadd.f32 %v2835_v27, %v7410_v34  ;;  %4357 = vmatmul.mubr.msk.f32.gmra.mxu0 %vm715_vm1, %v625_v56  ;;  %3931 = vmatprep.subr.mxu1 %v3140_v17  ;;  %v3138_v34 = vmax.f32 %v7633_v4, 0.0 }
 0x354   :  { %v2342_v21 = vpop.f32.mrf.mxu1  ;;  %v4214_v47 = vpop.f32.mrf.mxu0  ;;  %3932 = vmatpush3.msra.mxu1 %v3124_v6  ;;  %4359 = vmatprep.mubr.msk.f32.mxu0 %vm4454_vm0, %v8269_v48 }
 0x355   :  { %3933 = vmatprep.subr.mxu1 %v3139_v32  ;;  %v8432_v47 = vld [vmem:[#allocation35_spill] sm:$0xff] }
 0x356   :  { %v2345_v30 = vpop.f32.mrf.mxu1  ;;  %v2840_v22 = vpop.f32.mrf.mxu0  ;;  %3934 = vmatpush3.msra.mxu1 %v3123_v42 }
 0x357   :  { %v7938_v62 = vadd.f32 %v2345_v30, %v1676_v53  ;;  %v7941_v37 = vadd.f32 %v2840_v22, %v7435_v15  ;;  %4360 = vmatmul.mubr.msk.f32.gmra.mxu0 %vm715_vm1, %v630_v43  ;;  %3935 = vmatprep.subr.mxu1 %v3138_v34  ;;  %v3212_v15 = vld [vmem:[%s8231_s1 + $0x10] sm:$0xff]  ;;  %v1696_v43 = vadd.f32 %v7471_v38, %v8432_v47 }
 0x358   :  { %v2347_v1 = vpop.f32.mrf.mxu1  ;;  %v4217_v4 = vpop.f32.mrf.mxu0  ;;  %3936 = vmatpush3.msra.mxu1 %v3122_v49  ;;  %4362 = vmatprep.mubr.msk.f32.mxu0 %vm4454_vm0, %v8269_v48  ;;  %v8433_v22 = vld [vmem:[#allocation36_spill] sm:$0xff] }
 0x359   :  { %3937 = vmatprep.subr.mxu1 %v3137_v50  ;;  %v1701_v50 = vadd.f32 %v7471_v38, %v8433_v22 }
 0x35a   :  { %v2350_v55 = vpop.f32.mrf.mxu1  ;;  %v2845_v58 = vpop.f32.mrf.mxu0  ;;  %3938 = vmatpush3.msra.mxu1 %v3121_v45 }
 0x35b   :  { %v7958_v10 = vadd.f32 %v2350_v55, %v1681_v29  ;;  %v7961_v40 = vadd.f32 %v2845_v58, %v7456_v0  ;;  %4363 = vmatmul.mubr.msk.f32.gmra.mxu0 %vm715_vm1, %v635_v44  ;;  %3357 = vmatmul.mubr.f32.vlgmr.msra.gmra.mxu1 %v3212_v15  ;;  %v8431_v0 = vld [vmem:[#allocation34_spill] sm:$0xff]  ;;  %v1706_v29 = vadd.f32 %v7471_v38, %v8434_v51 }
 0x35c   :  { %v2352_v52 = vpop.f32.mrf.mxu1  ;;  %v4220_v39 = vpop.f32.mrf.mxu0  ;;  %3426 = vmatprep.mubr.f32.mxu1 %v3215_v2  ;;  %v1691_v17 = vadd.f32 %v7471_v38, %v8431_v0 }
 0x35e   :  { %v2355_v60 = vpop.f32.mrf.mxu1  ;;  %v2850_v13 = vpop.f32.mrf.mxu0 }
 0x35f   :  { %v7966_v33 = vadd.f32 %v2355_v60, %v1686_v35  ;;  %v7969_v56 = vadd.f32 %v2850_v13, %v7478_v9  ;;  %v1711_v35 = vadd.f32 %v7471_v38, %v8436_v36 }
 0x360   :  { %v2357_v26 = vpop.f32.mrf.mxu1  ;;  %v4223_v61 = vpop.f32.mrf.mxu0 }
 0x362   :  { %v2360_v6 = vpop.f32.mrf.mxu1  ;;  %v2855_v28 = vpop.f32.mrf.mxu0 }
 0x363   :  { %v7973_v27 = vadd.f32 %v2360_v6, %v1691_v17  ;;  %v7976_v32 = vadd.f32 %v2855_v28, %v7495_v59  ;;  %v8438_v17 = vld [vmem:[#allocation39_spill] sm:$0xff] }
 0x364   :  { %v2362_v42 = vpop.f32.mrf.mxu1  ;;  %v4226_v21 = vpop.f32.mrf.mxu0  ;;  %v1716_v6 = vadd.f32 %v7471_v38, %v8438_v17  ;;  %v8448_v17 = vld [vmem:[#allocation43_spill] sm:$0xff] }
 0x366   :  { %v2365_v41 = vpop.f32.mrf.mxu1  ;;  %v2860_v9 = vpop.f32.mrf.mxu0 }
 0x367   :  { %v7980_v53 = vadd.f32 %v2365_v41, %v1696_v43  ;;  %v7983_v34 = vadd.f32 %v2860_v9, %v7513_v19  ;;  %v8440_v41 = vld [vmem:[#allocation40_spill] sm:$0xff] }
 0x368   :  { %v2367_v49 = vpop.f32.mrf.mxu1  ;;  %v4229_v30 = vpop.f32.mrf.mxu0  ;;  %v1721_v9 = vadd.f32 %v7471_v38, %v8440_v41  ;;  %v8450_v41 = vld [vmem:[#allocation61_spill] sm:$0xff] }
 0x36a   :  { %v2370_v45 = vpop.f32.mrf.mxu1  ;;  %v2865_v59 = vpop.f32.mrf.mxu0 }
 0x36b   :  { %v7987_v1 = vadd.f32 %v2370_v45, %v1701_v50  ;;  %v7990_v4 = vadd.f32 %v2865_v59, %v7526_v46  ;;  %v8442_v59 = vld [vmem:[#allocation41_spill] sm:$0xff] }
 0x36c   :  { %v2372_v44 = vpop.f32.mrf.mxu1  ;;  %v4232_v15 = vpop.f32.mrf.mxu0 }
 0x36d   :  { %v1726_v44 = vadd.f32 %v7471_v38, %v8442_v59 }
 0x36e   :  { %v2375_v55 = vpop.f32.mrf.mxu1  ;;  %v2870_v19 = vpop.f32.mrf.mxu0 }
 0x36f   :  { %v7994_v58 = vadd.f32 %v2375_v55, %v1706_v29  ;;  %v7997_v2 = vadd.f32 %v2870_v19, %v7539_v11  ;;  %v8444_v29 = vld [vmem:[#allocation62_spill] sm:$0xff] }
 0x370   :  { %v2377_v52 = vpop.f32.mrf.mxu1  ;;  %v4235_v39 = vpop.f32.mrf.mxu0 }
 0x371   :  { %8435 = vst [vmem:[#allocation74_spill] sm:$0xff] %v7994_v58  ;;  %v8445_v39 = vld [vmem:[#allocation42_spill] sm:$0xff] }
 0x372   :  { %v2380_v60 = vpop.f32.mrf.mxu1  ;;  %v2875_v46 = vpop.f32.mrf.mxu0  ;;  %v1731_v36 = vadd.f32 %v7471_v38, %v8445_v39 }
 0x373   :  { %v8001_v13 = vadd.f32 %v2380_v60, %v1711_v35  ;;  %v8004_v26 = vadd.f32 %v2875_v46, %v7552_v54  ;;  %v8447_v46 = vld [vmem:[#allocation71_spill] sm:$0xff] }
 0x374   :  { %v2382_v61 = vpop.f32.mrf.mxu1  ;;  %v4238_v0 = vpop.f32.mrf.mxu0 }
 0x375   :  { %8437 = vst [vmem:[#allocation6_spill] sm:$0xff] %v8001_v13 }
 0x376   :  { %v2385_v28 = vpop.f32.mrf.mxu1  ;;  %v2880_v11 = vpop.f32.mrf.mxu0 }
 0x377   :  { %v8008_v42 = vadd.f32 %v2385_v28, %v1716_v6  ;;  %v8011_v21 = vadd.f32 %v2880_v11, %v7565_v7  ;;  %v1736_v6 = vadd.f32 %v7471_v38, %v8448_v17 }
 0x378   :  { %v2387_v47 = vpop.f32.mrf.mxu1  ;;  %v4241_v43 = vpop.f32.mrf.mxu0 }
 0x379   :  { %8439 = vst [vmem:[#allocation75_spill] sm:$0xff] %v8008_v42  ;;  %v8456_v42 = vld [vmem:[#allocation69_spill] sm:$0xff] }
 0x37a   :  { %v2390_v49 = vpop.f32.mrf.mxu1  ;;  %v2885_v54 = vpop.f32.mrf.mxu0 }
 0x37b   :  { %v8015_v30 = vadd.f32 %v2390_v49, %v1721_v9  ;;  %v8018_v22 = vadd.f32 %v2885_v54, %v7578_v8  ;;  %v4452_v54 = vld [vmem:[%s8230_s3] ss:$0 sm:$0xff] }
 0x37c   :  { %v2392_v50 = vpop.f32.mrf.mxu1  ;;  %v4244_v45 = vpop.f32.mrf.mxu0 }
 0x37d   :  { %8441 = vst [vmem:[#allocation7_spill] sm:$0xff] %v8015_v30  ;;  %v8451_v50 = vld [vmem:[#allocation44_spill] sm:$0xff] }
 0x37e   :  { %v2395_v15 = vpop.f32.mrf.mxu1  ;;  %v2890_v7 = vpop.f32.mrf.mxu0  ;;  %v1741_v45 = vadd.f32 %v4452_v54, %v8451_v50 }
 0x37f   :  { %v8022_v51 = vadd.f32 %v2395_v15, %v1726_v44  ;;  %v8025_v55 = vadd.f32 %v2890_v7, %v8444_v29  ;;  %v8452_v7 = vld [vmem:[#allocation63_spill] sm:$0xff] }
 0x380   :  { %v2397_v19 = vpop.f32.mrf.mxu1  ;;  %v4247_v52 = vpop.f32.mrf.mxu0 }
 0x381   :  { %8443 = vst [vmem:[#allocation76_spill] sm:$0xff] %v8022_v51  ;;  %v8453_v52 = vld [vmem:[#allocation45_spill] sm:$0xff]  ;;  %v8457_v51 = vld [vmem:[#allocation68_spill] sm:$0xff] }
 0x382   :  { %v2400_v35 = vpop.f32.mrf.mxu1  ;;  %v1746_v39 = vadd.f32 %v4452_v54, %v8453_v52 }
 0x383   :  { %v8029_v8 = vadd.f32 %v2400_v35, %v1731_v36  ;;  %v2895_v60 = vpop.f32.mrf.mxu0 }
 0x384   :  { %v8032_v61 = vadd.f32 %v2895_v60, %v8447_v46  ;;  %v2402_v0 = vpop.f32.mrf.mxu1 }
 0x385   :  { %8446 = vst [vmem:[#allocation8_spill] sm:$0xff] %v8029_v8  ;;  %v4250_v28 = vpop.f32.mrf.mxu0 }
 0x386   :  { %v2405_v11 = vpop.f32.mrf.mxu1 }
 0x387   :  { %v8036_v47 = vadd.f32 %v2405_v11, %v1736_v6  ;;  %v2900_v43 = vpop.f32.mrf.mxu0 }
 0x388   :  { %v8039_v9 = vadd.f32 %v2900_v43, %v8450_v41  ;;  %v2407_v49 = vpop.f32.mrf.mxu1 }
 0x389   :  { %8449 = vst [vmem:[#allocation77_spill] sm:$0xff] %v8036_v47  ;;  %v4253_v59 = vpop.f32.mrf.mxu0 }
 0x38a   :  { %v2410_v44 = vpop.f32.mrf.mxu1 }
 0x38b   :  { %v8045_v15 = vadd.f32 %v2410_v44, %v1741_v45  ;;  %v2905_v38 = vpop.f32.mrf.mxu0 }
 0x38c   :  { %v8048_v29 = vadd.f32 %v2905_v38, %v8452_v7  ;;  %v2412_v19 = vpop.f32.mrf.mxu1 }
 0x38d   :  { %v4256_v36 = vpop.f32.mrf.mxu0 }
 0x38e   :  { %v2415_v35 = vpop.f32.mrf.mxu1 }
 0x38f   :  { %v8051_v60 = vadd.f32 %v2415_v35, %v1746_v39  ;;  %v8053_v46 = vpop.f32.mrf.mxu0 }
 0x390   :  { %v2417_v0 = vpop.f32.mrf.mxu1 }
 0x391   :  { %v4259_v17 = vpop.f32.mrf.mxu0 }
 0x392   :  { %v8454_v17 = vld [vmem:[#allocation70_spill] sm:$0xff] }
 0x393   :  { %v8055_v6 = vpop.f32.mrf.mxu0 }
 0x395   :  { %v4262_v28 = vpop.f32.mrf.mxu0 }
 0x396   :  { %v8455_v28 = vld [vmem:[#allocation3_spill] sm:$0xff] }
 0x397   :  { %v2920_v11 = vpop.f32.mrf.mxu0 }
 0x399   :  { %v4265_v43 = vpop.f32.mrf.mxu0 }
 0x39b   :  { %v2925_v41 = vpop.f32.mrf.mxu0 }
 0x39d   :  { %v4268_v49 = vpop.f32.mrf.mxu0 }
 0x39f   :  { %v2930_v50 = vpop.f32.mrf.mxu0 }
 0x3a1   :  { %v4271_v45 = vpop.f32.mrf.mxu0 }
 0x3a2   :  { %v3168_v45 = vmax.f32 %v8011_v21, 0.0  ;;  %v8460_v21 = vld [vmem:[#allocation66_spill] sm:$0xff] }
 0x3a3   :  { %v2935_v59 = vpop.f32.mrf.mxu0 }
 0x3a5   :  { %v4274_v44 = vpop.f32.mrf.mxu0 }
 0x3a7   :  { %v2940_v54 = vpop.f32.mrf.mxu0 }
 0x3a9   :  { %v4277_v38 = vpop.f32.mrf.mxu0 }
 0x3ab   :  { %v2945_v7 = vpop.f32.mrf.mxu0 }
 0x3ac   :  { %v2946_v38 = vadd.f32 %v2945_v7, %v8457_v51 }
 0x3ad   :  { %v4280_v19 = vpop.f32.mrf.mxu0 }
 0x3ae   :  { %v8458_v19 = vld [vmem:[#allocation72_spill] sm:$0xff]  ;;  %v3181_v51 = vmax.f32 %v2946_v38, 0.0 }
 0x3af   :  { %v2950_v52 = vpop.f32.mrf.mxu0 }
 0x3b0   :  { %v2951_v49 = vadd.f32 %v2950_v52, %v8456_v42  ;;  %v2936_v52 = vadd.f32 %v2935_v59, %v8460_v21  ;;  %v8467_v21 = vld [vmem:[#allocation60_spill] sm:$0xff] }
 0x3b1   :  { %v4283_v39 = vpop.f32.mrf.mxu0 }
 0x3b2   :  { %v3167_v39 = vmax.f32 %v8004_v26, 0.0  ;;  %v3179_v59 = vmax.f32 %v2936_v52, 0.0 }
 0x3b3   :  { %v2955_v36 = vpop.f32.mrf.mxu0 }
 0x3b4   :  { %v2956_v58 = vadd.f32 %v2955_v36, %v8454_v17  ;;  %v8459_v36 = vld [vmem:[#allocation67_spill] sm:$0xff]  ;;  %v3182_v17 = vmax.f32 %v2951_v49, 0.0  ;;  %v8463_v49 = vld [vmem:[#allocation58_spill] sm:$0xff] }
 0x3b5   :  { %v4286_v35 = vpop.f32.mrf.mxu0 }
 0x3b6   :  { %v3183_v8 = vmax.f32 %v2956_v58, 0.0  ;;  %v8461_v58 = vld [vmem:[#allocation4_spill] sm:$0xff] }
 0x3b7   :  { %v2960_v0 = vpop.f32.mrf.mxu0 }
 0x3b8   :  { %v2961_v13 = vadd.f32 %v2960_v0, %v8455_v28  ;;  %v2941_v0 = vadd.f32 %v2940_v54, %v8459_v36  ;;  %v8462_v28 = vld [vmem:[#allocation65_spill] sm:$0xff]  ;;  %v3162_v36 = vmax.f32 %v7969_v56, 0.0  ;;  %v3160_v56 = vmax.f32 %v7941_v37, 0.0 }
 0x3b9   :  { %v4289_v43 = vpop.f32.mrf.mxu0  ;;  %v3173_v37 = vmax.f32 %v8048_v29, 0.0  ;;  %v3170_v29 = vmax.f32 %v8025_v55, 0.0  ;;  %v3217_v55 = vld [vmem:[%s8231_s1 + $0x38] sm:$0xff] }
 0x3ba   :  { %v3184_v30 = vmax.f32 %v2961_v13, 0.0  ;;  %v3166_v13 = vmax.f32 %v7997_v2, 0.0  ;;  %v2931_v43 = vadd.f32 %v2930_v50, %v8462_v28  ;;  %v3180_v54 = vmax.f32 %v2941_v0, 0.0  ;;  %v8466_v0 = vld [vmem:[#allocation59_spill] sm:$0xff] }
 0x3bb   :  { %v2965_v44 = vpop.f32.mrf.mxu0  ;;  %v3157_v28 = vmax.f32 %v7891_v18, 0.0  ;;  %v3154_v18 = vmax.f32 %v7836_v5, 0.0 }
 0x3bc   :  { %v8063_v47 = vadd.f32 %v2965_v44, %v8458_v19  ;;  %3942 = vmatprep.subr.mxu1 %v3184_v30  ;;  %v3165_v30 = vmax.f32 %v7990_v4, 0.0  ;;  %v8464_v44 = vld [vmem:[#allocation73_spill] sm:$0xff]  ;;  %v3163_v19 = vmax.f32 %v7976_v32, 0.0  ;;  %v3178_v50 = vmax.f32 %v2931_v43, 0.0 }
 0x3bd   :  { %v4292_v35 = vpop.f32.mrf.mxu0  ;;  %3943 = vmatpush3.msra.mxu1 %v3168_v45  ;;  %v2926_v45 = vadd.f32 %v2925_v41, %v8463_v49  ;;  %v2916_v41 = vadd.f32 %v8055_v6, %v8466_v0  ;;  %v3161_v32 = vmax.f32 %v7961_v40, 0.0 }
 0x3be   :  { %3944 = vmatprep.subr.mxu1 %v3183_v8  ;;  %v3164_v8 = vmax.f32 %v7983_v34, 0.0 }
 0x3bf   :  { %v2970_v42 = vpop.f32.mrf.mxu0  ;;  %3945 = vmatpush3.msra.mxu1 %v3167_v39  ;;  %v8465_v39 = vld [vmem:[#allocation64_spill] sm:$0xff] }
 0x3c0   :  { %v8070_v7 = vadd.f32 %v2970_v42, %v8461_v58  ;;  %3946 = vmatprep.subr.mxu1 %v3182_v17  ;;  %v2921_v35 = vadd.f32 %v2920_v11, %v8465_v39  ;;  %v3177_v17 = vmax.f32 %v2926_v45, 0.0  ;;  %v2911_v11 = vadd.f32 %v8053_v46, %v8467_v21 }
 0x3c1   :  { %v4295_v26 = vpop.f32.mrf.mxu0  ;;  %3947 = vmatpush3.msra.mxu1 %v3166_v13  ;;  %v3175_v58 = vmax.f32 %v2916_v41, 0.0 }
 0x3c2   :  { %3948 = vmatprep.subr.mxu1 %v3181_v51  ;;  %v3176_v52 = vmax.f32 %v2921_v35, 0.0  ;;  %v3174_v40 = vmax.f32 %v2911_v11, 0.0  ;;  %v3158_v26 = vmax.f32 %v7907_v25, 0.0  ;;  %v3171_v25 = vmax.f32 %v8032_v61, 0.0 }
 0x3c3   :  { %v2975_v2 = vpop.f32.mrf.mxu0  ;;  %3949 = vmatpush3.msra.mxu1 %v3165_v30 }
 0x3c4   :  { %v8077_v38 = vadd.f32 %v2975_v2, %v8464_v44  ;;  %3950 = vmatprep.subr.mxu1 %v3180_v54 }
 0x3c5   :  { %v4298_v4 = vpop.f32.mrf.mxu0  ;;  %3951 = vmatpush3.msra.mxu1 %v3164_v8  ;;  %v3155_v8 = vmax.f32 %v7855_v20, 0.0  ;;  %v3214_v20 = vld [vmem:[%s8231_s1 + $0x20] sm:$0xff] }
 0x3c6   :  { %3952 = vmatprep.subr.mxu1 %v3179_v59 }
 0x3c7   :  { %v2980_v34 = vpop.f32.mrf.mxu0  ;;  %3953 = vmatpush3.msra.mxu1 %v3163_v19 }
 0x3c8   :  { %v8085_v13 = vadd.f32 %v2980_v34, %v7811_v14  ;;  %3954 = vmatprep.subr.mxu1 %v3178_v50  ;;  %v3159_v14 = vmax.f32 %v7924_v12, 0.0  ;;  %v3156_v12 = vmax.f32 %v7874_v31, 0.0  ;;  %v8468_v31 = vld [vmem:[#allocation5_spill] sm:$0xff] }
 0x3c9   :  { %v4301_v42 = vpop.f32.mrf.mxu0  ;;  %3955 = vmatpush3.msra.mxu1 %v3162_v36  ;;  %v3153_v45 = vmax.f32 %v8468_v31, 0.0 }
 0x3ca   :  { %3956 = vmatprep.subr.mxu1 %v3177_v17 }
 0x3cb   :  { %v2985_v51 = vpop.f32.mrf.mxu0  ;;  %3957 = vmatpush3.msra.mxu1 %v3161_v32 }
 0x3cc   :  { %v8092_v6 = vadd.f32 %v2985_v51, %v7833_v23  ;;  %3958 = vmatprep.subr.mxu1 %v3176_v52  ;;  %v3172_v23 = vmax.f32 %v8039_v9, 0.0  ;;  %v3169_v9 = vmax.f32 %v8018_v22, 0.0 }
 0x3cd   :  { %v4304_v30 = vpop.f32.mrf.mxu0  ;;  %3959 = vmatpush3.msra.mxu1 %v3160_v56 }
 0x3ce   :  { %3960 = vmatprep.subr.mxu1 %v3175_v58 }
 0x3cf   :  { %v8096_v46 = vpop.f32.mrf.mxu0  ;;  %3961 = vmatpush3.msra.mxu1 %v3159_v14 }
 0x3d0   :  { %3962 = vmatprep.subr.mxu1 %v3174_v40 }
 0x3d1   :  { %v4307_v43 = vpop.f32.mrf.mxu0  ;;  %3963 = vmatpush3.msra.mxu1 %v3158_v26 }
 0x3d2   :  { %3964 = vmatprep.subr.mxu1 %v3173_v37 }
 0x3d3   :  { %v8102_v54 = vpop.f32.mrf.mxu0  ;;  %3965 = vmatpush3.msra.mxu1 %v3157_v28 }
 0x3d4   :  { %3966 = vmatprep.subr.mxu1 %v3172_v23 }
 0x3d5   :  { %v4310_v2 = vpop.f32.mrf.mxu0  ;;  %3967 = vmatpush3.msra.mxu1 %v3156_v12 }
 0x3d6   :  { %3968 = vmatprep.subr.mxu1 %v3171_v25 }
 0x3d7   :  { %v3000_v49 = vpop.f32.mrf.mxu0  ;;  %3969 = vmatpush3.msra.mxu1 %v3155_v8 }
 0x3d8   :  { %3970 = vmatprep.subr.mxu1 %v3170_v29 }
 0x3d9   :  { %v4313_v59 = vpop.f32.mrf.mxu0  ;;  %3971 = vmatpush3.msra.mxu1 %v3154_v18 }
 0x3da   :  { %3972 = vmatprep.subr.mxu1 %v3169_v9  ;;  %v3187_v59 = vmax.f32 %v8077_v38, 0.0 }
 0x3db   :  { %v3005_v5 = vpop.f32.mrf.mxu0  ;;  %3973 = vmatpush3.msra.mxu1 %v3153_v45 }
 0x3dc   :  { %3432 = vmatprep.subr.mxu1 %v8269_v48  ;;  %3427 = vmatmul.mubr.f32.vlgmr.msra.gmra.mxu1 %v3214_v20 }
 0x3dd   :  { %v4316_v22 = vpop.f32.mrf.mxu0  ;;  %3738 = vmatprep.mubr.msk.f32.mxu1 %vm3218_vm2, %v3217_v55  ;;  %v3186_v55 = vmax.f32 %v8070_v7, 0.0  ;;  %v8469_v7 = vld [vmem:[#allocation77_spill] sm:$0xff] }
 0x3df   :  { %v3010_v61 = vpop.f32.mrf.mxu0 }
 0x3e1   :  { %v4319_v44 = vpop.f32.mrf.mxu0 }
 0x3e3   :  { %v3015_v19 = vpop.f32.mrf.mxu0 }
 0x3e5   :  { %v4322_v4 = vpop.f32.mrf.mxu0 }
 0x3e7   :  { %v3020_v39 = vpop.f32.mrf.mxu0 }
 0x3e8   :  { %v3021_v40 = vadd.f32 %v3020_v39, %v7958_v10  ;;  %v3006_v10 = vadd.f32 %v3005_v5, %v7904_v16  ;;  %v2991_v16 = vadd.f32 %v8096_v46, %v7852_v57  ;;  %v3188_v57 = vmax.f32 %v8085_v13, 0.0  ;;  %v8470_v39 = vld [vmem:[#allocation8_spill] sm:$0xff] }
 0x3e9   :  { %v4325_v35 = vpop.f32.mrf.mxu0  ;;  %v3185_v5 = vmax.f32 %v8063_v47, 0.0  ;;  %v8471_v47 = vld [vmem:[#allocation76_spill] sm:$0xff] }
 0x3ea   :  { %v3196_v28 = vmax.f32 %v3021_v40, 0.0  ;;  %v3193_v2 = vmax.f32 %v3006_v10, 0.0  ;;  %v3190_v31 = vmax.f32 %v2991_v16, 0.0  ;;  %v3216_v40 = vld [vmem:[%s8231_s1 + $0x30] sm:$0xff] }
 0x3eb   :  { %v3025_v50 = vpop.f32.mrf.mxu0 }
 0x3ec   :  { %v3026_v58 = vadd.f32 %v3025_v50, %v7966_v33  ;;  %v3011_v33 = vadd.f32 %v3010_v61, %v7921_v63  ;;  %v2996_v63 = vadd.f32 %v8102_v54, %v7871_v24  ;;  %v3189_v54 = vmax.f32 %v8092_v6, 0.0 }
 0x3ed   :  { %v4328_v36 = vpop.f32.mrf.mxu0 }
 0x3ee   :  { %v3194_v25 = vmax.f32 %v3011_v33, 0.0  ;;  %v3503_v33 = vld [vmem:[%s8232_s4 + $0x8] sm:$0xff] }
 0x3ef   :  { %v3030_v34 = vpop.f32.mrf.mxu0 }
 0x3f0   :  { %v3031_v52 = vadd.f32 %v3030_v34, %v7973_v27  ;;  %v3016_v27 = vadd.f32 %v3015_v19, %v7938_v62  ;;  %v3001_v62 = vadd.f32 %v3000_v49, %v7888_v3  ;;  %v3191_v3 = vmax.f32 %v2996_v63, 0.0 }
 0x3f1   :  { %v4331_v0 = vpop.f32.mrf.mxu0 }
 0x3f2   :  { %v3198_v26 = vmax.f32 %v3031_v52, 0.0  ;;  %v3195_v23 = vmax.f32 %v3016_v27, 0.0  ;;  %v3192_v18 = vmax.f32 %v3001_v62, 0.0  ;;  %v8472_v0 = vld [vmem:[#allocation7_spill] sm:$0xff]  ;;  %v8475_v52 = vld [vmem:[#allocation74_spill] sm:$0xff] }
 0x3f3   :  { %v3035_v41 = vpop.f32.mrf.mxu0  ;;  %v3506_v27 = vld [vmem:[%s8232_s4 + $0x20] sm:$0xff] }
 0x3f4   :  { %v3036_v42 = vadd.f32 %v3035_v41, %v7980_v53 }
 0x3f5   :  { %v4334_v17 = vpop.f32.mrf.mxu0 }
 0x3f6   :  { %v3199_v14 = vmax.f32 %v3036_v42, 0.0  ;;  %v8474_v42 = vld [vmem:[#allocation6_spill] sm:$0xff] }
 0x3f7   :  { %v3040_v32 = vpop.f32.mrf.mxu0 }
 0x3f8   :  { %v3041_v21 = vadd.f32 %v3040_v32, %v7987_v1  ;;  %v3197_v1 = vmax.f32 %v3026_v58, 0.0 }
 0x3f9   :  { %v4337_v11 = vpop.f32.mrf.mxu0 }
 0x3fa   :  { %v3200_v56 = vmax.f32 %v3041_v21, 0.0 }
 0x3fb   :  { %v8120_v51 = vpop.f32.mrf.mxu0 }
 0x3fc   :  { %3433 = vmatpush1.msra.mxu1 %v3200_v56  ;;  %v3046_v56 = vadd.f32 %v8120_v51, %v8475_v52  ;;  %v3509_v51 = vld [vmem:[%s8232_s4 + $0x38] sm:$0xff] }
 0x3fd   :  { %v4340_v30 = vpop.f32.mrf.mxu0  ;;  %3434 = vmatprep.subr.mxu1 %v8269_v48 }
 0x3fe   :  { %3435 = vmatpush1.msra.mxu1 %v3199_v14  ;;  %v3201_v30 = vmax.f32 %v3046_v56, 0.0 }
 0x3ff   :  { %v8125_v53 = vpop.f32.mrf.mxu0  ;;  %3436 = vmatprep.subr.mxu1 %v8269_v48 }
 0x400   :  { %3437 = vmatpush1.msra.mxu1 %v3198_v26  ;;  %v3051_v21 = vadd.f32 %v8125_v53, %v8474_v42  ;;  %v3508_v26 = vld [vmem:[%s8232_s4 + $0x30] sm:$0xff]  ;;  %v3507_v53 = vld [vmem:[%s8232_s4 + $0x28] sm:$0xff] }
 0x401   :  { %v4343_v37 = vpop.f32.mrf.mxu0  ;;  %3438 = vmatprep.subr.mxu1 %v8269_v48 }
 0x402   :  { %3439 = vmatpush1.msra.mxu1 %v3197_v1  ;;  %v3202_v14 = vmax.f32 %v3051_v21, 0.0  ;;  %v3505_v1 = vld [vmem:[%s8232_s4 + $0x18] sm:$0xff]  ;;  %v3504_v37 = vld [vmem:[%s8232_s4 + $0x10] sm:$0xff] }
 0x403   :  { %v8131_v43 = vpop.f32.mrf.mxu0  ;;  %3440 = vmatprep.subr.mxu1 %v8269_v48 }
 0x404   :  { %3441 = vmatpush1.msra.mxu1 %v3196_v28  ;;  %v3502_v28 = vld [vmem:[%s8232_s4] sm:$0xff] }
 0x405   :  { %v4346_v12 = vpop.f32.mrf.mxu0  ;;  %3442 = vmatprep.subr.mxu1 %v8269_v48 }
 0x406   :  { %3443 = vmatpush1.msra.mxu1 %v3195_v23 }
 0x407   :  { %v3060_v8 = vpop.f32.mrf.mxu0  ;;  %3444 = vmatprep.subr.mxu1 %v8269_v48 }
 0x408   :  { %3445 = vmatpush1.msra.mxu1 %v3194_v25 }
 0x409   :  { %v4349_v29 = vpop.f32.mrf.mxu0  ;;  %3446 = vmatprep.subr.mxu1 %v8269_v48 }
 0x40a   :  { %3447 = vmatpush1.msra.mxu1 %v3193_v2 }
 0x40b   :  { %v3065_v9 = vpop.f32.mrf.mxu0  ;;  %3448 = vmatprep.subr.mxu1 %v8269_v48 }
 0x40c   :  { %3449 = vmatpush1.msra.mxu1 %v3192_v18  ;;  %v3066_v36 = vadd.f32 %v3065_v9, %v8471_v47 }
 0x40d   :  { %v4352_v49 = vpop.f32.mrf.mxu0  ;;  %3450 = vmatprep.subr.mxu1 %v8269_v48 }
 0x40e   :  { %3451 = vmatpush1.msra.mxu1 %v3191_v3  ;;  %v3205_v32 = vmax.f32 %v3066_v36, 0.0  ;;  %v3739_v49 = vld [vmem:[%s8234_s5] ss:$0 sm:$0xff] }
 0x40f   :  { %v3070_v24 = vpop.f32.mrf.mxu0  ;;  %3452 = vmatprep.subr.mxu1 %v8269_v48 }
 0x410   :  { %3453 = vmatpush1.msra.mxu1 %v3190_v31  ;;  %v3071_v35 = vadd.f32 %v3070_v24, %v8470_v39 }
 0x411   :  { %v4355_v45 = vpop.f32.mrf.mxu0  ;;  %3454 = vmatprep.subr.mxu1 %v8269_v48 }
 0x412   :  { %3455 = vmatpush1.msra.mxu1 %v3189_v54  ;;  %v3206_v41 = vmax.f32 %v3071_v35, 0.0  ;;  %v3741_v45 = vld [vmem:[%s8235_s6] ss:$0 sm:$0xff] }
 0x413   :  { %v3075_v46 = vpop.f32.mrf.mxu0  ;;  %3456 = vmatprep.subr.mxu1 %v8269_v48 }
 0x414   :  { %3457 = vmatpush1.msra.mxu1 %v3188_v57  ;;  %v3076_v19 = vadd.f32 %v3075_v46, %v8469_v7 }
 0x415   :  { %v4358_v20 = vpop.f32.mrf.mxu0  ;;  %3458 = vmatprep.subr.mxu1 %v8269_v48 }
 0x416   :  { %3459 = vmatpush1.msra.mxu1 %v3187_v59  ;;  %v3207_v34 = vmax.f32 %v3076_v19, 0.0 }
 0x417   :  { %v3080_v6 = vpop.f32.mrf.mxu0  ;;  %3460 = vmatprep.subr.mxu1 %v8269_v48 }
 0x418   :  { %3461 = vmatpush1.msra.mxu1 %v3186_v55  ;;  %v3081_v38 = vadd.f32 %v3080_v6, %v8045_v15  ;;  %v3061_v15 = vadd.f32 %v3060_v8, %v8472_v0 }
 0x419   :  { %v4361_v13 = vpop.f32.mrf.mxu0  ;;  %3462 = vmatprep.subr.mxu1 %v8269_v48 }
 0x41a   :  { %3463 = vmatpush1.msra.mxu1 %v3185_v5  ;;  %v3208_v50 = vmax.f32 %v3081_v38, 0.0  ;;  %v3204_v11 = vmax.f32 %v3061_v15, 0.0 }
 0x41b   :  { %v3085_v22 = vpop.f32.mrf.mxu0  ;;  %3478 = vmatprep.subr.mxu1 %v8269_v48 }
 0x41c   :  { %v3086_v61 = vadd.f32 %v3085_v22, %v8051_v60  ;;  %v8473_v60 = vld [vmem:[#allocation75_spill] sm:$0xff] }
 0x41d   :  { %v4364_v44 = vpop.f32.mrf.mxu0  ;;  %v3056_v17 = vadd.f32 %v8131_v43, %v8473_v60  ;;  %v3904_v43 = vpop.f32.mrf.mxu1 }
 0x41e   :  { %v3209_v4 = vmax.f32 %v3086_v61, 0.0 }
 0x41f   :  { %v3203_v58 = vmax.f32 %v3056_v17, 0.0  ;;  %v3905_v10 = vpop.f32.mrf.mxu1 }
 0x420   :  { %3479 = vmatpush2.msra.mxu1 %v3209_v4  ;;  %v3906_v8 = vadd.f32 %v3905_v10, %v3904_v43 }
 0x421   :  { %3480 = vmatprep.subr.mxu1 %v8269_v48  ;;  %v3939_v23 = vpop.f32.mrf.mxu1 }
 0x422   :  { %3481 = vmatpush2.msra.mxu1 %v3208_v50 }
 0x423   :  { %3482 = vmatprep.subr.mxu1 %v8269_v48  ;;  %v3940_v12 = vpop.f32.mrf.mxu1 }
 0x424   :  { %3483 = vmatpush2.msra.mxu1 %v3207_v34  ;;  %v3941_v63 = vadd.f32 %v3940_v12, %v3939_v23 }
 0x425   :  { %3484 = vmatprep.subr.mxu1 %v8269_v48 }
 0x426   :  { %3485 = vmatpush2.msra.mxu1 %v3206_v41  ;;  %v3359_v29 = vadd.f32 %v3941_v63, %v3906_v8 }
 0x427   :  { %3486 = vmatprep.subr.mxu1 %v8269_v48 }
 0x428   :  { %3487 = vmatpush2.msra.mxu1 %v3205_v32 }
 0x429   :  { %3488 = vmatprep.subr.mxu1 %v8269_v48 }
 0x42a   :  { %3489 = vmatpush2.msra.mxu1 %v3204_v11 }
 0x42b   :  { %3490 = vmatprep.subr.mxu1 %v8269_v48 }
 0x42c   :  { %3491 = vmatpush2.msra.mxu1 %v3203_v58 }
 0x42d   :  { %3492 = vmatprep.subr.mxu1 %v8269_v48 }
 0x42e   :  { %3493 = vmatpush2.msra.mxu1 %v3202_v14 }
 0x42f   :  { %3494 = vmatprep.subr.mxu1 %v8269_v48 }
 0x430   :  { %3495 = vmatpush2.msra.mxu1 %v3201_v30 }
 0x431   :  { %3497 = vmatmul.mubr.f32.vlgmr.msra.gmra.mxu1 %v3216_v40  ;;  %4365 = vmatprep.subr.mxu1 %v8269_v48 }
 0x432   :  { %4366 = vmatpush3.msra.mxu1 %v3509_v51  ;;  %4381 = vmatprep.mubr.msk.f32.mxu1 %vm4454_vm0, %v8269_v48 }
 0x433   :  { %4367 = vmatprep.subr.mxu1 %v8269_v48 }
 0x434   :  { %4368 = vmatpush3.msra.mxu1 %v3508_v26 }
 0x435   :  { %4369 = vmatprep.subr.mxu1 %v8269_v48 }
 0x436   :  { %4370 = vmatpush3.msra.mxu1 %v3507_v53 }
 0x437   :  { %4371 = vmatprep.subr.mxu1 %v8269_v48 }
 0x438   :  { %4372 = vmatpush3.msra.mxu1 %v3506_v27 }
 0x439   :  { %4373 = vmatprep.subr.mxu1 %v8269_v48 }
 0x43a   :  { %4374 = vmatpush3.msra.mxu1 %v3505_v1 }
 0x43b   :  { %4375 = vmatprep.subr.mxu1 %v8269_v48 }
 0x43c   :  { %4376 = vmatpush3.msra.mxu1 %v3504_v37 }
 0x43d   :  { %4377 = vmatprep.subr.mxu1 %v8269_v48 }
 0x43e   :  { %4378 = vmatpush3.msra.mxu1 %v3503_v33 }
 0x43f   :  { %4379 = vmatprep.subr.mxu1 %v8269_v48  ;;  %v13_v48 = vstv %s8233_s7 }
 0x440   :  { %4380 = vmatpush3.msra.mxu1 %v3502_v28  ;;  %14 = vst [vmem:[#allocation2] sm:$0x1] %v13_v48 }
 0x447   :  { %v3742_v20 = vld [vmem:[#allocation2] ss:$0 sm:$0xff] }
 0x49c   :  { %v3974_v62 = vpop.f32.mrf.mxu1 }
 0x49e   :  { %v3975_v25 = vpop.f32.mrf.mxu1 }
 0x49f   :  { %v3976_v2 = vadd.f32 %v3975_v25, %v3974_v62 }
 0x4a1   :  { %v3429_v16 = vadd.f32 %v3976_v2, %v3359_v29 }
 0x4f1   :  { %v3498_v18 = vpop.f32.mrf.mxu1 }
 0x4f2   :  { %v3499_v9 = vadd.f32 %v3498_v18, %v3429_v16 }
 0x4f3   :  { %v3500_v3 = vpop.f32.mrf.mxu1 }
 0x4f4   :  { %4382 = vmatmul.mubr.msk.f32.vlgmr.msra.gmra.mxu1 %vm715_vm1, %v3499_v9 }
 0x5b4   :  { %v3586_v31 = vpop.f32.mrf.mxu1 }
 0x5b5   :  { %v3587_v24 = vadd.f32 %v3739_v49, %v3586_v31 }
 0x5b6   :  { %v4383_v54 = vpop.f32.mrf.mxu1 }
 0x5b7   :  { %v3590_v57 = vmax.f32 %v3587_v24, 0.0 }
 0x5b9   :  { %v3598_v46 = vmul.f32 %v3741_v45, %v3590_v57 }
 0x5bb   :  { %v3599_v59 = vsel %vm715_vm1, %v3598_v46, 0.0 }
 0x5bc   :  { %3600 = vadd.xlane.f32.xlu0 %v3599_v59 }
 0x645   :  { %v3601_v55 = vpop.xlane.xlu0 %3600 }
 0x646   :  { %v3609_v6 = vadd.f32 %v3742_v20, %v3601_v55 }
 0x648   :  { %3611 = vst.msk [vmem:[%s8236_s8] sm:$0xff] %vm3610_vm3, %v3609_v6 }

</bundles_post_ra>
